<compile_context>
chip_gen: v6e
topology: v6e:2x2x1
jax: 0.10.0
libtpu: 0.0.40
codegen_flags: <defaults>
</compile_context>

<pallas_src>
import jax
import jax.numpy as jnp
from jax import lax
from jax.experimental import pallas as pl
from jax.experimental.pallas import tpu as pltpu

LN_EPS = 1e-5
NEG_INF = -1e30            # finite "-inf" for max-pool padding (never survives the max)
_MXU_DTYPE = jnp.bfloat16  # operand dtype for MXU matmuls (accumulation is always f32)


# ----------------------------- in-kernel helpers -----------------------------

def _mxu_dot(a, b):
    return jnp.dot(a.astype(_MXU_DTYPE), b.astype(_MXU_DTYPE),
                   preferred_element_type=jnp.float32)


def _shift_rows(x, direction, fill):
    """Shift (T, C) along time (sublanes). direction=+1 -> out[t]=x[t-1]; -1 -> out[t]=x[t+1]."""
    T = x.shape[0]
    shift = direction % T                       # pltpu.roll requires shift >= 0
    rolled = pltpu.roll(x, shift=shift, axis=0)
    idx = lax.broadcasted_iota(jnp.int32, (T, 1), 0)
    edge = 0 if direction > 0 else T - 1
    return jnp.where(idx == edge, fill, rolled)


def _channel_ln(x, gamma, beta):
    """LayerNorm over channels (last axis) per time step == LN over dim=1 of [B, C, T]."""
    mu = jnp.mean(x, axis=-1, keepdims=True)
    var = jnp.mean(jnp.square(x - mu), axis=-1, keepdims=True)
    return (x - mu) * lax.rsqrt(var + LN_EPS) * gamma + beta


def _stem_conv_ln_relu(x, w_flat, bias, gamma, beta, mask):
    """ConvModule: MaskedConv1D(k=3, p=1, bias) -> LN -> ReLU; conv folded into one MXU matmul."""
    x_prev = _shift_rows(x, +1, 0.0)
    x_next = _shift_rows(x, -1, 0.0)
    x3 = jnp.concatenate([x_prev, x, x_next], axis=-1)        # (T, 3*Cin)
    y = _mxu_dot(x3, w_flat) + bias
    y = y * mask                                              # MaskedConv1D masks the conv output
    y = _channel_ln(y, gamma, beta)
    return jnp.maximum(y, 0.0)                                # ReLU


def _convformer_block(x, mask, ln1g, ln1b, dww, dwb, ln2g, ln2b, w1, b1, w2, b2):
    # token mixer: LN -> masked depthwise conv (k=3, pad=1) -> residual   (drop_path = 0)
    h = _channel_ln(x, ln1g, ln1b) * mask
    h_prev = _shift_rows(h, +1, 0.0)
    h_next = _shift_rows(h, -1, 0.0)
    h = h_prev * dww[0:1, :] + h * dww[1:2, :] + h_next * dww[2:3, :] + dwb
    x = x + h
    # channel MLP: LN -> Linear(C->4C) -> GELU -> Linear(4C->C) -> residual
    g = _channel_ln(x, ln2g, ln2b)
    g = _mxu_dot(g, w1) + b1
    # TODO(synk): PyTorch nn.GELU() default is exact erf; tanh approximation used here.
    g = jax.nn.gelu(g, approximate=True)
    g = _mxu_dot(g, w2) + b2
    x = x + g
    return x * mask


def _downsample(x, mask, xbuf, mbuf):
    """MaxPool1d(kernel=3, stride=2, padding=1) over time for x (T, C) and mask (T, 1)."""
    T_cur = x.shape[0]
    T_out = T_cur // 2
    xbuf[pl.ds(0, T_cur), :] = x
    mbuf[pl.ds(0, T_cur), :] = mask

    def pool(buf, fill):
        center = buf[pl.ds(0, T_out, stride=2), :]            # v[2i]
        right = buf[pl.ds(1, T_out, stride=2), :]             # v[2i+1]
        left = _shift_rows(right, +1, fill)                   # v[2i-1]; i=0 sees the pad value
        return jnp.maximum(jnp.maximum(left, center), right)

    new_mask = pool(mbuf, 0.0)                                # maxpool(mask.float())
    new_x = pool(xbuf, NEG_INF) * new_mask                    # x = maxpool(x) * mask
    return new_x, new_mask


# ----------------------------- fused forward kernel -----------------------------

def _make_fused_kernel(num_stem, num_levels):
    def kernel(*refs):
        i = 0
        x_ref = refs[i]; i += 1                               # (T, Cin)
        m_ref = refs[i]; i += 1                               # (T, 1)
        stem_refs = []
        for _ in range(num_stem):
            stem_refs.append(refs[i:i + 4]); i += 4           # (w_flat, bias, gamma, beta)
        (ln1g, ln1b, dww, dwb, ln2g, ln2b,
         w1s, b1s, w2s, b2s) = refs[i:i + 10]; i += 10        # stacked over levels
        out_refs = refs[i:i + 2 * num_levels]; i += 2 * num_levels
        xbuf, mbuf = refs[i], refs[i + 1]                     # VMEM scratch for pooling

        x = x_ref[...].astype(jnp.float32)
        mask = m_ref[...].astype(jnp.float32)

        # stem: drop_out = 0 (identity); use_abs_pe = False (no PE branch executes)
        for (w_r, b_r, g_r, be_r) in stem_refs:
            x = _stem_conv_ln_relu(x, w_r[...], b_r[...], g_r[...], be_r[...], mask)

        # pyramid: all levels computed in VMEM, only per-level outputs hit HBM
        for lvl in range(num_levels):
            if lvl > 0:
                x, mask = _downsample(x, mask, xbuf, mbuf)
            x = _convformer_block(
                x, mask,
                ln1g[lvl], ln1b[lvl], dww[lvl], dwb[lvl],
                ln2g[lvl], ln2b[lvl], w1s[lvl], b1s[lvl], w2s[lvl], b2s[lvl])
            out_refs[2 * lvl][...] = x.astype(out_refs[2 * lvl].dtype)
            out_refs[2 * lvl + 1][...] = mask.astype(out_refs[2 * lvl + 1].dtype)

    return kernel


# ----------------------------- parameters & wrapper (plain JAX glue) -----------------------------

def init_params(key, in_channels, out_channels, arch=(2, 5), mlp_ratio=4):
    num_stem, num_levels = arch[0], arch[1] + 1
    C, H = out_channels, mlp_ratio * out_channels
    keys = jax.random.split(key, num_stem + 3)

    stem = []
    cin = in_channels
    for s in range(num_stem):
        w = jax.random.normal(keys[s], (3, cin, C), jnp.float32) / jnp.sqrt(3.0 * cin)
        stem.append(dict(
            w=w.reshape(3 * cin, C),                          # rows ordered [k=0 | k=1 | k=2]
            b=jnp.zeros((1, C), jnp.float32),                 # Conv1d bias (default bias=True)
            g=jnp.ones((1, C), jnp.float32),
            beta=jnp.zeros((1, C), jnp.float32)))
        cin = C

    L = num_levels
    kd, k1, k2 = keys[num_stem], keys[num_stem + 1], keys[num_stem + 2]
    pyramid = dict(
        ln1_g=jnp.ones((L, 1, C), jnp.float32), ln1_b=jnp.zeros((L, 1, C), jnp.float32),
        dw_w=jax.random.normal(kd, (L, 3, C), jnp.float32) * 0.2,
        dw_b=jnp.zeros((L, 1, C), jnp.float32),
        ln2_g=jnp.ones((L, 1, C), jnp.float32), ln2_b=jnp.zeros((L, 1, C), jnp.float32),
        w1=jax.random.normal(k1, (L, C, H), jnp.float32) / jnp.sqrt(float(C)),
        b1=jnp.zeros((L, 1, H), jnp.float32),
        w2=jax.random.normal(k2, (L, H, C), jnp.float32) / jnp.sqrt(float(H)),
        b2=jnp.zeros((L, 1, C), jnp.float32))
    return {"stem": stem, "pyramid": pyramid}


def mlp_pyramid_proj_forward(params, x_bct, mask_bt):
    """x_bct: [B, C_in, T] float32 (PyTorch layout); mask_bt: [B, T] bool.
    Returns (list of [B, C_out, T_l] features, list of [B, T_l] bool masks)."""
    B, Cin, T = x_bct.shape
    num_stem = len(params["stem"])
    pyr = params["pyramid"]
    L, C, H = pyr["w1"].shape
    assert T % (2 ** (L - 1)) == 0, "T must be divisible by 2**(num_levels-1)"

    x_btc = jnp.transpose(x_bct, (0, 2, 1)).astype(jnp.float32)   # channels-last (B, T, Cin)
    mask_f = mask_bt.astype(jnp.float32)[:, :, None]              # (B, T, 1)

    def batch_spec(t, c):
        return pl.BlockSpec((None, t, c), lambda b: (b, 0, 0))

    def const_spec(a):
        nd = a.ndim
        return pl.BlockSpec(a.shape, lambda b, _nd=nd: (0,) * _nd)

    in_arrays = [x_btc, mask_f]
    in_specs = [batch_spec(T, Cin), batch_spec(T, 1)]
    for s in params["stem"]:
        for k in ("w", "b", "g", "beta"):
            in_arrays.append(s[k]); in_specs.append(const_spec(s[k]))
    for k in ("ln1_g", "ln1_b", "dw_w", "dw_b", "ln2_g", "ln2_b", "w1", "b1", "w2", "b2"):
        in_arrays.append(pyr[k]); in_specs.append(const_spec(pyr[k]))

    t_levels = [T >> l for l in range(L)]
    out_shapes, out_specs = [], []
    for t in t_levels:
        out_shapes.append(jax.ShapeDtypeStruct((B, t, C), jnp.float32))
        out_specs.append(batch_spec(t, C))
        out_shapes.append(jax.ShapeDtypeStruct((B, t, 1), jnp.float32))
        out_specs.append(batch_spec(t, 1))

    results = pl.pallas_call(
        _make_fused_kernel(num_stem, L),
        out_shape=tuple(out_shapes),
        grid=(B,),
        in_specs=in_specs,
        out_specs=tuple(out_specs),
        scratch_shapes=[pltpu.VMEM((T, C), jnp.float32),    # maxpool decimation scratch (x)
                        pltpu.VMEM((T, 1), jnp.float32)],   # maxpool decimation scratch (mask)
        compiler_params=pltpu.CompilerParams(dimension_semantics=("parallel",)),
    )(*in_arrays)

    outs, out_masks = [], []
    for l in range(L):
        outs.append(jnp.transpose(results[2 * l], (0, 2, 1)))     # back to PyTorch [B, C, T_l]
        out_masks.append(results[2 * l + 1][:, :, 0] > 0.5)
    return outs, out_masks


if __name__ == "__main__":
    key = jax.random.PRNGKey(0)
    B, Cin, Cout, T = 2, 16, 32, 64
    arch = (2, 5)

    kx, kp = jax.random.split(key)
    x = jax.random.normal(kx, (B, Cin, T), dtype=jnp.float32)      # PyTorch-style [B, C, T]
    valid_len = jnp.array([T, 48])                                 # second sequence is padded
    mask = jnp.arange(T)[None, :] < valid_len[:, None]             # [B, T] bool

    params = init_params(kp, Cin, Cout, arch)
    forward = jax.jit(mlp_pyramid_proj_forward)
    outs, out_masks = forward(params, x, mask)
    jax.block_until_ready((outs, out_masks))

    assert len(outs) == arch[1] + 1 and len(out_masks) == arch[1] + 1
    expected_T = [T // (2 ** l) for l in range(arch[1] + 1)]
    for o, m, t in zip(outs, out_masks, expected_T):
        assert o.shape == (B, Cout, t) and m.shape == (B, t)
        assert bool(jnp.all(jnp.isfinite(o)))

    print("KERNEL_OK")
</pallas_src>

<mosaic_0001>
module attributes {stable_mosaic.version = 11 : i64} {
  func.func @kernel(%arg0: i32, %arg1: memref<1x64x16xf32, #tpu.memory_space<vmem>>, %arg2: memref<1x64x1xf32, #tpu.memory_space<vmem>>, %arg3: memref<48x32xf32, #tpu.memory_space<vmem>>, %arg4: memref<1x32xf32, #tpu.memory_space<vmem>>, %arg5: memref<1x32xf32, #tpu.memory_space<vmem>>, %arg6: memref<1x32xf32, #tpu.memory_space<vmem>>, %arg7: memref<96x32xf32, #tpu.memory_space<vmem>>, %arg8: memref<1x32xf32, #tpu.memory_space<vmem>>, %arg9: memref<1x32xf32, #tpu.memory_space<vmem>>, %arg10: memref<1x32xf32, #tpu.memory_space<vmem>>, %arg11: memref<6x1x32xf32, #tpu.memory_space<vmem>>, %arg12: memref<6x1x32xf32, #tpu.memory_space<vmem>>, %arg13: memref<6x3x32xf32, #tpu.memory_space<vmem>>, %arg14: memref<6x1x32xf32, #tpu.memory_space<vmem>>, %arg15: memref<6x1x32xf32, #tpu.memory_space<vmem>>, %arg16: memref<6x1x32xf32, #tpu.memory_space<vmem>>, %arg17: memref<6x32x128xf32, #tpu.memory_space<vmem>>, %arg18: memref<6x1x128xf32, #tpu.memory_space<vmem>>, %arg19: memref<6x128x32xf32, #tpu.memory_space<vmem>>, %arg20: memref<6x1x32xf32, #tpu.memory_space<vmem>>, %arg21: memref<1x64x32xf32, #tpu.memory_space<vmem>>, %arg22: memref<1x64x1xf32, #tpu.memory_space<vmem>>, %arg23: memref<1x32x32xf32, #tpu.memory_space<vmem>>, %arg24: memref<1x32x1xf32, #tpu.memory_space<vmem>>, %arg25: memref<1x16x32xf32, #tpu.memory_space<vmem>>, %arg26: memref<1x16x1xf32, #tpu.memory_space<vmem>>, %arg27: memref<1x8x32xf32, #tpu.memory_space<vmem>>, %arg28: memref<1x8x1xf32, #tpu.memory_space<vmem>>, %arg29: memref<1x4x32xf32, #tpu.memory_space<vmem>>, %arg30: memref<1x4x1xf32, #tpu.memory_space<vmem>>, %arg31: memref<1x2x32xf32, #tpu.memory_space<vmem>>, %arg32: memref<1x2x1xf32, #tpu.memory_space<vmem>>, %arg33: memref<64x32xf32, #tpu.memory_space<vmem>>, %arg34: memref<64x1xf32, #tpu.memory_space<vmem>>) attributes {dimension_semantics = [#tpu.dimension_semantics<parallel>], iteration_bounds = array<i64: 2>, scalar_prefetch = 0 : i64, scratch_operands = 2 : i64, tpu.core_type = #tpu.core_type<tc>, window_params = [{transform_indices = @transform_0, window_bounds = array<i64: 1, 64, 16>}, {transform_indices = @transform_1, window_bounds = array<i64: 1, 64, 1>}, {pipeline_mode = #tpu.pipeline_mode<synchronous>, transform_indices = @transform_2, window_bounds = array<i64: 48, 32>}, {pipeline_mode = #tpu.pipeline_mode<synchronous>, transform_indices = @transform_3, window_bounds = array<i64: 1, 32>}, {pipeline_mode = #tpu.pipeline_mode<synchronous>, transform_indices = @transform_4, window_bounds = array<i64: 1, 32>}, {pipeline_mode = #tpu.pipeline_mode<synchronous>, transform_indices = @transform_5, window_bounds = array<i64: 1, 32>}, {pipeline_mode = #tpu.pipeline_mode<synchronous>, transform_indices = @transform_6, window_bounds = array<i64: 96, 32>}, {pipeline_mode = #tpu.pipeline_mode<synchronous>, transform_indices = @transform_7, window_bounds = array<i64: 1, 32>}, {pipeline_mode = #tpu.pipeline_mode<synchronous>, transform_indices = @transform_8, window_bounds = array<i64: 1, 32>}, {pipeline_mode = #tpu.pipeline_mode<synchronous>, transform_indices = @transform_9, window_bounds = array<i64: 1, 32>}, {pipeline_mode = #tpu.pipeline_mode<synchronous>, transform_indices = @transform_10, window_bounds = array<i64: 6, 1, 32>}, {pipeline_mode = #tpu.pipeline_mode<synchronous>, transform_indices = @transform_11, window_bounds = array<i64: 6, 1, 32>}, {pipeline_mode = #tpu.pipeline_mode<synchronous>, transform_indices = @transform_12, window_bounds = array<i64: 6, 3, 32>}, {pipeline_mode = #tpu.pipeline_mode<synchronous>, transform_indices = @transform_13, window_bounds = array<i64: 6, 1, 32>}, {pipeline_mode = #tpu.pipeline_mode<synchronous>, transform_indices = @transform_14, window_bounds = array<i64: 6, 1, 32>}, {pipeline_mode = #tpu.pipeline_mode<synchronous>, transform_indices = @transform_15, window_bounds = array<i64: 6, 1, 32>}, {pipeline_mode = #tpu.pipeline_mode<synchronous>, transform_indices = @transform_16, window_bounds = array<i64: 6, 32, 128>}, {pipeline_mode = #tpu.pipeline_mode<synchronous>, transform_indices = @transform_17, window_bounds = array<i64: 6, 1, 128>}, {pipeline_mode = #tpu.pipeline_mode<synchronous>, transform_indices = @transform_18, window_bounds = array<i64: 6, 128, 32>}, {pipeline_mode = #tpu.pipeline_mode<synchronous>, transform_indices = @transform_19, window_bounds = array<i64: 6, 1, 32>}, {transform_indices = @transform_20, window_bounds = array<i64: 1, 64, 32>}, {transform_indices = @transform_21, window_bounds = array<i64: 1, 64, 1>}, {transform_indices = @transform_22, window_bounds = array<i64: 1, 32, 32>}, {transform_indices = @transform_23, window_bounds = array<i64: 1, 32, 1>}, {transform_indices = @transform_24, window_bounds = array<i64: 1, 16, 32>}, {transform_indices = @transform_25, window_bounds = array<i64: 1, 16, 1>}, {transform_indices = @transform_26, window_bounds = array<i64: 1, 8, 32>}, {transform_indices = @transform_27, window_bounds = array<i64: 1, 8, 1>}, {transform_indices = @transform_28, window_bounds = array<i64: 1, 4, 32>}, {transform_indices = @transform_29, window_bounds = array<i64: 1, 4, 1>}, {transform_indices = @transform_30, window_bounds = array<i64: 1, 2, 32>}, {transform_indices = @transform_31, window_bounds = array<i64: 1, 2, 1>}]} {
    %c0 = arith.constant 0 : index
    %c0_0 = arith.constant 0 : index
    %c0_1 = arith.constant 0 : index
    %0 = vector.load %arg1[%c0, %c0_0, %c0_1] : memref<1x64x16xf32, #tpu.memory_space<vmem>>, vector<1x64x16xf32>
    %1 = vector.shape_cast %0 : vector<1x64x16xf32> to vector<64x16xf32>
    %c0_2 = arith.constant 0 : index
    %c0_3 = arith.constant 0 : index
    %c0_4 = arith.constant 0 : index
    %2 = vector.load %arg2[%c0_2, %c0_3, %c0_4] : memref<1x64x1xf32, #tpu.memory_space<vmem>>, vector<1x64x1xf32>
    %3 = vector.shape_cast %2 : vector<1x64x1xf32> to vector<64x1xf32>
    %c0_5 = arith.constant 0 : index
    %c0_6 = arith.constant 0 : index
    %4 = vector.load %arg3[%c0_5, %c0_6] : memref<48x32xf32, #tpu.memory_space<vmem>>, vector<48x32xf32>
    %c0_7 = arith.constant 0 : index
    %c0_8 = arith.constant 0 : index
    %5 = vector.load %arg4[%c0_7, %c0_8] : memref<1x32xf32, #tpu.memory_space<vmem>>, vector<1x32xf32>
    %c0_9 = arith.constant 0 : index
    %c0_10 = arith.constant 0 : index
    %6 = vector.load %arg5[%c0_9, %c0_10] : memref<1x32xf32, #tpu.memory_space<vmem>>, vector<1x32xf32>
    %c0_11 = arith.constant 0 : index
    %c0_12 = arith.constant 0 : index
    %7 = vector.load %arg6[%c0_11, %c0_12] : memref<1x32xf32, #tpu.memory_space<vmem>>, vector<1x32xf32>
    %c1_i32 = arith.constant 1 : i32
    %8 = tpu.dynamic_rotate %1 by %c1_i32 dim 0 : vector<64x16xf32>, i32 -> vector<64x16xf32>
    %9 = tpu.iota {dimensions = array<i32: 0>} : vector<64x1xi32>
    %c0_i32 = arith.constant 0 : i32
    %10 = vector.broadcast %c0_i32 : i32 to vector<64x1xi32>
    %11 = arith.cmpi eq, %9, %10 : vector<64x1xi32>
    %cst = arith.constant 0.000000e+00 : f32
    %12 = vector.shape_cast %11 : vector<64x1xi1> to vector<64x1xi1>
    %13 = vector.broadcast %12 : vector<64x1xi1> to vector<64x16xi1>
    %14 = vector.broadcast %cst : f32 to vector<64x16xf32>
    %15 = arith.select %13, %14, %8 : vector<64x16xi1>, vector<64x16xf32>
    %c63_i32 = arith.constant 63 : i32
    %16 = tpu.dynamic_rotate %1 by %c63_i32 dim 0 : vector<64x16xf32>, i32 -> vector<64x16xf32>
    %17 = tpu.iota {dimensions = array<i32: 0>} : vector<64x1xi32>
    %c63_i32_13 = arith.constant 63 : i32
    %18 = vector.broadcast %c63_i32_13 : i32 to vector<64x1xi32>
    %19 = arith.cmpi eq, %17, %18 : vector<64x1xi32>
    %cst_14 = arith.constant 0.000000e+00 : f32
    %20 = vector.shape_cast %19 : vector<64x1xi1> to vector<64x1xi1>
    %21 = vector.broadcast %20 : vector<64x1xi1> to vector<64x16xi1>
    %22 = vector.broadcast %cst_14 : f32 to vector<64x16xf32>
    %23 = arith.select %21, %22, %16 : vector<64x16xi1>, vector<64x16xf32>
    %24 = tpu.concatenate %15, %1, %23 in 1 : vector<64x16xf32>, vector<64x16xf32>, vector<64x16xf32> -> vector<64x48xf32>
    %25 = arith.truncf %24 : vector<64x48xf32> to vector<64x48xbf16>
    %26 = arith.truncf %4 : vector<48x32xf32> to vector<48x32xbf16>
    %cst_15 = arith.constant dense<0.000000e+00> : vector<64x32xf32>
    %27 = tpu.matmul %25, %26, %cst_15 {dimension_numbers = #tpu.dot_dimension_numbers<[1], [0], [0], [1], [0, 0, 1, 1], [], []>} : vector<64x48xbf16>, vector<48x32xbf16>, vector<64x32xf32> -> vector<64x32xf32>
    %28 = vector.broadcast %5 : vector<1x32xf32> to vector<64x32xf32>
    %29 = arith.addf %27, %28 : vector<64x32xf32>
    %30 = vector.broadcast %3 : vector<64x1xf32> to vector<64x32xf32>
    %31 = arith.mulf %29, %30 : vector<64x32xf32>
    %cst_16 = arith.constant dense<0.000000e+00> : vector<64xf32>
    %32 = vector.multi_reduction <add>, %31, %cst_16 [1] : vector<64x32xf32> to vector<64xf32>
    %33 = vector.shape_cast %32 : vector<64xf32> to vector<64x1xf32>
    %cst_17 = arith.constant 3.200000e+01 : f32
    %34 = vector.broadcast %cst_17 : f32 to vector<64x1xf32>
    %35 = arith.divf %33, %34 : vector<64x1xf32>
    %36 = vector.broadcast %35 : vector<64x1xf32> to vector<64x32xf32>
    %37 = arith.subf %31, %36 : vector<64x32xf32>
    %38 = arith.mulf %37, %37 : vector<64x32xf32>
    %cst_18 = arith.constant dense<0.000000e+00> : vector<64xf32>
    %39 = vector.multi_reduction <add>, %38, %cst_18 [1] : vector<64x32xf32> to vector<64xf32>
    %40 = vector.shape_cast %39 : vector<64xf32> to vector<64x1xf32>
    %cst_19 = arith.constant 3.200000e+01 : f32
    %41 = vector.broadcast %cst_19 : f32 to vector<64x1xf32>
    %42 = arith.divf %40, %41 : vector<64x1xf32>
    %43 = vector.broadcast %35 : vector<64x1xf32> to vector<64x32xf32>
    %44 = arith.subf %31, %43 : vector<64x32xf32>
    %cst_20 = arith.constant 9.99999974E-6 : f32
    %45 = vector.broadcast %cst_20 : f32 to vector<64x1xf32>
    %46 = arith.addf %42, %45 : vector<64x1xf32>
    %47 = math.rsqrt %46 : vector<64x1xf32>
    %48 = vector.broadcast %47 : vector<64x1xf32> to vector<64x32xf32>
    %49 = arith.mulf %44, %48 : vector<64x32xf32>
    %50 = vector.broadcast %6 : vector<1x32xf32> to vector<64x32xf32>
    %51 = arith.mulf %49, %50 : vector<64x32xf32>
    %52 = vector.broadcast %7 : vector<1x32xf32> to vector<64x32xf32>
    %53 = arith.addf %51, %52 : vector<64x32xf32>
    %cst_21 = arith.constant 0.000000e+00 : f32
    %54 = vector.broadcast %cst_21 : f32 to vector<64x32xf32>
    %55 = arith.maximumf %53, %54 : vector<64x32xf32>
    %c0_22 = arith.constant 0 : index
    %c0_23 = arith.constant 0 : index
    %56 = vector.load %arg7[%c0_22, %c0_23] : memref<96x32xf32, #tpu.memory_space<vmem>>, vector<96x32xf32>
    %c0_24 = arith.constant 0 : index
    %c0_25 = arith.constant 0 : index
    %57 = vector.load %arg8[%c0_24, %c0_25] : memref<1x32xf32, #tpu.memory_space<vmem>>, vector<1x32xf32>
    %c0_26 = arith.constant 0 : index
    %c0_27 = arith.constant 0 : index
    %58 = vector.load %arg9[%c0_26, %c0_27] : memref<1x32xf32, #tpu.memory_space<vmem>>, vector<1x32xf32>
    %c0_28 = arith.constant 0 : index
    %c0_29 = arith.constant 0 : index
    %59 = vector.load %arg10[%c0_28, %c0_29] : memref<1x32xf32, #tpu.memory_space<vmem>>, vector<1x32xf32>
    %c1_i32_30 = arith.constant 1 : i32
    %60 = tpu.dynamic_rotate %55 by %c1_i32_30 dim 0 : vector<64x32xf32>, i32 -> vector<64x32xf32>
    %61 = tpu.iota {dimensions = array<i32: 0>} : vector<64x1xi32>
    %c0_i32_31 = arith.constant 0 : i32
    %62 = vector.broadcast %c0_i32_31 : i32 to vector<64x1xi32>
    %63 = arith.cmpi eq, %61, %62 : vector<64x1xi32>
    %cst_32 = arith.constant 0.000000e+00 : f32
    %64 = vector.shape_cast %63 : vector<64x1xi1> to vector<64x1xi1>
    %65 = vector.broadcast %64 : vector<64x1xi1> to vector<64x32xi1>
    %66 = vector.broadcast %cst_32 : f32 to vector<64x32xf32>
    %67 = arith.select %65, %66, %60 : vector<64x32xi1>, vector<64x32xf32>
    %c63_i32_33 = arith.constant 63 : i32
    %68 = tpu.dynamic_rotate %55 by %c63_i32_33 dim 0 : vector<64x32xf32>, i32 -> vector<64x32xf32>
    %69 = tpu.iota {dimensions = array<i32: 0>} : vector<64x1xi32>
    %c63_i32_34 = arith.constant 63 : i32
    %70 = vector.broadcast %c63_i32_34 : i32 to vector<64x1xi32>
    %71 = arith.cmpi eq, %69, %70 : vector<64x1xi32>
    %cst_35 = arith.constant 0.000000e+00 : f32
    %72 = vector.shape_cast %71 : vector<64x1xi1> to vector<64x1xi1>
    %73 = vector.broadcast %72 : vector<64x1xi1> to vector<64x32xi1>
    %74 = vector.broadcast %cst_35 : f32 to vector<64x32xf32>
    %75 = arith.select %73, %74, %68 : vector<64x32xi1>, vector<64x32xf32>
    %76 = tpu.concatenate %67, %55, %75 in 1 : vector<64x32xf32>, vector<64x32xf32>, vector<64x32xf32> -> vector<64x96xf32>
    %77 = arith.truncf %76 : vector<64x96xf32> to vector<64x96xbf16>
    %78 = arith.truncf %56 : vector<96x32xf32> to vector<96x32xbf16>
    %cst_36 = arith.constant dense<0.000000e+00> : vector<64x32xf32>
    %79 = tpu.matmul %77, %78, %cst_36 {dimension_numbers = #tpu.dot_dimension_numbers<[1], [0], [0], [1], [0, 0, 1, 1], [], []>} : vector<64x96xbf16>, vector<96x32xbf16>, vector<64x32xf32> -> vector<64x32xf32>
    %80 = vector.broadcast %57 : vector<1x32xf32> to vector<64x32xf32>
    %81 = arith.addf %79, %80 : vector<64x32xf32>
    %82 = vector.broadcast %3 : vector<64x1xf32> to vector<64x32xf32>
    %83 = arith.mulf %81, %82 : vector<64x32xf32>
    %cst_37 = arith.constant dense<0.000000e+00> : vector<64xf32>
    %84 = vector.multi_reduction <add>, %83, %cst_37 [1] : vector<64x32xf32> to vector<64xf32>
    %85 = vector.shape_cast %84 : vector<64xf32> to vector<64x1xf32>
    %cst_38 = arith.constant 3.200000e+01 : f32
    %86 = vector.broadcast %cst_38 : f32 to vector<64x1xf32>
    %87 = arith.divf %85, %86 : vector<64x1xf32>
    %88 = vector.broadcast %87 : vector<64x1xf32> to vector<64x32xf32>
    %89 = arith.subf %83, %88 : vector<64x32xf32>
    %90 = arith.mulf %89, %89 : vector<64x32xf32>
    %cst_39 = arith.constant dense<0.000000e+00> : vector<64xf32>
    %91 = vector.multi_reduction <add>, %90, %cst_39 [1] : vector<64x32xf32> to vector<64xf32>
    %92 = vector.shape_cast %91 : vector<64xf32> to vector<64x1xf32>
    %cst_40 = arith.constant 3.200000e+01 : f32
    %93 = vector.broadcast %cst_40 : f32 to vector<64x1xf32>
    %94 = arith.divf %92, %93 : vector<64x1xf32>
    %95 = vector.broadcast %87 : vector<64x1xf32> to vector<64x32xf32>
    %96 = arith.subf %83, %95 : vector<64x32xf32>
    %cst_41 = arith.constant 9.99999974E-6 : f32
    %97 = vector.broadcast %cst_41 : f32 to vector<64x1xf32>
    %98 = arith.addf %94, %97 : vector<64x1xf32>
    %99 = math.rsqrt %98 : vector<64x1xf32>
    %100 = vector.broadcast %99 : vector<64x1xf32> to vector<64x32xf32>
    %101 = arith.mulf %96, %100 : vector<64x32xf32>
    %102 = vector.broadcast %58 : vector<1x32xf32> to vector<64x32xf32>
    %103 = arith.mulf %101, %102 : vector<64x32xf32>
    %104 = vector.broadcast %59 : vector<1x32xf32> to vector<64x32xf32>
    %105 = arith.addf %103, %104 : vector<64x32xf32>
    %cst_42 = arith.constant 0.000000e+00 : f32
    %106 = vector.broadcast %cst_42 : f32 to vector<64x32xf32>
    %107 = arith.maximumf %105, %106 : vector<64x32xf32>
    %c0_43 = arith.constant 0 : index
    %c0_44 = arith.constant 0 : index
    %c0_45 = arith.constant 0 : index
    %108 = vector.load %arg11[%c0_43, %c0_44, %c0_45] : memref<6x1x32xf32, #tpu.memory_space<vmem>>, vector<1x1x32xf32>
    %109 = vector.shape_cast %108 : vector<1x1x32xf32> to vector<1x32xf32>
    %c0_46 = arith.constant 0 : index
    %c0_47 = arith.constant 0 : index
    %c0_48 = arith.constant 0 : index
    %110 = vector.load %arg12[%c0_46, %c0_47, %c0_48] : memref<6x1x32xf32, #tpu.memory_space<vmem>>, vector<1x1x32xf32>
    %111 = vector.shape_cast %110 : vector<1x1x32xf32> to vector<1x32xf32>
    %c0_49 = arith.constant 0 : index
    %c0_50 = arith.constant 0 : index
    %c0_51 = arith.constant 0 : index
    %112 = vector.load %arg13[%c0_49, %c0_50, %c0_51] : memref<6x3x32xf32, #tpu.memory_space<vmem>>, vector<1x3x32xf32>
    %113 = vector.shape_cast %112 : vector<1x3x32xf32> to vector<3x32xf32>
    %c0_52 = arith.constant 0 : index
    %c0_53 = arith.constant 0 : index
    %c0_54 = arith.constant 0 : index
    %114 = vector.load %arg14[%c0_52, %c0_53, %c0_54] : memref<6x1x32xf32, #tpu.memory_space<vmem>>, vector<1x1x32xf32>
    %115 = vector.shape_cast %114 : vector<1x1x32xf32> to vector<1x32xf32>
    %c0_55 = arith.constant 0 : index
    %c0_56 = arith.constant 0 : index
    %c0_57 = arith.constant 0 : index
    %116 = vector.load %arg15[%c0_55, %c0_56, %c0_57] : memref<6x1x32xf32, #tpu.memory_space<vmem>>, vector<1x1x32xf32>
    %117 = vector.shape_cast %116 : vector<1x1x32xf32> to vector<1x32xf32>
    %c0_58 = arith.constant 0 : index
    %c0_59 = arith.constant 0 : index
    %c0_60 = arith.constant 0 : index
    %118 = vector.load %arg16[%c0_58, %c0_59, %c0_60] : memref<6x1x32xf32, #tpu.memory_space<vmem>>, vector<1x1x32xf32>
    %119 = vector.shape_cast %118 : vector<1x1x32xf32> to vector<1x32xf32>
    %c0_61 = arith.constant 0 : index
    %c0_62 = arith.constant 0 : index
    %c0_63 = arith.constant 0 : index
    %120 = vector.load %arg17[%c0_61, %c0_62, %c0_63] : memref<6x32x128xf32, #tpu.memory_space<vmem>>, vector<1x32x128xf32>
    %121 = vector.shape_cast %120 : vector<1x32x128xf32> to vector<32x128xf32>
    %c0_64 = arith.constant 0 : index
    %c0_65 = arith.constant 0 : index
    %c0_66 = arith.constant 0 : index
    %122 = vector.load %arg18[%c0_64, %c0_65, %c0_66] : memref<6x1x128xf32, #tpu.memory_space<vmem>>, vector<1x1x128xf32>
    %123 = vector.shape_cast %122 : vector<1x1x128xf32> to vector<1x128xf32>
    %c0_67 = arith.constant 0 : index
    %c0_68 = arith.constant 0 : index
    %c0_69 = arith.constant 0 : index
    %124 = vector.load %arg19[%c0_67, %c0_68, %c0_69] : memref<6x128x32xf32, #tpu.memory_space<vmem>>, vector<1x128x32xf32>
    %125 = vector.shape_cast %124 : vector<1x128x32xf32> to vector<128x32xf32>
    %c0_70 = arith.constant 0 : index
    %c0_71 = arith.constant 0 : index
    %c0_72 = arith.constant 0 : index
    %126 = vector.load %arg20[%c0_70, %c0_71, %c0_72] : memref<6x1x32xf32, #tpu.memory_space<vmem>>, vector<1x1x32xf32>
    %127 = vector.shape_cast %126 : vector<1x1x32xf32> to vector<1x32xf32>
    %cst_73 = arith.constant dense<0.000000e+00> : vector<64xf32>
    %128 = vector.multi_reduction <add>, %107, %cst_73 [1] : vector<64x32xf32> to vector<64xf32>
    %129 = vector.shape_cast %128 : vector<64xf32> to vector<64x1xf32>
    %cst_74 = arith.constant 3.200000e+01 : f32
    %130 = vector.broadcast %cst_74 : f32 to vector<64x1xf32>
    %131 = arith.divf %129, %130 : vector<64x1xf32>
    %132 = vector.broadcast %131 : vector<64x1xf32> to vector<64x32xf32>
    %133 = arith.subf %107, %132 : vector<64x32xf32>
    %134 = arith.mulf %133, %133 : vector<64x32xf32>
    %cst_75 = arith.constant dense<0.000000e+00> : vector<64xf32>
    %135 = vector.multi_reduction <add>, %134, %cst_75 [1] : vector<64x32xf32> to vector<64xf32>
    %136 = vector.shape_cast %135 : vector<64xf32> to vector<64x1xf32>
    %cst_76 = arith.constant 3.200000e+01 : f32
    %137 = vector.broadcast %cst_76 : f32 to vector<64x1xf32>
    %138 = arith.divf %136, %137 : vector<64x1xf32>
    %139 = vector.broadcast %131 : vector<64x1xf32> to vector<64x32xf32>
    %140 = arith.subf %107, %139 : vector<64x32xf32>
    %cst_77 = arith.constant 9.99999974E-6 : f32
    %141 = vector.broadcast %cst_77 : f32 to vector<64x1xf32>
    %142 = arith.addf %138, %141 : vector<64x1xf32>
    %143 = math.rsqrt %142 : vector<64x1xf32>
    %144 = vector.broadcast %143 : vector<64x1xf32> to vector<64x32xf32>
    %145 = arith.mulf %140, %144 : vector<64x32xf32>
    %146 = vector.broadcast %109 : vector<1x32xf32> to vector<64x32xf32>
    %147 = arith.mulf %145, %146 : vector<64x32xf32>
    %148 = vector.broadcast %111 : vector<1x32xf32> to vector<64x32xf32>
    %149 = arith.addf %147, %148 : vector<64x32xf32>
    %150 = vector.broadcast %3 : vector<64x1xf32> to vector<64x32xf32>
    %151 = arith.mulf %149, %150 : vector<64x32xf32>
    %c1_i32_78 = arith.constant 1 : i32
    %152 = tpu.dynamic_rotate %151 by %c1_i32_78 dim 0 : vector<64x32xf32>, i32 -> vector<64x32xf32>
    %153 = tpu.iota {dimensions = array<i32: 0>} : vector<64x1xi32>
    %c0_i32_79 = arith.constant 0 : i32
    %154 = vector.broadcast %c0_i32_79 : i32 to vector<64x1xi32>
    %155 = arith.cmpi eq, %153, %154 : vector<64x1xi32>
    %cst_80 = arith.constant 0.000000e+00 : f32
    %156 = vector.shape_cast %155 : vector<64x1xi1> to vector<64x1xi1>
    %157 = vector.broadcast %156 : vector<64x1xi1> to vector<64x32xi1>
    %158 = vector.broadcast %cst_80 : f32 to vector<64x32xf32>
    %159 = arith.select %157, %158, %152 : vector<64x32xi1>, vector<64x32xf32>
    %c63_i32_81 = arith.constant 63 : i32
    %160 = tpu.dynamic_rotate %151 by %c63_i32_81 dim 0 : vector<64x32xf32>, i32 -> vector<64x32xf32>
    %161 = tpu.iota {dimensions = array<i32: 0>} : vector<64x1xi32>
    %c63_i32_82 = arith.constant 63 : i32
    %162 = vector.broadcast %c63_i32_82 : i32 to vector<64x1xi32>
    %163 = arith.cmpi eq, %161, %162 : vector<64x1xi32>
    %cst_83 = arith.constant 0.000000e+00 : f32
    %164 = vector.shape_cast %163 : vector<64x1xi1> to vector<64x1xi1>
    %165 = vector.broadcast %164 : vector<64x1xi1> to vector<64x32xi1>
    %166 = vector.broadcast %cst_83 : f32 to vector<64x32xf32>
    %167 = arith.select %165, %166, %160 : vector<64x32xi1>, vector<64x32xf32>
    %168 = vector.extract_strided_slice %113 {offsets = [0, 0], sizes = [1, 32], strides = [1, 1]} : vector<3x32xf32> to vector<1x32xf32>
    %169 = vector.broadcast %168 : vector<1x32xf32> to vector<64x32xf32>
    %170 = arith.mulf %159, %169 : vector<64x32xf32>
    %171 = vector.extract_strided_slice %113 {offsets = [1, 0], sizes = [1, 32], strides = [1, 1]} : vector<3x32xf32> to vector<1x32xf32>
    %172 = vector.broadcast %171 : vector<1x32xf32> to vector<64x32xf32>
    %173 = arith.mulf %151, %172 : vector<64x32xf32>
    %174 = arith.addf %170, %173 : vector<64x32xf32>
    %175 = vector.extract_strided_slice %113 {offsets = [2, 0], sizes = [1, 32], strides = [1, 1]} : vector<3x32xf32> to vector<1x32xf32>
    %176 = vector.broadcast %175 : vector<1x32xf32> to vector<64x32xf32>
    %177 = arith.mulf %167, %176 : vector<64x32xf32>
    %178 = arith.addf %174, %177 : vector<64x32xf32>
    %179 = vector.broadcast %115 : vector<1x32xf32> to vector<64x32xf32>
    %180 = arith.addf %178, %179 : vector<64x32xf32>
    %181 = arith.addf %107, %180 : vector<64x32xf32>
    %cst_84 = arith.constant dense<0.000000e+00> : vector<64xf32>
    %182 = vector.multi_reduction <add>, %181, %cst_84 [1] : vector<64x32xf32> to vector<64xf32>
    %183 = vector.shape_cast %182 : vector<64xf32> to vector<64x1xf32>
    %cst_85 = arith.constant 3.200000e+01 : f32
    %184 = vector.broadcast %cst_85 : f32 to vector<64x1xf32>
    %185 = arith.divf %183, %184 : vector<64x1xf32>
    %186 = vector.broadcast %185 : vector<64x1xf32> to vector<64x32xf32>
    %187 = arith.subf %181, %186 : vector<64x32xf32>
    %188 = arith.mulf %187, %187 : vector<64x32xf32>
    %cst_86 = arith.constant dense<0.000000e+00> : vector<64xf32>
    %189 = vector.multi_reduction <add>, %188, %cst_86 [1] : vector<64x32xf32> to vector<64xf32>
    %190 = vector.shape_cast %189 : vector<64xf32> to vector<64x1xf32>
    %cst_87 = arith.constant 3.200000e+01 : f32
    %191 = vector.broadcast %cst_87 : f32 to vector<64x1xf32>
    %192 = arith.divf %190, %191 : vector<64x1xf32>
    %193 = vector.broadcast %185 : vector<64x1xf32> to vector<64x32xf32>
    %194 = arith.subf %181, %193 : vector<64x32xf32>
    %cst_88 = arith.constant 9.99999974E-6 : f32
    %195 = vector.broadcast %cst_88 : f32 to vector<64x1xf32>
    %196 = arith.addf %192, %195 : vector<64x1xf32>
    %197 = math.rsqrt %196 : vector<64x1xf32>
    %198 = vector.broadcast %197 : vector<64x1xf32> to vector<64x32xf32>
    %199 = arith.mulf %194, %198 : vector<64x32xf32>
    %200 = vector.broadcast %117 : vector<1x32xf32> to vector<64x32xf32>
    %201 = arith.mulf %199, %200 : vector<64x32xf32>
    %202 = vector.broadcast %119 : vector<1x32xf32> to vector<64x32xf32>
    %203 = arith.addf %201, %202 : vector<64x32xf32>
    %204 = arith.truncf %203 : vector<64x32xf32> to vector<64x32xbf16>
    %205 = arith.truncf %121 : vector<32x128xf32> to vector<32x128xbf16>
    %cst_89 = arith.constant dense<0.000000e+00> : vector<64x128xf32>
    %206 = tpu.matmul %204, %205, %cst_89 {dimension_numbers = #tpu.dot_dimension_numbers<[1], [0], [0], [1], [0, 0, 1, 1], [], []>} : vector<64x32xbf16>, vector<32x128xbf16>, vector<64x128xf32> -> vector<64x128xf32>
    %207 = vector.broadcast %123 : vector<1x128xf32> to vector<64x128xf32>
    %208 = arith.addf %206, %207 : vector<64x128xf32>
    %209 = arith.mulf %208, %208 : vector<64x128xf32>
    %210 = arith.mulf %208, %209 : vector<64x128xf32>
    %cst_90 = arith.constant 4.471500e-02 : f32
    %211 = vector.broadcast %cst_90 : f32 to vector<64x128xf32>
    %212 = arith.mulf %211, %210 : vector<64x128xf32>
    %213 = arith.addf %208, %212 : vector<64x128xf32>
    %cst_91 = arith.constant 0.797884583 : f32
    %214 = vector.broadcast %cst_91 : f32 to vector<64x128xf32>
    %215 = arith.mulf %214, %213 : vector<64x128xf32>
    %216 = math.tanh %215 : vector<64x128xf32>
    %cst_92 = arith.constant 1.000000e+00 : f32
    %217 = vector.broadcast %cst_92 : f32 to vector<64x128xf32>
    %218 = arith.addf %217, %216 : vector<64x128xf32>
    %cst_93 = arith.constant 5.000000e-01 : f32
    %219 = vector.broadcast %cst_93 : f32 to vector<64x128xf32>
    %220 = arith.mulf %219, %218 : vector<64x128xf32>
    %221 = arith.mulf %208, %220 : vector<64x128xf32>
    %222 = arith.truncf %221 : vector<64x128xf32> to vector<64x128xbf16>
    %223 = arith.truncf %125 : vector<128x32xf32> to vector<128x32xbf16>
    %cst_94 = arith.constant dense<0.000000e+00> : vector<64x32xf32>
    %224 = tpu.matmul %222, %223, %cst_94 {dimension_numbers = #tpu.dot_dimension_numbers<[1], [0], [0], [1], [0, 0, 1, 1], [], []>} : vector<64x128xbf16>, vector<128x32xbf16>, vector<64x32xf32> -> vector<64x32xf32>
    %225 = vector.broadcast %127 : vector<1x32xf32> to vector<64x32xf32>
    %226 = arith.addf %224, %225 : vector<64x32xf32>
    %227 = arith.addf %181, %226 : vector<64x32xf32>
    %228 = vector.broadcast %3 : vector<64x1xf32> to vector<64x32xf32>
    %229 = arith.mulf %227, %228 : vector<64x32xf32>
    %c0_95 = arith.constant 0 : index
    %c0_96 = arith.constant 0 : index
    %c0_97 = arith.constant 0 : index
    %230 = vector.load %arg21[%c0_95, %c0_96, %c0_97] : memref<1x64x32xf32, #tpu.memory_space<vmem>>, vector<1x64x32xf32>
    %231 = vector.shape_cast %230 : vector<1x64x32xf32> to vector<64x32xf32>
    %232 = vector.shape_cast %229 : vector<64x32xf32> to vector<1x64x32xf32>
    tpu.vector_store %arg21[%c0_95, %c0_96, %c0_97], %232 {strides = array<i32>} : memref<1x64x32xf32, #tpu.memory_space<vmem>>, vector<1x64x32xf32>,
    %c0_98 = arith.constant 0 : index
    %c0_99 = arith.constant 0 : index
    %c0_100 = arith.constant 0 : index
    %233 = vector.load %arg22[%c0_98, %c0_99, %c0_100] : memref<1x64x1xf32, #tpu.memory_space<vmem>>, vector<1x64x1xf32>
    %234 = vector.shape_cast %233 : vector<1x64x1xf32> to vector<64x1xf32>
    %235 = vector.shape_cast %3 : vector<64x1xf32> to vector<1x64x1xf32>
    tpu.vector_store %arg22[%c0_98, %c0_99, %c0_100], %235 {strides = array<i32>} : memref<1x64x1xf32, #tpu.memory_space<vmem>>, vector<1x64x1xf32>,
    %c0_101 = arith.constant 0 : index
    %c0_102 = arith.constant 0 : index
    %236 = vector.load %arg33[%c0_101, %c0_102] : memref<64x32xf32, #tpu.memory_space<vmem>>, vector<64x32xf32>
    tpu.vector_store %arg33[%c0_101, %c0_102], %229 {strides = array<i32>} : memref<64x32xf32, #tpu.memory_space<vmem>>, vector<64x32xf32>,
    %c0_103 = arith.constant 0 : index
    %c0_104 = arith.constant 0 : index
    %237 = vector.load %arg34[%c0_103, %c0_104] : memref<64x1xf32, #tpu.memory_space<vmem>>, vector<64x1xf32>
    tpu.vector_store %arg34[%c0_103, %c0_104], %3 {strides = array<i32>} : memref<64x1xf32, #tpu.memory_space<vmem>>, vector<64x1xf32>,
    %c0_105 = arith.constant 0 : index
    %c0_106 = arith.constant 0 : index
    %238 = tpu.strided_load %arg34[%c0_105, %c0_106] {strides = array<i32: 2, 1>} : memref<64x1xf32, #tpu.memory_space<vmem>>, vector<32x1xf32>
    %c1 = arith.constant 1 : index
    %c0_107 = arith.constant 0 : index
    %239 = tpu.strided_load %arg34[%c1, %c0_107] {strides = array<i32: 2, 1>} : memref<64x1xf32, #tpu.memory_space<vmem>>, vector<32x1xf32>
    %c1_i32_108 = arith.constant 1 : i32
    %240 = tpu.dynamic_rotate %239 by %c1_i32_108 dim 0 : vector<32x1xf32>, i32 -> vector<32x1xf32>
    %241 = tpu.iota {dimensions = array<i32: 0>} : vector<32x1xi32>
    %c0_i32_109 = arith.constant 0 : i32
    %242 = vector.broadcast %c0_i32_109 : i32 to vector<32x1xi32>
    %243 = arith.cmpi eq, %241, %242 : vector<32x1xi32>
    %cst_110 = arith.constant 0.000000e+00 : f32
    %244 = vector.broadcast %cst_110 : f32 to vector<32x1xf32>
    %245 = arith.select %243, %244, %240 : vector<32x1xi1>, vector<32x1xf32>
    %246 = arith.maximumf %245, %238 : vector<32x1xf32>
    %247 = arith.maximumf %246, %239 : vector<32x1xf32>
    %c0_111 = arith.constant 0 : index
    %c0_112 = arith.constant 0 : index
    %248 = tpu.strided_load %arg33[%c0_111, %c0_112] {strides = array<i32: 2, 1>} : memref<64x32xf32, #tpu.memory_space<vmem>>, vector<32x32xf32>
    %c1_113 = arith.constant 1 : index
    %c0_114 = arith.constant 0 : index
    %249 = tpu.strided_load %arg33[%c1_113, %c0_114] {strides = array<i32: 2, 1>} : memref<64x32xf32, #tpu.memory_space<vmem>>, vector<32x32xf32>
    %c1_i32_115 = arith.constant 1 : i32
    %250 = tpu.dynamic_rotate %249 by %c1_i32_115 dim 0 : vector<32x32xf32>, i32 -> vector<32x32xf32>
    %251 = tpu.iota {dimensions = array<i32: 0>} : vector<32x1xi32>
    %c0_i32_116 = arith.constant 0 : i32
    %252 = vector.broadcast %c0_i32_116 : i32 to vector<32x1xi32>
    %253 = arith.cmpi eq, %251, %252 : vector<32x1xi32>
    %cst_117 = arith.constant -1.000000e+30 : f32
    %254 = vector.shape_cast %253 : vector<32x1xi1> to vector<32x1xi1>
    %255 = vector.broadcast %254 : vector<32x1xi1> to vector<32x32xi1>
    %256 = vector.broadcast %cst_117 : f32 to vector<32x32xf32>
    %257 = arith.select %255, %256, %250 : vector<32x32xi1>, vector<32x32xf32>
    %258 = arith.maximumf %257, %248 : vector<32x32xf32>
    %259 = arith.maximumf %258, %249 : vector<32x32xf32>
    %260 = vector.broadcast %247 : vector<32x1xf32> to vector<32x32xf32>
    %261 = arith.mulf %259, %260 : vector<32x32xf32>
    %c1_118 = arith.constant 1 : index
    %c0_119 = arith.constant 0 : index
    %c0_120 = arith.constant 0 : index
    %262 = vector.load %arg11[%c1_118, %c0_119, %c0_120] : memref<6x1x32xf32, #tpu.memory_space<vmem>>, vector<1x1x32xf32>
    %263 = vector.shape_cast %262 : vector<1x1x32xf32> to vector<1x32xf32>
    %c1_121 = arith.constant 1 : index
    %c0_122 = arith.constant 0 : index
    %c0_123 = arith.constant 0 : index
    %264 = vector.load %arg12[%c1_121, %c0_122, %c0_123] : memref<6x1x32xf32, #tpu.memory_space<vmem>>, vector<1x1x32xf32>
    %265 = vector.shape_cast %264 : vector<1x1x32xf32> to vector<1x32xf32>
    %c1_124 = arith.constant 1 : index
    %c0_125 = arith.constant 0 : index
    %c0_126 = arith.constant 0 : index
    %266 = vector.load %arg13[%c1_124, %c0_125, %c0_126] : memref<6x3x32xf32, #tpu.memory_space<vmem>>, vector<1x3x32xf32>
    %267 = vector.shape_cast %266 : vector<1x3x32xf32> to vector<3x32xf32>
    %c1_127 = arith.constant 1 : index
    %c0_128 = arith.constant 0 : index
    %c0_129 = arith.constant 0 : index
    %268 = vector.load %arg14[%c1_127, %c0_128, %c0_129] : memref<6x1x32xf32, #tpu.memory_space<vmem>>, vector<1x1x32xf32>
    %269 = vector.shape_cast %268 : vector<1x1x32xf32> to vector<1x32xf32>
    %c1_130 = arith.constant 1 : index
    %c0_131 = arith.constant 0 : index
    %c0_132 = arith.constant 0 : index
    %270 = vector.load %arg15[%c1_130, %c0_131, %c0_132] : memref<6x1x32xf32, #tpu.memory_space<vmem>>, vector<1x1x32xf32>
    %271 = vector.shape_cast %270 : vector<1x1x32xf32> to vector<1x32xf32>
    %c1_133 = arith.constant 1 : index
    %c0_134 = arith.constant 0 : index
    %c0_135 = arith.constant 0 : index
    %272 = vector.load %arg16[%c1_133, %c0_134, %c0_135] : memref<6x1x32xf32, #tpu.memory_space<vmem>>, vector<1x1x32xf32>
    %273 = vector.shape_cast %272 : vector<1x1x32xf32> to vector<1x32xf32>
    %c1_136 = arith.constant 1 : index
    %c0_137 = arith.constant 0 : index
    %c0_138 = arith.constant 0 : index
    %274 = vector.load %arg17[%c1_136, %c0_137, %c0_138] : memref<6x32x128xf32, #tpu.memory_space<vmem>>, vector<1x32x128xf32>
    %275 = vector.shape_cast %274 : vector<1x32x128xf32> to vector<32x128xf32>
    %c1_139 = arith.constant 1 : index
    %c0_140 = arith.constant 0 : index
    %c0_141 = arith.constant 0 : index
    %276 = vector.load %arg18[%c1_139, %c0_140, %c0_141] : memref<6x1x128xf32, #tpu.memory_space<vmem>>, vector<1x1x128xf32>
    %277 = vector.shape_cast %276 : vector<1x1x128xf32> to vector<1x128xf32>
    %c1_142 = arith.constant 1 : index
    %c0_143 = arith.constant 0 : index
    %c0_144 = arith.constant 0 : index
    %278 = vector.load %arg19[%c1_142, %c0_143, %c0_144] : memref<6x128x32xf32, #tpu.memory_space<vmem>>, vector<1x128x32xf32>
    %279 = vector.shape_cast %278 : vector<1x128x32xf32> to vector<128x32xf32>
    %c1_145 = arith.constant 1 : index
    %c0_146 = arith.constant 0 : index
    %c0_147 = arith.constant 0 : index
    %280 = vector.load %arg20[%c1_145, %c0_146, %c0_147] : memref<6x1x32xf32, #tpu.memory_space<vmem>>, vector<1x1x32xf32>
    %281 = vector.shape_cast %280 : vector<1x1x32xf32> to vector<1x32xf32>
    %cst_148 = arith.constant dense<0.000000e+00> : vector<32xf32>
    %282 = vector.multi_reduction <add>, %261, %cst_148 [1] : vector<32x32xf32> to vector<32xf32>
    %283 = vector.shape_cast %282 : vector<32xf32> to vector<32x1xf32>
    %cst_149 = arith.constant 3.200000e+01 : f32
    %284 = vector.broadcast %cst_149 : f32 to vector<32x1xf32>
    %285 = arith.divf %283, %284 : vector<32x1xf32>
    %286 = vector.broadcast %285 : vector<32x1xf32> to vector<32x32xf32>
    %287 = arith.subf %261, %286 : vector<32x32xf32>
    %288 = arith.mulf %287, %287 : vector<32x32xf32>
    %cst_150 = arith.constant dense<0.000000e+00> : vector<32xf32>
    %289 = vector.multi_reduction <add>, %288, %cst_150 [1] : vector<32x32xf32> to vector<32xf32>
    %290 = vector.shape_cast %289 : vector<32xf32> to vector<32x1xf32>
    %cst_151 = arith.constant 3.200000e+01 : f32
    %291 = vector.broadcast %cst_151 : f32 to vector<32x1xf32>
    %292 = arith.divf %290, %291 : vector<32x1xf32>
    %293 = vector.broadcast %285 : vector<32x1xf32> to vector<32x32xf32>
    %294 = arith.subf %261, %293 : vector<32x32xf32>
    %cst_152 = arith.constant 9.99999974E-6 : f32
    %295 = vector.broadcast %cst_152 : f32 to vector<32x1xf32>
    %296 = arith.addf %292, %295 : vector<32x1xf32>
    %297 = math.rsqrt %296 : vector<32x1xf32>
    %298 = vector.broadcast %297 : vector<32x1xf32> to vector<32x32xf32>
    %299 = arith.mulf %294, %298 : vector<32x32xf32>
    %300 = vector.broadcast %263 : vector<1x32xf32> to vector<32x32xf32>
    %301 = arith.mulf %299, %300 : vector<32x32xf32>
    %302 = vector.broadcast %265 : vector<1x32xf32> to vector<32x32xf32>
    %303 = arith.addf %301, %302 : vector<32x32xf32>
    %304 = vector.broadcast %247 : vector<32x1xf32> to vector<32x32xf32>
    %305 = arith.mulf %303, %304 : vector<32x32xf32>
    %c1_i32_153 = arith.constant 1 : i32
    %306 = tpu.dynamic_rotate %305 by %c1_i32_153 dim 0 : vector<32x32xf32>, i32 -> vector<32x32xf32>
    %307 = tpu.iota {dimensions = array<i32: 0>} : vector<32x1xi32>
    %c0_i32_154 = arith.constant 0 : i32
    %308 = vector.broadcast %c0_i32_154 : i32 to vector<32x1xi32>
    %309 = arith.cmpi eq, %307, %308 : vector<32x1xi32>
    %cst_155 = arith.constant 0.000000e+00 : f32
    %310 = vector.shape_cast %309 : vector<32x1xi1> to vector<32x1xi1>
    %311 = vector.broadcast %310 : vector<32x1xi1> to vector<32x32xi1>
    %312 = vector.broadcast %cst_155 : f32 to vector<32x32xf32>
    %313 = arith.select %311, %312, %306 : vector<32x32xi1>, vector<32x32xf32>
    %c31_i32 = arith.constant 31 : i32
    %314 = tpu.dynamic_rotate %305 by %c31_i32 dim 0 : vector<32x32xf32>, i32 -> vector<32x32xf32>
    %315 = tpu.iota {dimensions = array<i32: 0>} : vector<32x1xi32>
    %c31_i32_156 = arith.constant 31 : i32
    %316 = vector.broadcast %c31_i32_156 : i32 to vector<32x1xi32>
    %317 = arith.cmpi eq, %315, %316 : vector<32x1xi32>
    %cst_157 = arith.constant 0.000000e+00 : f32
    %318 = vector.shape_cast %317 : vector<32x1xi1> to vector<32x1xi1>
    %319 = vector.broadcast %318 : vector<32x1xi1> to vector<32x32xi1>
    %320 = vector.broadcast %cst_157 : f32 to vector<32x32xf32>
    %321 = arith.select %319, %320, %314 : vector<32x32xi1>, vector<32x32xf32>
    %322 = vector.extract_strided_slice %267 {offsets = [0, 0], sizes = [1, 32], strides = [1, 1]} : vector<3x32xf32> to vector<1x32xf32>
    %323 = vector.broadcast %322 : vector<1x32xf32> to vector<32x32xf32>
    %324 = arith.mulf %313, %323 : vector<32x32xf32>
    %325 = vector.extract_strided_slice %267 {offsets = [1, 0], sizes = [1, 32], strides = [1, 1]} : vector<3x32xf32> to vector<1x32xf32>
    %326 = vector.broadcast %325 : vector<1x32xf32> to vector<32x32xf32>
    %327 = arith.mulf %305, %326 : vector<32x32xf32>
    %328 = arith.addf %324, %327 : vector<32x32xf32>
    %329 = vector.extract_strided_slice %267 {offsets = [2, 0], sizes = [1, 32], strides = [1, 1]} : vector<3x32xf32> to vector<1x32xf32>
    %330 = vector.broadcast %329 : vector<1x32xf32> to vector<32x32xf32>
    %331 = arith.mulf %321, %330 : vector<32x32xf32>
    %332 = arith.addf %328, %331 : vector<32x32xf32>
    %333 = vector.broadcast %269 : vector<1x32xf32> to vector<32x32xf32>
    %334 = arith.addf %332, %333 : vector<32x32xf32>
    %335 = arith.addf %261, %334 : vector<32x32xf32>
    %cst_158 = arith.constant dense<0.000000e+00> : vector<32xf32>
    %336 = vector.multi_reduction <add>, %335, %cst_158 [1] : vector<32x32xf32> to vector<32xf32>
    %337 = vector.shape_cast %336 : vector<32xf32> to vector<32x1xf32>
    %cst_159 = arith.constant 3.200000e+01 : f32
    %338 = vector.broadcast %cst_159 : f32 to vector<32x1xf32>
    %339 = arith.divf %337, %338 : vector<32x1xf32>
    %340 = vector.broadcast %339 : vector<32x1xf32> to vector<32x32xf32>
    %341 = arith.subf %335, %340 : vector<32x32xf32>
    %342 = arith.mulf %341, %341 : vector<32x32xf32>
    %cst_160 = arith.constant dense<0.000000e+00> : vector<32xf32>
    %343 = vector.multi_reduction <add>, %342, %cst_160 [1] : vector<32x32xf32> to vector<32xf32>
    %344 = vector.shape_cast %343 : vector<32xf32> to vector<32x1xf32>
    %cst_161 = arith.constant 3.200000e+01 : f32
    %345 = vector.broadcast %cst_161 : f32 to vector<32x1xf32>
    %346 = arith.divf %344, %345 : vector<32x1xf32>
    %347 = vector.broadcast %339 : vector<32x1xf32> to vector<32x32xf32>
    %348 = arith.subf %335, %347 : vector<32x32xf32>
    %cst_162 = arith.constant 9.99999974E-6 : f32
    %349 = vector.broadcast %cst_162 : f32 to vector<32x1xf32>
    %350 = arith.addf %346, %349 : vector<32x1xf32>
    %351 = math.rsqrt %350 : vector<32x1xf32>
    %352 = vector.broadcast %351 : vector<32x1xf32> to vector<32x32xf32>
    %353 = arith.mulf %348, %352 : vector<32x32xf32>
    %354 = vector.broadcast %271 : vector<1x32xf32> to vector<32x32xf32>
    %355 = arith.mulf %353, %354 : vector<32x32xf32>
    %356 = vector.broadcast %273 : vector<1x32xf32> to vector<32x32xf32>
    %357 = arith.addf %355, %356 : vector<32x32xf32>
    %358 = arith.truncf %357 : vector<32x32xf32> to vector<32x32xbf16>
    %359 = arith.truncf %275 : vector<32x128xf32> to vector<32x128xbf16>
    %cst_163 = arith.constant dense<0.000000e+00> : vector<32x128xf32>
    %360 = tpu.matmul %358, %359, %cst_163 {dimension_numbers = #tpu.dot_dimension_numbers<[1], [0], [0], [1], [0, 0, 1, 1], [], []>} : vector<32x32xbf16>, vector<32x128xbf16>, vector<32x128xf32> -> vector<32x128xf32>
    %361 = vector.broadcast %277 : vector<1x128xf32> to vector<32x128xf32>
    %362 = arith.addf %360, %361 : vector<32x128xf32>
    %363 = arith.mulf %362, %362 : vector<32x128xf32>
    %364 = arith.mulf %362, %363 : vector<32x128xf32>
    %cst_164 = arith.constant 4.471500e-02 : f32
    %365 = vector.broadcast %cst_164 : f32 to vector<32x128xf32>
    %366 = arith.mulf %365, %364 : vector<32x128xf32>
    %367 = arith.addf %362, %366 : vector<32x128xf32>
    %cst_165 = arith.constant 0.797884583 : f32
    %368 = vector.broadcast %cst_165 : f32 to vector<32x128xf32>
    %369 = arith.mulf %368, %367 : vector<32x128xf32>
    %370 = math.tanh %369 : vector<32x128xf32>
    %cst_166 = arith.constant 1.000000e+00 : f32
    %371 = vector.broadcast %cst_166 : f32 to vector<32x128xf32>
    %372 = arith.addf %371, %370 : vector<32x128xf32>
    %cst_167 = arith.constant 5.000000e-01 : f32
    %373 = vector.broadcast %cst_167 : f32 to vector<32x128xf32>
    %374 = arith.mulf %373, %372 : vector<32x128xf32>
    %375 = arith.mulf %362, %374 : vector<32x128xf32>
    %376 = arith.truncf %375 : vector<32x128xf32> to vector<32x128xbf16>
    %377 = arith.truncf %279 : vector<128x32xf32> to vector<128x32xbf16>
    %cst_168 = arith.constant dense<0.000000e+00> : vector<32x32xf32>
    %378 = tpu.matmul %376, %377, %cst_168 {dimension_numbers = #tpu.dot_dimension_numbers<[1], [0], [0], [1], [0, 0, 1, 1], [], []>} : vector<32x128xbf16>, vector<128x32xbf16>, vector<32x32xf32> -> vector<32x32xf32>
    %379 = vector.broadcast %281 : vector<1x32xf32> to vector<32x32xf32>
    %380 = arith.addf %378, %379 : vector<32x32xf32>
    %381 = arith.addf %335, %380 : vector<32x32xf32>
    %382 = vector.broadcast %247 : vector<32x1xf32> to vector<32x32xf32>
    %383 = arith.mulf %381, %382 : vector<32x32xf32>
    %c0_169 = arith.constant 0 : index
    %c0_170 = arith.constant 0 : index
    %c0_171 = arith.constant 0 : index
    %384 = vector.load %arg23[%c0_169, %c0_170, %c0_171] : memref<1x32x32xf32, #tpu.memory_space<vmem>>, vector<1x32x32xf32>
    %385 = vector.shape_cast %384 : vector<1x32x32xf32> to vector<32x32xf32>
    %386 = vector.shape_cast %383 : vector<32x32xf32> to vector<1x32x32xf32>
    tpu.vector_store %arg23[%c0_169, %c0_170, %c0_171], %386 {strides = array<i32>} : memref<1x32x32xf32, #tpu.memory_space<vmem>>, vector<1x32x32xf32>,
    %c0_172 = arith.constant 0 : index
    %c0_173 = arith.constant 0 : index
    %c0_174 = arith.constant 0 : index
    %387 = vector.load %arg24[%c0_172, %c0_173, %c0_174] : memref<1x32x1xf32, #tpu.memory_space<vmem>>, vector<1x32x1xf32>
    %388 = vector.shape_cast %387 : vector<1x32x1xf32> to vector<32x1xf32>
    %389 = vector.shape_cast %247 : vector<32x1xf32> to vector<1x32x1xf32>
    tpu.vector_store %arg24[%c0_172, %c0_173, %c0_174], %389 {strides = array<i32>} : memref<1x32x1xf32, #tpu.memory_space<vmem>>, vector<1x32x1xf32>,
    %c0_175 = arith.constant 0 : index
    %c0_176 = arith.constant 0 : index
    %390 = vector.load %arg33[%c0_175, %c0_176] : memref<64x32xf32, #tpu.memory_space<vmem>>, vector<32x32xf32>
    tpu.vector_store %arg33[%c0_175, %c0_176], %383 {strides = array<i32>} : memref<64x32xf32, #tpu.memory_space<vmem>>, vector<32x32xf32>,
    %c0_177 = arith.constant 0 : index
    %c0_178 = arith.constant 0 : index
    %391 = vector.load %arg34[%c0_177, %c0_178] : memref<64x1xf32, #tpu.memory_space<vmem>>, vector<32x1xf32>
    tpu.vector_store %arg34[%c0_177, %c0_178], %247 {strides = array<i32>} : memref<64x1xf32, #tpu.memory_space<vmem>>, vector<32x1xf32>,
    %c0_179 = arith.constant 0 : index
    %c0_180 = arith.constant 0 : index
    %392 = tpu.strided_load %arg34[%c0_179, %c0_180] {strides = array<i32: 2, 1>} : memref<64x1xf32, #tpu.memory_space<vmem>>, vector<16x1xf32>
    %c1_181 = arith.constant 1 : index
    %c0_182 = arith.constant 0 : index
    %393 = tpu.strided_load %arg34[%c1_181, %c0_182] {strides = array<i32: 2, 1>} : memref<64x1xf32, #tpu.memory_space<vmem>>, vector<16x1xf32>
    %c1_i32_183 = arith.constant 1 : i32
    %394 = tpu.dynamic_rotate %393 by %c1_i32_183 dim 0 : vector<16x1xf32>, i32 -> vector<16x1xf32>
    %395 = tpu.iota {dimensions = array<i32: 0>} : vector<16x1xi32>
    %c0_i32_184 = arith.constant 0 : i32
    %396 = vector.broadcast %c0_i32_184 : i32 to vector<16x1xi32>
    %397 = arith.cmpi eq, %395, %396 : vector<16x1xi32>
    %cst_185 = arith.constant 0.000000e+00 : f32
    %398 = vector.broadcast %cst_185 : f32 to vector<16x1xf32>
    %399 = arith.select %397, %398, %394 : vector<16x1xi1>, vector<16x1xf32>
    %400 = arith.maximumf %399, %392 : vector<16x1xf32>
    %401 = arith.maximumf %400, %393 : vector<16x1xf32>
    %c0_186 = arith.constant 0 : index
    %c0_187 = arith.constant 0 : index
    %402 = tpu.strided_load %arg33[%c0_186, %c0_187] {strides = array<i32: 2, 1>} : memref<64x32xf32, #tpu.memory_space<vmem>>, vector<16x32xf32>
    %c1_188 = arith.constant 1 : index
    %c0_189 = arith.constant 0 : index
    %403 = tpu.strided_load %arg33[%c1_188, %c0_189] {strides = array<i32: 2, 1>} : memref<64x32xf32, #tpu.memory_space<vmem>>, vector<16x32xf32>
    %c1_i32_190 = arith.constant 1 : i32
    %404 = tpu.dynamic_rotate %403 by %c1_i32_190 dim 0 : vector<16x32xf32>, i32 -> vector<16x32xf32>
    %405 = tpu.iota {dimensions = array<i32: 0>} : vector<16x1xi32>
    %c0_i32_191 = arith.constant 0 : i32
    %406 = vector.broadcast %c0_i32_191 : i32 to vector<16x1xi32>
    %407 = arith.cmpi eq, %405, %406 : vector<16x1xi32>
    %cst_192 = arith.constant -1.000000e+30 : f32
    %408 = vector.shape_cast %407 : vector<16x1xi1> to vector<16x1xi1>
    %409 = vector.broadcast %408 : vector<16x1xi1> to vector<16x32xi1>
    %410 = vector.broadcast %cst_192 : f32 to vector<16x32xf32>
    %411 = arith.select %409, %410, %404 : vector<16x32xi1>, vector<16x32xf32>
    %412 = arith.maximumf %411, %402 : vector<16x32xf32>
    %413 = arith.maximumf %412, %403 : vector<16x32xf32>
    %414 = vector.broadcast %401 : vector<16x1xf32> to vector<16x32xf32>
    %415 = arith.mulf %413, %414 : vector<16x32xf32>
    %c2 = arith.constant 2 : index
    %c0_193 = arith.constant 0 : index
    %c0_194 = arith.constant 0 : index
    %416 = vector.load %arg11[%c2, %c0_193, %c0_194] : memref<6x1x32xf32, #tpu.memory_space<vmem>>, vector<1x1x32xf32>
    %417 = vector.shape_cast %416 : vector<1x1x32xf32> to vector<1x32xf32>
    %c2_195 = arith.constant 2 : index
    %c0_196 = arith.constant 0 : index
    %c0_197 = arith.constant 0 : index
    %418 = vector.load %arg12[%c2_195, %c0_196, %c0_197] : memref<6x1x32xf32, #tpu.memory_space<vmem>>, vector<1x1x32xf32>
    %419 = vector.shape_cast %418 : vector<1x1x32xf32> to vector<1x32xf32>
    %c2_198 = arith.constant 2 : index
    %c0_199 = arith.constant 0 : index
    %c0_200 = arith.constant 0 : index
    %420 = vector.load %arg13[%c2_198, %c0_199, %c0_200] : memref<6x3x32xf32, #tpu.memory_space<vmem>>, vector<1x3x32xf32>
    %421 = vector.shape_cast %420 : vector<1x3x32xf32> to vector<3x32xf32>
    %c2_201 = arith.constant 2 : index
    %c0_202 = arith.constant 0 : index
    %c0_203 = arith.constant 0 : index
    %422 = vector.load %arg14[%c2_201, %c0_202, %c0_203] : memref<6x1x32xf32, #tpu.memory_space<vmem>>, vector<1x1x32xf32>
    %423 = vector.shape_cast %422 : vector<1x1x32xf32> to vector<1x32xf32>
    %c2_204 = arith.constant 2 : index
    %c0_205 = arith.constant 0 : index
    %c0_206 = arith.constant 0 : index
    %424 = vector.load %arg15[%c2_204, %c0_205, %c0_206] : memref<6x1x32xf32, #tpu.memory_space<vmem>>, vector<1x1x32xf32>
    %425 = vector.shape_cast %424 : vector<1x1x32xf32> to vector<1x32xf32>
    %c2_207 = arith.constant 2 : index
    %c0_208 = arith.constant 0 : index
    %c0_209 = arith.constant 0 : index
    %426 = vector.load %arg16[%c2_207, %c0_208, %c0_209] : memref<6x1x32xf32, #tpu.memory_space<vmem>>, vector<1x1x32xf32>
    %427 = vector.shape_cast %426 : vector<1x1x32xf32> to vector<1x32xf32>
    %c2_210 = arith.constant 2 : index
    %c0_211 = arith.constant 0 : index
    %c0_212 = arith.constant 0 : index
    %428 = vector.load %arg17[%c2_210, %c0_211, %c0_212] : memref<6x32x128xf32, #tpu.memory_space<vmem>>, vector<1x32x128xf32>
    %429 = vector.shape_cast %428 : vector<1x32x128xf32> to vector<32x128xf32>
    %c2_213 = arith.constant 2 : index
    %c0_214 = arith.constant 0 : index
    %c0_215 = arith.constant 0 : index
    %430 = vector.load %arg18[%c2_213, %c0_214, %c0_215] : memref<6x1x128xf32, #tpu.memory_space<vmem>>, vector<1x1x128xf32>
    %431 = vector.shape_cast %430 : vector<1x1x128xf32> to vector<1x128xf32>
    %c2_216 = arith.constant 2 : index
    %c0_217 = arith.constant 0 : index
    %c0_218 = arith.constant 0 : index
    %432 = vector.load %arg19[%c2_216, %c0_217, %c0_218] : memref<6x128x32xf32, #tpu.memory_space<vmem>>, vector<1x128x32xf32>
    %433 = vector.shape_cast %432 : vector<1x128x32xf32> to vector<128x32xf32>
    %c2_219 = arith.constant 2 : index
    %c0_220 = arith.constant 0 : index
    %c0_221 = arith.constant 0 : index
    %434 = vector.load %arg20[%c2_219, %c0_220, %c0_221] : memref<6x1x32xf32, #tpu.memory_space<vmem>>, vector<1x1x32xf32>
    %435 = vector.shape_cast %434 : vector<1x1x32xf32> to vector<1x32xf32>
    %cst_222 = arith.constant dense<0.000000e+00> : vector<16xf32>
    %436 = vector.multi_reduction <add>, %415, %cst_222 [1] : vector<16x32xf32> to vector<16xf32>
    %437 = vector.shape_cast %436 : vector<16xf32> to vector<16x1xf32>
    %cst_223 = arith.constant 3.200000e+01 : f32
    %438 = vector.broadcast %cst_223 : f32 to vector<16x1xf32>
    %439 = arith.divf %437, %438 : vector<16x1xf32>
    %440 = vector.broadcast %439 : vector<16x1xf32> to vector<16x32xf32>
    %441 = arith.subf %415, %440 : vector<16x32xf32>
    %442 = arith.mulf %441, %441 : vector<16x32xf32>
    %cst_224 = arith.constant dense<0.000000e+00> : vector<16xf32>
    %443 = vector.multi_reduction <add>, %442, %cst_224 [1] : vector<16x32xf32> to vector<16xf32>
    %444 = vector.shape_cast %443 : vector<16xf32> to vector<16x1xf32>
    %cst_225 = arith.constant 3.200000e+01 : f32
    %445 = vector.broadcast %cst_225 : f32 to vector<16x1xf32>
    %446 = arith.divf %444, %445 : vector<16x1xf32>
    %447 = vector.broadcast %439 : vector<16x1xf32> to vector<16x32xf32>
    %448 = arith.subf %415, %447 : vector<16x32xf32>
    %cst_226 = arith.constant 9.99999974E-6 : f32
    %449 = vector.broadcast %cst_226 : f32 to vector<16x1xf32>
    %450 = arith.addf %446, %449 : vector<16x1xf32>
    %451 = math.rsqrt %450 : vector<16x1xf32>
    %452 = vector.broadcast %451 : vector<16x1xf32> to vector<16x32xf32>
    %453 = arith.mulf %448, %452 : vector<16x32xf32>
    %454 = vector.broadcast %417 : vector<1x32xf32> to vector<16x32xf32>
    %455 = arith.mulf %453, %454 : vector<16x32xf32>
    %456 = vector.broadcast %419 : vector<1x32xf32> to vector<16x32xf32>
    %457 = arith.addf %455, %456 : vector<16x32xf32>
    %458 = vector.broadcast %401 : vector<16x1xf32> to vector<16x32xf32>
    %459 = arith.mulf %457, %458 : vector<16x32xf32>
    %c1_i32_227 = arith.constant 1 : i32
    %460 = tpu.dynamic_rotate %459 by %c1_i32_227 dim 0 : vector<16x32xf32>, i32 -> vector<16x32xf32>
    %461 = tpu.iota {dimensions = array<i32: 0>} : vector<16x1xi32>
    %c0_i32_228 = arith.constant 0 : i32
    %462 = vector.broadcast %c0_i32_228 : i32 to vector<16x1xi32>
    %463 = arith.cmpi eq, %461, %462 : vector<16x1xi32>
    %cst_229 = arith.constant 0.000000e+00 : f32
    %464 = vector.shape_cast %463 : vector<16x1xi1> to vector<16x1xi1>
    %465 = vector.broadcast %464 : vector<16x1xi1> to vector<16x32xi1>
    %466 = vector.broadcast %cst_229 : f32 to vector<16x32xf32>
    %467 = arith.select %465, %466, %460 : vector<16x32xi1>, vector<16x32xf32>
    %c15_i32 = arith.constant 15 : i32
    %468 = tpu.dynamic_rotate %459 by %c15_i32 dim 0 : vector<16x32xf32>, i32 -> vector<16x32xf32>
    %469 = tpu.iota {dimensions = array<i32: 0>} : vector<16x1xi32>
    %c15_i32_230 = arith.constant 15 : i32
    %470 = vector.broadcast %c15_i32_230 : i32 to vector<16x1xi32>
    %471 = arith.cmpi eq, %469, %470 : vector<16x1xi32>
    %cst_231 = arith.constant 0.000000e+00 : f32
    %472 = vector.shape_cast %471 : vector<16x1xi1> to vector<16x1xi1>
    %473 = vector.broadcast %472 : vector<16x1xi1> to vector<16x32xi1>
    %474 = vector.broadcast %cst_231 : f32 to vector<16x32xf32>
    %475 = arith.select %473, %474, %468 : vector<16x32xi1>, vector<16x32xf32>
    %476 = vector.extract_strided_slice %421 {offsets = [0, 0], sizes = [1, 32], strides = [1, 1]} : vector<3x32xf32> to vector<1x32xf32>
    %477 = vector.broadcast %476 : vector<1x32xf32> to vector<16x32xf32>
    %478 = arith.mulf %467, %477 : vector<16x32xf32>
    %479 = vector.extract_strided_slice %421 {offsets = [1, 0], sizes = [1, 32], strides = [1, 1]} : vector<3x32xf32> to vector<1x32xf32>
    %480 = vector.broadcast %479 : vector<1x32xf32> to vector<16x32xf32>
    %481 = arith.mulf %459, %480 : vector<16x32xf32>
    %482 = arith.addf %478, %481 : vector<16x32xf32>
    %483 = vector.extract_strided_slice %421 {offsets = [2, 0], sizes = [1, 32], strides = [1, 1]} : vector<3x32xf32> to vector<1x32xf32>
    %484 = vector.broadcast %483 : vector<1x32xf32> to vector<16x32xf32>
    %485 = arith.mulf %475, %484 : vector<16x32xf32>
    %486 = arith.addf %482, %485 : vector<16x32xf32>
    %487 = vector.broadcast %423 : vector<1x32xf32> to vector<16x32xf32>
    %488 = arith.addf %486, %487 : vector<16x32xf32>
    %489 = arith.addf %415, %488 : vector<16x32xf32>
    %cst_232 = arith.constant dense<0.000000e+00> : vector<16xf32>
    %490 = vector.multi_reduction <add>, %489, %cst_232 [1] : vector<16x32xf32> to vector<16xf32>
    %491 = vector.shape_cast %490 : vector<16xf32> to vector<16x1xf32>
    %cst_233 = arith.constant 3.200000e+01 : f32
    %492 = vector.broadcast %cst_233 : f32 to vector<16x1xf32>
    %493 = arith.divf %491, %492 : vector<16x1xf32>
    %494 = vector.broadcast %493 : vector<16x1xf32> to vector<16x32xf32>
    %495 = arith.subf %489, %494 : vector<16x32xf32>
    %496 = arith.mulf %495, %495 : vector<16x32xf32>
    %cst_234 = arith.constant dense<0.000000e+00> : vector<16xf32>
    %497 = vector.multi_reduction <add>, %496, %cst_234 [1] : vector<16x32xf32> to vector<16xf32>
    %498 = vector.shape_cast %497 : vector<16xf32> to vector<16x1xf32>
    %cst_235 = arith.constant 3.200000e+01 : f32
    %499 = vector.broadcast %cst_235 : f32 to vector<16x1xf32>
    %500 = arith.divf %498, %499 : vector<16x1xf32>
    %501 = vector.broadcast %493 : vector<16x1xf32> to vector<16x32xf32>
    %502 = arith.subf %489, %501 : vector<16x32xf32>
    %cst_236 = arith.constant 9.99999974E-6 : f32
    %503 = vector.broadcast %cst_236 : f32 to vector<16x1xf32>
    %504 = arith.addf %500, %503 : vector<16x1xf32>
    %505 = math.rsqrt %504 : vector<16x1xf32>
    %506 = vector.broadcast %505 : vector<16x1xf32> to vector<16x32xf32>
    %507 = arith.mulf %502, %506 : vector<16x32xf32>
    %508 = vector.broadcast %425 : vector<1x32xf32> to vector<16x32xf32>
    %509 = arith.mulf %507, %508 : vector<16x32xf32>
    %510 = vector.broadcast %427 : vector<1x32xf32> to vector<16x32xf32>
    %511 = arith.addf %509, %510 : vector<16x32xf32>
    %512 = arith.truncf %511 : vector<16x32xf32> to vector<16x32xbf16>
    %513 = arith.truncf %429 : vector<32x128xf32> to vector<32x128xbf16>
    %cst_237 = arith.constant dense<0.000000e+00> : vector<16x128xf32>
    %514 = tpu.matmul %512, %513, %cst_237 {dimension_numbers = #tpu.dot_dimension_numbers<[1], [0], [0], [1], [0, 0, 1, 1], [], []>} : vector<16x32xbf16>, vector<32x128xbf16>, vector<16x128xf32> -> vector<16x128xf32>
    %515 = vector.broadcast %431 : vector<1x128xf32> to vector<16x128xf32>
    %516 = arith.addf %514, %515 : vector<16x128xf32>
    %517 = arith.mulf %516, %516 : vector<16x128xf32>
    %518 = arith.mulf %516, %517 : vector<16x128xf32>
    %cst_238 = arith.constant 4.471500e-02 : f32
    %519 = vector.broadcast %cst_238 : f32 to vector<16x128xf32>
    %520 = arith.mulf %519, %518 : vector<16x128xf32>
    %521 = arith.addf %516, %520 : vector<16x128xf32>
    %cst_239 = arith.constant 0.797884583 : f32
    %522 = vector.broadcast %cst_239 : f32 to vector<16x128xf32>
    %523 = arith.mulf %522, %521 : vector<16x128xf32>
    %524 = math.tanh %523 : vector<16x128xf32>
    %cst_240 = arith.constant 1.000000e+00 : f32
    %525 = vector.broadcast %cst_240 : f32 to vector<16x128xf32>
    %526 = arith.addf %525, %524 : vector<16x128xf32>
    %cst_241 = arith.constant 5.000000e-01 : f32
    %527 = vector.broadcast %cst_241 : f32 to vector<16x128xf32>
    %528 = arith.mulf %527, %526 : vector<16x128xf32>
    %529 = arith.mulf %516, %528 : vector<16x128xf32>
    %530 = arith.truncf %529 : vector<16x128xf32> to vector<16x128xbf16>
    %531 = arith.truncf %433 : vector<128x32xf32> to vector<128x32xbf16>
    %cst_242 = arith.constant dense<0.000000e+00> : vector<16x32xf32>
    %532 = tpu.matmul %530, %531, %cst_242 {dimension_numbers = #tpu.dot_dimension_numbers<[1], [0], [0], [1], [0, 0, 1, 1], [], []>} : vector<16x128xbf16>, vector<128x32xbf16>, vector<16x32xf32> -> vector<16x32xf32>
    %533 = vector.broadcast %435 : vector<1x32xf32> to vector<16x32xf32>
    %534 = arith.addf %532, %533 : vector<16x32xf32>
    %535 = arith.addf %489, %534 : vector<16x32xf32>
    %536 = vector.broadcast %401 : vector<16x1xf32> to vector<16x32xf32>
    %537 = arith.mulf %535, %536 : vector<16x32xf32>
    %c0_243 = arith.constant 0 : index
    %c0_244 = arith.constant 0 : index
    %c0_245 = arith.constant 0 : index
    %538 = vector.load %arg25[%c0_243, %c0_244, %c0_245] : memref<1x16x32xf32, #tpu.memory_space<vmem>>, vector<1x16x32xf32>
    %539 = vector.shape_cast %538 : vector<1x16x32xf32> to vector<16x32xf32>
    %540 = vector.shape_cast %537 : vector<16x32xf32> to vector<1x16x32xf32>
    tpu.vector_store %arg25[%c0_243, %c0_244, %c0_245], %540 {strides = array<i32>} : memref<1x16x32xf32, #tpu.memory_space<vmem>>, vector<1x16x32xf32>,
    %c0_246 = arith.constant 0 : index
    %c0_247 = arith.constant 0 : index
    %c0_248 = arith.constant 0 : index
    %541 = vector.load %arg26[%c0_246, %c0_247, %c0_248] : memref<1x16x1xf32, #tpu.memory_space<vmem>>, vector<1x16x1xf32>
    %542 = vector.shape_cast %541 : vector<1x16x1xf32> to vector<16x1xf32>
    %543 = vector.shape_cast %401 : vector<16x1xf32> to vector<1x16x1xf32>
    tpu.vector_store %arg26[%c0_246, %c0_247, %c0_248], %543 {strides = array<i32>} : memref<1x16x1xf32, #tpu.memory_space<vmem>>, vector<1x16x1xf32>,
    %c0_249 = arith.constant 0 : index
    %c0_250 = arith.constant 0 : index
    %544 = vector.load %arg33[%c0_249, %c0_250] : memref<64x32xf32, #tpu.memory_space<vmem>>, vector<16x32xf32>
    tpu.vector_store %arg33[%c0_249, %c0_250], %537 {strides = array<i32>} : memref<64x32xf32, #tpu.memory_space<vmem>>, vector<16x32xf32>,
    %c0_251 = arith.constant 0 : index
    %c0_252 = arith.constant 0 : index
    %545 = vector.load %arg34[%c0_251, %c0_252] : memref<64x1xf32, #tpu.memory_space<vmem>>, vector<16x1xf32>
    tpu.vector_store %arg34[%c0_251, %c0_252], %401 {strides = array<i32>} : memref<64x1xf32, #tpu.memory_space<vmem>>, vector<16x1xf32>,
    %c0_253 = arith.constant 0 : index
    %c0_254 = arith.constant 0 : index
    %546 = tpu.strided_load %arg34[%c0_253, %c0_254] {strides = array<i32: 2, 1>} : memref<64x1xf32, #tpu.memory_space<vmem>>, vector<8x1xf32>
    %c1_255 = arith.constant 1 : index
    %c0_256 = arith.constant 0 : index
    %547 = tpu.strided_load %arg34[%c1_255, %c0_256] {strides = array<i32: 2, 1>} : memref<64x1xf32, #tpu.memory_space<vmem>>, vector<8x1xf32>
    %c1_i32_257 = arith.constant 1 : i32
    %548 = tpu.dynamic_rotate %547 by %c1_i32_257 dim 0 : vector<8x1xf32>, i32 -> vector<8x1xf32>
    %549 = tpu.iota {dimensions = array<i32: 0>} : vector<8x1xi32>
    %c0_i32_258 = arith.constant 0 : i32
    %550 = vector.broadcast %c0_i32_258 : i32 to vector<8x1xi32>
    %551 = arith.cmpi eq, %549, %550 : vector<8x1xi32>
    %cst_259 = arith.constant 0.000000e+00 : f32
    %552 = vector.broadcast %cst_259 : f32 to vector<8x1xf32>
    %553 = arith.select %551, %552, %548 : vector<8x1xi1>, vector<8x1xf32>
    %554 = arith.maximumf %553, %546 : vector<8x1xf32>
    %555 = arith.maximumf %554, %547 : vector<8x1xf32>
    %c0_260 = arith.constant 0 : index
    %c0_261 = arith.constant 0 : index
    %556 = tpu.strided_load %arg33[%c0_260, %c0_261] {strides = array<i32: 2, 1>} : memref<64x32xf32, #tpu.memory_space<vmem>>, vector<8x32xf32>
    %c1_262 = arith.constant 1 : index
    %c0_263 = arith.constant 0 : index
    %557 = tpu.strided_load %arg33[%c1_262, %c0_263] {strides = array<i32: 2, 1>} : memref<64x32xf32, #tpu.memory_space<vmem>>, vector<8x32xf32>
    %c1_i32_264 = arith.constant 1 : i32
    %558 = tpu.dynamic_rotate %557 by %c1_i32_264 dim 0 : vector<8x32xf32>, i32 -> vector<8x32xf32>
    %559 = tpu.iota {dimensions = array<i32: 0>} : vector<8x1xi32>
    %c0_i32_265 = arith.constant 0 : i32
    %560 = vector.broadcast %c0_i32_265 : i32 to vector<8x1xi32>
    %561 = arith.cmpi eq, %559, %560 : vector<8x1xi32>
    %cst_266 = arith.constant -1.000000e+30 : f32
    %562 = vector.shape_cast %561 : vector<8x1xi1> to vector<8x1xi1>
    %563 = vector.broadcast %562 : vector<8x1xi1> to vector<8x32xi1>
    %564 = vector.broadcast %cst_266 : f32 to vector<8x32xf32>
    %565 = arith.select %563, %564, %558 : vector<8x32xi1>, vector<8x32xf32>
    %566 = arith.maximumf %565, %556 : vector<8x32xf32>
    %567 = arith.maximumf %566, %557 : vector<8x32xf32>
    %568 = vector.broadcast %555 : vector<8x1xf32> to vector<8x32xf32>
    %569 = arith.mulf %567, %568 : vector<8x32xf32>
    %c3 = arith.constant 3 : index
    %c0_267 = arith.constant 0 : index
    %c0_268 = arith.constant 0 : index
    %570 = vector.load %arg11[%c3, %c0_267, %c0_268] : memref<6x1x32xf32, #tpu.memory_space<vmem>>, vector<1x1x32xf32>
    %571 = vector.shape_cast %570 : vector<1x1x32xf32> to vector<1x32xf32>
    %c3_269 = arith.constant 3 : index
    %c0_270 = arith.constant 0 : index
    %c0_271 = arith.constant 0 : index
    %572 = vector.load %arg12[%c3_269, %c0_270, %c0_271] : memref<6x1x32xf32, #tpu.memory_space<vmem>>, vector<1x1x32xf32>
    %573 = vector.shape_cast %572 : vector<1x1x32xf32> to vector<1x32xf32>
    %c3_272 = arith.constant 3 : index
    %c0_273 = arith.constant 0 : index
    %c0_274 = arith.constant 0 : index
    %574 = vector.load %arg13[%c3_272, %c0_273, %c0_274] : memref<6x3x32xf32, #tpu.memory_space<vmem>>, vector<1x3x32xf32>
    %575 = vector.shape_cast %574 : vector<1x3x32xf32> to vector<3x32xf32>
    %c3_275 = arith.constant 3 : index
    %c0_276 = arith.constant 0 : index
    %c0_277 = arith.constant 0 : index
    %576 = vector.load %arg14[%c3_275, %c0_276, %c0_277] : memref<6x1x32xf32, #tpu.memory_space<vmem>>, vector<1x1x32xf32>
    %577 = vector.shape_cast %576 : vector<1x1x32xf32> to vector<1x32xf32>
    %c3_278 = arith.constant 3 : index
    %c0_279 = arith.constant 0 : index
    %c0_280 = arith.constant 0 : index
    %578 = vector.load %arg15[%c3_278, %c0_279, %c0_280] : memref<6x1x32xf32, #tpu.memory_space<vmem>>, vector<1x1x32xf32>
    %579 = vector.shape_cast %578 : vector<1x1x32xf32> to vector<1x32xf32>
    %c3_281 = arith.constant 3 : index
    %c0_282 = arith.constant 0 : index
    %c0_283 = arith.constant 0 : index
    %580 = vector.load %arg16[%c3_281, %c0_282, %c0_283] : memref<6x1x32xf32, #tpu.memory_space<vmem>>, vector<1x1x32xf32>
    %581 = vector.shape_cast %580 : vector<1x1x32xf32> to vector<1x32xf32>
    %c3_284 = arith.constant 3 : index
    %c0_285 = arith.constant 0 : index
    %c0_286 = arith.constant 0 : index
    %582 = vector.load %arg17[%c3_284, %c0_285, %c0_286] : memref<6x32x128xf32, #tpu.memory_space<vmem>>, vector<1x32x128xf32>
    %583 = vector.shape_cast %582 : vector<1x32x128xf32> to vector<32x128xf32>
    %c3_287 = arith.constant 3 : index
    %c0_288 = arith.constant 0 : index
    %c0_289 = arith.constant 0 : index
    %584 = vector.load %arg18[%c3_287, %c0_288, %c0_289] : memref<6x1x128xf32, #tpu.memory_space<vmem>>, vector<1x1x128xf32>
    %585 = vector.shape_cast %584 : vector<1x1x128xf32> to vector<1x128xf32>
    %c3_290 = arith.constant 3 : index
    %c0_291 = arith.constant 0 : index
    %c0_292 = arith.constant 0 : index
    %586 = vector.load %arg19[%c3_290, %c0_291, %c0_292] : memref<6x128x32xf32, #tpu.memory_space<vmem>>, vector<1x128x32xf32>
    %587 = vector.shape_cast %586 : vector<1x128x32xf32> to vector<128x32xf32>
    %c3_293 = arith.constant 3 : index
    %c0_294 = arith.constant 0 : index
    %c0_295 = arith.constant 0 : index
    %588 = vector.load %arg20[%c3_293, %c0_294, %c0_295] : memref<6x1x32xf32, #tpu.memory_space<vmem>>, vector<1x1x32xf32>
    %589 = vector.shape_cast %588 : vector<1x1x32xf32> to vector<1x32xf32>
    %cst_296 = arith.constant dense<0.000000e+00> : vector<8xf32>
    %590 = vector.multi_reduction <add>, %569, %cst_296 [1] : vector<8x32xf32> to vector<8xf32>
    %591 = vector.shape_cast %590 : vector<8xf32> to vector<8x1xf32>
    %cst_297 = arith.constant 3.200000e+01 : f32
    %592 = vector.broadcast %cst_297 : f32 to vector<8x1xf32>
    %593 = arith.divf %591, %592 : vector<8x1xf32>
    %594 = vector.broadcast %593 : vector<8x1xf32> to vector<8x32xf32>
    %595 = arith.subf %569, %594 : vector<8x32xf32>
    %596 = arith.mulf %595, %595 : vector<8x32xf32>
    %cst_298 = arith.constant dense<0.000000e+00> : vector<8xf32>
    %597 = vector.multi_reduction <add>, %596, %cst_298 [1] : vector<8x32xf32> to vector<8xf32>
    %598 = vector.shape_cast %597 : vector<8xf32> to vector<8x1xf32>
    %cst_299 = arith.constant 3.200000e+01 : f32
    %599 = vector.broadcast %cst_299 : f32 to vector<8x1xf32>
    %600 = arith.divf %598, %599 : vector<8x1xf32>
    %601 = vector.broadcast %593 : vector<8x1xf32> to vector<8x32xf32>
    %602 = arith.subf %569, %601 : vector<8x32xf32>
    %cst_300 = arith.constant 9.99999974E-6 : f32
    %603 = vector.broadcast %cst_300 : f32 to vector<8x1xf32>
    %604 = arith.addf %600, %603 : vector<8x1xf32>
    %605 = math.rsqrt %604 : vector<8x1xf32>
    %606 = vector.broadcast %605 : vector<8x1xf32> to vector<8x32xf32>
    %607 = arith.mulf %602, %606 : vector<8x32xf32>
    %608 = vector.broadcast %571 : vector<1x32xf32> to vector<8x32xf32>
    %609 = arith.mulf %607, %608 : vector<8x32xf32>
    %610 = vector.broadcast %573 : vector<1x32xf32> to vector<8x32xf32>
    %611 = arith.addf %609, %610 : vector<8x32xf32>
    %612 = vector.broadcast %555 : vector<8x1xf32> to vector<8x32xf32>
    %613 = arith.mulf %611, %612 : vector<8x32xf32>
    %c1_i32_301 = arith.constant 1 : i32
    %614 = tpu.dynamic_rotate %613 by %c1_i32_301 dim 0 : vector<8x32xf32>, i32 -> vector<8x32xf32>
    %615 = tpu.iota {dimensions = array<i32: 0>} : vector<8x1xi32>
    %c0_i32_302 = arith.constant 0 : i32
    %616 = vector.broadcast %c0_i32_302 : i32 to vector<8x1xi32>
    %617 = arith.cmpi eq, %615, %616 : vector<8x1xi32>
    %cst_303 = arith.constant 0.000000e+00 : f32
    %618 = vector.shape_cast %617 : vector<8x1xi1> to vector<8x1xi1>
    %619 = vector.broadcast %618 : vector<8x1xi1> to vector<8x32xi1>
    %620 = vector.broadcast %cst_303 : f32 to vector<8x32xf32>
    %621 = arith.select %619, %620, %614 : vector<8x32xi1>, vector<8x32xf32>
    %c7_i32 = arith.constant 7 : i32
    %622 = tpu.dynamic_rotate %613 by %c7_i32 dim 0 : vector<8x32xf32>, i32 -> vector<8x32xf32>
    %623 = tpu.iota {dimensions = array<i32: 0>} : vector<8x1xi32>
    %c7_i32_304 = arith.constant 7 : i32
    %624 = vector.broadcast %c7_i32_304 : i32 to vector<8x1xi32>
    %625 = arith.cmpi eq, %623, %624 : vector<8x1xi32>
    %cst_305 = arith.constant 0.000000e+00 : f32
    %626 = vector.shape_cast %625 : vector<8x1xi1> to vector<8x1xi1>
    %627 = vector.broadcast %626 : vector<8x1xi1> to vector<8x32xi1>
    %628 = vector.broadcast %cst_305 : f32 to vector<8x32xf32>
    %629 = arith.select %627, %628, %622 : vector<8x32xi1>, vector<8x32xf32>
    %630 = vector.extract_strided_slice %575 {offsets = [0, 0], sizes = [1, 32], strides = [1, 1]} : vector<3x32xf32> to vector<1x32xf32>
    %631 = vector.broadcast %630 : vector<1x32xf32> to vector<8x32xf32>
    %632 = arith.mulf %621, %631 : vector<8x32xf32>
    %633 = vector.extract_strided_slice %575 {offsets = [1, 0], sizes = [1, 32], strides = [1, 1]} : vector<3x32xf32> to vector<1x32xf32>
    %634 = vector.broadcast %633 : vector<1x32xf32> to vector<8x32xf32>
    %635 = arith.mulf %613, %634 : vector<8x32xf32>
    %636 = arith.addf %632, %635 : vector<8x32xf32>
    %637 = vector.extract_strided_slice %575 {offsets = [2, 0], sizes = [1, 32], strides = [1, 1]} : vector<3x32xf32> to vector<1x32xf32>
    %638 = vector.broadcast %637 : vector<1x32xf32> to vector<8x32xf32>
    %639 = arith.mulf %629, %638 : vector<8x32xf32>
    %640 = arith.addf %636, %639 : vector<8x32xf32>
    %641 = vector.broadcast %577 : vector<1x32xf32> to vector<8x32xf32>
    %642 = arith.addf %640, %641 : vector<8x32xf32>
    %643 = arith.addf %569, %642 : vector<8x32xf32>
    %cst_306 = arith.constant dense<0.000000e+00> : vector<8xf32>
    %644 = vector.multi_reduction <add>, %643, %cst_306 [1] : vector<8x32xf32> to vector<8xf32>
    %645 = vector.shape_cast %644 : vector<8xf32> to vector<8x1xf32>
    %cst_307 = arith.constant 3.200000e+01 : f32
    %646 = vector.broadcast %cst_307 : f32 to vector<8x1xf32>
    %647 = arith.divf %645, %646 : vector<8x1xf32>
    %648 = vector.broadcast %647 : vector<8x1xf32> to vector<8x32xf32>
    %649 = arith.subf %643, %648 : vector<8x32xf32>
    %650 = arith.mulf %649, %649 : vector<8x32xf32>
    %cst_308 = arith.constant dense<0.000000e+00> : vector<8xf32>
    %651 = vector.multi_reduction <add>, %650, %cst_308 [1] : vector<8x32xf32> to vector<8xf32>
    %652 = vector.shape_cast %651 : vector<8xf32> to vector<8x1xf32>
    %cst_309 = arith.constant 3.200000e+01 : f32
    %653 = vector.broadcast %cst_309 : f32 to vector<8x1xf32>
    %654 = arith.divf %652, %653 : vector<8x1xf32>
    %655 = vector.broadcast %647 : vector<8x1xf32> to vector<8x32xf32>
    %656 = arith.subf %643, %655 : vector<8x32xf32>
    %cst_310 = arith.constant 9.99999974E-6 : f32
    %657 = vector.broadcast %cst_310 : f32 to vector<8x1xf32>
    %658 = arith.addf %654, %657 : vector<8x1xf32>
    %659 = math.rsqrt %658 : vector<8x1xf32>
    %660 = vector.broadcast %659 : vector<8x1xf32> to vector<8x32xf32>
    %661 = arith.mulf %656, %660 : vector<8x32xf32>
    %662 = vector.broadcast %579 : vector<1x32xf32> to vector<8x32xf32>
    %663 = arith.mulf %661, %662 : vector<8x32xf32>
    %664 = vector.broadcast %581 : vector<1x32xf32> to vector<8x32xf32>
    %665 = arith.addf %663, %664 : vector<8x32xf32>
    %666 = arith.truncf %665 : vector<8x32xf32> to vector<8x32xbf16>
    %667 = arith.truncf %583 : vector<32x128xf32> to vector<32x128xbf16>
    %cst_311 = arith.constant dense<0.000000e+00> : vector<8x128xf32>
    %668 = tpu.matmul %666, %667, %cst_311 {dimension_numbers = #tpu.dot_dimension_numbers<[1], [0], [0], [1], [0, 0, 1, 1], [], []>} : vector<8x32xbf16>, vector<32x128xbf16>, vector<8x128xf32> -> vector<8x128xf32>
    %669 = vector.broadcast %585 : vector<1x128xf32> to vector<8x128xf32>
    %670 = arith.addf %668, %669 : vector<8x128xf32>
    %671 = arith.mulf %670, %670 : vector<8x128xf32>
    %672 = arith.mulf %670, %671 : vector<8x128xf32>
    %cst_312 = arith.constant 4.471500e-02 : f32
    %673 = vector.broadcast %cst_312 : f32 to vector<8x128xf32>
    %674 = arith.mulf %673, %672 : vector<8x128xf32>
    %675 = arith.addf %670, %674 : vector<8x128xf32>
    %cst_313 = arith.constant 0.797884583 : f32
    %676 = vector.broadcast %cst_313 : f32 to vector<8x128xf32>
    %677 = arith.mulf %676, %675 : vector<8x128xf32>
    %678 = math.tanh %677 : vector<8x128xf32>
    %cst_314 = arith.constant 1.000000e+00 : f32
    %679 = vector.broadcast %cst_314 : f32 to vector<8x128xf32>
    %680 = arith.addf %679, %678 : vector<8x128xf32>
    %cst_315 = arith.constant 5.000000e-01 : f32
    %681 = vector.broadcast %cst_315 : f32 to vector<8x128xf32>
    %682 = arith.mulf %681, %680 : vector<8x128xf32>
    %683 = arith.mulf %670, %682 : vector<8x128xf32>
    %684 = arith.truncf %683 : vector<8x128xf32> to vector<8x128xbf16>
    %685 = arith.truncf %587 : vector<128x32xf32> to vector<128x32xbf16>
    %cst_316 = arith.constant dense<0.000000e+00> : vector<8x32xf32>
    %686 = tpu.matmul %684, %685, %cst_316 {dimension_numbers = #tpu.dot_dimension_numbers<[1], [0], [0], [1], [0, 0, 1, 1], [], []>} : vector<8x128xbf16>, vector<128x32xbf16>, vector<8x32xf32> -> vector<8x32xf32>
    %687 = vector.broadcast %589 : vector<1x32xf32> to vector<8x32xf32>
    %688 = arith.addf %686, %687 : vector<8x32xf32>
    %689 = arith.addf %643, %688 : vector<8x32xf32>
    %690 = vector.broadcast %555 : vector<8x1xf32> to vector<8x32xf32>
    %691 = arith.mulf %689, %690 : vector<8x32xf32>
    %c0_317 = arith.constant 0 : index
    %c0_318 = arith.constant 0 : index
    %c0_319 = arith.constant 0 : index
    %692 = vector.load %arg27[%c0_317, %c0_318, %c0_319] : memref<1x8x32xf32, #tpu.memory_space<vmem>>, vector<1x8x32xf32>
    %693 = vector.shape_cast %692 : vector<1x8x32xf32> to vector<8x32xf32>
    %694 = vector.shape_cast %691 : vector<8x32xf32> to vector<1x8x32xf32>
    tpu.vector_store %arg27[%c0_317, %c0_318, %c0_319], %694 {strides = array<i32>} : memref<1x8x32xf32, #tpu.memory_space<vmem>>, vector<1x8x32xf32>,
    %c0_320 = arith.constant 0 : index
    %c0_321 = arith.constant 0 : index
    %c0_322 = arith.constant 0 : index
    %695 = vector.load %arg28[%c0_320, %c0_321, %c0_322] : memref<1x8x1xf32, #tpu.memory_space<vmem>>, vector<1x8x1xf32>
    %696 = vector.shape_cast %695 : vector<1x8x1xf32> to vector<8x1xf32>
    %697 = vector.shape_cast %555 : vector<8x1xf32> to vector<1x8x1xf32>
    tpu.vector_store %arg28[%c0_320, %c0_321, %c0_322], %697 {strides = array<i32>} : memref<1x8x1xf32, #tpu.memory_space<vmem>>, vector<1x8x1xf32>,
    %c0_323 = arith.constant 0 : index
    %c0_324 = arith.constant 0 : index
    %698 = vector.load %arg33[%c0_323, %c0_324] : memref<64x32xf32, #tpu.memory_space<vmem>>, vector<8x32xf32>
    tpu.vector_store %arg33[%c0_323, %c0_324], %691 {strides = array<i32>} : memref<64x32xf32, #tpu.memory_space<vmem>>, vector<8x32xf32>,
    %c0_325 = arith.constant 0 : index
    %c0_326 = arith.constant 0 : index
    %699 = vector.load %arg34[%c0_325, %c0_326] : memref<64x1xf32, #tpu.memory_space<vmem>>, vector<8x1xf32>
    tpu.vector_store %arg34[%c0_325, %c0_326], %555 {strides = array<i32>} : memref<64x1xf32, #tpu.memory_space<vmem>>, vector<8x1xf32>,
    %c0_327 = arith.constant 0 : index
    %c0_328 = arith.constant 0 : index
    %700 = tpu.strided_load %arg34[%c0_327, %c0_328] {strides = array<i32: 2, 1>} : memref<64x1xf32, #tpu.memory_space<vmem>>, vector<4x1xf32>
    %c1_329 = arith.constant 1 : index
    %c0_330 = arith.constant 0 : index
    %701 = tpu.strided_load %arg34[%c1_329, %c0_330] {strides = array<i32: 2, 1>} : memref<64x1xf32, #tpu.memory_space<vmem>>, vector<4x1xf32>
    %c1_i32_331 = arith.constant 1 : i32
    %702 = tpu.dynamic_rotate %701 by %c1_i32_331 dim 0 : vector<4x1xf32>, i32 -> vector<4x1xf32>
    %703 = tpu.iota {dimensions = array<i32: 0>} : vector<4x1xi32>
    %c0_i32_332 = arith.constant 0 : i32
    %704 = vector.broadcast %c0_i32_332 : i32 to vector<4x1xi32>
    %705 = arith.cmpi eq, %703, %704 : vector<4x1xi32>
    %cst_333 = arith.constant 0.000000e+00 : f32
    %706 = vector.broadcast %cst_333 : f32 to vector<4x1xf32>
    %707 = arith.select %705, %706, %702 : vector<4x1xi1>, vector<4x1xf32>
    %708 = arith.maximumf %707, %700 : vector<4x1xf32>
    %709 = arith.maximumf %708, %701 : vector<4x1xf32>
    %c0_334 = arith.constant 0 : index
    %c0_335 = arith.constant 0 : index
    %710 = tpu.strided_load %arg33[%c0_334, %c0_335] {strides = array<i32: 2, 1>} : memref<64x32xf32, #tpu.memory_space<vmem>>, vector<4x32xf32>
    %c1_336 = arith.constant 1 : index
    %c0_337 = arith.constant 0 : index
    %711 = tpu.strided_load %arg33[%c1_336, %c0_337] {strides = array<i32: 2, 1>} : memref<64x32xf32, #tpu.memory_space<vmem>>, vector<4x32xf32>
    %c1_i32_338 = arith.constant 1 : i32
    %712 = tpu.dynamic_rotate %711 by %c1_i32_338 dim 0 : vector<4x32xf32>, i32 -> vector<4x32xf32>
    %713 = tpu.iota {dimensions = array<i32: 0>} : vector<4x1xi32>
    %c0_i32_339 = arith.constant 0 : i32
    %714 = vector.broadcast %c0_i32_339 : i32 to vector<4x1xi32>
    %715 = arith.cmpi eq, %713, %714 : vector<4x1xi32>
    %cst_340 = arith.constant -1.000000e+30 : f32
    %716 = vector.shape_cast %715 : vector<4x1xi1> to vector<4x1xi1>
    %717 = vector.broadcast %716 : vector<4x1xi1> to vector<4x32xi1>
    %718 = vector.broadcast %cst_340 : f32 to vector<4x32xf32>
    %719 = arith.select %717, %718, %712 : vector<4x32xi1>, vector<4x32xf32>
    %720 = arith.maximumf %719, %710 : vector<4x32xf32>
    %721 = arith.maximumf %720, %711 : vector<4x32xf32>
    %722 = vector.broadcast %709 : vector<4x1xf32> to vector<4x32xf32>
    %723 = arith.mulf %721, %722 : vector<4x32xf32>
    %c4 = arith.constant 4 : index
    %c0_341 = arith.constant 0 : index
    %c0_342 = arith.constant 0 : index
    %724 = vector.load %arg11[%c4, %c0_341, %c0_342] : memref<6x1x32xf32, #tpu.memory_space<vmem>>, vector<1x1x32xf32>
    %725 = vector.shape_cast %724 : vector<1x1x32xf32> to vector<1x32xf32>
    %c4_343 = arith.constant 4 : index
    %c0_344 = arith.constant 0 : index
    %c0_345 = arith.constant 0 : index
    %726 = vector.load %arg12[%c4_343, %c0_344, %c0_345] : memref<6x1x32xf32, #tpu.memory_space<vmem>>, vector<1x1x32xf32>
    %727 = vector.shape_cast %726 : vector<1x1x32xf32> to vector<1x32xf32>
    %c4_346 = arith.constant 4 : index
    %c0_347 = arith.constant 0 : index
    %c0_348 = arith.constant 0 : index
    %728 = vector.load %arg13[%c4_346, %c0_347, %c0_348] : memref<6x3x32xf32, #tpu.memory_space<vmem>>, vector<1x3x32xf32>
    %729 = vector.shape_cast %728 : vector<1x3x32xf32> to vector<3x32xf32>
    %c4_349 = arith.constant 4 : index
    %c0_350 = arith.constant 0 : index
    %c0_351 = arith.constant 0 : index
    %730 = vector.load %arg14[%c4_349, %c0_350, %c0_351] : memref<6x1x32xf32, #tpu.memory_space<vmem>>, vector<1x1x32xf32>
    %731 = vector.shape_cast %730 : vector<1x1x32xf32> to vector<1x32xf32>
    %c4_352 = arith.constant 4 : index
    %c0_353 = arith.constant 0 : index
    %c0_354 = arith.constant 0 : index
    %732 = vector.load %arg15[%c4_352, %c0_353, %c0_354] : memref<6x1x32xf32, #tpu.memory_space<vmem>>, vector<1x1x32xf32>
    %733 = vector.shape_cast %732 : vector<1x1x32xf32> to vector<1x32xf32>
    %c4_355 = arith.constant 4 : index
    %c0_356 = arith.constant 0 : index
    %c0_357 = arith.constant 0 : index
    %734 = vector.load %arg16[%c4_355, %c0_356, %c0_357] : memref<6x1x32xf32, #tpu.memory_space<vmem>>, vector<1x1x32xf32>
    %735 = vector.shape_cast %734 : vector<1x1x32xf32> to vector<1x32xf32>
    %c4_358 = arith.constant 4 : index
    %c0_359 = arith.constant 0 : index
    %c0_360 = arith.constant 0 : index
    %736 = vector.load %arg17[%c4_358, %c0_359, %c0_360] : memref<6x32x128xf32, #tpu.memory_space<vmem>>, vector<1x32x128xf32>
    %737 = vector.shape_cast %736 : vector<1x32x128xf32> to vector<32x128xf32>
    %c4_361 = arith.constant 4 : index
    %c0_362 = arith.constant 0 : index
    %c0_363 = arith.constant 0 : index
    %738 = vector.load %arg18[%c4_361, %c0_362, %c0_363] : memref<6x1x128xf32, #tpu.memory_space<vmem>>, vector<1x1x128xf32>
    %739 = vector.shape_cast %738 : vector<1x1x128xf32> to vector<1x128xf32>
    %c4_364 = arith.constant 4 : index
    %c0_365 = arith.constant 0 : index
    %c0_366 = arith.constant 0 : index
    %740 = vector.load %arg19[%c4_364, %c0_365, %c0_366] : memref<6x128x32xf32, #tpu.memory_space<vmem>>, vector<1x128x32xf32>
    %741 = vector.shape_cast %740 : vector<1x128x32xf32> to vector<128x32xf32>
    %c4_367 = arith.constant 4 : index
    %c0_368 = arith.constant 0 : index
    %c0_369 = arith.constant 0 : index
    %742 = vector.load %arg20[%c4_367, %c0_368, %c0_369] : memref<6x1x32xf32, #tpu.memory_space<vmem>>, vector<1x1x32xf32>
    %743 = vector.shape_cast %742 : vector<1x1x32xf32> to vector<1x32xf32>
    %cst_370 = arith.constant dense<0.000000e+00> : vector<4xf32>
    %744 = vector.multi_reduction <add>, %723, %cst_370 [1] : vector<4x32xf32> to vector<4xf32>
    %745 = vector.shape_cast %744 : vector<4xf32> to vector<4x1xf32>
    %cst_371 = arith.constant 3.200000e+01 : f32
    %746 = vector.broadcast %cst_371 : f32 to vector<4x1xf32>
    %747 = arith.divf %745, %746 : vector<4x1xf32>
    %748 = vector.broadcast %747 : vector<4x1xf32> to vector<4x32xf32>
    %749 = arith.subf %723, %748 : vector<4x32xf32>
    %750 = arith.mulf %749, %749 : vector<4x32xf32>
    %cst_372 = arith.constant dense<0.000000e+00> : vector<4xf32>
    %751 = vector.multi_reduction <add>, %750, %cst_372 [1] : vector<4x32xf32> to vector<4xf32>
    %752 = vector.shape_cast %751 : vector<4xf32> to vector<4x1xf32>
    %cst_373 = arith.constant 3.200000e+01 : f32
    %753 = vector.broadcast %cst_373 : f32 to vector<4x1xf32>
    %754 = arith.divf %752, %753 : vector<4x1xf32>
    %755 = vector.broadcast %747 : vector<4x1xf32> to vector<4x32xf32>
    %756 = arith.subf %723, %755 : vector<4x32xf32>
    %cst_374 = arith.constant 9.99999974E-6 : f32
    %757 = vector.broadcast %cst_374 : f32 to vector<4x1xf32>
    %758 = arith.addf %754, %757 : vector<4x1xf32>
    %759 = math.rsqrt %758 : vector<4x1xf32>
    %760 = vector.broadcast %759 : vector<4x1xf32> to vector<4x32xf32>
    %761 = arith.mulf %756, %760 : vector<4x32xf32>
    %762 = vector.broadcast %725 : vector<1x32xf32> to vector<4x32xf32>
    %763 = arith.mulf %761, %762 : vector<4x32xf32>
    %764 = vector.broadcast %727 : vector<1x32xf32> to vector<4x32xf32>
    %765 = arith.addf %763, %764 : vector<4x32xf32>
    %766 = vector.broadcast %709 : vector<4x1xf32> to vector<4x32xf32>
    %767 = arith.mulf %765, %766 : vector<4x32xf32>
    %c1_i32_375 = arith.constant 1 : i32
    %768 = tpu.dynamic_rotate %767 by %c1_i32_375 dim 0 : vector<4x32xf32>, i32 -> vector<4x32xf32>
    %769 = tpu.iota {dimensions = array<i32: 0>} : vector<4x1xi32>
    %c0_i32_376 = arith.constant 0 : i32
    %770 = vector.broadcast %c0_i32_376 : i32 to vector<4x1xi32>
    %771 = arith.cmpi eq, %769, %770 : vector<4x1xi32>
    %cst_377 = arith.constant 0.000000e+00 : f32
    %772 = vector.shape_cast %771 : vector<4x1xi1> to vector<4x1xi1>
    %773 = vector.broadcast %772 : vector<4x1xi1> to vector<4x32xi1>
    %774 = vector.broadcast %cst_377 : f32 to vector<4x32xf32>
    %775 = arith.select %773, %774, %768 : vector<4x32xi1>, vector<4x32xf32>
    %c3_i32 = arith.constant 3 : i32
    %776 = tpu.dynamic_rotate %767 by %c3_i32 dim 0 : vector<4x32xf32>, i32 -> vector<4x32xf32>
    %777 = tpu.iota {dimensions = array<i32: 0>} : vector<4x1xi32>
    %c3_i32_378 = arith.constant 3 : i32
    %778 = vector.broadcast %c3_i32_378 : i32 to vector<4x1xi32>
    %779 = arith.cmpi eq, %777, %778 : vector<4x1xi32>
    %cst_379 = arith.constant 0.000000e+00 : f32
    %780 = vector.shape_cast %779 : vector<4x1xi1> to vector<4x1xi1>
    %781 = vector.broadcast %780 : vector<4x1xi1> to vector<4x32xi1>
    %782 = vector.broadcast %cst_379 : f32 to vector<4x32xf32>
    %783 = arith.select %781, %782, %776 : vector<4x32xi1>, vector<4x32xf32>
    %784 = vector.extract_strided_slice %729 {offsets = [0, 0], sizes = [1, 32], strides = [1, 1]} : vector<3x32xf32> to vector<1x32xf32>
    %785 = vector.broadcast %784 : vector<1x32xf32> to vector<4x32xf32>
    %786 = arith.mulf %775, %785 : vector<4x32xf32>
    %787 = vector.extract_strided_slice %729 {offsets = [1, 0], sizes = [1, 32], strides = [1, 1]} : vector<3x32xf32> to vector<1x32xf32>
    %788 = vector.broadcast %787 : vector<1x32xf32> to vector<4x32xf32>
    %789 = arith.mulf %767, %788 : vector<4x32xf32>
    %790 = arith.addf %786, %789 : vector<4x32xf32>
    %791 = vector.extract_strided_slice %729 {offsets = [2, 0], sizes = [1, 32], strides = [1, 1]} : vector<3x32xf32> to vector<1x32xf32>
    %792 = vector.broadcast %791 : vector<1x32xf32> to vector<4x32xf32>
    %793 = arith.mulf %783, %792 : vector<4x32xf32>
    %794 = arith.addf %790, %793 : vector<4x32xf32>
    %795 = vector.broadcast %731 : vector<1x32xf32> to vector<4x32xf32>
    %796 = arith.addf %794, %795 : vector<4x32xf32>
    %797 = arith.addf %723, %796 : vector<4x32xf32>
    %cst_380 = arith.constant dense<0.000000e+00> : vector<4xf32>
    %798 = vector.multi_reduction <add>, %797, %cst_380 [1] : vector<4x32xf32> to vector<4xf32>
    %799 = vector.shape_cast %798 : vector<4xf32> to vector<4x1xf32>
    %cst_381 = arith.constant 3.200000e+01 : f32
    %800 = vector.broadcast %cst_381 : f32 to vector<4x1xf32>
    %801 = arith.divf %799, %800 : vector<4x1xf32>
    %802 = vector.broadcast %801 : vector<4x1xf32> to vector<4x32xf32>
    %803 = arith.subf %797, %802 : vector<4x32xf32>
    %804 = arith.mulf %803, %803 : vector<4x32xf32>
    %cst_382 = arith.constant dense<0.000000e+00> : vector<4xf32>
    %805 = vector.multi_reduction <add>, %804, %cst_382 [1] : vector<4x32xf32> to vector<4xf32>
    %806 = vector.shape_cast %805 : vector<4xf32> to vector<4x1xf32>
    %cst_383 = arith.constant 3.200000e+01 : f32
    %807 = vector.broadcast %cst_383 : f32 to vector<4x1xf32>
    %808 = arith.divf %806, %807 : vector<4x1xf32>
    %809 = vector.broadcast %801 : vector<4x1xf32> to vector<4x32xf32>
    %810 = arith.subf %797, %809 : vector<4x32xf32>
    %cst_384 = arith.constant 9.99999974E-6 : f32
    %811 = vector.broadcast %cst_384 : f32 to vector<4x1xf32>
    %812 = arith.addf %808, %811 : vector<4x1xf32>
    %813 = math.rsqrt %812 : vector<4x1xf32>
    %814 = vector.broadcast %813 : vector<4x1xf32> to vector<4x32xf32>
    %815 = arith.mulf %810, %814 : vector<4x32xf32>
    %816 = vector.broadcast %733 : vector<1x32xf32> to vector<4x32xf32>
    %817 = arith.mulf %815, %816 : vector<4x32xf32>
    %818 = vector.broadcast %735 : vector<1x32xf32> to vector<4x32xf32>
    %819 = arith.addf %817, %818 : vector<4x32xf32>
    %820 = arith.truncf %819 : vector<4x32xf32> to vector<4x32xbf16>
    %821 = arith.truncf %737 : vector<32x128xf32> to vector<32x128xbf16>
    %cst_385 = arith.constant dense<0.000000e+00> : vector<4x128xf32>
    %822 = tpu.matmul %820, %821, %cst_385 {dimension_numbers = #tpu.dot_dimension_numbers<[1], [0], [0], [1], [0, 0, 1, 1], [], []>} : vector<4x32xbf16>, vector<32x128xbf16>, vector<4x128xf32> -> vector<4x128xf32>
    %823 = vector.broadcast %739 : vector<1x128xf32> to vector<4x128xf32>
    %824 = arith.addf %822, %823 : vector<4x128xf32>
    %825 = arith.mulf %824, %824 : vector<4x128xf32>
    %826 = arith.mulf %824, %825 : vector<4x128xf32>
    %cst_386 = arith.constant 4.471500e-02 : f32
    %827 = vector.broadcast %cst_386 : f32 to vector<4x128xf32>
    %828 = arith.mulf %827, %826 : vector<4x128xf32>
    %829 = arith.addf %824, %828 : vector<4x128xf32>
    %cst_387 = arith.constant 0.797884583 : f32
    %830 = vector.broadcast %cst_387 : f32 to vector<4x128xf32>
    %831 = arith.mulf %830, %829 : vector<4x128xf32>
    %832 = math.tanh %831 : vector<4x128xf32>
    %cst_388 = arith.constant 1.000000e+00 : f32
    %833 = vector.broadcast %cst_388 : f32 to vector<4x128xf32>
    %834 = arith.addf %833, %832 : vector<4x128xf32>
    %cst_389 = arith.constant 5.000000e-01 : f32
    %835 = vector.broadcast %cst_389 : f32 to vector<4x128xf32>
    %836 = arith.mulf %835, %834 : vector<4x128xf32>
    %837 = arith.mulf %824, %836 : vector<4x128xf32>
    %838 = arith.truncf %837 : vector<4x128xf32> to vector<4x128xbf16>
    %839 = arith.truncf %741 : vector<128x32xf32> to vector<128x32xbf16>
    %cst_390 = arith.constant dense<0.000000e+00> : vector<4x32xf32>
    %840 = tpu.matmul %838, %839, %cst_390 {dimension_numbers = #tpu.dot_dimension_numbers<[1], [0], [0], [1], [0, 0, 1, 1], [], []>} : vector<4x128xbf16>, vector<128x32xbf16>, vector<4x32xf32> -> vector<4x32xf32>
    %841 = vector.broadcast %743 : vector<1x32xf32> to vector<4x32xf32>
    %842 = arith.addf %840, %841 : vector<4x32xf32>
    %843 = arith.addf %797, %842 : vector<4x32xf32>
    %844 = vector.broadcast %709 : vector<4x1xf32> to vector<4x32xf32>
    %845 = arith.mulf %843, %844 : vector<4x32xf32>
    %c0_391 = arith.constant 0 : index
    %c0_392 = arith.constant 0 : index
    %c0_393 = arith.constant 0 : index
    %846 = vector.load %arg29[%c0_391, %c0_392, %c0_393] : memref<1x4x32xf32, #tpu.memory_space<vmem>>, vector<1x4x32xf32>
    %847 = vector.shape_cast %846 : vector<1x4x32xf32> to vector<4x32xf32>
    %848 = vector.shape_cast %845 : vector<4x32xf32> to vector<1x4x32xf32>
    tpu.vector_store %arg29[%c0_391, %c0_392, %c0_393], %848 {strides = array<i32>} : memref<1x4x32xf32, #tpu.memory_space<vmem>>, vector<1x4x32xf32>,
    %c0_394 = arith.constant 0 : index
    %c0_395 = arith.constant 0 : index
    %c0_396 = arith.constant 0 : index
    %849 = vector.load %arg30[%c0_394, %c0_395, %c0_396] : memref<1x4x1xf32, #tpu.memory_space<vmem>>, vector<1x4x1xf32>
    %850 = vector.shape_cast %849 : vector<1x4x1xf32> to vector<4x1xf32>
    %851 = vector.shape_cast %709 : vector<4x1xf32> to vector<1x4x1xf32>
    tpu.vector_store %arg30[%c0_394, %c0_395, %c0_396], %851 {strides = array<i32>} : memref<1x4x1xf32, #tpu.memory_space<vmem>>, vector<1x4x1xf32>,
    %c0_397 = arith.constant 0 : index
    %c0_398 = arith.constant 0 : index
    %852 = vector.load %arg33[%c0_397, %c0_398] : memref<64x32xf32, #tpu.memory_space<vmem>>, vector<4x32xf32>
    tpu.vector_store %arg33[%c0_397, %c0_398], %845 {strides = array<i32>} : memref<64x32xf32, #tpu.memory_space<vmem>>, vector<4x32xf32>,
    %c0_399 = arith.constant 0 : index
    %c0_400 = arith.constant 0 : index
    %853 = vector.load %arg34[%c0_399, %c0_400] : memref<64x1xf32, #tpu.memory_space<vmem>>, vector<4x1xf32>
    tpu.vector_store %arg34[%c0_399, %c0_400], %709 {strides = array<i32>} : memref<64x1xf32, #tpu.memory_space<vmem>>, vector<4x1xf32>,
    %c0_401 = arith.constant 0 : index
    %c0_402 = arith.constant 0 : index
    %854 = tpu.strided_load %arg34[%c0_401, %c0_402] {strides = array<i32: 2, 1>} : memref<64x1xf32, #tpu.memory_space<vmem>>, vector<2x1xf32>
    %c1_403 = arith.constant 1 : index
    %c0_404 = arith.constant 0 : index
    %855 = tpu.strided_load %arg34[%c1_403, %c0_404] {strides = array<i32: 2, 1>} : memref<64x1xf32, #tpu.memory_space<vmem>>, vector<2x1xf32>
    %c1_i32_405 = arith.constant 1 : i32
    %856 = tpu.dynamic_rotate %855 by %c1_i32_405 dim 0 : vector<2x1xf32>, i32 -> vector<2x1xf32>
    %857 = tpu.iota {dimensions = array<i32: 0>} : vector<2x1xi32>
    %c0_i32_406 = arith.constant 0 : i32
    %858 = vector.broadcast %c0_i32_406 : i32 to vector<2x1xi32>
    %859 = arith.cmpi eq, %857, %858 : vector<2x1xi32>
    %cst_407 = arith.constant 0.000000e+00 : f32
    %860 = vector.broadcast %cst_407 : f32 to vector<2x1xf32>
    %861 = arith.select %859, %860, %856 : vector<2x1xi1>, vector<2x1xf32>
    %862 = arith.maximumf %861, %854 : vector<2x1xf32>
    %863 = arith.maximumf %862, %855 : vector<2x1xf32>
    %c0_408 = arith.constant 0 : index
    %c0_409 = arith.constant 0 : index
    %864 = tpu.strided_load %arg33[%c0_408, %c0_409] {strides = array<i32: 2, 1>} : memref<64x32xf32, #tpu.memory_space<vmem>>, vector<2x32xf32>
    %c1_410 = arith.constant 1 : index
    %c0_411 = arith.constant 0 : index
    %865 = tpu.strided_load %arg33[%c1_410, %c0_411] {strides = array<i32: 2, 1>} : memref<64x32xf32, #tpu.memory_space<vmem>>, vector<2x32xf32>
    %c1_i32_412 = arith.constant 1 : i32
    %866 = tpu.dynamic_rotate %865 by %c1_i32_412 dim 0 : vector<2x32xf32>, i32 -> vector<2x32xf32>
    %867 = tpu.iota {dimensions = array<i32: 0>} : vector<2x1xi32>
    %c0_i32_413 = arith.constant 0 : i32
    %868 = vector.broadcast %c0_i32_413 : i32 to vector<2x1xi32>
    %869 = arith.cmpi eq, %867, %868 : vector<2x1xi32>
    %cst_414 = arith.constant -1.000000e+30 : f32
    %870 = vector.shape_cast %869 : vector<2x1xi1> to vector<2x1xi1>
    %871 = vector.broadcast %870 : vector<2x1xi1> to vector<2x32xi1>
    %872 = vector.broadcast %cst_414 : f32 to vector<2x32xf32>
    %873 = arith.select %871, %872, %866 : vector<2x32xi1>, vector<2x32xf32>
    %874 = arith.maximumf %873, %864 : vector<2x32xf32>
    %875 = arith.maximumf %874, %865 : vector<2x32xf32>
    %876 = vector.broadcast %863 : vector<2x1xf32> to vector<2x32xf32>
    %877 = arith.mulf %875, %876 : vector<2x32xf32>
    %c5 = arith.constant 5 : index
    %c0_415 = arith.constant 0 : index
    %c0_416 = arith.constant 0 : index
    %878 = vector.load %arg11[%c5, %c0_415, %c0_416] : memref<6x1x32xf32, #tpu.memory_space<vmem>>, vector<1x1x32xf32>
    %879 = vector.shape_cast %878 : vector<1x1x32xf32> to vector<1x32xf32>
    %c5_417 = arith.constant 5 : index
    %c0_418 = arith.constant 0 : index
    %c0_419 = arith.constant 0 : index
    %880 = vector.load %arg12[%c5_417, %c0_418, %c0_419] : memref<6x1x32xf32, #tpu.memory_space<vmem>>, vector<1x1x32xf32>
    %881 = vector.shape_cast %880 : vector<1x1x32xf32> to vector<1x32xf32>
    %c5_420 = arith.constant 5 : index
    %c0_421 = arith.constant 0 : index
    %c0_422 = arith.constant 0 : index
    %882 = vector.load %arg13[%c5_420, %c0_421, %c0_422] : memref<6x3x32xf32, #tpu.memory_space<vmem>>, vector<1x3x32xf32>
    %883 = vector.shape_cast %882 : vector<1x3x32xf32> to vector<3x32xf32>
    %c5_423 = arith.constant 5 : index
    %c0_424 = arith.constant 0 : index
    %c0_425 = arith.constant 0 : index
    %884 = vector.load %arg14[%c5_423, %c0_424, %c0_425] : memref<6x1x32xf32, #tpu.memory_space<vmem>>, vector<1x1x32xf32>
    %885 = vector.shape_cast %884 : vector<1x1x32xf32> to vector<1x32xf32>
    %c5_426 = arith.constant 5 : index
    %c0_427 = arith.constant 0 : index
    %c0_428 = arith.constant 0 : index
    %886 = vector.load %arg15[%c5_426, %c0_427, %c0_428] : memref<6x1x32xf32, #tpu.memory_space<vmem>>, vector<1x1x32xf32>
    %887 = vector.shape_cast %886 : vector<1x1x32xf32> to vector<1x32xf32>
    %c5_429 = arith.constant 5 : index
    %c0_430 = arith.constant 0 : index
    %c0_431 = arith.constant 0 : index
    %888 = vector.load %arg16[%c5_429, %c0_430, %c0_431] : memref<6x1x32xf32, #tpu.memory_space<vmem>>, vector<1x1x32xf32>
    %889 = vector.shape_cast %888 : vector<1x1x32xf32> to vector<1x32xf32>
    %c5_432 = arith.constant 5 : index
    %c0_433 = arith.constant 0 : index
    %c0_434 = arith.constant 0 : index
    %890 = vector.load %arg17[%c5_432, %c0_433, %c0_434] : memref<6x32x128xf32, #tpu.memory_space<vmem>>, vector<1x32x128xf32>
    %891 = vector.shape_cast %890 : vector<1x32x128xf32> to vector<32x128xf32>
    %c5_435 = arith.constant 5 : index
    %c0_436 = arith.constant 0 : index
    %c0_437 = arith.constant 0 : index
    %892 = vector.load %arg18[%c5_435, %c0_436, %c0_437] : memref<6x1x128xf32, #tpu.memory_space<vmem>>, vector<1x1x128xf32>
    %893 = vector.shape_cast %892 : vector<1x1x128xf32> to vector<1x128xf32>
    %c5_438 = arith.constant 5 : index
    %c0_439 = arith.constant 0 : index
    %c0_440 = arith.constant 0 : index
    %894 = vector.load %arg19[%c5_438, %c0_439, %c0_440] : memref<6x128x32xf32, #tpu.memory_space<vmem>>, vector<1x128x32xf32>
    %895 = vector.shape_cast %894 : vector<1x128x32xf32> to vector<128x32xf32>
    %c5_441 = arith.constant 5 : index
    %c0_442 = arith.constant 0 : index
    %c0_443 = arith.constant 0 : index
    %896 = vector.load %arg20[%c5_441, %c0_442, %c0_443] : memref<6x1x32xf32, #tpu.memory_space<vmem>>, vector<1x1x32xf32>
    %897 = vector.shape_cast %896 : vector<1x1x32xf32> to vector<1x32xf32>
    %cst_444 = arith.constant dense<0.000000e+00> : vector<2xf32>
    %898 = vector.multi_reduction <add>, %877, %cst_444 [1] : vector<2x32xf32> to vector<2xf32>
    %899 = vector.shape_cast %898 : vector<2xf32> to vector<2x1xf32>
    %cst_445 = arith.constant 3.200000e+01 : f32
    %900 = vector.broadcast %cst_445 : f32 to vector<2x1xf32>
    %901 = arith.divf %899, %900 : vector<2x1xf32>
    %902 = vector.broadcast %901 : vector<2x1xf32> to vector<2x32xf32>
    %903 = arith.subf %877, %902 : vector<2x32xf32>
    %904 = arith.mulf %903, %903 : vector<2x32xf32>
    %cst_446 = arith.constant dense<0.000000e+00> : vector<2xf32>
    %905 = vector.multi_reduction <add>, %904, %cst_446 [1] : vector<2x32xf32> to vector<2xf32>
    %906 = vector.shape_cast %905 : vector<2xf32> to vector<2x1xf32>
    %cst_447 = arith.constant 3.200000e+01 : f32
    %907 = vector.broadcast %cst_447 : f32 to vector<2x1xf32>
    %908 = arith.divf %906, %907 : vector<2x1xf32>
    %909 = vector.broadcast %901 : vector<2x1xf32> to vector<2x32xf32>
    %910 = arith.subf %877, %909 : vector<2x32xf32>
    %cst_448 = arith.constant 9.99999974E-6 : f32
    %911 = vector.broadcast %cst_448 : f32 to vector<2x1xf32>
    %912 = arith.addf %908, %911 : vector<2x1xf32>
    %913 = math.rsqrt %912 : vector<2x1xf32>
    %914 = vector.broadcast %913 : vector<2x1xf32> to vector<2x32xf32>
    %915 = arith.mulf %910, %914 : vector<2x32xf32>
    %916 = vector.broadcast %879 : vector<1x32xf32> to vector<2x32xf32>
    %917 = arith.mulf %915, %916 : vector<2x32xf32>
    %918 = vector.broadcast %881 : vector<1x32xf32> to vector<2x32xf32>
    %919 = arith.addf %917, %918 : vector<2x32xf32>
    %920 = vector.broadcast %863 : vector<2x1xf32> to vector<2x32xf32>
    %921 = arith.mulf %919, %920 : vector<2x32xf32>
    %c1_i32_449 = arith.constant 1 : i32
    %922 = tpu.dynamic_rotate %921 by %c1_i32_449 dim 0 : vector<2x32xf32>, i32 -> vector<2x32xf32>
    %923 = tpu.iota {dimensions = array<i32: 0>} : vector<2x1xi32>
    %c0_i32_450 = arith.constant 0 : i32
    %924 = vector.broadcast %c0_i32_450 : i32 to vector<2x1xi32>
    %925 = arith.cmpi eq, %923, %924 : vector<2x1xi32>
    %cst_451 = arith.constant 0.000000e+00 : f32
    %926 = vector.shape_cast %925 : vector<2x1xi1> to vector<2x1xi1>
    %927 = vector.broadcast %926 : vector<2x1xi1> to vector<2x32xi1>
    %928 = vector.broadcast %cst_451 : f32 to vector<2x32xf32>
    %929 = arith.select %927, %928, %922 : vector<2x32xi1>, vector<2x32xf32>
    %c1_i32_452 = arith.constant 1 : i32
    %930 = tpu.dynamic_rotate %921 by %c1_i32_452 dim 0 : vector<2x32xf32>, i32 -> vector<2x32xf32>
    %931 = tpu.iota {dimensions = array<i32: 0>} : vector<2x1xi32>
    %c1_i32_453 = arith.constant 1 : i32
    %932 = vector.broadcast %c1_i32_453 : i32 to vector<2x1xi32>
    %933 = arith.cmpi eq, %931, %932 : vector<2x1xi32>
    %cst_454 = arith.constant 0.000000e+00 : f32
    %934 = vector.shape_cast %933 : vector<2x1xi1> to vector<2x1xi1>
    %935 = vector.broadcast %934 : vector<2x1xi1> to vector<2x32xi1>
    %936 = vector.broadcast %cst_454 : f32 to vector<2x32xf32>
    %937 = arith.select %935, %936, %930 : vector<2x32xi1>, vector<2x32xf32>
    %938 = vector.extract_strided_slice %883 {offsets = [0, 0], sizes = [1, 32], strides = [1, 1]} : vector<3x32xf32> to vector<1x32xf32>
    %939 = vector.broadcast %938 : vector<1x32xf32> to vector<2x32xf32>
    %940 = arith.mulf %929, %939 : vector<2x32xf32>
    %941 = vector.extract_strided_slice %883 {offsets = [1, 0], sizes = [1, 32], strides = [1, 1]} : vector<3x32xf32> to vector<1x32xf32>
    %942 = vector.broadcast %941 : vector<1x32xf32> to vector<2x32xf32>
    %943 = arith.mulf %921, %942 : vector<2x32xf32>
    %944 = arith.addf %940, %943 : vector<2x32xf32>
    %945 = vector.extract_strided_slice %883 {offsets = [2, 0], sizes = [1, 32], strides = [1, 1]} : vector<3x32xf32> to vector<1x32xf32>
    %946 = vector.broadcast %945 : vector<1x32xf32> to vector<2x32xf32>
    %947 = arith.mulf %937, %946 : vector<2x32xf32>
    %948 = arith.addf %944, %947 : vector<2x32xf32>
    %949 = vector.broadcast %885 : vector<1x32xf32> to vector<2x32xf32>
    %950 = arith.addf %948, %949 : vector<2x32xf32>
    %951 = arith.addf %877, %950 : vector<2x32xf32>
    %cst_455 = arith.constant dense<0.000000e+00> : vector<2xf32>
    %952 = vector.multi_reduction <add>, %951, %cst_455 [1] : vector<2x32xf32> to vector<2xf32>
    %953 = vector.shape_cast %952 : vector<2xf32> to vector<2x1xf32>
    %cst_456 = arith.constant 3.200000e+01 : f32
    %954 = vector.broadcast %cst_456 : f32 to vector<2x1xf32>
    %955 = arith.divf %953, %954 : vector<2x1xf32>
    %956 = vector.broadcast %955 : vector<2x1xf32> to vector<2x32xf32>
    %957 = arith.subf %951, %956 : vector<2x32xf32>
    %958 = arith.mulf %957, %957 : vector<2x32xf32>
    %cst_457 = arith.constant dense<0.000000e+00> : vector<2xf32>
    %959 = vector.multi_reduction <add>, %958, %cst_457 [1] : vector<2x32xf32> to vector<2xf32>
    %960 = vector.shape_cast %959 : vector<2xf32> to vector<2x1xf32>
    %cst_458 = arith.constant 3.200000e+01 : f32
    %961 = vector.broadcast %cst_458 : f32 to vector<2x1xf32>
    %962 = arith.divf %960, %961 : vector<2x1xf32>
    %963 = vector.broadcast %955 : vector<2x1xf32> to vector<2x32xf32>
    %964 = arith.subf %951, %963 : vector<2x32xf32>
    %cst_459 = arith.constant 9.99999974E-6 : f32
    %965 = vector.broadcast %cst_459 : f32 to vector<2x1xf32>
    %966 = arith.addf %962, %965 : vector<2x1xf32>
    %967 = math.rsqrt %966 : vector<2x1xf32>
    %968 = vector.broadcast %967 : vector<2x1xf32> to vector<2x32xf32>
    %969 = arith.mulf %964, %968 : vector<2x32xf32>
    %970 = vector.broadcast %887 : vector<1x32xf32> to vector<2x32xf32>
    %971 = arith.mulf %969, %970 : vector<2x32xf32>
    %972 = vector.broadcast %889 : vector<1x32xf32> to vector<2x32xf32>
    %973 = arith.addf %971, %972 : vector<2x32xf32>
    %974 = arith.truncf %973 : vector<2x32xf32> to vector<2x32xbf16>
    %975 = arith.truncf %891 : vector<32x128xf32> to vector<32x128xbf16>
    %cst_460 = arith.constant dense<0.000000e+00> : vector<2x128xf32>
    %976 = tpu.matmul %974, %975, %cst_460 {dimension_numbers = #tpu.dot_dimension_numbers<[1], [0], [0], [1], [0, 0, 1, 1], [], []>} : vector<2x32xbf16>, vector<32x128xbf16>, vector<2x128xf32> -> vector<2x128xf32>
    %977 = vector.broadcast %893 : vector<1x128xf32> to vector<2x128xf32>
    %978 = arith.addf %976, %977 : vector<2x128xf32>
    %979 = arith.mulf %978, %978 : vector<2x128xf32>
    %980 = arith.mulf %978, %979 : vector<2x128xf32>
    %cst_461 = arith.constant 4.471500e-02 : f32
    %981 = vector.broadcast %cst_461 : f32 to vector<2x128xf32>
    %982 = arith.mulf %981, %980 : vector<2x128xf32>
    %983 = arith.addf %978, %982 : vector<2x128xf32>
    %cst_462 = arith.constant 0.797884583 : f32
    %984 = vector.broadcast %cst_462 : f32 to vector<2x128xf32>
    %985 = arith.mulf %984, %983 : vector<2x128xf32>
    %986 = math.tanh %985 : vector<2x128xf32>
    %cst_463 = arith.constant 1.000000e+00 : f32
    %987 = vector.broadcast %cst_463 : f32 to vector<2x128xf32>
    %988 = arith.addf %987, %986 : vector<2x128xf32>
    %cst_464 = arith.constant 5.000000e-01 : f32
    %989 = vector.broadcast %cst_464 : f32 to vector<2x128xf32>
    %990 = arith.mulf %989, %988 : vector<2x128xf32>
    %991 = arith.mulf %978, %990 : vector<2x128xf32>
    %992 = arith.truncf %991 : vector<2x128xf32> to vector<2x128xbf16>
    %993 = arith.truncf %895 : vector<128x32xf32> to vector<128x32xbf16>
    %cst_465 = arith.constant dense<0.000000e+00> : vector<2x32xf32>
    %994 = tpu.matmul %992, %993, %cst_465 {dimension_numbers = #tpu.dot_dimension_numbers<[1], [0], [0], [1], [0, 0, 1, 1], [], []>} : vector<2x128xbf16>, vector<128x32xbf16>, vector<2x32xf32> -> vector<2x32xf32>
    %995 = vector.broadcast %897 : vector<1x32xf32> to vector<2x32xf32>
    %996 = arith.addf %994, %995 : vector<2x32xf32>
    %997 = arith.addf %951, %996 : vector<2x32xf32>
    %998 = vector.broadcast %863 : vector<2x1xf32> to vector<2x32xf32>
    %999 = arith.mulf %997, %998 : vector<2x32xf32>
    %c0_466 = arith.constant 0 : index
    %c0_467 = arith.constant 0 : index
    %c0_468 = arith.constant 0 : index
    %1000 = vector.load %arg31[%c0_466, %c0_467, %c0_468] : memref<1x2x32xf32, #tpu.memory_space<vmem>>, vector<1x2x32xf32>
    %1001 = vector.shape_cast %1000 : vector<1x2x32xf32> to vector<2x32xf32>
    %1002 = vector.shape_cast %999 : vector<2x32xf32> to vector<1x2x32xf32>
    tpu.vector_store %arg31[%c0_466, %c0_467, %c0_468], %1002 {strides = array<i32>} : memref<1x2x32xf32, #tpu.memory_space<vmem>>, vector<1x2x32xf32>,
    %c0_469 = arith.constant 0 : index
    %c0_470 = arith.constant 0 : index
    %c0_471 = arith.constant 0 : index
    %1003 = vector.load %arg32[%c0_469, %c0_470, %c0_471] : memref<1x2x1xf32, #tpu.memory_space<vmem>>, vector<1x2x1xf32>
    %1004 = vector.shape_cast %1003 : vector<1x2x1xf32> to vector<2x1xf32>
    %1005 = vector.shape_cast %863 : vector<2x1xf32> to vector<1x2x1xf32>
    tpu.vector_store %arg32[%c0_469, %c0_470, %c0_471], %1005 {strides = array<i32>} : memref<1x2x1xf32, #tpu.memory_space<vmem>>, vector<1x2x1xf32>,
    return
  }
  func.func @transform_0(%arg0: i32) -> (i32, i32, i32) {
    %c0_i32 = arith.constant 0 : i32
    %c0_i32_0 = arith.constant 0 : i32
    %c0_i32_1 = arith.constant 0 : i32
    return %arg0, %c0_i32, %c0_i32_0 : i32, i32, i32
  }
  func.func @transform_1(%arg0: i32) -> (i32, i32, i32) {
    %c0_i32 = arith.constant 0 : i32
    %c0_i32_0 = arith.constant 0 : i32
    %c0_i32_1 = arith.constant 0 : i32
    return %arg0, %c0_i32, %c0_i32_0 : i32, i32, i32
  }
  func.func @transform_2(%arg0: i32) -> (i32, i32) {
    %c0_i32 = arith.constant 0 : i32
    %c0_i32_0 = arith.constant 0 : i32
    %c0_i32_1 = arith.constant 0 : i32
    return %c0_i32, %c0_i32_0 : i32, i32
  }
  func.func @transform_3(%arg0: i32) -> (i32, i32) {
    %c0_i32 = arith.constant 0 : i32
    %c0_i32_0 = arith.constant 0 : i32
    %c0_i32_1 = arith.constant 0 : i32
    return %c0_i32, %c0_i32_0 : i32, i32
  }
  func.func @transform_4(%arg0: i32) -> (i32, i32) {
    %c0_i32 = arith.constant 0 : i32
    %c0_i32_0 = arith.constant 0 : i32
    %c0_i32_1 = arith.constant 0 : i32
    return %c0_i32, %c0_i32_0 : i32, i32
  }
  func.func @transform_5(%arg0: i32) -> (i32, i32) {
    %c0_i32 = arith.constant 0 : i32
    %c0_i32_0 = arith.constant 0 : i32
    %c0_i32_1 = arith.constant 0 : i32
    return %c0_i32, %c0_i32_0 : i32, i32
  }
  func.func @transform_6(%arg0: i32) -> (i32, i32) {
    %c0_i32 = arith.constant 0 : i32
    %c0_i32_0 = arith.constant 0 : i32
    %c0_i32_1 = arith.constant 0 : i32
    return %c0_i32, %c0_i32_0 : i32, i32
  }
  func.func @transform_7(%arg0: i32) -> (i32, i32) {
    %c0_i32 = arith.constant 0 : i32
    %c0_i32_0 = arith.constant 0 : i32
    %c0_i32_1 = arith.constant 0 : i32
    return %c0_i32, %c0_i32_0 : i32, i32
  }
  func.func @transform_8(%arg0: i32) -> (i32, i32) {
    %c0_i32 = arith.constant 0 : i32
    %c0_i32_0 = arith.constant 0 : i32
    %c0_i32_1 = arith.constant 0 : i32
    return %c0_i32, %c0_i32_0 : i32, i32
  }
  func.func @transform_9(%arg0: i32) -> (i32, i32) {
    %c0_i32 = arith.constant 0 : i32
    %c0_i32_0 = arith.constant 0 : i32
    %c0_i32_1 = arith.constant 0 : i32
    return %c0_i32, %c0_i32_0 : i32, i32
  }
  func.func @transform_10(%arg0: i32) -> (i32, i32, i32) {
    %c0_i32 = arith.constant 0 : i32
    %c0_i32_0 = arith.constant 0 : i32
    %c0_i32_1 = arith.constant 0 : i32
    %c0_i32_2 = arith.constant 0 : i32
    return %c0_i32, %c0_i32_0, %c0_i32_1 : i32, i32, i32
  }
  func.func @transform_11(%arg0: i32) -> (i32, i32, i32) {
    %c0_i32 = arith.constant 0 : i32
    %c0_i32_0 = arith.constant 0 : i32
    %c0_i32_1 = arith.constant 0 : i32
    %c0_i32_2 = arith.constant 0 : i32
    return %c0_i32, %c0_i32_0, %c0_i32_1 : i32, i32, i32
  }
  func.func @transform_12(%arg0: i32) -> (i32, i32, i32) {
    %c0_i32 = arith.constant 0 : i32
    %c0_i32_0 = arith.constant 0 : i32
    %c0_i32_1 = arith.constant 0 : i32
    %c0_i32_2 = arith.constant 0 : i32
    return %c0_i32, %c0_i32_0, %c0_i32_1 : i32, i32, i32
  }
  func.func @transform_13(%arg0: i32) -> (i32, i32, i32) {
    %c0_i32 = arith.constant 0 : i32
    %c0_i32_0 = arith.constant 0 : i32
    %c0_i32_1 = arith.constant 0 : i32
    %c0_i32_2 = arith.constant 0 : i32
    return %c0_i32, %c0_i32_0, %c0_i32_1 : i32, i32, i32
  }
  func.func @transform_14(%arg0: i32) -> (i32, i32, i32) {
    %c0_i32 = arith.constant 0 : i32
    %c0_i32_0 = arith.constant 0 : i32
    %c0_i32_1 = arith.constant 0 : i32
    %c0_i32_2 = arith.constant 0 : i32
    return %c0_i32, %c0_i32_0, %c0_i32_1 : i32, i32, i32
  }
  func.func @transform_15(%arg0: i32) -> (i32, i32, i32) {
    %c0_i32 = arith.constant 0 : i32
    %c0_i32_0 = arith.constant 0 : i32
    %c0_i32_1 = arith.constant 0 : i32
    %c0_i32_2 = arith.constant 0 : i32
    return %c0_i32, %c0_i32_0, %c0_i32_1 : i32, i32, i32
  }
  func.func @transform_16(%arg0: i32) -> (i32, i32, i32) {
    %c0_i32 = arith.constant 0 : i32
    %c0_i32_0 = arith.constant 0 : i32
    %c0_i32_1 = arith.constant 0 : i32
    %c0_i32_2 = arith.constant 0 : i32
    return %c0_i32, %c0_i32_0, %c0_i32_1 : i32, i32, i32
  }
  func.func @transform_17(%arg0: i32) -> (i32, i32, i32) {
    %c0_i32 = arith.constant 0 : i32
    %c0_i32_0 = arith.constant 0 : i32
    %c0_i32_1 = arith.constant 0 : i32
    %c0_i32_2 = arith.constant 0 : i32
    return %c0_i32, %c0_i32_0, %c0_i32_1 : i32, i32, i32
  }
  func.func @transform_18(%arg0: i32) -> (i32, i32, i32) {
    %c0_i32 = arith.constant 0 : i32
    %c0_i32_0 = arith.constant 0 : i32
    %c0_i32_1 = arith.constant 0 : i32
    %c0_i32_2 = arith.constant 0 : i32
    return %c0_i32, %c0_i32_0, %c0_i32_1 : i32, i32, i32
  }
  func.func @transform_19(%arg0: i32) -> (i32, i32, i32) {
    %c0_i32 = arith.constant 0 : i32
    %c0_i32_0 = arith.constant 0 : i32
    %c0_i32_1 = arith.constant 0 : i32
    %c0_i32_2 = arith.constant 0 : i32
    return %c0_i32, %c0_i32_0, %c0_i32_1 : i32, i32, i32
  }
  func.func @transform_20(%arg0: i32) -> (i32, i32, i32) {
    %c0_i32 = arith.constant 0 : i32
    %c0_i32_0 = arith.constant 0 : i32
    %c0_i32_1 = arith.constant 0 : i32
    return %arg0, %c0_i32, %c0_i32_0 : i32, i32, i32
  }
  func.func @transform_21(%arg0: i32) -> (i32, i32, i32) {
    %c0_i32 = arith.constant 0 : i32
    %c0_i32_0 = arith.constant 0 : i32
    %c0_i32_1 = arith.constant 0 : i32
    return %arg0, %c0_i32, %c0_i32_0 : i32, i32, i32
  }
  func.func @transform_22(%arg0: i32) -> (i32, i32, i32) {
    %c0_i32 = arith.constant 0 : i32
    %c0_i32_0 = arith.constant 0 : i32
    %c0_i32_1 = arith.constant 0 : i32
    return %arg0, %c0_i32, %c0_i32_0 : i32, i32, i32
  }
  func.func @transform_23(%arg0: i32) -> (i32, i32, i32) {
    %c0_i32 = arith.constant 0 : i32
    %c0_i32_0 = arith.constant 0 : i32
    %c0_i32_1 = arith.constant 0 : i32
    return %arg0, %c0_i32, %c0_i32_0 : i32, i32, i32
  }
  func.func @transform_24(%arg0: i32) -> (i32, i32, i32) {
    %c0_i32 = arith.constant 0 : i32
    %c0_i32_0 = arith.constant 0 : i32
    %c0_i32_1 = arith.constant 0 : i32
    return %arg0, %c0_i32, %c0_i32_0 : i32, i32, i32
  }
  func.func @transform_25(%arg0: i32) -> (i32, i32, i32) {
    %c0_i32 = arith.constant 0 : i32
    %c0_i32_0 = arith.constant 0 : i32
    %c0_i32_1 = arith.constant 0 : i32
    return %arg0, %c0_i32, %c0_i32_0 : i32, i32, i32
  }
  func.func @transform_26(%arg0: i32) -> (i32, i32, i32) {
    %c0_i32 = arith.constant 0 : i32
    %c0_i32_0 = arith.constant 0 : i32
    %c0_i32_1 = arith.constant 0 : i32
    return %arg0, %c0_i32, %c0_i32_0 : i32, i32, i32
  }
  func.func @transform_27(%arg0: i32) -> (i32, i32, i32) {
    %c0_i32 = arith.constant 0 : i32
    %c0_i32_0 = arith.constant 0 : i32
    %c0_i32_1 = arith.constant 0 : i32
    return %arg0, %c0_i32, %c0_i32_0 : i32, i32, i32
  }
  func.func @transform_28(%arg0: i32) -> (i32, i32, i32) {
    %c0_i32 = arith.constant 0 : i32
    %c0_i32_0 = arith.constant 0 : i32
    %c0_i32_1 = arith.constant 0 : i32
    return %arg0, %c0_i32, %c0_i32_0 : i32, i32, i32
  }
  func.func @transform_29(%arg0: i32) -> (i32, i32, i32) {
    %c0_i32 = arith.constant 0 : i32
    %c0_i32_0 = arith.constant 0 : i32
    %c0_i32_1 = arith.constant 0 : i32
    return %arg0, %c0_i32, %c0_i32_0 : i32, i32, i32
  }
  func.func @transform_30(%arg0: i32) -> (i32, i32, i32) {
    %c0_i32 = arith.constant 0 : i32
    %c0_i32_0 = arith.constant 0 : i32
    %c0_i32_1 = arith.constant 0 : i32
    return %arg0, %c0_i32, %c0_i32_0 : i32, i32, i32
  }
  func.func @transform_31(%arg0: i32) -> (i32, i32, i32) {
    %c0_i32 = arith.constant 0 : i32
    %c0_i32_0 = arith.constant 0 : i32
    %c0_i32_1 = arith.constant 0 : i32
    return %arg0, %c0_i32, %c0_i32_0 : i32, i32, i32
  }
}

</mosaic_0001>

<bundles_post_ra>
// kernel: mlp_pyramid_proj_forward.1
= control target key start
LH: loop header
LB: loop body
LE: loop exit
PB: predicated region body
PF: predicated region fallthrough
CT: control target
= control target key end

     0   :  { %s5969_s6 = smov 1   ;;  %s5970_s10 = smov 2   ;;  %s7713_s0 = inlined_call_operand.smem [shape: u32[32], index: -1, kind: input, shape index: {}] }
   0x1   :  { %s6020_s5 = sld [smem:[%s7713_s0]]   ;;  %s5971_s14 = smov 3  }
   0x2   :  { %s6025_s9 = sld [smem:[%s7713_s0 + %s5969_s6]]   ;;  %s5972_s18 = smov 4  }
   0x3   :  { %s6030_s13 = sld [smem:[%s7713_s0 + %s5970_s10]]   ;;  %s5973_s22 = smov 5  }
   0x4   :  { %s6035_s17 = sld [smem:[%s7713_s0 + %s5971_s14]]   ;;  %s5974_s26 = smov 6  }
   0x5   :  { %s6040_s21 = sld [smem:[%s7713_s0 + %s5972_s18]]   ;;  %s5975_s30 = smov 7  }
   0x6   :  { %s6045_s25 = sld [smem:[%s7713_s0 + %s5973_s22]]   ;;  %s5976_s4 = smov 8  }
   0x7   :  { %7738 = sst [smem:[#allocation14_spill]] %s6020_s5  ;;  %s5977_s10 = smov 9  }
   0x8   :  { %7739 = sst [smem:[#allocation15_spill]] %s6025_s9  ;;  %s5978_s15 = smov 10  }
   0x9   :  { %7740 = sst [smem:[#allocation16_spill]] %s6030_s13  ;;  %s5979_s20 = smov 11  }
   0xa   :  { %7741 = sst [smem:[#allocation17_spill]] %s6035_s17  ;;  %s5981_s1 = smov 13  }
   0xb   :  { %7742 = sst [smem:[#allocation18_spill]] %s6040_s21  ;;  %s5982_s7 = smov 14  }
   0xc   :  { %s6050_s29 = sld [smem:[%s7713_s0 + %s5974_s26]]   ;;  %s5980_s26 = smov 12  }
   0xd   :  { %s6055_s3 = sld [smem:[%s7713_s0 + %s5975_s30]]   ;;  %s5984_s22 = smov 16  }
   0xe   :  { %s6060_s8 = sld [smem:[%s7713_s0 + %s5976_s4]]   ;;  %s5985_s28 = smov 17  }
   0xf   :  { %s6065_s14 = sld [smem:[%s7713_s0 + %s5977_s10]]  }
  0x10   :  { %s6070_s19 = sld [smem:[%s7713_s0 + %s5978_s15]]   ;;  %s5983_s15 = smov 15  }
  0x11   :  { %s6075_s24 = sld [smem:[%s7713_s0 + %s5979_s20]]  }
  0x12   :  { %s6080_s30 = sld [smem:[%s7713_s0 + %s5980_s26]]  }
  0x13   :  { %7743 = sst [smem:[#allocation19_spill]] %s6055_s3 }
  0x14   :  { %7744 = sst [smem:[#allocation20_spill]] %s6060_s8 }
  0x15   :  { %7745 = sst [smem:[#allocation21_spill]] %s6065_s14 }
  0x16   :  { %7746 = sst [smem:[#allocation22_spill]] %s6070_s19 }
  0x17   :  { %7747 = sst [smem:[#allocation23_spill]] %s6075_s24 }
  0x18   :  { %s6085_s6 = sld [smem:[%s7713_s0 + %s5981_s1]]  }
  0x19   :  { %s6090_s12 = sld [smem:[%s7713_s0 + %s5982_s7]]   ;;  %s5986_s7 = smov 18  }
  0x1a   :  { %s6095_s20 = sld [smem:[%s7713_s0 + %s5983_s15]]   ;;  %s5987_s15 = smov 19  }
  0x1b   :  { %s6100_s27 = sld [smem:[%s7713_s0 + %s5984_s22]]   ;;  %s5988_s22 = smov 20  }
  0x1c   :  { %s6105_s4 = sld [smem:[%s7713_s0 + %s5985_s28]]   ;;  %s5989_s28 = smov 21  }
  0x1e   :  { %7748 = sst [smem:[#allocation24_spill]] %s6085_s6 }
  0x1f   :  { %7749 = sst [smem:[#allocation25_spill]] %s6090_s12 }
  0x20   :  { %7750 = sst [smem:[#allocation26_spill]] %s6095_s20 }
  0x21   :  { %7751 = sst [smem:[#allocation27_spill]] %s6100_s27 }
  0x22   :  { %7752 = sst [smem:[#allocation28_spill]] %s6105_s4 }
  0x23   :  { %s6110_s12 = sld [smem:[%s7713_s0 + %s5986_s7]]   ;;  %s5990_s7 = smov 22  }
  0x24   :  { %s6115_s20 = sld [smem:[%s7713_s0 + %s5987_s15]]   ;;  %s5991_s15 = smov 23  }
  0x25   :  { %s6120_s27 = sld [smem:[%s7713_s0 + %s5988_s22]]   ;;  %s5992_s22 = smov 24  }
  0x26   :  { %s6125_s4 = sld [smem:[%s7713_s0 + %s5989_s28]]   ;;  %s5993_s28 = smov 25  }
  0x27   :  { %s6145_s6 = sld [smem:[%s7713_s0 + %s5993_s28]]   ;;  %s5997_s28 = smov 29  }
  0x29   :  { %7753 = sst [smem:[#allocation29_spill]] %s6110_s12 }
  0x2a   :  { %7754 = sst [smem:[#allocation30_spill]] %s6115_s20 }
  0x2b   :  { %7755 = sst [smem:[#allocation31_spill]] %s6120_s27 }
  0x2c   :  { %7756 = sst [smem:[#allocation32_spill]] %s6125_s4 }
  0x2d   :  { %s6130_s12 = sld [smem:[%s7713_s0 + %s5990_s7]]   ;;  %s5994_s7 = smov 26  }
  0x2e   :  { %s6135_s20 = sld [smem:[%s7713_s0 + %s5991_s15]]   ;;  %s5995_s15 = smov 27  }
  0x2f   :  { %s6140_s27 = sld [smem:[%s7713_s0 + %s5992_s22]]   ;;  %s5996_s22 = smov 28  }
  0x30   :  { %7760 = sst [smem:[#allocation36_spill]] %s6145_s6 }
  0x31   :  { %s6165_s6 = sld [smem:[%s7713_s0 + %s5997_s28]]  }
  0x33   :  { %7757 = sst [smem:[#allocation33_spill]] %s6130_s12 }
  0x34   :  { %7758 = sst [smem:[#allocation34_spill]] %s6135_s20 }
  0x35   :  { %7759 = sst [smem:[#allocation35_spill]] %s6140_s27 }
  0x36   :  { %s6150_s12 = sld [smem:[%s7713_s0 + %s5994_s7]]   ;;  %s5998_s7 = smov 30  }
  0x37   :  { %s6155_s20 = sld [smem:[%s7713_s0 + %s5995_s15]]   ;;  %s5999_s15 = smov 31  }
  0x38   :  { %s6160_s27 = sld [smem:[%s7713_s0 + %s5996_s22]]  }
  0x39   :  { %7763 = sst [smem:[#allocation39_spill]] %s6165_s6 }
  0x3c   :  { %7761 = sst [smem:[#allocation37_spill]] %s6150_s12 }
  0x3d   :  { %7762 = sst [smem:[#allocation38_spill]] %s6155_s20 }
  0x3e   :  { %s6170_s12 = sld [smem:[%s7713_s0 + %s5998_s7]]  }
  0x3f   :  { %s6175_s20 = sld [smem:[%s7713_s0 + %s5999_s15]]  }
  0x45   :  { %7764 = sst [smem:[#allocation40_spill]] %s6175_s20 }
  0x46   :  { %69 = vsyncpa [#allocation5], 0 }
  0x47   :  { %71 = vsyncpa [#allocation5 + $0x1], 0 }
  0x48   :  { %72 = vsyncpa [#allocation7], 0 }
  0x49   :  { %74 = vsyncpa [#allocation7 + $0x1], 0 }
  0x4a   :  { %75 = vsyncpa [#allocation10], 0 }
  0x4b   :  { %77 = vsyncpa [#allocation10 + $0x1], 0  ;;  %s6177_s22 = smov 0   ;;  %s6179_s23 = smov 0  }
  0x4c   :  { %s6181_s26 = smov 0   ;;  %s6183_s28 = smov 0  }
  0x4d LB: > { %s7765_s24 = sld [smem:[#allocation23_spill]]  ;;  %s6198_s0 = sadd.s32 4294967295, %s5967_s28   ;;  %s5963_s26 = sphi %s6181_s26, %s7799_s26   ;;  %s5959_s23 = sphi %s6179_s23, %s7798_s23   ;;  %s5955_s22 = sphi %s6177_s22, %s7797_s22   ;;  %s5967_s28 = sphi %s6183_s28, %s7800_s28  }
  0x4e   : > { %s7766_s19 = sld [smem:[#allocation22_spill]]  ;;  %s7723_s1 = sadd.s32 4294967294, %s5967_s28  }
  0x4f   : > { %s7767_s13 = sld [smem:[#allocation16_spill]]  ;;  %s6202_s2 = sadd.s32 1, %s5967_s28  }
  0x50   : > { %s624_s7 = sadd.s32 1, %s5963_s26  ;;  %s621_s10 = ssub.s32 %s5967_s28, %s6202_s2 }
  0x51   : > { %p634_p0 = scmp.ne.s32.totalorder %s5963_s26, %s5959_s23  ;;  %p622_p1 = scmp.eq.s32.totalorder %s621_s10, 0 }
  0x52   : > { %p635_p2 = scmp.eq.s32.totalorder %s6198_s0, 1  ;;  %p640_p3 = scmp.ne.s32.totalorder %s5959_s23, %s5955_s22 }
  0x53   : > { %p641_p4 = scmp.eq.s32.totalorder %s7723_s1, 1  ;;  %p4958_p7 = scmp.ge.s32.totalorder %s5967_s28, 1 }
  0x54   : > { %s6215_s11 = scalar_select %p622_p1, %s5963_s26, %s624_s7  }
  0x55   : > { %p6217_p5 = por %p635_p2, %p634_p0  ;;  %p6221_p6 = por %p641_p4, %p640_p3 }
  0x56   : > { %p911_p8 = scmp.lt.s32.totalorder %s5967_s28, 3 }
  0x58   : > { %p912_p9 = pnand %p4958_p7, %p911_p8 }
  0x59   : > { %s7770_s5 = sld [smem:[#allocation14_spill]] (!%p912_p9)  ;;  %p1048_p10 = scmp.lt.s32.totalorder (!%p912_p9), %s6198_s0, 1 }
  0x5a   : > { %915 = sbr.rel (%p912_p9) target bundleno = 7929 (0x1ef9), region = 100  ;;  %s7724_s1 = smov (!%p912_p9), 16  }
  0x5b   : > { %s7772_s9 = sld [smem:[#allocation15_spill]] (!%p912_p9) }
  0x5c   : > { %s7773_s4 = sld [smem:[#allocation32_spill]] (!%p912_p9) }
  0x5d   : > { %s7774_s17 = sld [smem:[#allocation17_spill]] (!%p912_p9) }
  0x5e   : > { %s7775_s21 = sld [smem:[#allocation18_spill]] (!%p912_p9) }
  0x5f   : > { %v1129_v0 = vlaneseq  ;;  %v1116_v1 = vld [vmem:[%s7767_s13 + $0x20] sm:$0xff]  ;;  %v1117_v2 = vld [vmem:[%s7767_s13 + $0x28] sm:$0xff]  ;;  %v1114_v3 = vld [vmem:[%s7767_s13 + $0x10] sm:$0xff]  ;;  %s6233_s18 = scalar_select %p1048_p10, %s6198_s0, 1  ;;  %vm2666_vm3 = vcmask 7168   ;;  %v6002_v60 = vmov 0  }
  0x60   : > { %v1316_v4 = vpack.c.bf16 %v1117_v2, %v1116_v1  ;;  %v1115_v5 = vld [vmem:[%s7767_s13 + $0x18] sm:$0xff]  ;;  %v1112_v8 = vld [vmem:[%s7767_s13] sm:$0xff]  ;;  %v1113_v9 = vld [vmem:[%s7767_s13 + $0x8] sm:$0xff]  ;;  %5646 = vset.pattern.permute.xlu1 %v6002_v60  ;;  %5645 = vset.pattern.permute.xlu0 %v6002_v60  ;;  %vm1292_vm5 = vcmask 130048   ;;  %vm1301_vm6 = vcmask 261120   ;;  %vm1323_vm7 = vcmask 392192  }
  0x61   : > { %v6235_v6 = vshrl.u32 %v1129_v0, 7  ;;  %v1315_v7 = vpack.c.bf16 %v1115_v5, %v1114_v3  ;;  %s6240_s7 = sshll.u32 %s6233_s18, 6  ;;  %v1314_v10 = vpack.c.bf16 %v1113_v9, %v1112_v8  ;;  %vm1725_vm8 = vcmask 523264   ;;  %s7776_s3 = sld [smem:[#allocation19_spill]] }
  0x62   : > { %5302 = vmatprep.subr.bf16.mxu0 %v1316_v4  ;;  %s6244_s10 = scalar_lea.vmem %s7770_s5, %s6240_s7  ;;  %s1057_s5 = scalar_lea.vmem %s7772_s9, %s6240_s7  ;;  %vm1750_vm9 = vcmask 785408   ;;  %vm6005_vm12 = vmmov 0   ;;  %vm3863_vm14 = vcmask 1047556   ;;  %vm4144_vm15 = vcmask 3072  }
  0x63   : > { %5303 = vmatpush3.bf16.msra.mxu0 %v1316_v4  ;;  %v1096_v11 = vld [vmem:[%s6244_s10] sm:$0xff]  ;;  %v1097_v12 = vld [vmem:[%s6244_s10 + $0x8] sm:$0xff]  ;;  %v1098_v13 = vld [vmem:[%s6244_s10 + $0x10] sm:$0xff]  ;;  %vm1187_vm0 = vcmp.lt.s32.totalorder %v6235_v6, 7  ;;  %v6254_v20 = vadd.s32 56, %v6235_v6  ;;  %vm1131_vm1 = vcmp.lt.s32.totalorder %v6235_v6, 1  ;;  %s6318_s13 = scalar_lea.vmem %s7773_s4, %s6240_s7 }
  0x64   : > { %5304 = vmatprep.subr.bf16.mxu0 %v1315_v7  ;;  %v1122_v14 = vrot.slane %v1097_v12, 7  ;;  %v1180_v15 = vrot.slane %v1097_v12, 1  ;;  %v5605_v16 = vpack.i.bf16 %v1097_v12, %v1096_v11  ;;  %v1099_v17 = vld [vmem:[%s6244_s10 + $0x18] sm:$0xff]  ;;  %v1100_v18 = vld [vmem:[%s6244_s10 + $0x20] sm:$0xff]  ;;  %v1101_v19 = vld [vmem:[%s6244_s10 + $0x28] sm:$0xff]  ;;  %v1179_v21 = vrot.slane %v1096_v11, 1 }
  0x65   : > { %v1123_v22 = vrot.slane %v1098_v13, 7  ;;  %v1181_v23 = vrot.slane %v1098_v13, 1  ;;  %v1124_v24 = vrot.slane %v1099_v17, 7  ;;  %v1182_v25 = vrot.slane %v1099_v17, 1  ;;  %v6258_v29 = vld [vmem:[%s6244_s10 + $0x38] sm:$0xff]  ;;  %v1102_v34 = vld [vmem:[%s6244_s10 + $0x30] sm:$0xff] }
  0x66   : > { %5606 = vrot.lane.b32.xlu0 %v5605_v16, %s7724_s1  ;;  %v5610_v26 = vpack.i.bf16 %v1099_v17, %v1098_v13  ;;  %v1125_v27 = vrot.slane %v1100_v18, 7  ;;  %v1183_v28 = vrot.slane %v1100_v18, 1  ;;  %v1194_v31 = vsel %vm1187_vm0, %v1179_v21, %v1180_v15  ;;  %s6001_s1 = smov 32   ;;  %s7771_s10 = smov 16   ;;  %v1105_v61 = vld [vmem:[%s1057_s5 + $0x8] sm:$0xff]  ;;  %v1104_v62 = vld [vmem:[%s1057_s5] sm:$0xff] }
  0x67   : > { %5305 = vmatpush3.bf16.msra.mxu0 %v1315_v7  ;;  %v1193_v30 = vsel %vm1187_vm0, %v1180_v15, %v1181_v23  ;;  %v1126_v32 = vrot.slane %v1101_v19, 7  ;;  %v1184_v33 = vrot.slane %v1101_v19, 1  ;;  %v1121_v35 = vrot.slane %v1096_v11, 7  ;;  %v1106_v63 = vld [vmem:[%s1057_s5 + $0x10] sm:$0xff]  ;;  %2668 = vst.msk [vmem:[%s6318_s13 + $0x8] sm:$0xff] %vm2666_vm3, %v1105_v61  ;;  %2684 = vst.msk [vmem:[#allocation3 + $0x8] sm:$0xff] %vm2666_vm3, %v1105_v61 }
  0x68   : > { %5306 = vmatprep.subr.bf16.mxu0 %v1314_v10  ;;  %v5620_v36 = vpack.i.bf16 %v1193_v30, %v1194_v31  ;;  %v1191_v37 = vsel %vm1187_vm0, %v1182_v25, %v1183_v28  ;;  %v1192_v38 = vsel %vm1187_vm0, %v1181_v23, %v1182_v25  ;;  %v5615_v39 = vpack.i.bf16 %v1101_v19, %v1100_v18  ;;  %v1107_v0 = vld [vmem:[%s1057_s5 + $0x18] sm:$0xff]  ;;  %v1108_v1 = vld [vmem:[%s1057_s5 + $0x20] sm:$0xff]  ;;  %v1109_v2 = vld [vmem:[%s1057_s5 + $0x28] sm:$0xff]  ;;  %s7777_s8 = sld [smem:[#allocation20_spill]] }
  0x69   : > { %v1128_v40 = vrot.slane %v6258_v29, 7  ;;  %v1186_v41 = vrot.slane %v6258_v29, 1  ;;  %v5625_v42 = vpack.i.bf16 %v1191_v37, %v1192_v38  ;;  %v1127_v43 = vrot.slane %v1102_v34, 7  ;;  %2667 = vst.msk [vmem:[%s6318_s13] sm:$0xff] %vm2666_vm3, %v1104_v62  ;;  %2683 = vst.msk [vmem:[#allocation3] sm:$0xff] %vm2666_vm3, %v1104_v62  ;;  %v1110_v3 = vld [vmem:[%s1057_s5 + $0x30] sm:$0xff] }
  0x6a   : > { %5621 = vrot.lane.b32.xlu1 %v5620_v36, %s6001_s1  ;;  %5611 = vrot.lane.b32.xlu0 %v5610_v26, %s7771_s10  ;;  %v1185_v44 = vrot.slane %v1102_v34, 1  ;;  %v6276_v45 = vsel %vm1131_vm1, %v1123_v22, %v1124_v24  ;;  %v1190_v46 = vsel %vm1187_vm0, %v1183_v28, %v1184_v33  ;;  %v6282_v47 = vsel %vm1131_vm1, %v1122_v14, %v1123_v22  ;;  %v1111_v4 = vld [vmem:[%s1057_s5 + $0x38] sm:$0xff]  ;;  %s6003_s5 = smov 64   ;;  %s7778_s14 = sld [smem:[#allocation21_spill]] }
  0x6b   : > { %5307 = vmatpush3.bf16.msra.mxu0 %v1314_v10  ;;  %v6286_v48 = vsel %vm1131_vm1, %v1125_v27, %v1126_v32  ;;  %v6290_v49 = vsel %vm1131_vm1, %v1124_v24, %v1125_v27  ;;  %v1195_v51 = vsel %vm1187_vm0, %v1186_v41, %v1179_v21  ;;  %vm1203_vm2 = vcmp.eq.s32.totalorder %v6254_v20, 63  ;;  %2669 = vst.msk [vmem:[%s6318_s13 + $0x10] sm:$0xff] %vm2666_vm3, %v1106_v63  ;;  %s7785_s4 = sld [smem:[#allocation28_spill]] }
  0x6c   : > { %v1189_v50 = vsel %vm1187_vm0, %v1184_v33, %v1185_v44  ;;  %v6299_v52 = vsel %vm1131_vm1, %v1121_v35, %v1122_v14  ;;  %v5630_v53 = vpack.i.bf16 %v6258_v29, %v1102_v34  ;;  %v1139_v54 = vsel %vm1131_vm1, %v1128_v40, %v1121_v35  ;;  %2685 = vst.msk [vmem:[#allocation3 + $0x10] sm:$0xff] %vm2666_vm3, %v1106_v63  ;;  %s7787_s9 = sld [smem:[#allocation31_spill]] }
  0x6d   : > { %v6306_v55 = vsel %vm1131_vm1, %v1127_v43, %v1128_v40  ;;  %v5635_v56 = vpack.i.bf16 %v1189_v50, %v1190_v46  ;;  %v6312_v57 = vsel %vm1131_vm1, %v1126_v32, %v1127_v43  ;;  %v1188_v58 = vsel %vm1187_vm0, %v1185_v44, %v1186_v41  ;;  %2670 = vst.msk [vmem:[%s6318_s13 + $0x18] sm:$0xff] %vm2666_vm3, %v1107_v0  ;;  %s7792_s6 = sld [smem:[#allocation39_spill]] }
  0x6e   : > { %5626 = vrot.lane.b32.xlu1 %v5625_v42, %s6001_s1  ;;  %5616 = vrot.lane.b32.xlu0 %v5615_v39, %s7771_s10  ;;  %v1227_v59 = vsel %vm1203_vm2, 0.0, %v1195_v51  ;;  %2686 = vst.msk [vmem:[#allocation3 + $0x18] sm:$0xff] %vm2666_vm3, %v1107_v0  ;;  %2671 = vst.msk [vmem:[%s6318_s13 + $0x20] sm:$0xff] %vm2666_vm3, %v1108_v1  ;;  %vm1147_vm4 = vcmp.eq.s32.totalorder %v6235_v6, 0  ;;  %vm3683_vm13 = vcmp.eq.s32.totalorder %v6235_v6, 7  ;;  %s7793_s20 = sld [smem:[#allocation40_spill]] }
  0x6f   : > { %2687 = vst.msk [vmem:[#allocation3 + $0x20] sm:$0xff] %vm2666_vm3, %v1108_v1  ;;  %2672 = vst.msk [vmem:[%s6318_s13 + $0x28] sm:$0xff] %vm2666_vm3, %v1109_v2  ;;  %v5640_v5 = vpack.i.bf16 %v1227_v59, %v1188_v58  ;;  %v1171_v10 = vsel %vm1147_vm4, 0.0, %v1139_v54  ;;  %v4980_v54 = vld [vmem:[%s7774_s17] ss:$0 sm:$0xff] }
  0x70   : > { %2688 = vst.msk [vmem:[#allocation3 + $0x28] sm:$0xff] %vm2666_vm3, %v1109_v2  ;;  %2673 = vst.msk [vmem:[%s6318_s13 + $0x30] sm:$0xff] %vm2666_vm3, %v1110_v3 }
  0x71   : > { %2689 = vst.msk [vmem:[#allocation3 + $0x30] sm:$0xff] %vm2666_vm3, %v1110_v3  ;;  %2674 = vst.msk [vmem:[%s6318_s13 + $0x38] sm:$0xff] %vm2666_vm3, %v1111_v4  ;;  %s7779_s13 = sld [smem:[#allocation24_spill]] }
  0x72   : > { %5631 = vrot.lane.b32.xlu1 %v5630_v53, %s7771_s10  ;;  %5636 = vrot.lane.b32.xlu0 %v5635_v56, %s6001_s1  ;;  %2690 = vst.msk [vmem:[#allocation3 + $0x38] sm:$0xff] %vm2666_vm3, %v1111_v4  ;;  %s7727_s10 = sshll.u32 %s6233_s18, 5 }
  0x76   : > { %5641 = vrot.lane.b32.xlu1 %v5640_v5, %s6001_s1  ;;  %1403 = vperm.xlu0 %5645, %v1104_v62  }
  0x7a   : > { %1408 = vperm.xlu1 %5646, %v1105_v61   ;;  %1418 = vperm.xlu0 %5645, %v1107_v0  }
  0x7e   : > { %1413 = vperm.xlu1 %5646, %v1106_v63   ;;  %1428 = vperm.xlu0 %5645, %v1109_v2  }
  0x82   : > { %1423 = vperm.xlu1 %5646, %v1108_v1   ;;  %1438 = vperm.xlu0 %5645, %v1111_v4  }
  0x86   : > { %1433 = vperm.xlu1 %5646, %v1110_v3  }
  0xd8   : > { %v5607_v7 = vpop.permute.xlu0 %5606 }
  0xd9   : > { %v5609_v8 = vunpack.i.h.bf16 %v5607_v7  ;;  %v5608_v9 = vunpack.i.l.bf16 %v5607_v7 }
  0xdb   : > { %v1293_v13 = vsel %vm1292_vm5, %v1171_v10, %v5608_v9  ;;  %v1294_v14 = vsel %vm1292_vm5, %v6299_v52, %v5609_v8 }
  0xdc   : > { %v5622_v11 = vpop.permute.xlu1 %5621  ;;  %v5612_v12 = vpop.permute.xlu0 %5611 }
  0xdd   : > { %v5624_v15 = vunpack.i.h.bf16 %v5622_v11  ;;  %v5623_v16 = vunpack.i.l.bf16 %v5622_v11  ;;  %v5614_v17 = vunpack.i.h.bf16 %v5612_v12  ;;  %v5613_v18 = vunpack.i.l.bf16 %v5612_v12 }
  0xdf   : > { %v1302_v19 = vsel %vm1301_vm6, %v1293_v13, %v5623_v16  ;;  %v1303_v21 = vsel %vm1301_vm6, %v1294_v14, %v5624_v15  ;;  %v1296_v22 = vsel %vm1292_vm5, %v6276_v45, %v5614_v17  ;;  %v1295_v23 = vsel %vm1292_vm5, %v6282_v47, %v5613_v18 }
  0xe0   : > { %v5627_v24 = vpop.permute.xlu1 %5626  ;;  %v5617_v25 = vpop.permute.xlu0 %5616  ;;  %v1310_v26 = vpack.c.bf16 %v1303_v21, %v1302_v19 }
  0xe1   : > { %v5629_v27 = vunpack.i.h.bf16 %v5627_v24  ;;  %v5628_v28 = vunpack.i.l.bf16 %v5627_v24  ;;  %v5619_v29 = vunpack.i.h.bf16 %v5617_v25  ;;  %v5618_v30 = vunpack.i.l.bf16 %v5617_v25 }
  0xe2   : > { %5308 = vmatprep.mubr.msk.bf16.mxu0 %vm1323_vm7, %v1310_v26 }
  0xe3   : > { %v1305_v31 = vsel %vm1301_vm6, %v1296_v22, %v5629_v27  ;;  %v1304_v32 = vsel %vm1301_vm6, %v1295_v23, %v5628_v28  ;;  %v1298_v33 = vsel %vm1292_vm5, %v6286_v48, %v5619_v29  ;;  %v1297_v34 = vsel %vm1292_vm5, %v6290_v49, %v5618_v30 }
  0xe4   : > { %v5632_v35 = vpop.permute.xlu1 %5631  ;;  %v5637_v36 = vpop.permute.xlu0 %5636  ;;  %v1311_v37 = vpack.c.bf16 %v1305_v31, %v1304_v32 }
  0xe5   : > { %v5639_v38 = vunpack.i.h.bf16 %v5637_v36  ;;  %v5638_v39 = vunpack.i.l.bf16 %v5637_v36  ;;  %v5634_v40 = vunpack.i.h.bf16 %v5632_v35  ;;  %v5633_v41 = vunpack.i.l.bf16 %v5632_v35 }
  0xe6   : > { %5309 = vmatmul.mubr.msk.bf16.vlgmr.msra.gmra.mxu0 %vm1323_vm7, %v1311_v37 }
  0xe7   : > { %v1306_v42 = vsel %vm1301_vm6, %v1297_v34, %v5638_v39  ;;  %v1307_v43 = vsel %vm1301_vm6, %v1298_v33, %v5639_v38  ;;  %v1300_v48 = vsel %vm1292_vm5, %v6306_v55, %v5634_v40  ;;  %v1299_v49 = vsel %vm1292_vm5, %v6312_v57, %v5633_v41 }
  0xe8   : > { %v5642_v44 = vpop.permute.xlu1 %5641  ;;  %v1312_v45 = vpack.c.bf16 %v1307_v43, %v1306_v42  ;;  %vm4217_vm5 = vcmask 254976  }
  0xe9   : > { %v5644_v46 = vunpack.i.h.bf16 %v5642_v44  ;;  %v5643_v47 = vunpack.i.l.bf16 %v5642_v44 }
  0xea   : > { %5312 = vmatprep.mubr.msk.bf16.mxu0 %vm1323_vm7, %v1312_v45 }
  0xeb   : > { %v1308_v50 = vsel %vm1301_vm6, %v1299_v49, %v5643_v47  ;;  %v1309_v51 = vsel %vm1301_vm6, %v1300_v48, %v5644_v46 }
  0xec   : > { %v1313_v52 = vpack.c.bf16 %v1309_v51, %v1308_v50 }
  0xee   : > { %5313 = vmatmul.mubr.msk.bf16.gmra.mxu0 %vm1323_vm7, %v1313_v52  ;;  %vm4254_vm7 = vcmp.eq.s32.totalorder %v6235_v6, 1 }
  0xf1   : > { %v6384_v56 = vpop.permute.xlu0 %1403 }
  0xf5   : > { %v6381_v53 = vpop.permute.xlu1 %1408  ;;  %v6391_v2 = vpop.permute.xlu0 %1418 }
  0xf9   : > { %v6386_v55 = vpop.permute.xlu1 %1413  ;;  %v6400_v16 = vpop.permute.xlu0 %1428 }
  0xfd   : > { %v6395_v8 = vpop.permute.xlu1 %1423  ;;  %v6408_v27 = vpop.permute.xlu0 %1438 }
 0x101   : > { %v6403_v19 = vpop.permute.xlu1 %1433 }
 0x1a6   : > { %v5310_v58 = vpop.f32.mrf.mxu0 }
 0x1a7   : > { %v1379_v59 = vadd.f32 %v5310_v58, %v4980_v54 }
 0x1a8   : > { %v1370_v60 = vpop.f32.mrf.mxu0 }
 0x1a9   : > { %v1371_v57 = vadd.f32 %v4980_v54, %v1370_v60  ;;  %v1443_v61 = vmul.f32 %v6386_v55, %v1379_v59 }
 0x1aa   : > { %v5311_v62 = vpop.f32.mrf.mxu0 }
 0x1ab   : > { %v1382_v63 = vadd.f32 %v5311_v62, %v4980_v54  ;;  %v1455_v0 = vsel %vm1301_vm6, %v1443_v61, 0.0  ;;  %v1441_v1 = vmul.f32 %v6384_v56, %v1371_v57 }
 0x1ac   : > { %1456 = vadd.xlane.f32.xlu0 %v1455_v0  ;;  %v1373_v3 = vpop.f32.mrf.mxu0 }
 0x1ad   : > { %v1374_v4 = vadd.f32 %v4980_v54, %v1373_v3  ;;  %v1449_v5 = vsel %vm1301_vm6, %v1441_v1, 0.0  ;;  %v1444_v7 = vmul.f32 %v6391_v2, %v1382_v63 }
 0x1ae   : > { %v5314_v9 = vpop.f32.mrf.mxu0  ;;  %1450 = vadd.xlane.f32.xlu1 %v1449_v5 }
 0x1af   : > { %v1442_v10 = vmul.f32 %v6381_v53, %v1374_v4  ;;  %v1395_v12 = vadd.f32 %v5314_v9, %v4980_v54  ;;  %v1458_v15 = vsel %vm1301_vm6, %v1444_v7, 0.0 }
 0x1b0   : > { %v1386_v11 = vpop.f32.mrf.mxu0 }
 0x1b1   : > { %v1387_v13 = vadd.f32 %v4980_v54, %v1386_v11  ;;  %v1452_v14 = vsel %vm1301_vm6, %v1442_v10, 0.0  ;;  %v1447_v25 = vmul.f32 %v6403_v19, %v1395_v12 }
 0x1b2   : > { %v5315_v17 = vpop.f32.mrf.mxu0  ;;  %1453 = vadd.xlane.f32.xlu0 %v1452_v14  ;;  %1459 = vadd.xlane.f32.xlu1 %v1458_v15  ;;  %v1600_v14 = vld [vmem:[%s6050_s29 + $0x50] sm:$0xff]  ;;  %v1601_v15 = vld [vmem:[%s6050_s29 + $0x58] sm:$0xff] }
 0x1b3   : > { %v1445_v18 = vmul.f32 %v6395_v8, %v1387_v13  ;;  %v1398_v22 = vadd.f32 %v5315_v17, %v4980_v54  ;;  %v1467_v28 = vsel %vm1301_vm6, %v1447_v25, 0.0  ;;  %v1598_v17 = vld [vmem:[%s6050_s29 + $0x40] sm:$0xff] }
 0x1b4   : > { %v1389_v21 = vpop.f32.mrf.mxu0 }
 0x1b5   : > { %v1390_v23 = vadd.f32 %v4980_v54, %v1389_v21  ;;  %v1461_v24 = vsel %vm1301_vm6, %v1445_v18, 0.0  ;;  %v1448_v30 = vmul.f32 %v6408_v27, %v1398_v22  ;;  %v1599_v21 = vld [vmem:[%s6050_s29 + $0x48] sm:$0xff] }
 0x1b6   : > { %1462 = vadd.xlane.f32.xlu0 %v1461_v24  ;;  %v1742_v22 = vpack.c.bf16 %v1599_v21, %v1598_v17  ;;  %v1597_v24 = vld [vmem:[%s6050_s29 + $0x38] sm:$0xff] }
 0x1b7   : > { %v1446_v26 = vmul.f32 %v6400_v16, %v1390_v23  ;;  %v1470_v31 = vsel %vm1301_vm6, %v1448_v30, 0.0  ;;  %v1596_v23 = vld [vmem:[%s6050_s29 + $0x30] sm:$0xff] }
 0x1b9   : > { %v1464_v29 = vsel %vm1301_vm6, %v1446_v26, 0.0 }
 0x1ba   : > { %1468 = vadd.xlane.f32.xlu0 %v1467_v28  ;;  %1465 = vadd.xlane.f32.xlu1 %v1464_v29 }
 0x1be   : > { %1471 = vadd.xlane.f32.xlu1 %v1470_v31 }
 0x235   : > { %v1457_v32 = vpop.xlane.xlu0 %1456 }
 0x236   : > { %v1476_v33 = vmul.f32 0.03125, %v1457_v32 }
 0x237   : > { %v1451_v34 = vpop.xlane.xlu1 %1450 }
 0x238   : > { %v6414_v35 = vsub.f32 %v1443_v61, %v1476_v33  ;;  %v1474_v36 = vmul.f32 0.03125, %v1451_v34 }
 0x23a   : > { %v6416_v37 = vsub.f32 %v1441_v1, %v1474_v36  ;;  %v1492_v38 = vmul.f32 %v6414_v35, %v6414_v35 }
 0x23b   : > { %v1454_v39 = vpop.xlane.xlu0 %1453  ;;  %v1460_v40 = vpop.xlane.xlu1 %1459 }
 0x23c   : > { %v1475_v41 = vmul.f32 0.03125, %v1454_v39  ;;  %v1477_v42 = vmul.f32 0.03125, %v1460_v40  ;;  %v1504_v43 = vsel %vm1301_vm6, %v1492_v38, 0.0  ;;  %v1490_v44 = vmul.f32 %v6416_v37, %v6416_v37 }
 0x23d   : > { %1505 = vadd.xlane.f32.xlu0 %v1504_v43 }
 0x23e   : > { %v6423_v45 = vsub.f32 %v1442_v10, %v1475_v41  ;;  %v6425_v46 = vsub.f32 %v1444_v7, %v1477_v42  ;;  %v1498_v49 = vsel %vm1301_vm6, %v1490_v44, 0.0 }
 0x23f   : > { %v1463_v47 = vpop.xlane.xlu0 %1462 }
 0x240   : > { %v1478_v48 = vmul.f32 0.03125, %v1463_v47  ;;  %v1493_v50 = vmul.f32 %v6425_v46, %v6425_v46  ;;  %v1491_v54 = vmul.f32 %v6423_v45, %v6423_v45 }
 0x241   : > { %1499 = vadd.xlane.f32.xlu0 %v1498_v49 }
 0x242   : > { %v6430_v51 = vsub.f32 %v1445_v18, %v1478_v48  ;;  %v1507_v52 = vsel %vm1301_vm6, %v1493_v50, 0.0  ;;  %v1501_v1 = vsel %vm1301_vm6, %v1491_v54, 0.0  ;;  %v1743_v18 = vpack.c.bf16 %v1601_v15, %v1600_v14  ;;  %v1592_v14 = vld [vmem:[%s6050_s29 + $0x10] sm:$0xff]  ;;  %v1593_v15 = vld [vmem:[%s6050_s29 + $0x18] sm:$0xff] }
 0x243   : > { %v1469_v58 = vpop.xlane.xlu0 %1468  ;;  %1508 = vadd.xlane.f32.xlu1 %v1507_v52  ;;  %v1466_v59 = vpop.xlane.xlu1 %1465 }
 0x244   : > { %v1480_v60 = vmul.f32 0.03125, %v1469_v58  ;;  %v1479_v57 = vmul.f32 0.03125, %v1466_v59  ;;  %v1494_v61 = vmul.f32 %v6430_v51, %v6430_v51  ;;  %5316 = vmatprep.subr.bf16.mxu1 %v1743_v18  ;;  %v6461_v59 = vld [vmem:[%s7775_s21] ss:$0 sm:$0xff] }
 0x245   : > { %5317 = vmatpush3.bf16.msra.mxu1 %v1743_v18 }
 0x246   : > { %v6437_v62 = vsub.f32 %v1447_v25, %v1480_v60  ;;  %v6439_v63 = vsub.f32 %v1446_v26, %v1479_v57  ;;  %v1510_v0 = vsel %vm1301_vm6, %v1494_v61, 0.0  ;;  %5318 = vmatprep.subr.bf16.mxu1 %v1742_v22  ;;  %v1741_v25 = vpack.c.bf16 %v1597_v24, %v1596_v23 }
 0x247   : > { %1511 = vadd.xlane.f32.xlu0 %v1510_v0  ;;  %1502 = vadd.xlane.f32.xlu1 %v1501_v1  ;;  %v1472_v3 = vpop.xlane.xlu1 %1471  ;;  %v6465_v0 = vld [vmem:[%s6045_s25] ss:$0 sm:$0xff] }
 0x248   : > { %v1481_v4 = vmul.f32 0.03125, %v1472_v3  ;;  %v1496_v5 = vmul.f32 %v6437_v62, %v6437_v62  ;;  %v1495_v7 = vmul.f32 %v6439_v63, %v6439_v63 }
 0x249   : > { %5319 = vmatpush3.bf16.msra.mxu1 %v1742_v22  ;;  %v1739_v22 = vpack.c.bf16 %v1593_v15, %v1592_v14 }
 0x24a   : > { %v6447_v9 = vsub.f32 %v1448_v30, %v1481_v4  ;;  %v1516_v10 = vsel %vm1301_vm6, %v1496_v5, 0.0  ;;  %v1513_v11 = vsel %vm1301_vm6, %v1495_v7, 0.0  ;;  %5320 = vmatprep.subr.bf16.mxu1 %v1741_v25  ;;  %v1594_v4 = vld [vmem:[%s6050_s29 + $0x20] sm:$0xff]  ;;  %v1595_v5 = vld [vmem:[%s6050_s29 + $0x28] sm:$0xff] }
 0x24b   : > { %1517 = vadd.xlane.f32.xlu0 %v1516_v10  ;;  %1514 = vadd.xlane.f32.xlu1 %v1513_v11  ;;  %v1740_v10 = vpack.c.bf16 %v1595_v5, %v1594_v4 }
 0x24c   : > { %v1497_v12 = vmul.f32 %v6447_v9, %v6447_v9 }
 0x24d   : > { %5321 = vmatpush3.bf16.msra.mxu1 %v1741_v25 }
 0x24e   : > { %v1519_v13 = vsel %vm1301_vm6, %v1497_v12, 0.0  ;;  %5322 = vmatprep.subr.bf16.mxu1 %v1740_v10 }
 0x24f   : > { %1520 = vadd.xlane.f32.xlu1 %v1519_v13 }
 0x251   : > { %5323 = vmatpush3.bf16.msra.mxu1 %v1740_v10 }
 0x252   : > { %5324 = vmatprep.subr.bf16.mxu1 %v1739_v22 }
 0x255   : > { %5325 = vmatpush3.bf16.msra.mxu1 %v1739_v22 }
 0x2c6   : > { %v1506_v26 = vpop.xlane.xlu0 %1505 }
 0x2c7   : > { %v1524_v28 = vmul.f32 0.03125, %v1506_v26  ;;  %v1590_v26 = vld [vmem:[%s6050_s29] sm:$0xff] }
 0x2c9   : > { %v1532_v29 = vadd.f32 1e-05, %v1524_v28  ;;  %v1591_v28 = vld [vmem:[%s6050_s29 + $0x8] sm:$0xff] }
 0x2ca   : > { %v1500_v30 = vpop.xlane.xlu0 %1499 }
 0x2cb   : > { %5687 = vrsqrt.f32 %v1532_v29  ;;  %v1522_v31 = vmul.f32 0.03125, %v1500_v30 }
 0x2cc   : > { %v1509_v32 = vpop.xlane.xlu1 %1508 }
 0x2cd   : > { %v1530_v33 = vadd.f32 1e-05, %v1522_v31  ;;  %v1525_v34 = vmul.f32 0.03125, %v1509_v32  ;;  %v1738_v32 = vpack.c.bf16 %v1591_v28, %v1590_v26 }
 0x2cf   : > { %5689 = vrsqrt.f32 %v1530_v33  ;;  %v1533_v36 = vadd.f32 1e-05, %v1525_v34  ;;  %5326 = vmatprep.subr.bf16.mxu1 %v1738_v32 }
 0x2d0   : > { %v1512_v38 = vpop.xlane.xlu0 %1511  ;;  %v1503_v39 = vpop.xlane.xlu1 %1502  ;;  %5327 = vmatpush3.bf16.msra.mxu1 %v1738_v32 }
 0x2d1   : > { %5691 = vrsqrt.f32 %v1533_v36  ;;  %v1526_v40 = vmul.f32 0.03125, %v1512_v38  ;;  %v1523_v41 = vmul.f32 0.03125, %v1503_v39 }
 0x2d3   : > { %v1534_v42 = vadd.f32 1e-05, %v1526_v40  ;;  %v1531_v43 = vadd.f32 1e-05, %v1523_v41 }
 0x2d4   : > { %v1518_v44 = vpop.xlane.xlu0 %1517  ;;  %v1515_v47 = vpop.xlane.xlu1 %1514 }
 0x2d5   : > { %5693 = vrsqrt.f32 %v1534_v42  ;;  %v1528_v48 = vmul.f32 0.03125, %v1518_v44  ;;  %v1527_v49 = vmul.f32 0.03125, %v1515_v47 }
 0x2d6   : > { %5695 = vrsqrt.f32 %v1531_v43 }
 0x2d7   : > { %v1536_v50 = vadd.f32 1e-05, %v1528_v48  ;;  %v1535_v52 = vadd.f32 1e-05, %v1527_v49 }
 0x2d8   : > { %v5688_v54 = vpop.eup %5687  ;;  %v1521_v58 = vpop.xlane.xlu1 %1520 }
 0x2d9   : > { %5697 = vrsqrt.f32 %v1536_v50  ;;  %v1529_v60 = vmul.f32 0.03125, %v1521_v58  ;;  %v1548_v57 = vmul.f32 %v5688_v54, %v6414_v35 }
 0x2da   : > { %5699 = vrsqrt.f32 %v1535_v52 }
 0x2db   : > { %v1537_v61 = vadd.f32 1e-05, %v1529_v60  ;;  %v1562_v1 = vmul.f32 %v6461_v59, %v1548_v57 }
 0x2dc   : > { %v5690_v3 = vpop.eup %5689 }
 0x2dd   : > { %5701 = vrsqrt.f32 %v1537_v61  ;;  %v1546_v7 = vmul.f32 %v5690_v3, %v6416_v37  ;;  %v1576_v12 = vadd.f32 %v6465_v0, %v1562_v1 }
 0x2de   : > { %v5692_v11 = vpop.eup %5691 }
 0x2df   : > { %v1549_v35 = vmul.f32 %v5692_v11, %v6425_v46  ;;  %v1560_v13 = vmul.f32 %v6461_v59, %v1546_v7  ;;  %v1584_v37 = vmax.f32 %v1576_v12, 0.0 }
 0x2e1   : > { %v1563_v17 = vmul.f32 %v6461_v59, %v1549_v35  ;;  %v1574_v18 = vadd.f32 %v6465_v0, %v1560_v13  ;;  %v1607_v34 = vrot.slane %v1584_v37, 7  ;;  %v1631_v47 = vrot.slane %v1584_v37, 1 }
 0x2e2   : > { %v5694_v21 = vpop.eup %5693 }
 0x2e3   : > { %v5696_v23 = vpop.eup %5695  ;;  %v1550_v24 = vmul.f32 %v5694_v21, %v6430_v51  ;;  %v1577_v46 = vadd.f32 %v6465_v0, %v1563_v17  ;;  %v6483_v30 = vmax.f32 %v1574_v18, 0.0 }
 0x2e4   : > { %v1547_v25 = vmul.f32 %v5696_v23, %v6423_v45 }
 0x2e5   : > { %v1585_v29 = vmax.f32 %v1577_v46, 0.0  ;;  %v1564_v31 = vmul.f32 %v6461_v59, %v1550_v24  ;;  %v1629_v44 = vrot.slane %v6483_v30, 1 }
 0x2e6   : > { %v5698_v33 = vpop.eup %5697  ;;  %v1561_v36 = vmul.f32 %v6461_v59, %v1547_v25 }
 0x2e7   : > { %v5700_v38 = vpop.eup %5699  ;;  %v5647_v51 = vpack.i.bf16 %v1585_v29, %v1584_v37  ;;  %v1608_v39 = vrot.slane %v1585_v29, 7  ;;  %v1578_v40 = vadd.f32 %v6465_v0, %v1564_v31  ;;  %v1632_v45 = vrot.slane %v1585_v29, 1 }
 0x2e8   : > { %v1575_v41 = vadd.f32 %v6465_v0, %v1561_v36  ;;  %v1551_v42 = vmul.f32 %v5700_v38, %v6439_v63  ;;  %v1552_v43 = vmul.f32 %v5698_v33, %v6437_v62  ;;  %v1605_v63 = vrot.slane %v6483_v30, 7 }
 0x2e9   : > { %5648 = vrot.lane.b32.xlu1 %v5647_v51, %s6001_s1  ;;  %v1586_v48 = vmax.f32 %v1578_v40, 0.0  ;;  %v6495_v49 = vsel %vm1131_vm1, %v1607_v34, %v1608_v39  ;;  %v1641_v60 = vsel %vm1187_vm0, %v1631_v47, %v1632_v45 }
 0x2ea   : > { %v5702_v50 = vpop.eup %5701  ;;  %v1583_v52 = vmax.f32 %v1575_v41, 0.0  ;;  %v1565_v54 = vmul.f32 %v6461_v59, %v1551_v42  ;;  %v1566_v58 = vmul.f32 %v6461_v59, %v1552_v43 }
 0x2eb   : > { %v1633_v62 = vrot.slane %v1586_v48, 1  ;;  %v1553_v57 = vmul.f32 %v5702_v50, %v6447_v9  ;;  %v1609_v61 = vrot.slane %v1586_v48, 7 }
 0x2ec   : > { %v5652_v1 = vpack.i.bf16 %v1583_v52, %v6483_v30  ;;  %v1606_v3 = vrot.slane %v1583_v52, 7  ;;  %v1630_v4 = vrot.slane %v1583_v52, 1  ;;  %v1579_v5 = vadd.f32 %v6465_v0, %v1565_v54 }
 0x2ed   : > { %v1640_v7 = vsel %vm1187_vm0, %v1632_v45, %v1633_v62  ;;  %v1567_v10 = vmul.f32 %v6461_v59, %v1553_v57  ;;  %v1580_v11 = vadd.f32 %v6465_v0, %v1566_v58  ;;  %v6511_v12 = vsel %vm1131_vm1, %v1608_v39, %v1609_v61 }
 0x2ee   : > { %5653 = vrot.lane.b32.xlu0 %v5652_v1, %s6001_s1  ;;  %v1642_v9 = vsel %vm1187_vm0, %v1630_v4, %v1631_v47  ;;  %v1643_v35 = vsel %vm1187_vm0, %v1629_v44, %v1630_v4  ;;  %v5662_v13 = vpack.i.bf16 %v1640_v7, %v1641_v60  ;;  %v1587_v14 = vmax.f32 %v1579_v5, 0.0 }
 0x2ef   : > { %v5657_v15 = vpack.i.bf16 %v1642_v9, %v1643_v35  ;;  %v1581_v17 = vadd.f32 %v6465_v0, %v1567_v10  ;;  %v1588_v59 = vmax.f32 %v1580_v11, 0.0  ;;  %v1618_v18 = vsel %vm1131_vm1, %v1606_v3, %v1607_v34 }
 0x2f0   : > { %v1610_v21 = vrot.slane %v1587_v14, 7  ;;  %v1634_v37 = vrot.slane %v1587_v14, 1  ;;  %v1619_v22 = vsel %vm1131_vm1, %v1605_v63, %v1606_v3  ;;  %v5672_v26 = vpack.i.bf16 %v1587_v14, %v1586_v48 }
 0x2f1   : > { %5658 = vrot.lane.b32.xlu1 %v5657_v15, %s6003_s5  ;;  %v1589_v23 = vmax.f32 %v1581_v17, 0.0  ;;  %v1635_v24 = vrot.slane %v1588_v59, 1  ;;  %v1611_v46 = vrot.slane %v1588_v59, 7 }
 0x2f2   : > { %5663 = vrot.lane.b32.xlu0 %v5662_v13, %s6003_s5  ;;  %v1615_v25 = vsel %vm1131_vm1, %v1609_v61, %v1610_v21  ;;  %v1639_v31 = vsel %vm1187_vm0, %v1633_v62, %v1634_v37 }
 0x2f3   : > { %v5667_v0 = vpack.i.bf16 %v1589_v23, %v1588_v59  ;;  %v1636_v28 = vrot.slane %v1589_v23, 1  ;;  %v1614_v29 = vsel %vm1131_vm1, %v1610_v21, %v1611_v46  ;;  %v1638_v30 = vsel %vm1187_vm0, %v1634_v37, %v1635_v24 }
 0x2f4   : > { %v1612_v32 = vrot.slane %v1589_v23, 7  ;;  %v5677_v39 = vpack.i.bf16 %v1638_v30, %v1639_v31 }
 0x2f5   : > { %5673 = vrot.lane.b32.xlu1 %v5672_v26, %s6001_s1  ;;  %v1637_v33 = vsel %vm1187_vm0, %v1635_v24, %v1636_v28  ;;  %v1644_v34 = vsel %vm1187_vm0, %v1636_v28, %v1629_v44 }
 0x2f6   : > { %5668 = vrot.lane.b32.xlu0 %v5667_v0, %s6001_s1  ;;  %v1652_v36 = vsel %vm1203_vm2, 0.0, %v1644_v34  ;;  %v1613_v38 = vsel %vm1131_vm1, %v1611_v46, %v1612_v32  ;;  %v1620_v51 = vsel %vm1131_vm1, %v1612_v32, %v1605_v63  ;;  %s7780_s1 = sld [smem:[#allocation34_spill]] }
 0x2f7   : > { %v5682_v40 = vpack.i.bf16 %v1652_v36, %v1637_v33  ;;  %v1621_v58 = vsel %vm1147_vm4, 0.0, %v1620_v51 }
 0x2f9   : > { %5678 = vrot.lane.b32.xlu1 %v5677_v39, %s6003_s5 }
 0x2fa   : > { %5683 = vrot.lane.b32.xlu0 %v5682_v40, %s6003_s5 }
 0x2fc   : > { %s1077_s5 = scalar_lea.vmem %s7780_s1, %s7727_s10  ;;  %s7781_s1 = sld [smem:[#allocation27_spill]] }
 0x2fd   : > { %s7783_s10 = sld [smem:[#allocation26_spill]] }
 0x35b   : > { %v5649_v45 = vpop.permute.xlu1 %5648 }
 0x35c   : > { %v5651_v44 = vunpack.i.h.bf16 %v5649_v45  ;;  %v5650_v47 = vunpack.i.l.bf16 %v5649_v45 }
 0x35e   : > { %v1720_v61 = vsel %vm1301_vm6, %v6495_v49, %v5651_v44  ;;  %v1719_v1 = vsel %vm1301_vm6, %v1618_v18, %v5650_v47 }
 0x360   : > { %v5654_v41 = vpop.permute.xlu0 %5653 }
 0x361   : > { %v5656_v42 = vunpack.i.h.bf16 %v5654_v41  ;;  %v5655_v43 = vunpack.i.l.bf16 %v5654_v41 }
 0x363   : > { %v5659_v48 = vpop.permute.xlu1 %5658  ;;  %v1717_v60 = vsel %vm1301_vm6, %v1621_v58, %v5655_v43  ;;  %v1718_v57 = vsel %vm1301_vm6, %v1619_v22, %v5656_v42 }
 0x364   : > { %v5661_v50 = vunpack.i.h.bf16 %v5659_v48  ;;  %v5660_v52 = vunpack.i.l.bf16 %v5659_v48  ;;  %v5664_v54 = vpop.permute.xlu0 %5663 }
 0x365   : > { %v5666_v63 = vunpack.i.h.bf16 %v5664_v54  ;;  %v5665_v62 = vunpack.i.l.bf16 %v5664_v54 }
 0x366   : > { %v1726_v3 = vsel %vm1725_vm8, %v1717_v60, %v5660_v52  ;;  %v1727_v4 = vsel %vm1725_vm8, %v1718_v57, %v5661_v50 }
 0x367   : > { %v1728_v5 = vsel %vm1725_vm8, %v1719_v1, %v5665_v62  ;;  %v1729_v7 = vsel %vm1725_vm8, %v1720_v61, %v5666_v63  ;;  %v5674_v10 = vpop.permute.xlu1 %5673  ;;  %v1734_v11 = vpack.c.bf16 %v1727_v4, %v1726_v3 }
 0x368   : > { %v1735_v9 = vpack.c.bf16 %v1729_v7, %v1728_v5  ;;  %v5669_v35 = vpop.permute.xlu0 %5668  ;;  %v5676_v13 = vunpack.i.h.bf16 %v5674_v10  ;;  %v5675_v14 = vunpack.i.l.bf16 %v5674_v10 }
 0x369   : > { %5328 = vmatprep.mubr.msk.bf16.mxu1 %vm1750_vm9, %v1734_v11  ;;  %v5671_v15 = vunpack.i.h.bf16 %v5669_v35  ;;  %v5670_v49 = vunpack.i.l.bf16 %v5669_v35 }
 0x36a   : > { %5329 = vmatmul.mubr.msk.bf16.vlgmr.msra.gmra.mxu1 %vm1750_vm9, %v1735_v9  ;;  %v1722_v37 = vsel %vm1301_vm6, %v1615_v25, %v5676_v13  ;;  %v1721_v22 = vsel %vm1301_vm6, %v6511_v12, %v5675_v14  ;;  %v4987_v12 = vld [vmem:[%s7776_s3] ss:$0 sm:$0xff]  ;;  %s7784_s3 = sld [smem:[#allocation29_spill]] }
 0x36b   : > { %v5679_v17 = vpop.permute.xlu1 %5678  ;;  %v1723_v46 = vsel %vm1301_vm6, %v1614_v29, %v5670_v49  ;;  %v1724_v26 = vsel %vm1301_vm6, %v1613_v38, %v5671_v15 }
 0x36c   : > { %v5681_v59 = vunpack.i.h.bf16 %v5679_v17  ;;  %v5680_v18 = vunpack.i.l.bf16 %v5679_v17  ;;  %v5684_v21 = vpop.permute.xlu0 %5683 }
 0x36d   : > { %v5686_v23 = vunpack.i.h.bf16 %v5684_v21  ;;  %v5685_v24 = vunpack.i.l.bf16 %v5684_v21 }
 0x36e   : > { %v1730_v0 = vsel %vm1725_vm8, %v1721_v22, %v5680_v18  ;;  %v1731_v28 = vsel %vm1725_vm8, %v1722_v37, %v5681_v59 }
 0x36f   : > { %v1732_v30 = vsel %vm1725_vm8, %v1723_v46, %v5685_v24  ;;  %v1733_v31 = vsel %vm1725_vm8, %v1724_v26, %v5686_v23  ;;  %v1736_v32 = vpack.c.bf16 %v1731_v28, %v1730_v0 }
 0x370   : > { %v1737_v33 = vpack.c.bf16 %v1733_v31, %v1732_v30 }
 0x371   : > { %5332 = vmatprep.mubr.msk.bf16.mxu1 %vm1750_vm9, %v1736_v32 }
 0x372   : > { %5333 = vmatmul.mubr.msk.bf16.gmra.mxu1 %vm1750_vm9, %v1737_v33 }
 0x42a   : > { %v5330_v25 = vpop.f32.mrf.mxu1 }
 0x42b   : > { %v1806_v34 = vadd.f32 %v5330_v25, %v4987_v12 }
 0x42c   : > { %v1797_v29 = vpop.f32.mrf.mxu1 }
 0x42d   : > { %v1798_v36 = vadd.f32 %v4987_v12, %v1797_v29  ;;  %v1830_v38 = vmul.f32 %v1806_v34, %v6386_v55 }
 0x42e   : > { %v5331_v51 = vpop.f32.mrf.mxu1 }
 0x42f   : > { %v1842_v39 = vsel %vm1301_vm6, %v1830_v38, 0.0  ;;  %v1828_v40 = vmul.f32 %v1798_v36, %v6384_v56  ;;  %v1809_v58 = vadd.f32 %v5331_v51, %v4987_v12 }
 0x430   : > { %1843 = vadd.xlane.f32.xlu1 %v1842_v39  ;;  %v1800_v45 = vpop.f32.mrf.mxu1 }
 0x431   : > { %v1801_v41 = vadd.f32 %v4987_v12, %v1800_v45  ;;  %v1836_v43 = vsel %vm1301_vm6, %v1828_v40, 0.0  ;;  %v1831_v5 = vmul.f32 %v1809_v58, %v6391_v2 }
 0x432   : > { %v5334_v42 = vpop.f32.mrf.mxu1 }
 0x433   : > { %v1829_v44 = vmul.f32 %v1801_v41, %v6381_v53  ;;  %v1822_v48 = vadd.f32 %v5334_v42, %v4987_v12  ;;  %v1845_v10 = vsel %vm1301_vm6, %v1831_v5, 0.0 }
 0x434   : > { %v1813_v47 = vpop.f32.mrf.mxu1  ;;  %1837 = vadd.xlane.f32.xlu1 %v1836_v43 }
 0x435   : > { %v1814_v50 = vadd.f32 %v4987_v12, %v1813_v47  ;;  %v1839_v52 = vsel %vm1301_vm6, %v1829_v44, 0.0  ;;  %v1834_v1 = vmul.f32 %v1822_v48, %v6403_v19 }
 0x436   : > { %v5335_v54 = vpop.f32.mrf.mxu1  ;;  %1840 = vadd.xlane.f32.xlu0 %v1839_v52 }
 0x437   : > { %v1825_v63 = vadd.f32 %v5335_v54, %v4987_v12  ;;  %v1832_v62 = vmul.f32 %v1814_v50, %v6395_v8  ;;  %v1854_v7 = vsel %vm1301_vm6, %v1834_v1, 0.0 }
 0x438   : > { %v1816_v60 = vpop.f32.mrf.mxu1 }
 0x439   : > { %v1848_v57 = vsel %vm1301_vm6, %v1832_v62, 0.0  ;;  %v1835_v61 = vmul.f32 %v1825_v63, %v6408_v27  ;;  %v1817_v3 = vadd.f32 %v4987_v12, %v1816_v60 }
 0x43a   : > { %1849 = vadd.xlane.f32.xlu1 %v1848_v57 }
 0x43b   : > { %v1857_v4 = vsel %vm1301_vm6, %v1835_v61, 0.0  ;;  %v1833_v11 = vmul.f32 %v1817_v3, %v6400_v16 }
 0x43c   : > { %1858 = vadd.xlane.f32.xlu0 %v1857_v4 }
 0x43d   : > { %v1851_v9 = vsel %vm1301_vm6, %v1833_v11, 0.0 }
 0x43e   : > { %1855 = vadd.xlane.f32.xlu1 %v1854_v7 }
 0x440   : > { %1846 = vadd.xlane.f32.xlu0 %v1845_v10 }
 0x444   : > { %1852 = vadd.xlane.f32.xlu0 %v1851_v9 }
 0x4b9   : > { %v1844_v35 = vpop.xlane.xlu1 %1843 }
 0x4ba   : > { %v1862_v13 = vmul.f32 0.03125, %v1844_v35 }
 0x4bc   : > { %v6584_v14 = vsub.f32 %v1830_v38, %v1862_v13 }
 0x4bd   : > { %v1838_v15 = vpop.xlane.xlu1 %1837 }
 0x4be   : > { %v1860_v49 = vmul.f32 0.03125, %v1838_v15  ;;  %v1878_v17 = vmul.f32 %v6584_v14, %v6584_v14 }
 0x4bf   : > { %v1841_v59 = vpop.xlane.xlu0 %1840 }
 0x4c0   : > { %v6588_v18 = vsub.f32 %v1828_v40, %v1860_v49  ;;  %v1861_v21 = vmul.f32 0.03125, %v1841_v59  ;;  %v1890_v37 = vsel %vm1301_vm6, %v1878_v17, 0.0  ;;  %v4992_v49 = vld [vmem:[%s7777_s8] ss:$0 sm:$0xff]  ;;  %s7786_s8 = sld [smem:[#allocation30_spill]] }
 0x4c1   : > { %1891 = vadd.xlane.f32.xlu1 %v1890_v37 }
 0x4c2   : > { %v6591_v22 = vsub.f32 %v1829_v44, %v1861_v21  ;;  %v1876_v23 = vmul.f32 %v6588_v18, %v6588_v18 }
 0x4c3   : > { %v1850_v24 = vpop.xlane.xlu1 %1849 }
 0x4c4   : > { %v1864_v46 = vmul.f32 0.03125, %v1850_v24  ;;  %v1884_v26 = vsel %vm1301_vm6, %v1876_v23, 0.0  ;;  %v1877_v0 = vmul.f32 %v6591_v22, %v6591_v22  ;;  %v4993_v24 = vld [vmem:[%s7778_s14] ss:$0 sm:$0xff]  ;;  %s7066_s14 = scalar_lea.vmem %s7787_s9, %s6240_s7  ;;  %s7788_s9 = sld [smem:[#allocation36_spill]] }
 0x4c5   : > { %v1859_v28 = vpop.xlane.xlu0 %1858  ;;  %1885 = vadd.xlane.f32.xlu0 %v1884_v26 }
 0x4c6   : > { %v1867_v30 = vmul.f32 0.03125, %v1859_v28  ;;  %v6598_v32 = vsub.f32 %v1832_v62, %v1864_v46  ;;  %v1887_v25 = vsel %vm1301_vm6, %v1877_v0, 0.0 }
 0x4c7   : > { %v1856_v31 = vpop.xlane.xlu1 %1855 }
 0x4c8   : > { %v6600_v33 = vsub.f32 %v1835_v61, %v1867_v30  ;;  %v1866_v12 = vmul.f32 0.03125, %v1856_v31  ;;  %v1880_v40 = vmul.f32 %v6598_v32, %v6598_v32 }
 0x4c9   : > { %v1847_v34 = vpop.xlane.xlu0 %1846  ;;  %1888 = vadd.xlane.f32.xlu0 %v1887_v25 }
 0x4ca   : > { %v1863_v29 = vmul.f32 0.03125, %v1847_v34  ;;  %v1883_v36 = vmul.f32 %v6600_v33, %v6600_v33  ;;  %v6605_v38 = vsub.f32 %v1834_v1, %v1866_v12  ;;  %v1896_v47 = vsel %vm1301_vm6, %v1880_v40, 0.0 }
 0x4cc   : > { %v6607_v51 = vsub.f32 %v1831_v5, %v1863_v29  ;;  %v1905_v39 = vsel %vm1301_vm6, %v1883_v36, 0.0  ;;  %v1882_v48 = vmul.f32 %v6605_v38, %v6605_v38 }
 0x4cd   : > { %v1853_v45 = vpop.xlane.xlu0 %1852  ;;  %1906 = vadd.xlane.f32.xlu1 %v1905_v39 }
 0x4ce   : > { %v1865_v41 = vmul.f32 0.03125, %v1853_v45  ;;  %v1879_v42 = vmul.f32 %v6607_v51, %v6607_v51  ;;  %v1902_v54 = vsel %vm1301_vm6, %v1882_v48, 0.0 }
 0x4d0   : > { %v6614_v43 = vsub.f32 %v1833_v11, %v1865_v41  ;;  %v1893_v44 = vsel %vm1301_vm6, %v1879_v42, 0.0 }
 0x4d1   : > { %1894 = vadd.xlane.f32.xlu0 %v1893_v44  ;;  %1897 = vadd.xlane.f32.xlu1 %v1896_v47 }
 0x4d2   : > { %v1881_v50 = vmul.f32 %v6614_v43, %v6614_v43 }
 0x4d4   : > { %v1899_v52 = vsel %vm1301_vm6, %v1881_v50, 0.0 }
 0x4d5   : > { %1900 = vadd.xlane.f32.xlu0 %v1899_v52  ;;  %1903 = vadd.xlane.f32.xlu1 %v1902_v54 }
 0x54a   : > { %v1892_v58 = vpop.xlane.xlu1 %1891 }
 0x54b   : > { %v1910_v63 = vmul.f32 0.03125, %v1892_v58 }
 0x54d   : > { %v1918_v62 = vadd.f32 1e-05, %v1910_v63 }
 0x54e   : > { %v1886_v60 = vpop.xlane.xlu0 %1885 }
 0x54f   : > { %5703 = vrsqrt.f32 %v1918_v62  ;;  %v1908_v57 = vmul.f32 0.03125, %v1886_v60 }
 0x551   : > { %v1916_v61 = vadd.f32 1e-05, %v1908_v57 }
 0x552   : > { %v1889_v1 = vpop.xlane.xlu0 %1888 }
 0x553   : > { %5705 = vrsqrt.f32 %v1916_v61  ;;  %v1909_v3 = vmul.f32 0.03125, %v1889_v1 }
 0x555   : > { %v1917_v4 = vadd.f32 1e-05, %v1909_v3 }
 0x556   : > { %v1907_v5 = vpop.xlane.xlu1 %1906 }
 0x557   : > { %5707 = vrsqrt.f32 %v1917_v4  ;;  %v1915_v7 = vmul.f32 0.03125, %v1907_v5 }
 0x559   : > { %v1923_v10 = vadd.f32 1e-05, %v1915_v7 }
 0x55a   : > { %v1895_v11 = vpop.xlane.xlu0 %1894  ;;  %v1898_v9 = vpop.xlane.xlu1 %1897 }
 0x55b   : > { %5709 = vrsqrt.f32 %v1923_v10  ;;  %v1911_v35 = vmul.f32 0.03125, %v1895_v11  ;;  %v1912_v13 = vmul.f32 0.03125, %v1898_v9 }
 0x55c   : > { %v5704_v15 = vpop.eup %5703 }
 0x55d   : > { %v1919_v17 = vadd.f32 1e-05, %v1911_v35  ;;  %v1920_v59 = vadd.f32 1e-05, %v1912_v13  ;;  %v1934_v21 = vmul.f32 %v5704_v15, %v6584_v14 }
 0x55e   : > { %v1901_v37 = vpop.xlane.xlu0 %1900  ;;  %v1904_v23 = vpop.xlane.xlu1 %1903 }
 0x55f   : > { %5711 = vrsqrt.f32 %v1919_v17  ;;  %v1913_v46 = vmul.f32 0.03125, %v1901_v37  ;;  %v1914_v26 = vmul.f32 0.03125, %v1904_v23  ;;  %v1948_v0 = vmul.f32 %v4992_v49, %v1934_v21 }
 0x560   : > { %v5706_v28 = vpop.eup %5705  ;;  %5713 = vrsqrt.f32 %v1920_v59 }
 0x561   : > { %v1921_v30 = vadd.f32 1e-05, %v1913_v46  ;;  %v1922_v31 = vadd.f32 1e-05, %v1914_v26  ;;  %v1962_v12 = vadd.f32 %v4993_v24, %v1948_v0  ;;  %v1932_v25 = vmul.f32 %v5706_v28, %v6588_v18 }
 0x563   : > { %5715 = vrsqrt.f32 %v1921_v30  ;;  %v6628_v34 = vmax.f32 %v1962_v12, 0.0  ;;  %v1946_v29 = vmul.f32 %v4992_v49, %v1932_v25 }
 0x564   : > { %v5708_v36 = vpop.eup %5707  ;;  %5717 = vrsqrt.f32 %v1922_v31 }
 0x565   : > { %v2010_v14 = vsel %vm1301_vm6, %v6628_v34, 0.0  ;;  %v1960_v39 = vadd.f32 %v4993_v24, %v1946_v29  ;;  %v1933_v40 = vmul.f32 %v5708_v36, %v6591_v22 }
 0x566   : > { %2011 = vadd.xlane.f32.xlu1 %v2010_v14 }
 0x567   : > { %v6633_v45 = vmax.f32 %v1960_v39, 0.0  ;;  %v1947_v41 = vmul.f32 %v4992_v49, %v1933_v40 }
 0x568   : > { %v5710_v42 = vpop.eup %5709 }
 0x569   : > { %v2004_v18 = vsel %vm1301_vm6, %v6633_v45, 0.0  ;;  %v1961_v44 = vadd.f32 %v4993_v24, %v1947_v41  ;;  %v1939_v47 = vmul.f32 %v5710_v42, %v6600_v33 }
 0x56a   : > { %2005 = vadd.xlane.f32.xlu0 %v2004_v18 }
 0x56b   : > { %v6638_v48 = vmax.f32 %v1961_v44, 0.0  ;;  %v1953_v50 = vmul.f32 %v4992_v49, %v1939_v47 }
 0x56c   : > { %v5712_v52 = vpop.eup %5711 }
 0x56d   : > { %v5714_v54 = vpop.eup %5713  ;;  %v2007_v22 = vsel %vm1301_vm6, %v6638_v48, 0.0  ;;  %v1967_v58 = vadd.f32 %v4993_v24, %v1953_v50  ;;  %v1935_v63 = vmul.f32 %v5712_v52, %v6607_v51 }
 0x56e   : > { %2008 = vadd.xlane.f32.xlu0 %v2007_v22  ;;  %v1936_v62 = vmul.f32 %v5714_v54, %v6598_v32 }
 0x56f   : > { %v6644_v60 = vmax.f32 %v1967_v58, 0.0  ;;  %v1949_v57 = vmul.f32 %v4992_v49, %v1935_v63 }
 0x570   : > { %v5716_v61 = vpop.eup %5715  ;;  %v1950_v33 = vmul.f32 %v4992_v49, %v1936_v62 }
 0x571   : > { %v5718_v1 = vpop.eup %5717  ;;  %v2025_v3 = vsel %vm1301_vm6, %v6644_v60, 0.0  ;;  %v1963_v4 = vadd.f32 %v4993_v24, %v1949_v57  ;;  %v1937_v5 = vmul.f32 %v5716_v61, %v6614_v43 }
 0x572   : > { %2026 = vadd.xlane.f32.xlu1 %v2025_v3  ;;  %v1964_v7 = vadd.f32 %v4993_v24, %v1950_v33  ;;  %v1938_v10 = vmul.f32 %v5718_v1, %v6605_v38 }
 0x573   : > { %v6650_v51 = vmax.f32 %v1963_v4, 0.0  ;;  %v1951_v11 = vmul.f32 %v4992_v49, %v1937_v5 }
 0x574   : > { %v6652_v32 = vmax.f32 %v1964_v7, 0.0  ;;  %v1952_v9 = vmul.f32 %v4992_v49, %v1938_v10 }
 0x575   : > { %v2013_v35 = vsel %vm1301_vm6, %v6650_v51, 0.0  ;;  %v1965_v13 = vadd.f32 %v4993_v24, %v1951_v11 }
 0x576   : > { %2014 = vadd.xlane.f32.xlu0 %v2013_v35  ;;  %v2016_v15 = vsel %vm1301_vm6, %v6652_v32, 0.0  ;;  %v1966_v17 = vadd.f32 %v4993_v24, %v1952_v9 }
 0x577   : > { %2017 = vadd.xlane.f32.xlu1 %v2016_v15  ;;  %v6658_v43 = vmax.f32 %v1965_v13, 0.0 }
 0x578   : > { %v6660_v59 = vmax.f32 %v1966_v17, 0.0 }
 0x579   : > { %v2019_v38 = vsel %vm1301_vm6, %v6658_v43, 0.0 }
 0x57a   : > { %2020 = vadd.xlane.f32.xlu0 %v2019_v38  ;;  %v2022_v49 = vsel %vm1301_vm6, %v6660_v59, 0.0 }
 0x57b   : > { %2023 = vadd.xlane.f32.xlu1 %v2022_v49 }
 0x5ef   : > { %v2012_v21 = vpop.xlane.xlu1 %2011 }
 0x5f0   : > { %v2030_v37 = vmul.f32 0.03125, %v2012_v21 }
 0x5f2   : > { %v6667_v23 = vsub.f32 %v6628_v34, %v2030_v37 }
 0x5f3   : > { %v2006_v46 = vpop.xlane.xlu0 %2005 }
 0x5f4   : > { %v2028_v24 = vmul.f32 0.03125, %v2006_v46  ;;  %v2046_v26 = vmul.f32 %v6667_v23, %v6667_v23 }
 0x5f6   : > { %v6672_v0 = vsub.f32 %v6633_v45, %v2028_v24  ;;  %v2058_v28 = vsel %vm1301_vm6, %v2046_v26, 0.0 }
 0x5f7   : > { %v2009_v30 = vpop.xlane.xlu0 %2008  ;;  %2059 = vadd.xlane.f32.xlu1 %v2058_v28 }
 0x5f8   : > { %v2029_v31 = vmul.f32 0.03125, %v2009_v30  ;;  %v2044_v12 = vmul.f32 %v6672_v0, %v6672_v0 }
 0x5fa   : > { %v6678_v25 = vsub.f32 %v6638_v48, %v2029_v31  ;;  %v2052_v29 = vsel %vm1301_vm6, %v2044_v12, 0.0 }
 0x5fb   : > { %2053 = vadd.xlane.f32.xlu0 %v2052_v29  ;;  %v2027_v36 = vpop.xlane.xlu1 %2026 }
 0x5fc   : > { %v2035_v14 = vmul.f32 0.03125, %v2027_v36  ;;  %v2045_v39 = vmul.f32 %v6678_v25, %v6678_v25 }
 0x5fe   : > { %v6684_v40 = vsub.f32 %v6644_v60, %v2035_v14  ;;  %v2055_v41 = vsel %vm1301_vm6, %v2045_v39, 0.0  ;;  %v6715_v14 = vld [vmem:[%s7766_s19] ss:$0 sm:$0xff] }
 0x5ff   : > { %2056 = vadd.xlane.f32.xlu0 %v2055_v41  ;;  %v2015_v42 = vpop.xlane.xlu0 %2014 }
 0x600   : > { %v2031_v18 = vmul.f32 0.03125, %v2015_v42  ;;  %v2018_v44 = vpop.xlane.xlu1 %2017  ;;  %v2051_v47 = vmul.f32 %v6684_v40, %v6684_v40 }
 0x601   : > { %v2032_v50 = vmul.f32 0.03125, %v2018_v44 }
 0x602   : > { %v6690_v52 = vsub.f32 %v6650_v51, %v2031_v18  ;;  %v2073_v54 = vsel %vm1301_vm6, %v2051_v47, 0.0 }
 0x603   : > { %v6694_v22 = vsub.f32 %v6652_v32, %v2032_v50  ;;  %v2021_v58 = vpop.xlane.xlu0 %2020  ;;  %2074 = vadd.xlane.f32.xlu1 %v2073_v54 }
 0x604   : > { %v2033_v63 = vmul.f32 0.03125, %v2021_v58  ;;  %v2024_v62 = vpop.xlane.xlu1 %2023  ;;  %v2047_v57 = vmul.f32 %v6690_v52, %v6690_v52 }
 0x605   : > { %v2034_v61 = vmul.f32 0.03125, %v2024_v62  ;;  %v2048_v33 = vmul.f32 %v6694_v22, %v6694_v22 }
 0x606   : > { %v6701_v1 = vsub.f32 %v6658_v43, %v2033_v63  ;;  %v2061_v3 = vsel %vm1301_vm6, %v2047_v57, 0.0  ;;  %v6720_v63 = vld [vmem:[%s7765_s24] ss:$0 sm:$0xff] }
 0x607   : > { %v6705_v4 = vsub.f32 %v6660_v59, %v2034_v61  ;;  %2062 = vadd.xlane.f32.xlu0 %v2061_v3  ;;  %v2064_v5 = vsel %vm1301_vm6, %v2048_v33, 0.0 }
 0x608   : > { %2065 = vadd.xlane.f32.xlu1 %v2064_v5  ;;  %v2049_v7 = vmul.f32 %v6701_v1, %v6701_v1  ;;  %v6726_v5 = vsub.s32 1, %v6235_v6 }
 0x609   : > { %v2050_v10 = vmul.f32 %v6705_v4, %v6705_v4 }
 0x60a   : > { %v2067_v11 = vsel %vm1301_vm6, %v2049_v7, 0.0 }
 0x60b   : > { %2068 = vadd.xlane.f32.xlu0 %v2067_v11  ;;  %v2070_v9 = vsel %vm1301_vm6, %v2050_v10, 0.0  ;;  %v1978_v11 = vld [vmem:[%s6080_s30] sm:$0x7] }
 0x60c   : > { %2071 = vadd.xlane.f32.xlu1 %v2070_v9 }
 0x680   : > { %v2060_v35 = vpop.xlane.xlu1 %2059 }
 0x681   : > { %v2078_v13 = vmul.f32 0.03125, %v2060_v35  ;;  %v6736_v35 = vsub.s32 2, %v6235_v6 }
 0x683   : > { %v2086_v15 = vadd.f32 1e-05, %v2078_v13 }
 0x684   : > { %v2054_v17 = vpop.xlane.xlu0 %2053 }
 0x685   : > { %5719 = vrsqrt.f32 %v2086_v15  ;;  %v2076_v38 = vmul.f32 0.03125, %v2054_v17 }
 0x687   : > { %v2084_v49 = vadd.f32 1e-05, %v2076_v38  ;;  %v6743_v38 = vrot.slane %v1978_v11, %v6726_v5 }
 0x688   : > { %v2057_v21 = vpop.xlane.xlu0 %2056 }
 0x689   : > { %5721 = vrsqrt.f32 %v2084_v49  ;;  %v2077_v37 = vmul.f32 0.03125, %v2057_v21 }
 0x68b   : > { %v2085_v46 = vadd.f32 1e-05, %v2077_v37 }
 0x68c   : > { %v2075_v24 = vpop.xlane.xlu1 %2074 }
 0x68d   : > { %5723 = vrsqrt.f32 %v2085_v46  ;;  %v2083_v26 = vmul.f32 0.03125, %v2075_v24  ;;  %v6753_v24 = vrot.slane %v1978_v11, %v6736_v35 }
 0x68f   : > { %v2091_v28 = vadd.f32 1e-05, %v2083_v26 }
 0x690   : > { %v2063_v30 = vpop.xlane.xlu0 %2062 }
 0x691   : > { %5725 = vrsqrt.f32 %v2091_v28  ;;  %v2079_v31 = vmul.f32 0.03125, %v2063_v30  ;;  %v2066_v12 = vpop.xlane.xlu1 %2065 }
 0x692   : > { %v5720_v29 = vpop.eup %5719  ;;  %v2080_v36 = vmul.f32 0.03125, %v2066_v12 }
 0x693   : > { %v2102_v39 = vmul.f32 %v5720_v29, %v6667_v23  ;;  %v2087_v41 = vadd.f32 1e-05, %v2079_v31 }
 0x694   : > { %v2088_v42 = vadd.f32 1e-05, %v2080_v36  ;;  %v2069_v18 = vpop.xlane.xlu0 %2068 }
 0x695   : > { %5727 = vrsqrt.f32 %v2087_v41  ;;  %v2081_v44 = vmul.f32 0.03125, %v2069_v18  ;;  %v2072_v47 = vpop.xlane.xlu1 %2071  ;;  %v2116_v54 = vmul.f32 %v6715_v14, %v2102_v39 }
 0x696   : > { %v5722_v50 = vpop.eup %5721  ;;  %5729 = vrsqrt.f32 %v2088_v42  ;;  %v2082_v58 = vmul.f32 0.03125, %v2072_v47 }
 0x697   : > { %v2100_v62 = vmul.f32 %v5722_v50, %v6672_v0  ;;  %v2089_v57 = vadd.f32 1e-05, %v2081_v44  ;;  %v2130_v3 = vadd.f32 %v6720_v63, %v2116_v54  ;;  %v6733_v0 = vsub.s32 0, %v6235_v6 }
 0x698   : > { %v2090_v61 = vadd.f32 1e-05, %v2082_v58 }
 0x699   : > { %v2114_v23 = vmul.f32 %v6715_v14, %v2100_v62  ;;  %5731 = vrsqrt.f32 %v2089_v57  ;;  %v2138_v17 = vmul.f32 %v2130_v3, %v6386_v55  ;;  %v6750_v46 = vrot.slane %v1978_v11, %v6733_v0 }
 0x69a   : > { %v5724_v33 = vpop.eup %5723  ;;  %5733 = vrsqrt.f32 %v2090_v61 }
 0x69b   : > { %v2128_v7 = vadd.f32 %v6720_v63, %v2114_v23  ;;  %v2101_v10 = vmul.f32 %v5724_v33, %v6678_v25  ;;  %v2170_v30 = vrot.slane %v2138_v17, 1  ;;  %v2146_v31 = vrot.slane %v2138_v17, 7 }
 0x69c   : > { %v2210_v12 = vmul.f32 %v6743_v38, %v2138_v17 }
 0x69d   : > { %v2115_v9 = vmul.f32 %v6715_v14, %v2101_v10  ;;  %v6739_v15 = vmul.f32 %v2128_v7, %v6384_v56 }
 0x69e   : > { %v5726_v13 = vpop.eup %5725 }
 0x69f   : > { %v2107_v25 = vmul.f32 %v5726_v13, %v6684_v40  ;;  %v2129_v49 = vadd.f32 %v6720_v63, %v2115_v9  ;;  %v2144_v28 = vrot.slane %v6739_v15, 7  ;;  %v2168_v44 = vrot.slane %v6739_v15, 1 }
 0x6a0   : > { %v2208_v47 = vmul.f32 %v6743_v38, %v6739_v15 }
 0x6a1   : > { %v2121_v21 = vmul.f32 %v6715_v14, %v2107_v25  ;;  %v2137_v37 = vmul.f32 %v2129_v49, %v6381_v53 }
 0x6a2   : > { %v5728_v26 = vpop.eup %5727 }
 0x6a3   : > { %v5730_v40 = vpop.eup %5729  ;;  %v2135_v29 = vadd.f32 %v6720_v63, %v2121_v21  ;;  %v2103_v36 = vmul.f32 %v5728_v26, %v6690_v52  ;;  %v2145_v39 = vrot.slane %v2137_v37, 7  ;;  %v2169_v41 = vrot.slane %v2137_v37, 1  ;;  %v6789_v21 = vld [vmem:[%s7779_s13] ss:$0 sm:$0xff] }
 0x6a4   : > { %v2104_v42 = vmul.f32 %v5730_v40, %v6694_v22  ;;  %v2209_v18 = vmul.f32 %v6743_v38, %v2137_v37 }
 0x6a5   : > { %v6765_v50 = vmul.f32 %v2135_v29, %v6408_v27  ;;  %v2117_v54 = vmul.f32 %v6715_v14, %v2103_v36  ;;  %v2158_v58 = vsel %vm1131_vm1, %v2144_v28, %v2145_v39  ;;  %v2181_v52 = vsel %vm1187_vm0, %v2169_v41, %v2170_v30 }
 0x6a6   : > { %v5732_v22 = vpop.eup %5731  ;;  %v2118_v62 = vmul.f32 %v6715_v14, %v2104_v42  ;;  %v2197_v57 = vmul.f32 %v6750_v46, %v2158_v58  ;;  %v2229_v61 = vmul.f32 %v6753_v24, %v2181_v52  ;;  %v2182_v23 = vsel %vm1187_vm0, %v2168_v44, %v2169_v41 }
 0x6a7   : > { %v5734_v33 = vpop.eup %5733  ;;  %v2105_v3 = vmul.f32 %v5732_v22, %v6701_v1  ;;  %v2151_v7 = vrot.slane %v6765_v50, 7  ;;  %v2228_v10 = vmul.f32 %v6753_v24, %v2182_v23  ;;  %v2131_v11 = vadd.f32 %v6720_v63, %v2117_v54 }
 0x6a8   : > { %v2132_v9 = vadd.f32 %v6720_v63, %v2118_v62  ;;  %v2106_v13 = vmul.f32 %v5734_v33, %v6705_v4  ;;  %v2217_v17 = vadd.f32 %v2209_v18, %v2197_v57  ;;  %v2157_v25 = vsel %vm1131_vm1, %v2145_v39, %v2146_v31 }
 0x6a9   : > { %v2119_v49 = vmul.f32 %v6715_v14, %v2105_v3  ;;  %v2159_v1 = vsel %vm1131_vm1, %v2151_v7, %v2144_v28  ;;  %v2139_v37 = vmul.f32 %v2131_v11, %v6391_v2  ;;  %v2198_v26 = vmul.f32 %v6750_v46, %v2157_v25 }
 0x6aa   : > { %v2120_v40 = vmul.f32 %v6715_v14, %v2106_v13  ;;  %v2237_v4 = vadd.f32 %v2229_v61, %v2217_v17  ;;  %v2160_v29 = vsel %vm1147_vm4, 0.0, %v2159_v1  ;;  %v2140_v36 = vmul.f32 %v2132_v9, %v6395_v8 }
 0x6ab   : > { %v2196_v39 = vmul.f32 %v6750_v46, %v2160_v29  ;;  %v2147_v41 = vrot.slane %v2139_v37, 7  ;;  %v2171_v42 = vrot.slane %v2139_v37, 1  ;;  %v2211_v18 = vmul.f32 %v6743_v38, %v2139_v37 }
 0x6ac   : > { %v2134_v28 = vadd.f32 %v6720_v63, %v2120_v40  ;;  %v2251_v54 = vadd.f32 %v6789_v21, %v2237_v4  ;;  %v2172_v58 = vrot.slane %v2140_v36, 1  ;;  %v2218_v52 = vadd.f32 %v2210_v12, %v2198_v26 }
 0x6ad   : > { %v2216_v22 = vadd.f32 %v2208_v47, %v2196_v39  ;;  %v2156_v14 = vsel %vm1131_vm1, %v2146_v31, %v2147_v41  ;;  %v2180_v62 = vsel %vm1187_vm0, %v2170_v30, %v2171_v42  ;;  %v2133_v57 = vadd.f32 %v6720_v63, %v2119_v49 }
 0x6ae   : > { %v6811_v61 = vadd.f32 %v2251_v54, %v6638_v48  ;;  %v2179_v23 = vsel %vm1187_vm0, %v2171_v42, %v2172_v58  ;;  %v2199_v33 = vmul.f32 %v6750_v46, %v2156_v14  ;;  %v2230_v3 = vmul.f32 %v6753_v24, %v2180_v62 }
 0x6af   : > { %v2236_v12 = vadd.f32 %v2228_v10, %v2216_v22  ;;  %v2231_v47 = vmul.f32 %v6753_v24, %v2179_v23  ;;  %v2141_v31 = vmul.f32 %v2133_v57, %v6400_v16  ;;  %v2142_v11 = vmul.f32 %v2134_v28, %v6403_v19 }
 0x6b0   : > { %v2269_v63 = vsel %vm1301_vm6, %v6811_v61, 0.0  ;;  %v2219_v30 = vadd.f32 %v2211_v18, %v2199_v33  ;;  %v2238_v48 = vadd.f32 %v2230_v3, %v2218_v52  ;;  %v2148_v9 = vrot.slane %v2140_v36, 7 }
 0x6b1   : > { %2270 = vadd.xlane.f32.xlu1 %v2269_v63  ;;  %v2250_v13 = vadd.f32 %v6789_v21, %v2236_v12  ;;  %v2149_v17 = vrot.slane %v2141_v31, 7  ;;  %v2173_v25 = vrot.slane %v2141_v31, 1  ;;  %v2174_v49 = vrot.slane %v2142_v11, 1 }
 0x6b2   : > { %v2239_v1 = vadd.f32 %v2231_v47, %v2219_v30  ;;  %v2252_v10 = vadd.f32 %v6789_v21, %v2238_v48  ;;  %v2155_v37 = vsel %vm1131_vm1, %v2147_v41, %v2148_v9  ;;  %v2213_v41 = vmul.f32 %v6743_v38, %v2141_v31 }
 0x6b3   : > { %v6827_v26 = vadd.f32 %v2250_v13, %v6633_v45  ;;  %v2154_v40 = vsel %vm1131_vm1, %v2148_v9, %v2149_v17  ;;  %v2177_v4 = vsel %vm1187_vm0, %v2173_v25, %v2174_v49  ;;  %v2178_v29 = vsel %vm1187_vm0, %v2172_v58, %v2173_v25 }
 0x6b4   : > { %v2253_v39 = vadd.f32 %v6789_v21, %v2239_v1  ;;  %v6837_v42 = vadd.f32 %v2252_v10, %v6628_v34  ;;  %v2201_v18 = vmul.f32 %v6750_v46, %v2154_v40  ;;  %v2200_v28 = vmul.f32 %v6750_v46, %v2155_v37 }
 0x6b5   : > { %v2266_v45 = vsel %vm1301_vm6, %v6827_v26, 0.0  ;;  %v2212_v54 = vmul.f32 %v6743_v38, %v2140_v36  ;;  %v2232_v52 = vmul.f32 %v6753_v24, %v2178_v29  ;;  %v2233_v34 = vmul.f32 %v6753_v24, %v2177_v4  ;;  %v2703_v4 = vld [vmem:[#allocation3 + $0x21] ss:$2 sm:$0xff]  ;;  %v2705_v29 = vld [vmem:[#allocation3 + $0x31] ss:$2 sm:$0xff] }
 0x6b6   : > { %2267 = vadd.xlane.f32.xlu0 %v2266_v45  ;;  %v6847_v58 = vadd.f32 %v2253_v39, %v6650_v51  ;;  %v2221_v22 = vadd.f32 %v2213_v41, %v2201_v18  ;;  %v2150_v14 = vrot.slane %v2142_v11, 7  ;;  %v2272_v62 = vsel %vm1301_vm6, %v6837_v42, 0.0  ;;  %v2697_v18 = vld [vmem:[#allocation3 + $0x30] ss:$2 sm:$0xff]  ;;  %v2699_v45 = vld [vmem:[#allocation3 + $0x1] ss:$2 sm:$0xff] }
 0x6b7   : > { %v2220_v57 = vadd.f32 %v2212_v54, %v2200_v28  ;;  %v2175_v23 = vrot.slane %v6765_v50, 1  ;;  %v2215_v33 = vmul.f32 %v6743_v38, %v6765_v50  ;;  %v2214_v9 = vmul.f32 %v6743_v38, %v2142_v11  ;;  %v2693_v28 = vld [vmem:[#allocation3 + $0x10] ss:$2 sm:$0xff]  ;;  %v2701_v54 = vld [vmem:[#allocation3 + $0x11] ss:$2 sm:$0xff] }
 0x6b8   : > { %v2275_v36 = vsel %vm1301_vm6, %v6847_v58, 0.0  ;;  %v2241_v3 = vadd.f32 %v2233_v34, %v2221_v22  ;;  %v2152_v51 = vsel %vm1131_vm1, %v2150_v14, %v2151_v7  ;;  %v2153_v12 = vsel %vm1131_vm1, %v2149_v17, %v2150_v14  ;;  %v2691_v34 = vld [vmem:[#allocation3] ss:$2 sm:$0xff] }
 0x6b9   : > { %2276 = vadd.xlane.f32.xlu1 %v2275_v36  ;;  %v2240_v47 = vadd.f32 %v2232_v52, %v2220_v57  ;;  %v2183_v31 = vsel %vm1187_vm0, %v2175_v23, %v2168_v44  ;;  %v2203_v63 = vmul.f32 %v6750_v46, %v2152_v51  ;;  %v2176_v30 = vsel %vm1187_vm0, %v2174_v49, %v2175_v23  ;;  %v2695_v36 = vld [vmem:[#allocation3 + $0x20] ss:$2 sm:$0xff] }
 0x6ba   : > { %2273 = vadd.xlane.f32.xlu0 %v2272_v62  ;;  %v2255_v50 = vadd.f32 %v6789_v21, %v2241_v3  ;;  %v2191_v7 = vsel %vm1203_vm2, 0.0, %v2183_v31  ;;  %v2202_v48 = vmul.f32 %v6750_v46, %v2153_v12  ;;  %v2234_v49 = vmul.f32 %v6753_v24, %v2176_v30 }
 0x6bb   : > { %v2254_v15 = vadd.f32 %v6789_v21, %v2240_v47  ;;  %v2223_v13 = vadd.f32 %v2215_v33, %v2203_v63  ;;  %v2235_v44 = vmul.f32 %v6753_v24, %v2191_v7  ;;  %v2708_v39 = vrot.slane %v2703_v4, 7 }
 0x6bc   : > { %v6878_v17 = vadd.f32 %v2255_v50, %v6658_v43  ;;  %v2222_v25 = vadd.f32 %v2214_v9, %v2202_v48  ;;  %v2709_v41 = vrot.slane %v2705_v29, 7  ;;  %v2706_v52 = vrot.slane %v2699_v45, 7 }
 0x6bd   : > { %v6882_v1 = vadd.f32 %v2254_v15, %v6652_v32  ;;  %v2243_v20 = vadd.f32 %v2235_v44, %v2223_v13  ;;  %v2707_v22 = vrot.slane %v2701_v54, 7  ;;  %vm4150_vm2 = vcmask 1047554  }
 0x6be   : > { %v2281_v46 = vsel %vm1301_vm6, %v6878_v17, 0.0  ;;  %v2242_v10 = vadd.f32 %v2234_v49, %v2222_v25  ;;  %v2713_v62 = vsel %vm1131_vm1, %v2709_v41, %v2706_v52 }
 0x6bf   : > { %2282 = vadd.xlane.f32.xlu1 %v2281_v46  ;;  %v2278_v38 = vsel %vm1301_vm6, %v6882_v1, 0.0  ;;  %v2257_v11 = vadd.f32 %v6789_v21, %v2243_v20  ;;  %v2712_v14 = vsel %vm1131_vm1, %v2706_v52, %v2707_v22  ;;  %v2714_v23 = vsel %vm1147_vm4, 0.0, %v2713_v62 }
 0x6c0   : > { %2279 = vadd.xlane.f32.xlu0 %v2278_v38  ;;  %v2256_v43 = vadd.f32 %v6789_v21, %v2242_v10  ;;  %v2719_v57 = vmax.f32 %v2712_v14, %v2693_v28  ;;  %v2718_v33 = vmax.f32 %v2714_v23, %v2691_v34  ;;  %v2711_v3 = vsel %vm1131_vm1, %v2707_v22, %v2708_v39 }
 0x6c1   : > { %v6891_v32 = vadd.f32 %v2257_v11, %v6644_v60  ;;  %v2710_v60 = vsel %vm1131_vm1, %v2708_v39, %v2709_v41  ;;  %v2720_v12 = vmax.f32 %v2711_v3, %v2695_v36 }
 0x6c2   : > { %v6894_v24 = vadd.f32 %v2256_v43, %v6660_v59  ;;  %v2721_v21 = vmax.f32 %v2710_v60, %v2697_v18  ;;  %v2723_v51 = vmax.f32 %v2719_v57, %v2701_v54  ;;  %v6920_v47 = vmax.f32 %v2718_v33, %v2699_v45 }
 0x6c3   : > { %v2287_v37 = vsel %vm1301_vm6, %v6891_v32, 0.0  ;;  %v6924_v31 = vmax.f32 %v2720_v12, %v2703_v4 }
 0x6c4   : > { %2288 = vadd.xlane.f32.xlu1 %v2287_v37  ;;  %v2284_v40 = vsel %vm1301_vm6, %v6894_v24, 0.0  ;;  %v6906_v59 = vmax.f32 %v2721_v21, %v2705_v29  ;;  %3232 = vst.msk [vmem:[%s1077_s5 + $0x8] sm:$0xff] %vm2666_vm3, %v2723_v51  ;;  %3240 = vst.msk [vmem:[#allocation3 + $0x8] sm:$0xff] %vm2666_vm3, %v2723_v51 }
 0x6c5   : > { %2285 = vadd.xlane.f32.xlu0 %v2284_v40  ;;  %3231 = vst.msk [vmem:[%s1077_s5] sm:$0xff] %vm2666_vm3, %v6920_v47  ;;  %3239 = vst.msk [vmem:[#allocation3] sm:$0xff] %vm2666_vm3, %v6920_v47 }
 0x6c6   : > { %3234 = vst.msk [vmem:[%s1077_s5 + $0x18] sm:$0xff] %vm2666_vm3, %v6906_v59  ;;  %3242 = vst.msk [vmem:[#allocation3 + $0x18] sm:$0xff] %vm2666_vm3, %v6906_v59 }
 0x6c7   : > { %3233 = vst.msk [vmem:[%s1077_s5 + $0x10] sm:$0xff] %vm2666_vm3, %v6924_v31  ;;  %3241 = vst.msk [vmem:[#allocation3 + $0x10] sm:$0xff] %vm2666_vm3, %v6924_v31  ;;  %s7782_s5 = sld [smem:[#allocation25_spill]] }
 0x73a   : > { %v2271_v63 = vpop.xlane.xlu1 %2270 }
 0x73b   : > { %v2291_v30 = vmul.f32 0.03125, %v2271_v63  ;;  %v1984_v63 = vld [vmem:[%s7781_s1 + $0x10] sm:$0xff] }
 0x73d   : > { %v6935_v50 = vsub.f32 %v6811_v61, %v2291_v30  ;;  %v1985_v30 = vld [vmem:[%s7781_s1 + $0x18] sm:$0xff] }
 0x73f   : > { %v2268_v7 = vpop.xlane.xlu0 %2267  ;;  %v2307_v48 = vmul.f32 %v6935_v50, %v6935_v50 }
 0x740   : > { %v2290_v9 = vmul.f32 0.03125, %v2268_v7  ;;  %v1982_v7 = vld [vmem:[%s7781_s1] sm:$0xff] }
 0x741   : > { %v2317_v15 = vsel %vm1301_vm6, %v2307_v48, 0.0  ;;  %v2403_v48 = vpack.c.bf16 %v1985_v30, %v1984_v63  ;;  %v4998_v63 = vld [vmem:[%s7783_s10] ss:$0 sm:$0xff] }
 0x742   : > { %v6941_v13 = vsub.f32 %v6827_v26, %v2290_v9  ;;  %2318 = vadd.xlane.f32.xlu1 %v2317_v15  ;;  %v2277_v44 = vpop.xlane.xlu1 %2276  ;;  %v1983_v9 = vld [vmem:[%s7781_s1 + $0x8] sm:$0xff] }
 0x743   : > { %v2293_v25 = vmul.f32 0.03125, %v2277_v44  ;;  %v2274_v49 = vpop.xlane.xlu0 %2273  ;;  %v2402_v15 = vpack.c.bf16 %v1983_v9, %v1982_v7  ;;  %5336 = vmatprep.subr.bf16.mxu0 %v2403_v48 }
 0x744   : > { %v2292_v20 = vmul.f32 0.03125, %v2274_v49  ;;  %v2306_v46 = vmul.f32 %v6941_v13, %v6941_v13  ;;  %5337 = vmatpush3.bf16.msra.mxu0 %v2403_v48 }
 0x745   : > { %v6946_v10 = vsub.f32 %v6847_v58, %v2293_v25  ;;  %5338 = vmatprep.subr.bf16.mxu0 %v2402_v15 }
 0x746   : > { %v6949_v38 = vsub.f32 %v6837_v42, %v2292_v20  ;;  %v2314_v11 = vsel %vm1301_vm6, %v2306_v46, 0.0 }
 0x747   : > { %2315 = vadd.xlane.f32.xlu0 %v2314_v11  ;;  %v2309_v43 = vmul.f32 %v6946_v10, %v6946_v10 }
 0x748   : > { %v2283_v37 = vpop.xlane.xlu1 %2282  ;;  %v2308_v40 = vmul.f32 %v6949_v38, %v6949_v38  ;;  %5339 = vmatpush3.bf16.msra.mxu0 %v2402_v15 }
 0x749   : > { %v2295_v4 = vmul.f32 0.03125, %v2283_v37  ;;  %v2280_v29 = vpop.xlane.xlu0 %2279  ;;  %v2323_v39 = vsel %vm1301_vm6, %v2309_v43, 0.0 }
 0x74a   : > { %v2294_v18 = vmul.f32 0.03125, %v2280_v29  ;;  %2324 = vadd.xlane.f32.xlu1 %v2323_v39  ;;  %v2320_v41 = vsel %vm1301_vm6, %v2308_v40, 0.0 }
 0x74b   : > { %v6959_v60 = vsub.f32 %v6878_v17, %v2295_v4  ;;  %2321 = vadd.xlane.f32.xlu0 %v2320_v41 }
 0x74c   : > { %v6962_v21 = vsub.f32 %v6882_v1, %v2294_v18 }
 0x74d   : > { %v2289_v45 = vpop.xlane.xlu1 %2288  ;;  %v2311_v28 = vmul.f32 %v6959_v60, %v6959_v60 }
 0x74e   : > { %v2297_v54 = vmul.f32 0.03125, %v2289_v45  ;;  %v2286_v52 = vpop.xlane.xlu0 %2285  ;;  %v2310_v22 = vmul.f32 %v6962_v21, %v6962_v21 }
 0x74f   : > { %v2296_v34 = vmul.f32 0.03125, %v2286_v52  ;;  %v2329_v14 = vsel %vm1301_vm6, %v2311_v28, 0.0 }
 0x750   : > { %v6970_v62 = vsub.f32 %v6891_v32, %v2297_v54  ;;  %2330 = vadd.xlane.f32.xlu1 %v2329_v14  ;;  %v2326_v57 = vsel %vm1301_vm6, %v2310_v22, 0.0 }
 0x751   : > { %v6974_v23 = vsub.f32 %v6894_v24, %v2296_v34  ;;  %2327 = vadd.xlane.f32.xlu0 %v2326_v57  ;;  %v4997_v34 = vld [vmem:[%s7782_s5] ss:$0 sm:$0xff] }
 0x752   : > { %v2313_v33 = vmul.f32 %v6970_v62, %v6970_v62 }
 0x753   : > { %v2312_v36 = vmul.f32 %v6974_v23, %v6974_v23 }
 0x754   : > { %v2335_v3 = vsel %vm1301_vm6, %v2313_v33, 0.0 }
 0x755   : > { %2336 = vadd.xlane.f32.xlu1 %v2335_v3  ;;  %v2332_v12 = vsel %vm1301_vm6, %v2312_v36, 0.0 }
 0x756   : > { %2333 = vadd.xlane.f32.xlu0 %v2332_v12 }
 0x766   : > { %2778 = vperm.xlu1 %5646, %v6906_v59  }
 0x76a   : > { %2768 = vperm.xlu1 %5646, %v2723_v51  }
 0x76c   : > { %2763 = vperm.xlu0 %5645, %v6920_v47  }
 0x770   : > { %2773 = vperm.xlu0 %5645, %v6924_v31  }
 0x7cb   : > { %v2319_v44 = vpop.xlane.xlu1 %2318 }
 0x7cc   : > { %v2339_v25 = vmul.f32 0.03125, %v2319_v44 }
 0x7ce   : > { %v2347_v49 = vadd.f32 1e-05, %v2339_v25 }
 0x7d0   : > { %5735 = vrsqrt.f32 %v2347_v49  ;;  %v2316_v59 = vpop.xlane.xlu0 %2315 }
 0x7d1   : > { %v2338_v20 = vmul.f32 0.03125, %v2316_v59 }
 0x7d3   : > { %v2346_v46 = vadd.f32 1e-05, %v2338_v20  ;;  %v2325_v11 = vpop.xlane.xlu1 %2324 }
 0x7d4   : > { %v2341_v51 = vmul.f32 0.03125, %v2325_v11  ;;  %v2322_v43 = vpop.xlane.xlu0 %2321 }
 0x7d5   : > { %5737 = vrsqrt.f32 %v2346_v46  ;;  %v2340_v37 = vmul.f32 0.03125, %v2322_v43 }
 0x7d6   : > { %v2349_v40 = vadd.f32 1e-05, %v2341_v51 }
 0x7d7   : > { %v2348_v47 = vadd.f32 1e-05, %v2340_v37 }
 0x7d8   : > { %5739 = vrsqrt.f32 %v2349_v40 }
 0x7d9   : > { %5741 = vrsqrt.f32 %v2348_v47  ;;  %v2331_v4 = vpop.xlane.xlu1 %2330 }
 0x7da   : > { %v2343_v31 = vmul.f32 0.03125, %v2331_v4  ;;  %v2328_v29 = vpop.xlane.xlu0 %2327 }
 0x7db   : > { %v2342_v39 = vmul.f32 0.03125, %v2328_v29 }
 0x7dc   : > { %v2351_v18 = vadd.f32 1e-05, %v2343_v31 }
 0x7dd   : > { %v5736_v41 = vpop.eup %5735  ;;  %v2350_v45 = vadd.f32 1e-05, %v2342_v39 }
 0x7de   : > { %5743 = vrsqrt.f32 %v2351_v18  ;;  %v2337_v28 = vpop.xlane.xlu1 %2336  ;;  %v2363_v22 = vmul.f32 %v5736_v41, %v6935_v50 }
 0x7df   : > { %5745 = vrsqrt.f32 %v2350_v45  ;;  %v2345_v54 = vmul.f32 0.03125, %v2337_v28  ;;  %v2334_v52 = vpop.xlane.xlu0 %2333 }
 0x7e0   : > { %v2344_v14 = vmul.f32 0.03125, %v2334_v52  ;;  %v2377_v12 = vmul.f32 %v4997_v34, %v2363_v22  ;;  %v2002_v52 = vld [vmem:[%s7784_s3 + $0x78] sm:$0xff]  ;;  %v2000_v22 = vld [vmem:[%s7784_s3 + $0x68] sm:$0xff] }
 0x7e1   : > { %v2353_v57 = vadd.f32 1e-05, %v2345_v54  ;;  %v2001_v54 = vld [vmem:[%s7784_s3 + $0x70] sm:$0xff] }
 0x7e2   : > { %v5738_v33 = vpop.eup %5737  ;;  %v2352_v36 = vadd.f32 1e-05, %v2344_v14  ;;  %v2391_v50 = vadd.f32 %v4998_v63, %v2377_v12  ;;  %v1997_v14 = vld [vmem:[%s7784_s3 + $0x50] sm:$0xff] }
 0x7e3   : > { %5747 = vrsqrt.f32 %v2353_v57  ;;  %v2362_v3 = vmul.f32 %v5738_v33, %v6941_v13  ;;  %v1998_v57 = vld [vmem:[%s7784_s3 + $0x58] sm:$0xff] }
 0x7e4   : > { %5749 = vrsqrt.f32 %v2352_v36  ;;  %v2568_v33 = vpack.c.bf16 %v1998_v57, %v1997_v14  ;;  %v1995_v36 = vld [vmem:[%s7784_s3 + $0x40] sm:$0xff] }
 0x7e5   : > { %v5740_v30 = vpop.eup %5739  ;;  %v2376_v7 = vmul.f32 %v4997_v34, %v2362_v3  ;;  %v1996_v3 = vld [vmem:[%s7784_s3 + $0x48] sm:$0xff] }
 0x7e6   : > { %v5742_v48 = vpop.eup %5741  ;;  %v2365_v9 = vmul.f32 %v5740_v30, %v6946_v10  ;;  %v2567_v12 = vpack.c.bf16 %v1996_v3, %v1995_v36  ;;  %v1994_v30 = vld [vmem:[%s7784_s3 + $0x38] sm:$0xff] }
 0x7e7   : > { %v2364_v15 = vmul.f32 %v5742_v48, %v6949_v38  ;;  %v2390_v44 = vadd.f32 %v4998_v63, %v2376_v7  ;;  %v1991_v7 = vld [vmem:[%s7784_s3 + $0x20] sm:$0xff] }
 0x7e8   : > { %v2379_v25 = vmul.f32 %v4997_v34, %v2365_v9  ;;  %v1992_v9 = vld [vmem:[%s7784_s3 + $0x28] sm:$0xff] }
 0x7e9   : > { %v2378_v49 = vmul.f32 %v4997_v34, %v2364_v15  ;;  %v2398_v59 = vpack.c.bf16 %v2391_v50, %v2390_v44  ;;  %v2565_v15 = vpack.c.bf16 %v1992_v9, %v1991_v7  ;;  %v1989_v44 = vld [vmem:[%s7784_s3 + $0x10] sm:$0xff]  ;;  %v1990_v50 = vld [vmem:[%s7784_s3 + $0x18] sm:$0xff] }
 0x7ea   : > { %v2393_v20 = vadd.f32 %v4998_v63, %v2379_v25  ;;  %v2564_v25 = vpack.c.bf16 %v1990_v50, %v1989_v44 }
 0x7eb   : > { %v5744_v46 = vpop.eup %5743  ;;  %5340 = vmatprep.mubr.msk.bf16.mxu0 %vm1301_vm6, %v2398_v59  ;;  %v2392_v13 = vadd.f32 %v4998_v63, %v2378_v49  ;;  %v1987_v49 = vld [vmem:[%s7784_s3] sm:$0xff]  ;;  %v1988_v59 = vld [vmem:[%s7784_s3 + $0x8] sm:$0xff] }
 0x7ec   : > { %v5746_v11 = vpop.eup %5745  ;;  %v2367_v51 = vmul.f32 %v5744_v46, %v6959_v60  ;;  %v4999_v46 = vld [vmem:[%s7785_s4] ss:$0 sm:$0xff] }
 0x7ed   : > { %v2399_v43 = vpack.c.bf16 %v2393_v20, %v2392_v13  ;;  %v2366_v37 = vmul.f32 %v5746_v11, %v6962_v21  ;;  %v2563_v20 = vpack.c.bf16 %v1988_v59, %v1987_v49 }
 0x7ee   : > { %v2381_v40 = vmul.f32 %v4997_v34, %v2367_v51 }
 0x7ef   : > { %5341 = vmatmul.mubr.msk.bf16.vlgmr.msra.gmra.mxu0 %vm1301_vm6, %v2399_v43  ;;  %v2380_v10 = vmul.f32 %v4997_v34, %v2366_v37 }
 0x7f0   : > { %v5748_v38 = vpop.eup %5747  ;;  %v2395_v47 = vadd.f32 %v4998_v63, %v2381_v40 }
 0x7f1   : > { %v5750_v4 = vpop.eup %5749  ;;  %v2394_v31 = vadd.f32 %v4998_v63, %v2380_v10  ;;  %v2369_v29 = vmul.f32 %v5748_v38, %v6970_v62  ;;  %v2570_v62 = vpack.c.bf16 %v2002_v52, %v2001_v54 }
 0x7f2   : > { %v2368_v39 = vmul.f32 %v5750_v4, %v6974_v23  ;;  %v1999_v23 = vld [vmem:[%s7784_s3 + $0x60] sm:$0xff] }
 0x7f3   : > { %v2400_v60 = vpack.c.bf16 %v2395_v47, %v2394_v31  ;;  %v2383_v18 = vmul.f32 %v4997_v34, %v2369_v29  ;;  %5348 = vmatprep.subr.bf16.mxu1 %v2570_v62 }
 0x7f4   : > { %v2382_v41 = vmul.f32 %v4997_v34, %v2368_v39  ;;  %5349 = vmatpush3.bf16.msra.mxu1 %v2570_v62  ;;  %v2569_v34 = vpack.c.bf16 %v2000_v22, %v1999_v23 }
 0x7f5   : > { %5344 = vmatprep.mubr.msk.bf16.mxu0 %vm1301_vm6, %v2400_v60  ;;  %v2397_v21 = vadd.f32 %v4998_v63, %v2383_v18 }
 0x7f6   : > { %v2396_v45 = vadd.f32 %v4998_v63, %v2382_v41  ;;  %5350 = vmatprep.subr.bf16.mxu1 %v2569_v34  ;;  %v1993_v63 = vld [vmem:[%s7784_s3 + $0x30] sm:$0xff] }
 0x7f7   : > { %v2566_v48 = vpack.c.bf16 %v1994_v30, %v1993_v63 }
 0x7f8   : > { %v2401_v28 = vpack.c.bf16 %v2397_v21, %v2396_v45  ;;  %5351 = vmatpush3.bf16.msra.mxu1 %v2569_v34 }
 0x7f9   : > { %5352 = vmatprep.subr.bf16.mxu1 %v2568_v33 }
 0x7fa   : > { %5345 = vmatmul.mubr.msk.bf16.gmra.mxu0 %vm1301_vm6, %v2401_v28 }
 0x7fc   : > { %5353 = vmatpush3.bf16.msra.mxu1 %v2568_v33 }
 0x7fd   : > { %5354 = vmatprep.subr.bf16.mxu1 %v2567_v12 }
 0x800   : > { %5355 = vmatpush3.bf16.msra.mxu1 %v2567_v12 }
 0x801   : > { %5356 = vmatprep.subr.bf16.mxu1 %v2566_v48 }
 0x804   : > { %5357 = vmatpush3.bf16.msra.mxu1 %v2566_v48 }
 0x805   : > { %5358 = vmatprep.subr.bf16.mxu1 %v2565_v15 }
 0x808   : > { %5359 = vmatpush3.bf16.msra.mxu1 %v2565_v15 }
 0x809   : > { %5360 = vmatprep.subr.bf16.mxu1 %v2564_v25 }
 0x80c   : > { %5361 = vmatpush3.bf16.msra.mxu1 %v2564_v25 }
 0x80d   : > { %5362 = vmatprep.subr.bf16.mxu1 %v2563_v20 }
 0x810   : > { %5363 = vmatpush3.bf16.msra.mxu1 %v2563_v20 }
 0x8af   : > { %v5342_v13 = vpop.f32.mrf.mxu0 }
 0x8b0   : > { %v7020_v11 = vadd.f32 %v5342_v13, %v4999_v46 }
 0x8b1   : > { %v2456_v51 = vpop.f32.mrf.mxu0 }
 0x8b2   : > { %v2489_v43 = vmul.f32 %v7020_v11, %v7020_v11  ;;  %v7024_v37 = vadd.f32 %v4999_v46, %v2456_v51 }
 0x8b3   : > { %v5343_v40 = vpop.f32.mrf.mxu0 }
 0x8b4   : > { %v2497_v10 = vmul.f32 %v2489_v43, %v7020_v11  ;;  %v2487_v38 = vmul.f32 %v7024_v37, %v7024_v37  ;;  %v7029_v47 = vadd.f32 %v5343_v40, %v4999_v46 }
 0x8b5   : > { %v2459_v4 = vpop.f32.mrf.mxu0 }
 0x8b6   : > { %v2505_v31 = vmul.f32 0.044715, %v2497_v10  ;;  %v2495_v29 = vmul.f32 %v2487_v38, %v7024_v37  ;;  %v2490_v39 = vmul.f32 %v7029_v47, %v7029_v47  ;;  %v7034_v60 = vadd.f32 %v4999_v46, %v2459_v4 }
 0x8b8   : > { %v2513_v18 = vadd.f32 %v2505_v31, %v7020_v11  ;;  %v2503_v41 = vmul.f32 0.044715, %v2495_v29  ;;  %v2498_v21 = vmul.f32 %v2490_v39, %v7029_v47  ;;  %v2488_v45 = vmul.f32 %v7034_v60, %v7034_v60 }
 0x8ba   : > { %v2521_v28 = vmul.f32 0.7978846, %v2513_v18  ;;  %v2511_v54 = vadd.f32 %v2503_v41, %v7024_v37  ;;  %v2506_v52 = vmul.f32 0.044715, %v2498_v21  ;;  %v2496_v62 = vmul.f32 %v2488_v45, %v7034_v60  ;;  %v5346_v23 = vpop.f32.mrf.mxu0 }
 0x8bb   : > { %v7042_v22 = vadd.f32 %v5346_v23, %v4999_v46 }
 0x8bc   : > { %v2519_v34 = vmul.f32 0.7978846, %v2511_v54  ;;  %v2514_v14 = vadd.f32 %v2506_v52, %v7029_v47  ;;  %v2504_v57 = vmul.f32 0.044715, %v2496_v62  ;;  %v2472_v33 = vpop.f32.mrf.mxu0  ;;  %5751 = vtanh.f32 %v2521_v28 }
 0x8bd   : > { %v2493_v36 = vmul.f32 %v7042_v22, %v7042_v22  ;;  %v7047_v3 = vadd.f32 %v4999_v46, %v2472_v33 }
 0x8be   : > { %5753 = vtanh.f32 %v2519_v34  ;;  %v2522_v12 = vmul.f32 0.7978846, %v2514_v14  ;;  %v2512_v63 = vadd.f32 %v2504_v57, %v7034_v60  ;;  %v5347_v30 = vpop.f32.mrf.mxu0 }
 0x8bf   : > { %v2501_v7 = vmul.f32 %v2493_v36, %v7042_v22  ;;  %v2491_v48 = vmul.f32 %v7047_v3, %v7047_v3  ;;  %v2484_v9 = vadd.f32 %v5347_v30, %v4999_v46 }
 0x8c0   : > { %5755 = vtanh.f32 %v2522_v12  ;;  %v2520_v15 = vmul.f32 0.7978846, %v2512_v63  ;;  %v2475_v44 = vpop.f32.mrf.mxu0 }
 0x8c1   : > { %v2509_v50 = vmul.f32 0.044715, %v2501_v7  ;;  %v2499_v25 = vmul.f32 %v2491_v48, %v7047_v3  ;;  %v2494_v49 = vmul.f32 %v2484_v9, %v2484_v9  ;;  %v2476_v59 = vadd.f32 %v4999_v46, %v2475_v44 }
 0x8c2   : > { %5757 = vtanh.f32 %v2520_v15 }
 0x8c3   : > { %v2517_v20 = vadd.f32 %v2509_v50, %v7042_v22  ;;  %v2507_v13 = vmul.f32 0.044715, %v2499_v25  ;;  %v2502_v51 = vmul.f32 %v2494_v49, %v2484_v9  ;;  %v2492_v43 = vmul.f32 %v2476_v59, %v2476_v59 }
 0x8c5   : > { %v2525_v40 = vmul.f32 0.7978846, %v2517_v20  ;;  %v2515_v10 = vadd.f32 %v2507_v13, %v7047_v3  ;;  %v2510_v38 = vmul.f32 0.044715, %v2502_v51  ;;  %v2500_v4 = vmul.f32 %v2492_v43, %v2476_v59 }
 0x8c7   : > { %v2523_v31 = vmul.f32 0.7978846, %v2515_v10  ;;  %v2518_v29 = vadd.f32 %v2510_v38, %v2484_v9  ;;  %v2508_v39 = vmul.f32 0.044715, %v2500_v4  ;;  %5759 = vtanh.f32 %v2525_v40 }
 0x8c9   : > { %5761 = vtanh.f32 %v2523_v31  ;;  %v2526_v18 = vmul.f32 0.7978846, %v2518_v29  ;;  %v2516_v41 = vadd.f32 %v2508_v39, %v2476_v59  ;;  %v5752_v21 = vpop.eup %5751  ;;  %v5004_v39 = vld [vmem:[%s7786_s8] ss:$0 sm:$0xff] }
 0x8ca   : > { %v2537_v52 = vadd.f32 1.0, %v5752_v21 }
 0x8cb   : > { %v5754_v46 = vpop.eup %5753  ;;  %5763 = vtanh.f32 %v2526_v18  ;;  %v2524_v45 = vmul.f32 0.7978846, %v2516_v41 }
 0x8cc   : > { %v2535_v28 = vadd.f32 1.0, %v5754_v46  ;;  %v2545_v33 = vmul.f32 0.5, %v2537_v52 }
 0x8cd   : > { %v5756_v54 = vpop.eup %5755  ;;  %5765 = vtanh.f32 %v2524_v45 }
 0x8ce   : > { %v2538_v62 = vadd.f32 1.0, %v5756_v54  ;;  %v2543_v57 = vmul.f32 0.5, %v2535_v28  ;;  %v2553_v48 = vmul.f32 %v2545_v33, %v7020_v11 }
 0x8cf   : > { %v5758_v23 = vpop.eup %5757 }
 0x8d0   : > { %v2546_v34 = vmul.f32 0.5, %v2538_v62  ;;  %v2536_v14 = vadd.f32 1.0, %v5758_v23  ;;  %v2551_v63 = vmul.f32 %v2543_v57, %v7024_v37 }
 0x8d2   : > { %v2544_v36 = vmul.f32 0.5, %v2536_v14  ;;  %v2554_v12 = vmul.f32 %v2546_v34, %v7029_v47 }
 0x8d4   : > { %v2552_v30 = vmul.f32 %v2544_v36, %v7034_v60  ;;  %v5760_v7 = vpop.eup %5759  ;;  %v2560_v50 = vpack.c.bf16 %v2554_v12, %v2553_v48 }
 0x8d5   : > { %v2541_v20 = vadd.f32 1.0, %v5760_v7 }
 0x8d6   : > { %v5762_v15 = vpop.eup %5761  ;;  %v2559_v44 = vpack.c.bf16 %v2552_v30, %v2551_v63 }
 0x8d7   : > { %v2539_v25 = vadd.f32 1.0, %v5762_v15  ;;  %v2549_v37 = vmul.f32 0.5, %v2541_v20 }
 0x8d8   : > { %v5764_v49 = vpop.eup %5763  ;;  %5364 = vmatprep.mubr.bf16.mxu1 %v2559_v44 }
 0x8d9   : > { %5365 = vmatmul.mubr.bf16.vlgmr.msra.gmra.mxu1 %v2560_v50  ;;  %v2542_v13 = vadd.f32 1.0, %v5764_v49  ;;  %v2547_v47 = vmul.f32 0.5, %v2539_v25  ;;  %v2557_v4 = vmul.f32 %v2549_v37, %v7042_v22 }
 0x8da   : > { %v5766_v51 = vpop.eup %5765 }
 0x8db   : > { %v2540_v43 = vadd.f32 1.0, %v5766_v51  ;;  %v2550_v40 = vmul.f32 0.5, %v2542_v13  ;;  %v2555_v11 = vmul.f32 %v2547_v47, %v7047_v3  ;;  %v7115_v51 = vpop.permute.xlu1 %2778 }
 0x8dd   : > { %v2548_v60 = vmul.f32 0.5, %v2540_v43  ;;  %v2558_v10 = vmul.f32 %v2550_v40, %v2484_v9 }
 0x8df   : > { %v2556_v38 = vmul.f32 %v2548_v60, %v2476_v59  ;;  %v2562_v29 = vpack.c.bf16 %v2558_v10, %v2557_v4 }
 0x8e1   : > { %v2561_v31 = vpack.c.bf16 %v2556_v38, %v2555_v11 }
 0x8e3   : > { %5368 = vmatprep.mubr.bf16.mxu1 %v2561_v31 }
 0x8e4   : > { %5369 = vmatmul.mubr.bf16.gmra.mxu1 %v2562_v29 }
 0x999   : > { %v5366_v18 = vpop.f32.mrf.mxu1 }
 0x99a   : > { %v2620_v41 = vadd.f32 %v5366_v18, %v5004_v39 }
 0x99b   : > { %v2611_v21 = vpop.f32.mrf.mxu1 }
 0x99c   : > { %v2644_v46 = vadd.f32 %v2620_v41, %v6837_v42  ;;  %v2612_v45 = vadd.f32 %v5004_v39, %v2611_v21  ;;  %v7129_v21 = vpop.permute.xlu1 %2768 }
 0x99d   : > { %v5367_v3 = vpop.f32.mrf.mxu1 }
 0x99e   : > { %v2652_v9 = vmul.f32 %v2644_v46, %v6386_v55  ;;  %v2642_v22 = vadd.f32 %v2612_v45, %v6827_v26  ;;  %v2623_v59 = vadd.f32 %v5367_v3, %v5004_v39 }
 0x99f   : > { %v2614_v28 = vpop.f32.mrf.mxu1 }
 0x9a0   : > { %2660 = vst.msk [vmem:[%s7066_s14 + $0x10] sm:$0xff] %vm1301_vm6, %v2652_v9  ;;  %2677 = vst.msk [vmem:[#allocation2 + $0x10] sm:$0xff] %vm1301_vm6, %v2652_v9  ;;  %v2650_v42 = vmul.f32 %v2642_v22, %v6384_v56  ;;  %v2645_v54 = vadd.f32 %v2623_v59, %v6847_v58  ;;  %v2615_v52 = vadd.f32 %v5004_v39, %v2614_v28 }
 0x9a2   : > { %2658 = vst.msk [vmem:[%s7066_s14] sm:$0xff] %vm1301_vm6, %v2650_v42  ;;  %2675 = vst.msk [vmem:[#allocation2] sm:$0xff] %vm1301_vm6, %v2650_v42  ;;  %v2653_v55 = vmul.f32 %v2645_v54, %v6391_v2  ;;  %v2643_v26 = vadd.f32 %v2615_v52, %v6811_v61 }
 0x9a4   : > { %2661 = vst.msk [vmem:[%s7066_s14 + $0x18] sm:$0xff] %vm1301_vm6, %v2653_v55  ;;  %2678 = vst.msk [vmem:[#allocation2 + $0x18] sm:$0xff] %vm1301_vm6, %v2653_v55  ;;  %v2651_v62 = vmul.f32 %v2643_v26, %v6381_v53  ;;  %v5370_v23 = vpop.f32.mrf.mxu1 }
 0x9a5   : > { %v2636_v56 = vadd.f32 %v5370_v23, %v5004_v39 }
 0x9a6   : > { %2659 = vst.msk [vmem:[%s7066_s14 + $0x8] sm:$0xff] %vm1301_vm6, %v2651_v62  ;;  %2676 = vst.msk [vmem:[#allocation2 + $0x8] sm:$0xff] %vm1301_vm6, %v2651_v62  ;;  %v2627_v58 = vpop.f32.mrf.mxu1 }
 0x9a7   : > { %v2648_v34 = vadd.f32 %v2636_v56, %v6894_v24  ;;  %v2628_v2 = vadd.f32 %v5004_v39, %v2627_v58 }
 0x9a8   : > { %v5371_v61 = vpop.f32.mrf.mxu1 }
 0x9a9   : > { %v2656_v14 = vmul.f32 %v2648_v34, %v6403_v19  ;;  %v2646_v57 = vadd.f32 %v2628_v2, %v6882_v1  ;;  %v2639_v33 = vadd.f32 %v5371_v61, %v5004_v39 }
 0x9aa   : > { %v2630_v53 = vpop.f32.mrf.mxu1 }
 0x9ab   : > { %2664 = vst.msk [vmem:[%s7066_s14 + $0x30] sm:$0xff] %vm1301_vm6, %v2656_v14  ;;  %2681 = vst.msk [vmem:[#allocation2 + $0x30] sm:$0xff] %vm1301_vm6, %v2656_v14  ;;  %v2654_v36 = vmul.f32 %v2646_v57, %v6395_v8  ;;  %v2649_v12 = vadd.f32 %v2639_v33, %v6891_v32  ;;  %v2631_v63 = vadd.f32 %v5004_v39, %v2630_v53  ;;  %v2736_v8 = vld [vmem:[#allocation2 + $0x11] ss:$2 sm:$0xff]  ;;  %v2728_v25 = vld [vmem:[#allocation2 + $0x10] ss:$2 sm:$0xff] }
 0x9ac   : > { %v2742_v7 = vrot.slane %v2736_v8, 7 }
 0x9ad   : > { %2662 = vst.msk [vmem:[%s7066_s14 + $0x20] sm:$0xff] %vm1301_vm6, %v2654_v36  ;;  %2679 = vst.msk [vmem:[#allocation2 + $0x20] sm:$0xff] %vm1301_vm6, %v2654_v36  ;;  %v2657_v19 = vmul.f32 %v2649_v12, %v6408_v27  ;;  %v2647_v1 = vadd.f32 %v2631_v63, %v6878_v17  ;;  %v2734_v30 = vld [vmem:[#allocation2 + $0x1] ss:$2 sm:$0xff]  ;;  %v2726_v49 = vld [vmem:[#allocation2] ss:$2 sm:$0xff] }
 0x9ae   : > { %v2741_v32 = vrot.slane %v2734_v30, 7 }
 0x9af   : > { %2665 = vst.msk [vmem:[%s7066_s14 + $0x38] sm:$0xff] %vm1301_vm6, %v2657_v19  ;;  %2682 = vst.msk [vmem:[#allocation2 + $0x38] sm:$0xff] %vm1301_vm6, %v2657_v19  ;;  %v2655_v24 = vmul.f32 %v2647_v1, %v6400_v16  ;;  %v7111_v16 = vpop.permute.xlu0 %2763 }
 0x9b0   : > { %v2747_v27 = vsel %vm1131_vm1, %v2741_v32, %v2742_v7 }
 0x9b1   : > { %2663 = vst.msk [vmem:[%s7066_s14 + $0x28] sm:$0xff] %vm1301_vm6, %v2655_v24  ;;  %2680 = vst.msk [vmem:[#allocation2 + $0x28] sm:$0xff] %vm1301_vm6, %v2655_v24  ;;  %v2754_v13 = vmax.f32 %v2747_v27, %v2728_v25  ;;  %v5033_v25 = vld [vmem:[%s7766_s19 + $0x1] ss:$0 sm:$0xff]  ;;  %s5203_s14 = sshll.u32 %s6233_s18, 4 }
 0x9b2   : > { %s1082_s7 = scalar_lea.vmem %s7788_s9, %s5203_s14  ;;  %s7789_s9 = sld [smem:[#allocation33_spill]] }
 0x9b3   : > { %v2758_v29 = vmax.f32 %v2754_v13, %v2736_v8  ;;  %v7124_v18 = vpop.permute.xlu0 %2773  ;;  %v5034_v13 = vld [vmem:[%s7765_s24 + $0x1] ss:$0 sm:$0xff]  ;;  %s7790_s14 = sshll.u32 %s6233_s18, 5 }
 0x9b5   : > { %v7139_v9 = vmul.f32 %v7129_v21, %v2758_v29 }
 0x9b6   : > { %v2740_v48 = vld [vmem:[#allocation2 + $0x31] ss:$2 sm:$0xff]  ;;  %v2732_v47 = vld [vmem:[#allocation2 + $0x30] ss:$2 sm:$0xff] }
 0x9b7   : > { %v2744_v15 = vrot.slane %v2740_v48, 7  ;;  %v2826_v59 = vsel %vm1301_vm6, %v7139_v9, 0.0 }
 0x9b8   : > { %v2738_v17 = vld [vmem:[#allocation2 + $0x21] ss:$2 sm:$0xff]  ;;  %v2730_v37 = vld [vmem:[#allocation2 + $0x20] ss:$2 sm:$0xff] }
 0x9b9   : > { %v2748_v44 = vsel %vm1131_vm1, %v2744_v15, %v2741_v32  ;;  %v2743_v50 = vrot.slane %v2738_v17, 7 }
 0x9ba   : > { %v2749_v20 = vsel %vm1147_vm4, -1e+30, %v2748_v44 }
 0x9bb   : > { %v2753_v43 = vmax.f32 %v2749_v20, %v2726_v49  ;;  %v2745_v40 = vsel %vm1131_vm1, %v2743_v50, %v2744_v15  ;;  %v2746_v60 = vsel %vm1131_vm1, %v2742_v7, %v2743_v50 }
 0x9bc   : > { %v2756_v10 = vmax.f32 %v2745_v40, %v2732_v47  ;;  %v2755_v11 = vmax.f32 %v2746_v60, %v2730_v37 }
 0x9bd   : > { %v2757_v38 = vmax.f32 %v2753_v43, %v2734_v30 }
 0x9be   : > { %v2760_v4 = vmax.f32 %v2756_v10, %v2740_v48  ;;  %v2759_v31 = vmax.f32 %v2755_v11, %v2738_v17 }
 0x9bf   : > { %v7122_v39 = vmul.f32 %v7111_v16, %v2757_v38 }
 0x9c0   : > { %v7127_v41 = vmul.f32 %v7115_v51, %v2760_v4  ;;  %v7134_v45 = vmul.f32 %v7124_v18, %v2759_v31  ;;  %v5007_v31 = vld [vmem:[%s6080_s30 + $0x4] sm:$0x7] }
 0x9c1   : > { %v2823_v46 = vsel %vm1301_vm6, %v7122_v39, 0.0 }
 0x9c2   : > { %2824 = vadd.xlane.f32.xlu1 %v2823_v46  ;;  %v2832_v3 = vsel %vm1301_vm6, %v7127_v41, 0.0  ;;  %v2829_v22 = vsel %vm1301_vm6, %v7134_v45, 0.0 }
 0x9c3   : > { %2833 = vadd.xlane.f32.xlu0 %v2832_v3 }
 0x9c6   : > { %2830 = vadd.xlane.f32.xlu1 %v2829_v22  ;;  %v1142_v22 = vadd.s32 24, %v6235_v6 }
 0x9c7   : > { %2827 = vadd.xlane.f32.xlu0 %v2826_v59 }
 0x9c8   : > { %vm2922_vm10 = vcmp.eq.s32.totalorder %v1142_v22, 31 }
 0xa4b   : > { %v2825_v28 = vpop.xlane.xlu1 %2824 }
 0xa4c   : > { %v2835_v42 = vmul.f32 0.03125, %v2825_v28  ;;  %v2834_v54 = vpop.xlane.xlu0 %2833 }
 0xa4d   : > { %v2838_v52 = vmul.f32 0.03125, %v2834_v54  ;;  %v2938_v54 = vrot.slane %v5007_v31, %v6733_v0 }
 0xa4e   : > { %v2839_v55 = vsub.f32 %v7122_v39, %v2835_v42 }
 0xa4f   : > { %v2842_v26 = vsub.f32 %v7127_v41, %v2838_v52  ;;  %v2831_v62 = vpop.xlane.xlu1 %2830 }
 0xa50   : > { %v2837_v23 = vmul.f32 0.03125, %v2831_v62  ;;  %v2828_v56 = vpop.xlane.xlu0 %2827  ;;  %v2843_v58 = vmul.f32 %v2839_v55, %v2839_v55 }
 0xa51   : > { %v2836_v34 = vmul.f32 0.03125, %v2828_v56  ;;  %v2846_v2 = vmul.f32 %v2842_v26, %v2842_v26 }
 0xa52   : > { %v2841_v61 = vsub.f32 %v7134_v45, %v2837_v23  ;;  %v2847_v14 = vsel %vm1301_vm6, %v2843_v58, 0.0 }
 0xa53   : > { %v2840_v57 = vsub.f32 %v7139_v9, %v2836_v34  ;;  %2848 = vadd.xlane.f32.xlu0 %v2847_v14  ;;  %v2856_v33 = vsel %vm1301_vm6, %v2846_v2, 0.0  ;;  %v2958_v14 = vrot.slane %v5007_v31, %v6736_v35 }
 0xa54   : > { %2857 = vadd.xlane.f32.xlu1 %v2856_v33  ;;  %v2845_v53 = vmul.f32 %v2841_v61, %v2841_v61 }
 0xa55   : > { %v2844_v36 = vmul.f32 %v2840_v57, %v2840_v57 }
 0xa56   : > { %v2853_v12 = vsel %vm1301_vm6, %v2845_v53, 0.0 }
 0xa57   : > { %v2850_v63 = vsel %vm1301_vm6, %v2844_v36, 0.0 }
 0xa58   : > { %2851 = vadd.xlane.f32.xlu0 %v2850_v63  ;;  %2854 = vadd.xlane.f32.xlu1 %v2853_v12 }
 0xadc   : > { %v2849_v19 = vpop.xlane.xlu0 %2848 }
 0xadd   : > { %v2859_v1 = vmul.f32 0.03125, %v2849_v19  ;;  %v2858_v24 = vpop.xlane.xlu1 %2857 }
 0xade   : > { %v2862_v30 = vmul.f32 0.03125, %v2858_v24 }
 0xadf   : > { %v2863_v8 = vadd.f32 1e-05, %v2859_v1 }
 0xae0   : > { %v2866_v32 = vadd.f32 1e-05, %v2862_v30 }
 0xae1   : > { %5767 = vrsqrt.f32 %v2863_v8  ;;  %v2852_v7 = vpop.xlane.xlu0 %2851  ;;  %v2855_v48 = vpop.xlane.xlu1 %2854 }
 0xae2   : > { %5769 = vrsqrt.f32 %v2866_v32  ;;  %v2860_v15 = vmul.f32 0.03125, %v2852_v7  ;;  %v2861_v27 = vmul.f32 0.03125, %v2855_v48 }
 0xae4   : > { %v2864_v17 = vadd.f32 1e-05, %v2860_v15  ;;  %v2865_v44 = vadd.f32 1e-05, %v2861_v27 }
 0xae6   : > { %5771 = vrsqrt.f32 %v2864_v17  ;;  %v5035_v17 = vld [vmem:[%s7779_s13 + $0x1] ss:$0 sm:$0xff] }
 0xae7   : > { %5773 = vrsqrt.f32 %v2865_v44 }
 0xaee   : > { %v5768_v50 = vpop.eup %5767 }
 0xaef   : > { %v5770_v49 = vpop.eup %5769  ;;  %v2871_v20 = vmul.f32 %v5768_v50, %v2839_v55 }
 0xaf0   : > { %v2874_v43 = vmul.f32 %v5770_v49, %v2842_v26  ;;  %v2946_v26 = vrot.slane %v5007_v31, %v6726_v5 }
 0xaf1   : > { %v2881_v47 = vmul.f32 %v5033_v25, %v2871_v20 }
 0xaf2   : > { %v2884_v40 = vmul.f32 %v5033_v25, %v2874_v43 }
 0xaf3   : > { %v5772_v37 = vpop.eup %5771  ;;  %v2891_v60 = vadd.f32 %v5034_v13, %v2881_v47 }
 0xaf4   : > { %v5774_v10 = vpop.eup %5773  ;;  %v2894_v11 = vadd.f32 %v5034_v13, %v2884_v40  ;;  %v2872_v38 = vmul.f32 %v5772_v37, %v2840_v57 }
 0xaf5   : > { %v2873_v4 = vmul.f32 %v5774_v10, %v2841_v61  ;;  %v2895_v29 = vmul.f32 %v2891_v60, %v7111_v16 }
 0xaf6   : > { %v2898_v46 = vmul.f32 %v2894_v11, %v7115_v51  ;;  %v2882_v3 = vmul.f32 %v5033_v25, %v2872_v38 }
 0xaf7   : > { %v2883_v59 = vmul.f32 %v5033_v25, %v2873_v4  ;;  %v2899_v28 = vrot.slane %v2895_v29, 7  ;;  %v2911_v42 = vrot.slane %v2895_v29, 1  ;;  %v2947_v53 = vmul.f32 %v2946_v26, %v2895_v29 }
 0xaf8   : > { %v2892_v52 = vadd.f32 %v5034_v13, %v2882_v3  ;;  %v2902_v55 = vrot.slane %v2898_v46, 7  ;;  %v2914_v62 = vrot.slane %v2898_v46, 1  ;;  %v2950_v1 = vmul.f32 %v2946_v26, %v2898_v46 }
 0xaf9   : > { %v2893_v23 = vadd.f32 %v5034_v13, %v2883_v59 }
 0xafa   : > { %v2896_v56 = vmul.f32 %v2892_v52, %v7129_v21  ;;  %v2906_v58 = vsel %vm1131_vm1, %v2902_v55, %v2899_v28  ;;  %v2918_v34 = vsel %vm1187_vm0, %v2914_v62, %v2911_v42 }
 0xafb   : > { %v2897_v2 = vmul.f32 %v2893_v23, %v7124_v18  ;;  %v2907_v61 = vsel %vm1147_vm4, 0.0, %v2906_v58  ;;  %v2934_v19 = vsel %vm2922_vm10, 0.0, %v2918_v34  ;;  %v3243_v34 = vld [vmem:[#allocation3] ss:$2 sm:$0xff] }
 0xafc   : > { %v2912_v57 = vrot.slane %v2896_v56, 1  ;;  %v2939_v33 = vmul.f32 %v2938_v54, %v2907_v61  ;;  %v2900_v36 = vrot.slane %v2896_v56, 7  ;;  %v2948_v32 = vmul.f32 %v2946_v26, %v2896_v56 }
 0xafd   : > { %v2913_v12 = vrot.slane %v2897_v2, 1  ;;  %v2901_v63 = vrot.slane %v2897_v2, 7  ;;  %v2949_v25 = vmul.f32 %v2946_v26, %v2897_v2  ;;  %v2962_v38 = vmul.f32 %v2958_v14, %v2934_v19  ;;  %v3246_v26 = vld [vmem:[#allocation3 + $0x11] ss:$2 sm:$0xff] }
 0xafe   : > { %v2917_v24 = vsel %vm1187_vm0, %v2911_v42, %v2912_v57  ;;  %v2951_v30 = vadd.f32 %v2947_v53, %v2939_v33  ;;  %v2905_v8 = vsel %vm1131_vm1, %v2899_v28, %v2900_v36  ;;  %v3248_v23 = vrot.slane %v3246_v26, 7 }
 0xaff   : > { %v2959_v7 = vmul.f32 %v2958_v14, %v2917_v24  ;;  %v2916_v48 = vsel %vm1187_vm0, %v2912_v57, %v2913_v12  ;;  %v2940_v15 = vmul.f32 %v2938_v54, %v2905_v8  ;;  %v2904_v27 = vsel %vm1131_vm1, %v2900_v36, %v2901_v63 }
 0xb00   : > { %v2915_v44 = vsel %vm1187_vm0, %v2913_v12, %v2914_v62  ;;  %v2941_v50 = vmul.f32 %v2938_v54, %v2904_v27  ;;  %v2903_v49 = vsel %vm1131_vm1, %v2901_v63, %v2902_v55  ;;  %v2960_v43 = vmul.f32 %v2958_v14, %v2916_v48  ;;  %v3245_v55 = vld [vmem:[#allocation3 + $0x1] ss:$2 sm:$0xff]  ;;  %v3244_v62 = vld [vmem:[#allocation3 + $0x10] ss:$2 sm:$0xff] }
 0xb01   : > { %v2963_v20 = vadd.f32 %v2959_v7, %v2951_v30  ;;  %v2952_v13 = vadd.f32 %v2948_v32, %v2940_v15  ;;  %v2942_v47 = vmul.f32 %v2938_v54, %v2903_v49  ;;  %v2961_v37 = vmul.f32 %v2958_v14, %v2915_v44 }
 0xb02   : > { %v2953_v40 = vadd.f32 %v2949_v25, %v2941_v50 }
 0xb03   : > { %v2973_v60 = vadd.f32 %v5035_v17, %v2963_v20  ;;  %v2964_v10 = vadd.f32 %v2960_v43, %v2952_v13  ;;  %v2954_v11 = vadd.f32 %v2950_v1, %v2942_v47  ;;  %v5013_v20 = vld [vmem:[%s7781_s1 + $0x30] sm:$0xff]  ;;  %v5014_v13 = vld [vmem:[%s7781_s1 + $0x38] sm:$0xff]  ;;  %v5011_v43 = vld [vmem:[%s7781_s1 + $0x20] sm:$0xff] }
 0xb04   : > { %v2965_v4 = vadd.f32 %v2961_v37, %v2953_v40  ;;  %v3056_v47 = vpack.c.bf16 %v5014_v13, %v5013_v20  ;;  %v5012_v40 = vld [vmem:[%s7781_s1 + $0x28] sm:$0xff]  ;;  %v5020_v13 = vld [vmem:[%s7784_s3 + $0xa0] sm:$0xff] }
 0xb05   : > { %v7184_v31 = vadd.f32 %v2973_v60, %v7122_v39  ;;  %v2974_v29 = vadd.f32 %v5035_v17, %v2964_v10  ;;  %v2966_v46 = vadd.f32 %v2962_v38, %v2954_v11  ;;  %v3055_v37 = vpack.c.bf16 %v5012_v40, %v5011_v43  ;;  %v5021_v43 = vld [vmem:[%s7784_s3 + $0xa8] sm:$0xff]  ;;  %v5018_v40 = vld [vmem:[%s7784_s3 + $0x90] sm:$0xff] }
 0xb06   : > { %v2975_v3 = vadd.f32 %v5035_v17, %v2965_v4  ;;  %5372 = vmatprep.subr.bf16.mxu1 %v3056_v47 }
 0xb07   : > { %v2981_v22 = vsel %vm1301_vm6, %v7184_v31, 0.0  ;;  %v7189_v59 = vadd.f32 %v2974_v29, %v7139_v9  ;;  %v2976_v28 = vadd.f32 %v5035_v17, %v2966_v46  ;;  %5373 = vmatpush3.bf16.msra.mxu1 %v3056_v47  ;;  %v3158_v47 = vpack.c.bf16 %v5021_v43, %v5020_v13 }
 0xb08   : > { %2982 = vadd.xlane.f32.xlu0 %v2981_v22  ;;  %v7192_v42 = vadd.f32 %v2975_v3, %v7134_v45  ;;  %v3247_v45 = vrot.slane %v3245_v55, 7  ;;  %5374 = vmatprep.subr.bf16.mxu1 %v3055_v37 }
 0xb09   : > { %v2984_v39 = vsel %vm1301_vm6, %v7189_v59, 0.0  ;;  %v7197_v54 = vadd.f32 %v2976_v28, %v7127_v41 }
 0xb0a   : > { %2985 = vadd.xlane.f32.xlu1 %v2984_v39  ;;  %v2987_v52 = vsel %vm1301_vm6, %v7192_v42, 0.0  ;;  %v3249_v56 = vsel %vm1131_vm1, %v3247_v45, %v3248_v23  ;;  %v3250_v2 = vsel %vm1131_vm1, %v3248_v23, %v3247_v45 }
 0xb0b   : > { %v2990_v9 = vsel %vm1301_vm6, %v7197_v54, 0.0  ;;  %v3254_v41 = vmax.f32 %v3249_v56, %v3244_v62  ;;  %v3251_v61 = vsel %vm1147_vm4, 0.0, %v3250_v2  ;;  %5375 = vmatpush3.bf16.msra.mxu1 %v3055_v37  ;;  %v5019_v37 = vld [vmem:[%s7784_s3 + $0x98] sm:$0xff] }
 0xb0c   : > { %2988 = vadd.xlane.f32.xlu0 %v2987_v52  ;;  %v3253_v14 = vmax.f32 %v3251_v61, %v3243_v34 }
 0xb0d   : > { %v3256_v58 = vmax.f32 %v3254_v41, %v3246_v26  ;;  %v5037_v41 = vld [vmem:[%s7783_s10 + $0x1] ss:$0 sm:$0xff] }
 0xb0e   : > { %2991 = vadd.xlane.f32.xlu1 %v2990_v9  ;;  %v3255_v57 = vmax.f32 %v3253_v14, %v3245_v55  ;;  %v5036_v55 = vld [vmem:[%s7782_s5 + $0x1] ss:$0 sm:$0xff] }
 0xb0f   : > { %3591 = vst.msk [vmem:[%s1082_s7 + $0x8] sm:$0xff] %vm2666_vm3, %v3256_v58  ;;  %3595 = vst.msk [vmem:[#allocation3 + $0x8] sm:$0xff] %vm2666_vm3, %v3256_v58 }
 0xb10   : > { %3590 = vst.msk [vmem:[%s1082_s7] sm:$0xff] %vm2666_vm3, %v3255_v57  ;;  %3594 = vst.msk [vmem:[#allocation3] sm:$0xff] %vm2666_vm3, %v3255_v57  ;;  %s1072_s7 = scalar_lea.vmem %s7789_s9, %s7790_s14  ;;  %s7791_s9 = sld [smem:[#allocation38_spill]] }
 0xb11   : > { %s4977_s14 = sshll.u32 %s6233_s18, 3 }
 0xb91   : > { %v2983_v33 = vpop.xlane.xlu0 %2982 }
 0xb92   : > { %v2993_v53 = vmul.f32 0.03125, %v2983_v33 }
 0xb93   : > { %v2986_v36 = vpop.xlane.xlu1 %2985 }
 0xb94   : > { %v2997_v12 = vsub.f32 %v7184_v31, %v2993_v53  ;;  %v2994_v63 = vmul.f32 0.03125, %v2986_v36 }
 0xb95   : > { %v2989_v19 = vpop.xlane.xlu0 %2988 }
 0xb96   : > { %v2998_v1 = vsub.f32 %v7189_v59, %v2994_v63  ;;  %v2995_v24 = vmul.f32 0.03125, %v2989_v19  ;;  %v3001_v30 = vmul.f32 %v2997_v12, %v2997_v12 }
 0xb97   : > { %v2992_v8 = vpop.xlane.xlu1 %2991 }
 0xb98   : > { %v2999_v32 = vsub.f32 %v7192_v42, %v2995_v24  ;;  %v2996_v7 = vmul.f32 0.03125, %v2992_v8  ;;  %v3005_v48 = vsel %vm1301_vm6, %v3001_v30, 0.0  ;;  %v3002_v15 = vmul.f32 %v2998_v1, %v2998_v1  ;;  %v5031_v24 = vld [vmem:[%s7784_s3 + $0xf8] sm:$0xff]  ;;  %v5028_v8 = vld [vmem:[%s7784_s3 + $0xe0] sm:$0xff] }
 0xb99   : > { %3006 = vadd.xlane.f32.xlu0 %v3005_v48  ;;  %v5026_v48 = vld [vmem:[%s7784_s3 + $0xd0] sm:$0xff] }
 0xb9a   : > { %v3000_v27 = vsub.f32 %v7197_v54, %v2996_v7  ;;  %v3008_v17 = vsel %vm1301_vm6, %v3002_v15, 0.0  ;;  %v3003_v44 = vmul.f32 %v2999_v32, %v2999_v32  ;;  %v5027_v15 = vld [vmem:[%s7784_s3 + $0xd8] sm:$0xff] }
 0xb9b   : > { %3009 = vadd.xlane.f32.xlu1 %v3008_v17  ;;  %v5024_v17 = vld [vmem:[%s7784_s3 + $0xc0] sm:$0xff] }
 0xb9c   : > { %v3011_v50 = vsel %vm1301_vm6, %v3003_v44, 0.0  ;;  %v3004_v25 = vmul.f32 %v3000_v27, %v3000_v27  ;;  %v5025_v44 = vld [vmem:[%s7784_s3 + $0xc8] sm:$0xff] }
 0xb9d   : > { %3012 = vadd.xlane.f32.xlu0 %v3011_v50  ;;  %v3160_v50 = vpack.c.bf16 %v5025_v44, %v5024_v17 }
 0xb9e   : > { %v3014_v49 = vsel %vm1301_vm6, %v3004_v25, 0.0  ;;  %v5022_v25 = vld [vmem:[%s7784_s3 + $0xb0] sm:$0xff] }
 0xb9f   : > { %3015 = vadd.xlane.f32.xlu1 %v3014_v49  ;;  %v5023_v49 = vld [vmem:[%s7784_s3 + $0xb8] sm:$0xff] }
 0xba0   : > { %v3159_v20 = vpack.c.bf16 %v5023_v49, %v5022_v25 }
 0xbb0   : > { %3278 = vperm.xlu1 %5646, %v3256_v58  }
 0xbb3   : > { %3273 = vperm.xlu0 %5645, %v3255_v57  }
 0xc22   : > { %v3007_v60 = vpop.xlane.xlu0 %3006 }
 0xc23   : > { %v3017_v10 = vmul.f32 0.03125, %v3007_v60  ;;  %v3157_v60 = vpack.c.bf16 %v5019_v37, %v5018_v40  ;;  %v5041_v37 = vld [vmem:[%s7786_s8 + $0x1] ss:$0 sm:$0xff] }
 0xc24   : > { %v3010_v11 = vpop.xlane.xlu1 %3009 }
 0xc25   : > { %v3021_v38 = vadd.f32 1e-05, %v3017_v10  ;;  %v3018_v4 = vmul.f32 0.03125, %v3010_v11  ;;  %v5016_v10 = vld [vmem:[%s7784_s3 + $0x80] sm:$0xff]  ;;  %v5017_v11 = vld [vmem:[%s7784_s3 + $0x88] sm:$0xff] }
 0xc26   : > { %v3013_v29 = vpop.xlane.xlu0 %3012 }
 0xc27   : > { %5775 = vrsqrt.f32 %v3021_v38  ;;  %v3022_v46 = vadd.f32 1e-05, %v3018_v4  ;;  %v3019_v3 = vmul.f32 0.03125, %v3013_v29  ;;  %v3156_v38 = vpack.c.bf16 %v5017_v11, %v5016_v10  ;;  %v5038_v4 = vld [vmem:[%s7785_s4 + $0x1] ss:$0 sm:$0xff] }
 0xc28   : > { %v3016_v22 = vpop.xlane.xlu1 %3015 }
 0xc29   : > { %5777 = vrsqrt.f32 %v3022_v46  ;;  %v3023_v28 = vadd.f32 1e-05, %v3019_v3  ;;  %v3020_v39 = vmul.f32 0.03125, %v3016_v22 }
 0xc2b   : > { %5779 = vrsqrt.f32 %v3023_v28  ;;  %v3024_v52 = vadd.f32 1e-05, %v3020_v39 }
 0xc2d   : > { %5781 = vrsqrt.f32 %v3024_v52 }
 0xc34   : > { %v5776_v9 = vpop.eup %5775 }
 0xc35   : > { %v3029_v26 = vmul.f32 %v5776_v9, %v2997_v12 }
 0xc36   : > { %v5778_v45 = vpop.eup %5777 }
 0xc37   : > { %v3030_v62 = vmul.f32 %v5778_v45, %v2998_v1  ;;  %v3039_v23 = vmul.f32 %v5036_v55, %v3029_v26  ;;  %v5030_v1 = vld [vmem:[%s7784_s3 + $0xf0] sm:$0xff] }
 0xc38   : > { %v5780_v56 = vpop.eup %5779  ;;  %v3163_v30 = vpack.c.bf16 %v5031_v24, %v5030_v1 }
 0xc39   : > { %v3031_v58 = vmul.f32 %v5780_v56, %v2999_v32  ;;  %v3040_v34 = vmul.f32 %v5036_v55, %v3030_v62  ;;  %v3049_v57 = vadd.f32 %v5037_v41, %v3039_v23  ;;  %v5029_v32 = vld [vmem:[%s7784_s3 + $0xe8] sm:$0xff] }
 0xc3a   : > { %v5782_v2 = vpop.eup %5781  ;;  %5380 = vmatprep.subr.bf16.mxu0 %v3163_v30  ;;  %v3162_v7 = vpack.c.bf16 %v5029_v32, %v5028_v8 }
 0xc3b   : > { %v3032_v61 = vmul.f32 %v5782_v2, %v3000_v27  ;;  %v3041_v14 = vmul.f32 %v5036_v55, %v3031_v58  ;;  %v3050_v33 = vadd.f32 %v5037_v41, %v3040_v34  ;;  %5381 = vmatpush3.bf16.msra.mxu0 %v3163_v30  ;;  %v3161_v27 = vpack.c.bf16 %v5027_v15, %v5026_v48 }
 0xc3c   : > { %5382 = vmatprep.subr.bf16.mxu0 %v3162_v7 }
 0xc3d   : > { %v3042_v53 = vmul.f32 %v5036_v55, %v3032_v61  ;;  %v3053_v36 = vpack.c.bf16 %v3050_v33, %v3049_v57  ;;  %v3051_v12 = vadd.f32 %v5037_v41, %v3041_v14 }
 0xc3f   : > { %v3052_v63 = vadd.f32 %v5037_v41, %v3042_v53  ;;  %5376 = vmatprep.mubr.msk.bf16.mxu1 %vm1301_vm6, %v3053_v36  ;;  %5383 = vmatpush3.bf16.msra.mxu0 %v3162_v7 }
 0xc40   : > { %5384 = vmatprep.subr.bf16.mxu0 %v3161_v27 }
 0xc41   : > { %v3054_v19 = vpack.c.bf16 %v3052_v63, %v3051_v12 }
 0xc43   : > { %5377 = vmatmul.mubr.msk.bf16.vlgmr.msra.gmra.mxu1 %vm1301_vm6, %v3054_v19  ;;  %5385 = vmatpush3.bf16.msra.mxu0 %v3161_v27 }
 0xc44   : > { %5386 = vmatprep.subr.bf16.mxu0 %v3160_v50 }
 0xc47   : > { %5387 = vmatpush3.bf16.msra.mxu0 %v3160_v50 }
 0xc48   : > { %5388 = vmatprep.subr.bf16.mxu0 %v3159_v20 }
 0xc4b   : > { %5389 = vmatpush3.bf16.msra.mxu0 %v3159_v20 }
 0xc4c   : > { %5390 = vmatprep.subr.bf16.mxu0 %v3158_v47 }
 0xc4f   : > { %5391 = vmatpush3.bf16.msra.mxu0 %v3158_v47 }
 0xc50   : > { %5392 = vmatprep.subr.bf16.mxu0 %v3157_v60 }
 0xc53   : > { %5393 = vmatpush3.bf16.msra.mxu0 %v3157_v60 }
 0xc54   : > { %5394 = vmatprep.subr.bf16.mxu0 %v3156_v38 }
 0xc57   : > { %5395 = vmatpush3.bf16.msra.mxu0 %v3156_v38 }
 0xd03   : > { %v5378_v29 = vpop.f32.mrf.mxu1 }
 0xd04   : > { %v3112_v46 = vadd.f32 %v5378_v29, %v5038_v4 }
 0xd05   : > { %v3103_v3 = vpop.f32.mrf.mxu1 }
 0xd06   : > { %v3120_v22 = vmul.f32 %v3112_v46, %v3112_v46  ;;  %v3104_v28 = vadd.f32 %v5038_v4, %v3103_v3 }
 0xd07   : > { %v5379_v39 = vpop.f32.mrf.mxu1 }
 0xd08   : > { %v3124_v52 = vmul.f32 %v3120_v22, %v3112_v46  ;;  %v3118_v9 = vmul.f32 %v3104_v28, %v3104_v28  ;;  %v3115_v55 = vadd.f32 %v5379_v39, %v5038_v4 }
 0xd09   : > { %v3106_v26 = vpop.f32.mrf.mxu1 }
 0xd0a   : > { %v3128_v45 = vmul.f32 0.044715, %v3124_v52  ;;  %v3122_v62 = vmul.f32 %v3118_v9, %v3104_v28  ;;  %v3121_v23 = vmul.f32 %v3115_v55, %v3115_v55  ;;  %v3107_v56 = vadd.f32 %v5038_v4, %v3106_v26 }
 0xd0c   : > { %v3132_v41 = vadd.f32 %v3128_v45, %v3112_v46  ;;  %v3126_v58 = vmul.f32 0.044715, %v3122_v62  ;;  %v3125_v34 = vmul.f32 %v3121_v23, %v3115_v55  ;;  %v3119_v2 = vmul.f32 %v3107_v56, %v3107_v56 }
 0xd0e   : > { %v3136_v61 = vmul.f32 0.7978846, %v3132_v41  ;;  %v3130_v14 = vadd.f32 %v3126_v58, %v3104_v28  ;;  %v3129_v57 = vmul.f32 0.044715, %v3125_v34  ;;  %v3123_v33 = vmul.f32 %v3119_v2, %v3107_v56  ;;  %v7274_v58 = vpop.permute.xlu1 %3278  ;;  %v7276_v2 = vpop.permute.xlu0 %3273 }
 0xd10   : > { %v3134_v53 = vmul.f32 0.7978846, %v3130_v14  ;;  %v3133_v36 = vadd.f32 %v3129_v57, %v3115_v55  ;;  %v3127_v12 = vmul.f32 0.044715, %v3123_v33  ;;  %5783 = vtanh.f32 %v3136_v61 }
 0xd12   : > { %5785 = vtanh.f32 %v3134_v53  ;;  %v3137_v63 = vmul.f32 0.7978846, %v3133_v36  ;;  %v3131_v19 = vadd.f32 %v3127_v12, %v3107_v56 }
 0xd14   : > { %5787 = vtanh.f32 %v3137_v63  ;;  %v3135_v1 = vmul.f32 0.7978846, %v3131_v19 }
 0xd16   : > { %5789 = vtanh.f32 %v3135_v1 }
 0xd1d   : > { %v5784_v24 = vpop.eup %5783 }
 0xd1e   : > { %v3144_v7 = vadd.f32 1.0, %v5784_v24 }
 0xd1f   : > { %v5786_v30 = vpop.eup %5785 }
 0xd20   : > { %v3142_v8 = vadd.f32 1.0, %v5786_v30  ;;  %v3148_v50 = vmul.f32 0.5, %v3144_v7 }
 0xd21   : > { %v5788_v32 = vpop.eup %5787 }
 0xd22   : > { %v3145_v48 = vadd.f32 1.0, %v5788_v32  ;;  %v3146_v44 = vmul.f32 0.5, %v3142_v8  ;;  %v3152_v43 = vmul.f32 %v3148_v50, %v3112_v46 }
 0xd23   : > { %v5790_v15 = vpop.eup %5789 }
 0xd24   : > { %v3149_v27 = vmul.f32 0.5, %v3145_v48  ;;  %v3143_v17 = vadd.f32 1.0, %v5790_v15  ;;  %v3150_v20 = vmul.f32 %v3146_v44, %v3104_v28 }
 0xd26   : > { %v3147_v25 = vmul.f32 0.5, %v3143_v17  ;;  %v3153_v49 = vmul.f32 %v3149_v27, %v3115_v55 }
 0xd28   : > { %v3151_v13 = vmul.f32 %v3147_v25, %v3107_v56  ;;  %v3155_v40 = vpack.c.bf16 %v3153_v49, %v3152_v43  ;;  %v5070_v25 = vld [vmem:[%s7766_s19 + $0x2] ss:$0 sm:$0xff] }
 0xd2a   : > { %v3154_v47 = vpack.c.bf16 %v3151_v13, %v3150_v20  ;;  %v5071_v13 = vld [vmem:[%s7765_s24 + $0x2] ss:$0 sm:$0xff] }
 0xd2c   : > { %5396 = vmatprep.mubr.bf16.mxu0 %v3154_v47 }
 0xd2d   : > { %5397 = vmatmul.mubr.bf16.vlgmr.msra.gmra.mxu0 %v3155_v40 }
 0xded   : > { %v5398_v60 = vpop.f32.mrf.mxu0 }
 0xdee   : > { %v3213_v10 = vadd.f32 %v5398_v60, %v5041_v37  ;;  %v5044_v60 = vld [vmem:[%s6080_s30 + $0x8] sm:$0x7] }
 0xdef   : > { %v3204_v11 = vpop.f32.mrf.mxu0 }
 0xdf0   : > { %v3221_v38 = vadd.f32 %v3213_v10, %v7192_v42  ;;  %v3205_v4 = vadd.f32 %v5041_v37, %v3204_v11  ;;  %v1140_v11 = vadd.s32 8, %v6235_v6 }
 0xdf1   : > { %v5399_v29 = vpop.f32.mrf.mxu0 }
 0xdf2   : > { %v3225_v3 = vmul.f32 %v3221_v38, %v7124_v18  ;;  %v3219_v22 = vadd.f32 %v3205_v4, %v7184_v31  ;;  %v3216_v28 = vadd.f32 %v5399_v29, %v5041_v37  ;;  %v3392_v29 = vrot.slane %v5044_v60, %v6726_v5 }
 0xdf3   : > { %v3207_v46 = vpop.f32.mrf.mxu0  ;;  %vm3376_vm11 = vcmp.eq.s32.totalorder %v1140_v11, 15 }
 0xdf4   : > { %3229 = vst.msk [vmem:[%s1072_s7 + $0x10] sm:$0xff] %vm1301_vm6, %v3225_v3  ;;  %3237 = vst.msk [vmem:[#allocation2 + $0x10] sm:$0xff] %vm1301_vm6, %v3225_v3  ;;  %v3223_v39 = vmul.f32 %v3219_v22, %v7111_v16  ;;  %v3222_v52 = vadd.f32 %v3216_v28, %v7197_v54  ;;  %v3208_v9 = vadd.f32 %v5041_v37, %v3207_v46 }
 0xdf5   : > { %v3386_v28 = vrot.slane %v5044_v60, %v6733_v0 }
 0xdf6   : > { %3227 = vst.msk [vmem:[%s1072_s7] sm:$0xff] %vm1301_vm6, %v3223_v39  ;;  %3235 = vst.msk [vmem:[#allocation2] sm:$0xff] %vm1301_vm6, %v3223_v39  ;;  %v3226_v42 = vmul.f32 %v3222_v52, %v7115_v51  ;;  %v3220_v18 = vadd.f32 %v3208_v9, %v7189_v59  ;;  %v3400_v52 = vrot.slane %v5044_v60, %v6736_v35 }
 0xdf8   : > { %3230 = vst.msk [vmem:[%s1072_s7 + $0x18] sm:$0xff] %vm1301_vm6, %v3226_v42  ;;  %3238 = vst.msk [vmem:[#allocation2 + $0x18] sm:$0xff] %vm1301_vm6, %v3226_v42  ;;  %v3224_v31 = vmul.f32 %v3220_v18, %v7129_v21 }
 0xdfa   : > { %3228 = vst.msk [vmem:[%s1072_s7 + $0x8] sm:$0xff] %vm1301_vm6, %v3224_v31  ;;  %3236 = vst.msk [vmem:[#allocation2 + $0x8] sm:$0xff] %vm1301_vm6, %v3224_v31  ;;  %s1086_s7 = scalar_lea.vmem %s7791_s9, %s4977_s14  ;;  %s7377_s9 = sand.u32 1, %s5959_s23  }
 0xdfb   : > { %s4959_s14 = sshll.u32 %s7377_s9, 4 }
 0xdff   : > { %v3260_v16 = vld [vmem:[#allocation2 + $0x11] ss:$2 sm:$0xff]  ;;  %v3258_v45 = vld [vmem:[#allocation2 + $0x10] ss:$2 sm:$0xff] }
 0xe00   : > { %v3262_v26 = vrot.slane %v3260_v16, 7 }
 0xe01   : > { %v3259_v54 = vld [vmem:[#allocation2 + $0x1] ss:$2 sm:$0xff]  ;;  %v3257_v23 = vld [vmem:[#allocation2] ss:$2 sm:$0xff] }
 0xe02   : > { %v3261_v55 = vrot.slane %v3259_v54, 7 }
 0xe04   : > { %v3263_v51 = vsel %vm1131_vm1, %v3261_v55, %v3262_v26  ;;  %v3264_v59 = vsel %vm1131_vm1, %v3262_v26, %v3261_v55 }
 0xe05   : > { %v3268_v62 = vmax.f32 %v3263_v51, %v3258_v45  ;;  %v3265_v21 = vsel %vm1147_vm4, -1e+30, %v3264_v59 }
 0xe06   : > { %v3267_v56 = vmax.f32 %v3265_v21, %v3257_v23  ;;  %v5072_v23 = vld [vmem:[%s7779_s13 + $0x2] ss:$0 sm:$0xff] }
 0xe07   : > { %v3270_v41 = vmax.f32 %v3268_v62, %v3260_v16 }
 0xe08   : > { %v3269_v34 = vmax.f32 %v3267_v56, %v3259_v54 }
 0xe09   : > { %v7279_v61 = vmul.f32 %v7274_v58, %v3270_v41 }
 0xe0a   : > { %v7282_v14 = vmul.f32 %v7276_v2, %v3269_v34 }
 0xe0b   : > { %v3324_v57 = vsel %vm1301_vm6, %v7279_v61, 0.0 }
 0xe0c   : > { %3325 = vadd.xlane.f32.xlu0 %v3324_v57  ;;  %v3321_v33 = vsel %vm1301_vm6, %v7282_v14, 0.0 }
 0xe0d   : > { %3322 = vadd.xlane.f32.xlu1 %v3321_v33 }
 0xe95   : > { %v3326_v53 = vpop.xlane.xlu0 %3325 }
 0xe96   : > { %v3328_v36 = vmul.f32 0.03125, %v3326_v53  ;;  %v3323_v12 = vpop.xlane.xlu1 %3322 }
 0xe97   : > { %v3327_v63 = vmul.f32 0.03125, %v3323_v12 }
 0xe98   : > { %v3330_v19 = vsub.f32 %v7279_v61, %v3328_v36 }
 0xe99   : > { %v3329_v1 = vsub.f32 %v7282_v14, %v3327_v63 }
 0xe9a   : > { %v3332_v24 = vmul.f32 %v3330_v19, %v3330_v19 }
 0xe9b   : > { %v3331_v30 = vmul.f32 %v3329_v1, %v3329_v1 }
 0xe9c   : > { %v3336_v8 = vsel %vm1301_vm6, %v3332_v24, 0.0 }
 0xe9d   : > { %3337 = vadd.xlane.f32.xlu1 %v3336_v8  ;;  %v3333_v32 = vsel %vm1301_vm6, %v3331_v30, 0.0 }
 0xe9e   : > { %3334 = vadd.xlane.f32.xlu0 %v3333_v32 }
 0xf26   : > { %v3338_v7 = vpop.xlane.xlu1 %3337 }
 0xf27   : > { %v3340_v48 = vmul.f32 0.03125, %v3338_v7  ;;  %v3335_v15 = vpop.xlane.xlu0 %3334 }
 0xf28   : > { %v3339_v27 = vmul.f32 0.03125, %v3335_v15 }
 0xf29   : > { %v3342_v17 = vadd.f32 1e-05, %v3340_v48 }
 0xf2a   : > { %v3341_v44 = vadd.f32 1e-05, %v3339_v27 }
 0xf2b   : > { %5791 = vrsqrt.f32 %v3342_v17 }
 0xf2c   : > { %5793 = vrsqrt.f32 %v3341_v44 }
 0xf38   : > { %v5792_v50 = vpop.eup %5791 }
 0xf39   : > { %v5794_v49 = vpop.eup %5793  ;;  %v3346_v20 = vmul.f32 %v5792_v50, %v3330_v19  ;;  %v3597_v19 = vld [vmem:[#allocation3 + $0x1] ss:$2 sm:$0xff] }
 0xf3a   : > { %v3345_v43 = vmul.f32 %v5794_v49, %v3329_v1  ;;  %v3596_v1 = vld [vmem:[#allocation3] ss:$2 sm:$0xff]  ;;  %v3598_v24 = vrot.slane %v3597_v19, 7  ;;  %v5050_v49 = vld [vmem:[%s7781_s1 + $0x50] sm:$0xff] }
 0xf3b   : > { %v3354_v47 = vmul.f32 %v5070_v25, %v3346_v20  ;;  %v5051_v20 = vld [vmem:[%s7781_s1 + $0x58] sm:$0xff] }
 0xf3c   : > { %v3353_v40 = vmul.f32 %v5070_v25, %v3345_v43  ;;  %v3599_v30 = vsel %vm1147_vm4, 0.0, %v3598_v24  ;;  %v6004_v43 = vmov 0.0   ;;  %v5055_v24 = vld [vmem:[%s7784_s3 + $0x110] sm:$0xff] }
 0xf3d   : > { %v3362_v37 = vadd.f32 %v5071_v13, %v3354_v47  ;;  %5400 = vmatprep.subr.bf16.mxu0 %v6004_v43  ;;  %v3459_v47 = vpack.c.bf16 %v5051_v20, %v5050_v49  ;;  %5404 = vmatprep.mubr.msk.bf16.mxu0 %vm6005_vm12, %v6004_v43 }
 0xf3e   : > { %v3361_v10 = vadd.f32 %v5071_v13, %v3353_v40  ;;  %v5048_v13 = vld [vmem:[%s7781_s1 + $0x40] sm:$0xff]  ;;  %v5049_v40 = vld [vmem:[%s7781_s1 + $0x48] sm:$0xff]  ;;  %5408 = vmatprep.subr.bf16.mxu1 %v6004_v43  ;;  %5424 = vmatprep.mubr.msk.bf16.mxu1 %vm6005_vm12, %v6004_v43 }
 0xf3f   : > { %v3364_v38 = vmul.f32 %v3362_v37, %v7274_v58  ;;  %5401 = vmatpush3.bf16.msra.mxu0 %v3459_v47  ;;  %v3458_v37 = vpack.c.bf16 %v5049_v40, %v5048_v13 }
 0xf40   : > { %v3363_v4 = vmul.f32 %v3361_v10, %v7276_v2  ;;  %5402 = vmatprep.subr.bf16.mxu0 %v6004_v43 }
 0xf41   : > { %v3366_v3 = vrot.slane %v3364_v38, 7  ;;  %v3372_v22 = vrot.slane %v3364_v38, 1  ;;  %v3394_v18 = vmul.f32 %v3392_v29, %v3364_v38 }
 0xf42   : > { %v3365_v46 = vrot.slane %v3363_v4, 7  ;;  %v3371_v39 = vrot.slane %v3363_v4, 1  ;;  %v3393_v59 = vmul.f32 %v3392_v29, %v3363_v4 }
 0xf43   : > { %5403 = vmatpush3.bf16.msra.mxu0 %v3458_v37 }
 0xf44   : > { %v3367_v9 = vsel %vm1131_vm1, %v3365_v46, %v3366_v3  ;;  %v3374_v42 = vsel %vm1187_vm0, %v3372_v22, %v3371_v39  ;;  %v3368_v31 = vsel %vm1131_vm1, %v3366_v3, %v3365_v46  ;;  %v3373_v26 = vsel %vm1187_vm0, %v3371_v39, %v3372_v22  ;;  %5428 = vmatprep.subr.bf16.mxu0 %v6004_v43  ;;  %v5073_v22 = vld [vmem:[%s7782_s5 + $0x2] ss:$0 sm:$0xff] }
 0xf45   : > { %v3382_v16 = vsel %vm3376_vm11, 0.0, %v3374_v42  ;;  %v3388_v54 = vmul.f32 %v3386_v28, %v3367_v9  ;;  %v3369_v55 = vsel %vm1147_vm4, 0.0, %v3368_v31  ;;  %v3401_v56 = vmul.f32 %v3400_v52, %v3373_v26 }
 0xf46   : > { %v3402_v45 = vmul.f32 %v3400_v52, %v3382_v16  ;;  %v3387_v51 = vmul.f32 %v3386_v28, %v3369_v55  ;;  %v5074_v52 = vld [vmem:[%s7783_s10 + $0x2] ss:$0 sm:$0xff]  ;;  %v5068_v55 = vld [vmem:[%s7784_s3 + $0x178] sm:$0xff]  ;;  %vm3930_vm0 = vcmask 257024   ;;  %vm3967_vm1 = vcmp.eq.s32.totalorder %v6235_v6, 3 }
 0xf47   : > { %v3396_v62 = vadd.f32 %v3394_v18, %v3388_v54  ;;  %v5067_v54 = vld [vmem:[%s7784_s3 + $0x170] sm:$0xff] }
 0xf48   : > { %v3395_v21 = vadd.f32 %v3393_v59, %v3387_v51  ;;  %v3536_v26 = vpack.c.bf16 %v5068_v55, %v5067_v54  ;;  %v5066_v51 = vld [vmem:[%s7784_s3 + $0x168] sm:$0xff] }
 0xf49   : > { %v3404_v41 = vadd.f32 %v3402_v45, %v3396_v62  ;;  %v5065_v45 = vld [vmem:[%s7784_s3 + $0x160] sm:$0xff]  ;;  %v5063_v62 = vld [vmem:[%s7784_s3 + $0x150] sm:$0xff] }
 0xf4a   : > { %v3403_v34 = vadd.f32 %v3401_v56, %v3395_v21  ;;  %5409 = vmatpush3.bf16.msra.mxu1 %v3536_v26  ;;  %v3535_v59 = vpack.c.bf16 %v5066_v51, %v5065_v45  ;;  %v5061_v56 = vld [vmem:[%s7784_s3 + $0x140] sm:$0xff] }
 0xf4b   : > { %v3412_v57 = vadd.f32 %v5072_v23, %v3404_v41  ;;  %5410 = vmatprep.subr.bf16.mxu1 %v6004_v43  ;;  %v5062_v41 = vld [vmem:[%s7784_s3 + $0x148] sm:$0xff] }
 0xf4c   : > { %v3411_v33 = vadd.f32 %v5072_v23, %v3403_v34  ;;  %v5064_v23 = vld [vmem:[%s7784_s3 + $0x158] sm:$0xff]  ;;  %v3533_v34 = vpack.c.bf16 %v5062_v41, %v5061_v56 }
 0xf4d   : > { %v7313_v53 = vadd.f32 %v3412_v57, %v7279_v61  ;;  %v3600_v61 = vmax.f32 %v3599_v30, %v3596_v1  ;;  %v3534_v21 = vpack.c.bf16 %v5064_v23, %v5063_v62  ;;  %v5059_v57 = vld [vmem:[%s7784_s3 + $0x130] sm:$0xff]  ;;  %v5056_v30 = vld [vmem:[%s7784_s3 + $0x118] sm:$0xff] }
 0xf4e   : > { %v7316_v36 = vadd.f32 %v3411_v33, %v7282_v14  ;;  %5411 = vmatpush3.bf16.msra.mxu1 %v3535_v59  ;;  %v5060_v33 = vld [vmem:[%s7784_s3 + $0x138] sm:$0xff] }
 0xf4f   : > { %v3418_v12 = vsel %vm1301_vm6, %v7313_v53, 0.0  ;;  %v3601_v8 = vmax.f32 %v3600_v61, %v3597_v19  ;;  %5412 = vmatprep.subr.bf16.mxu1 %v6004_v43  ;;  %v5058_v19 = vld [vmem:[%s7784_s3 + $0x128] sm:$0xff]  ;;  %v3530_v61 = vpack.c.bf16 %v5056_v30, %v5055_v24 }
 0xf50   : > { %3419 = vadd.xlane.f32.xlu1 %v3418_v12  ;;  %v3415_v63 = vsel %vm1301_vm6, %v7316_v36, 0.0  ;;  %v3532_v12 = vpack.c.bf16 %v5060_v33, %v5059_v57 }
 0xf51   : > { %3416 = vadd.xlane.f32.xlu0 %v3415_v63  ;;  %3858 = vst.msk [vmem:[%s1086_s7] sm:$0xff] %vm2666_vm3, %v3601_v8  ;;  %3860 = vst.msk [vmem:[#allocation3] sm:$0xff] %vm2666_vm3, %v3601_v8  ;;  %v5057_v63 = vld [vmem:[%s7784_s3 + $0x120] sm:$0xff]  ;;  %s7383_s7 = scalar_lea.vmem [#allocation4], %s4959_s14  ;;  %s4978_s14 = sshll.u32 %s6233_s18, 2  ;;  %vm4429_vm3 = vcmask 1024  }
 0xf52   : > { %5413 = vmatpush3.bf16.msra.mxu1 %v3534_v21  ;;  %v3531_v1 = vpack.c.bf16 %v5058_v19, %v5057_v63  ;;  %s1090_s17 = scalar_lea.vmem %s7792_s6, %s4978_s14 }
 0xf53   : > { %5414 = vmatprep.subr.bf16.mxu1 %v6004_v43 }
 0xf56   : > { %5415 = vmatpush3.bf16.msra.mxu1 %v3533_v34 }
 0xf57   : > { %5416 = vmatprep.subr.bf16.mxu1 %v6004_v43 }
 0xf5a   : > { %5417 = vmatpush3.bf16.msra.mxu1 %v3532_v12 }
 0xf5b   : > { %5418 = vmatprep.subr.bf16.mxu1 %v6004_v43 }
 0xf5e   : > { %5419 = vmatpush3.bf16.msra.mxu1 %v3531_v1 }
 0xf5f   : > { %5420 = vmatprep.subr.bf16.mxu1 %v6004_v43 }
 0xf62   : > { %5421 = vmatpush3.bf16.msra.mxu1 %v3530_v61  ;;  %v5106_v61 = vld [vmem:[%s7766_s19 + $0x3] ss:$0 sm:$0xff] }
 0xf63   : > { %5422 = vmatprep.subr.bf16.mxu1 %v6004_v43 }
 0xfd9   : > { %v3420_v14 = vpop.xlane.xlu1 %3419 }
 0xfda   : > { %v3422_v32 = vmul.f32 0.03125, %v3420_v14  ;;  %v3417_v7 = vpop.xlane.xlu0 %3416  ;;  %v5054_v14 = vld [vmem:[%s7784_s3 + $0x108] sm:$0xff] }
 0xfdb   : > { %v3421_v48 = vmul.f32 0.03125, %v3417_v7  ;;  %v5075_v7 = vld [vmem:[%s7785_s4 + $0x2] ss:$0 sm:$0xff] }
 0xfdc   : > { %v3424_v15 = vsub.f32 %v7313_v53, %v3422_v32 }
 0xfdd   : > { %v3423_v27 = vsub.f32 %v7316_v36, %v3421_v48 }
 0xfde   : > { %v3426_v17 = vmul.f32 %v3424_v15, %v3424_v15 }
 0xfdf   : > { %v3425_v44 = vmul.f32 %v3423_v27, %v3423_v27 }
 0xfe0   : > { %v3430_v50 = vsel %vm1301_vm6, %v3426_v17, 0.0 }
 0xfe1   : > { %3431 = vadd.xlane.f32.xlu1 %v3430_v50  ;;  %v3427_v25 = vsel %vm1301_vm6, %v3425_v44, 0.0 }
 0xfe2   : > { %3428 = vadd.xlane.f32.xlu0 %v3427_v25 }
 0xff8   : > { %3610 = vperm.xlu0 %5645, %v3601_v8   ;;  %v5053_v8 = vld [vmem:[%s7784_s3 + $0x100] sm:$0xff] }
 0xff9   : > { %v3529_v32 = vpack.c.bf16 %v5054_v14, %v5053_v8  ;;  %v5107_v14 = vld [vmem:[%s7765_s24 + $0x3] ss:$0 sm:$0xff] }
 0xffb   : > { %5423 = vmatpush3.bf16.msra.mxu1 %v3529_v32 }
 0xffc   : > { %5456 = vmatprep.subr.bf16.mxu1 %v6004_v43 }
0x106a   : > { %v3432_v60 = vpop.xlane.xlu1 %3431 }
0x106b   : > { %v3434_v10 = vmul.f32 0.03125, %v3432_v60  ;;  %v3429_v11 = vpop.xlane.xlu0 %3428 }
0x106c   : > { %v3433_v38 = vmul.f32 0.03125, %v3429_v11 }
0x106d   : > { %v3436_v4 = vadd.f32 1e-05, %v3434_v10 }
0x106e   : > { %v3435_v29 = vadd.f32 1e-05, %v3433_v38 }
0x106f   : > { %5795 = vrsqrt.f32 %v3436_v4 }
0x1070   : > { %5797 = vrsqrt.f32 %v3435_v29 }
0x1073   : > { %v7395_v41 = vpop.permute.xlu0 %3610 }
0x107c   : > { %v5796_v3 = vpop.eup %5795 }
0x107d   : > { %v5798_v28 = vpop.eup %5797  ;;  %v3440_v46 = vmul.f32 %v5796_v3, %v3424_v15 }
0x107e   : > { %v3439_v39 = vmul.f32 %v5798_v28, %v3423_v27 }
0x107f   : > { %v3448_v9 = vmul.f32 %v5073_v22, %v3440_v46 }
0x1080   : > { %v3447_v42 = vmul.f32 %v5073_v22, %v3439_v39 }
0x1081   : > { %v3456_v18 = vadd.f32 %v5074_v52, %v3448_v9  ;;  %v5077_v9 = vld [vmem:[%s7786_s8 + $0x2] ss:$0 sm:$0xff] }
0x1082   : > { %v3455_v31 = vadd.f32 %v5074_v52, %v3447_v42 }
0x1084   : > { %v3457_v16 = vpack.c.bf16 %v3456_v18, %v3455_v31 }
0x1086   : > { %5405 = vmatmul.mubr.msk.bf16.vlgmr.msra.gmra.mxu0 %vm1301_vm6, %v3457_v16 }
0x1087   : > { %5432 = vmatprep.mubr.msk.bf16.mxu0 %vm6005_vm12, %v6004_v43 }
0x1146   : > { %v3503_v48 = vpop.f32.mrf.mxu0 }
0x1147   : > { %v3504_v15 = vadd.f32 %v5075_v7, %v3503_v48  ;;  %v5080_v48 = vld [vmem:[%s6080_s30 + $0xc] sm:$0x7] }
0x1148   : > { %v5406_v27 = vpop.f32.mrf.mxu0 }
0x1149   : > { %v3510_v17 = vmul.f32 %v3504_v15, %v3504_v15  ;;  %v3690_v27 = vrot.slane %v5080_v48, %v6733_v0 }
0x114a   : > { %v3506_v44 = vpop.f32.mrf.mxu0 }
0x114b   : > { %v3512_v50 = vmul.f32 %v3510_v17, %v3504_v15  ;;  %v3507_v25 = vadd.f32 %v5075_v7, %v3506_v44  ;;  %v3695_v17 = vrot.slane %v5080_v48, %v6726_v5 }
0x114c   : > { %v5407_v49 = vpop.f32.mrf.mxu0 }
0x114d   : > { %v3514_v20 = vmul.f32 0.044715, %v3512_v50  ;;  %v3511_v13 = vmul.f32 %v3507_v25, %v3507_v25 }
0x114f   : > { %v3516_v47 = vadd.f32 %v3514_v20, %v3504_v15  ;;  %v3513_v40 = vmul.f32 %v3511_v13, %v3507_v25 }
0x1151   : > { %v3518_v37 = vmul.f32 0.7978846, %v3516_v47  ;;  %v3515_v60 = vmul.f32 0.044715, %v3513_v40 }
0x1153   : > { %5799 = vtanh.f32 %v3518_v37  ;;  %v3517_v10 = vadd.f32 %v3515_v60, %v3507_v25  ;;  %v5108_v60 = vld [vmem:[%s7779_s13 + $0x3] ss:$0 sm:$0xff] }
0x1155   : > { %v3519_v11 = vmul.f32 0.7978846, %v3517_v10 }
0x1157   : > { %5801 = vtanh.f32 %v3519_v11 }
0x1160   : > { %v5800_v38 = vpop.eup %5799 }
0x1161   : > { %v3522_v4 = vadd.f32 1.0, %v5800_v38 }
0x1163   : > { %v3524_v3 = vmul.f32 0.5, %v3522_v4 }
0x1164   : > { %v5802_v29 = vpop.eup %5801 }
0x1165   : > { %v3523_v22 = vadd.f32 1.0, %v5802_v29  ;;  %v3526_v46 = vmul.f32 %v3524_v3, %v3504_v15  ;;  %v3862_v29 = vld [vmem:[#allocation3 + $0x1] ss:$2 sm:$0xf] }
0x1166   : > { %v3864_v3 = vrot.slane %v3862_v29, 4 }
0x1167   : > { %v3525_v28 = vmul.f32 0.5, %v3523_v22 }
0x1168   : > { %v3865_v22 = vsel %vm3863_vm14, %v3864_v3, %v3862_v29 }
0x1169   : > { %v3527_v39 = vmul.f32 %v3525_v28, %v3507_v25  ;;  %v3701_v25 = vrot.slane %v5080_v48, %v6736_v35  ;;  %v3866_v28 = vrot.slane %v3865_v22, 4  ;;  %v5097_v48 = vld [vmem:[%s7784_s3 + $0x1c0] sm:$0xff] }
0x116b   : > { %v3528_v52 = vpack.c.bf16 %v3527_v39, %v3526_v46  ;;  %v3867_v46 = vsel %vm3863_vm14, %v3866_v28, %v3862_v29  ;;  %v3861_v39 = vld [vmem:[#allocation3] ss:$2 sm:$0xf] }
0x116d   : > { %5425 = vmatmul.mubr.bf16.vlgmr.msra.gmra.mxu1 %v3528_v52  ;;  %v3869_v52 = vrot.slane %v3867_v46, 3 }
0x116e   : > { %5460 = vmatprep.mubr.msk.bf16.mxu1 %vm6005_vm12, %v6004_v43 }
0x122d   : > { %v3577_v42 = vpop.f32.mrf.mxu1 }
0x122e   : > { %v3578_v18 = vadd.f32 %v5077_v9, %v3577_v42 }
0x122f   : > { %v5426_v31 = vpop.f32.mrf.mxu1 }
0x1230   : > { %v3584_v16 = vadd.f32 %v3578_v18, %v7316_v36 }
0x1231   : > { %v3580_v54 = vpop.f32.mrf.mxu1 }
0x1232   : > { %v3586_v55 = vmul.f32 %v3584_v16, %v7276_v2  ;;  %v3581_v26 = vadd.f32 %v5077_v9, %v3580_v54  ;;  %v3871_v9 = vsel %vm1147_vm4, 0.0, %v3869_v52 }
0x1233   : > { %v5427_v45 = vpop.f32.mrf.mxu1  ;;  %v3872_v42 = vmax.f32 %v3871_v9, %v3861_v39 }
0x1234   : > { %3588 = vst.msk [vmem:[%s7383_s7] sm:$0xff] %vm1301_vm6, %v3586_v55  ;;  %3592 = vst.msk [vmem:[#allocation2] sm:$0xff] %vm1301_vm6, %v3586_v55  ;;  %v3585_v51 = vadd.f32 %v3581_v26, %v7313_v53  ;;  %v5086_v45 = vld [vmem:[%s7781_s1 + $0x70] sm:$0xff] }
0x1235   : > { %v3873_v18 = vmax.f32 %v3872_v42, %v3862_v29 }
0x1236   : > { %v3587_v59 = vmul.f32 %v3585_v51, %v7274_v58  ;;  %v5087_v51 = vld [vmem:[%s7781_s1 + $0x78] sm:$0xff] }
0x1237   : > { %4145 = vst.msk [vmem:[%s1090_s17] sm:$0xf] %vm4144_vm15, %v3873_v18  ;;  %4147 = vst.msk [vmem:[#allocation3] sm:$0xf] %vm4144_vm15, %v3873_v18  ;;  %s4960_s17 = sshll.u32 %s7377_s9, 3 }
0x1238   : > { %3589 = vst.msk [vmem:[%s7383_s7 + $0x8] sm:$0xff] %vm1301_vm6, %v3587_v59  ;;  %3593 = vst.msk [vmem:[#allocation2 + $0x8] sm:$0xff] %vm1301_vm6, %v3587_v59  ;;  %v5084_v59 = vld [vmem:[%s7781_s1 + $0x60] sm:$0xff]  ;;  %s7466_s14 = scalar_lea.vmem [#allocation6], %s4960_s17  ;;  %s4979_s17 = sshll.u32 %s6233_s18, 1 }
0x1239   : > { %s1094_s6 = scalar_lea.vmem %s7793_s20, %s4979_s17  ;;  %s7794_s17 = sld [smem:[#allocation37_spill]] }
0x123f   : > { %v3603_v36 = vld [vmem:[#allocation2 + $0x1] ss:$2 sm:$0xff]  ;;  %v3602_v62 = vld [vmem:[#allocation2] ss:$2 sm:$0xff] }
0x1240   : > { %v3604_v2 = vrot.slane %v3603_v36, 7 }
0x1242   : > { %v3605_v23 = vsel %vm1147_vm4, -1e+30, %v3604_v2  ;;  %v5085_v2 = vld [vmem:[%s7781_s1 + $0x68] sm:$0xff] }
0x1243   : > { %v3606_v21 = vmax.f32 %v3605_v23, %v3602_v62  ;;  %v3740_v62 = vpack.c.bf16 %v5085_v2, %v5084_v59 }
0x1245   : > { %v3607_v56 = vmax.f32 %v3606_v21, %v3603_v36  ;;  %v3741_v36 = vpack.c.bf16 %v5087_v51, %v5086_v45 }
0x1247   : > { %v3613_v34 = vmul.f32 %v7395_v41, %v3607_v56  ;;  %5429 = vmatpush3.bf16.msra.mxu0 %v3741_v36 }
0x1248   : > { %5430 = vmatprep.subr.bf16.mxu0 %v6004_v43 }
0x1249   : > { %v3652_v58 = vsel %vm1301_vm6, %v3613_v34, 0.0 }
0x124a   : > { %3653 = vadd.xlane.f32.xlu1 %v3652_v58  ;;  %v5109_v58 = vld [vmem:[%s7782_s5 + $0x3] ss:$0 sm:$0xff] }
0x124b   : > { %5431 = vmatpush3.bf16.msra.mxu0 %v3740_v62 }
0x124c   : > { %5436 = vmatprep.subr.bf16.mxu0 %v6004_v43 }
0x12d3   : > { %v3654_v53 = vpop.xlane.xlu1 %3653 }
0x12d4   : > { %v3655_v57 = vmul.f32 0.03125, %v3654_v53 }
0x12d6   : > { %v3656_v33 = vsub.f32 %v3613_v34, %v3655_v57  ;;  %v5110_v57 = vld [vmem:[%s7783_s10 + $0x3] ss:$0 sm:$0xff] }
0x12d8   : > { %v3657_v12 = vmul.f32 %v3656_v33, %v3656_v33 }
0x12da   : > { %v3658_v63 = vsel %vm1301_vm6, %v3657_v12, 0.0 }
0x12db   : > { %3659 = vadd.xlane.f32.xlu1 %v3658_v63 }
0x1364   : > { %v3660_v19 = vpop.xlane.xlu1 %3659 }
0x1365   : > { %v3661_v1 = vmul.f32 0.03125, %v3660_v19  ;;  %v5103_v19 = vld [vmem:[%s7784_s3 + $0x1f0] sm:$0xff] }
0x1367   : > { %v3662_v24 = vadd.f32 1e-05, %v3661_v1  ;;  %v5104_v1 = vld [vmem:[%s7784_s3 + $0x1f8] sm:$0xff] }
0x1369   : > { %5803 = vrsqrt.f32 %v3662_v24  ;;  %v5101_v24 = vld [vmem:[%s7784_s3 + $0x1e0] sm:$0xff] }
0x1376   : > { %v5804_v30 = vpop.eup %5803 }
0x1377   : > { %v3664_v8 = vmul.f32 %v5804_v30, %v3656_v33  ;;  %v3808_v30 = vpack.c.bf16 %v5104_v1, %v5103_v19 }
0x1379   : > { %v3671_v32 = vmul.f32 %v5106_v61, %v3664_v8  ;;  %v5102_v61 = vld [vmem:[%s7784_s3 + $0x1e8] sm:$0xff] }
0x137a   : > { %v3807_v8 = vpack.c.bf16 %v5102_v61, %v5101_v24 }
0x137b   : > { %v3678_v7 = vadd.f32 %v5107_v14, %v3671_v32  ;;  %v5099_v14 = vld [vmem:[%s7784_s3 + $0x1d0] sm:$0xff]  ;;  %v5100_v32 = vld [vmem:[%s7784_s3 + $0x1d8] sm:$0xff] }
0x137d   : > { %v3679_v15 = vmul.f32 %v3678_v7, %v7395_v41  ;;  %v3806_v7 = vpack.c.bf16 %v5100_v32, %v5099_v14 }
0x137f   : > { %v3680_v44 = vrot.slane %v3679_v15, 7  ;;  %v3682_v50 = vrot.slane %v3679_v15, 1  ;;  %v3696_v47 = vmul.f32 %v3695_v17, %v3679_v15  ;;  %v5098_v15 = vld [vmem:[%s7784_s3 + $0x1c8] sm:$0xff]  ;;  %v5095_v17 = vld [vmem:[%s7784_s3 + $0x1b0] sm:$0xff] }
0x1381   : > { %v3681_v49 = vsel %vm1147_vm4, 0.0, %v3680_v44  ;;  %v3686_v20 = vsel %vm3683_vm13, 0.0, %v3682_v50  ;;  %v5096_v44 = vld [vmem:[%s7784_s3 + $0x1b8] sm:$0xff] }
0x1382   : > { %v3691_v13 = vmul.f32 %v3690_v27, %v3681_v49  ;;  %v3702_v37 = vmul.f32 %v3701_v25, %v3686_v20  ;;  %v3805_v27 = vpack.c.bf16 %v5098_v15, %v5097_v48  ;;  %v3804_v50 = vpack.c.bf16 %v5096_v44, %v5095_v17  ;;  %v5093_v25 = vld [vmem:[%s7784_s3 + $0x1a0] sm:$0xff]  ;;  %v5094_v49 = vld [vmem:[%s7784_s3 + $0x1a8] sm:$0xff] }
0x1383   : > { %v3803_v20 = vpack.c.bf16 %v5094_v49, %v5093_v25  ;;  %v5143_v44 = vld [vmem:[%s7765_s24 + $0x4] ss:$0 sm:$0xff] }
0x1384   : > { %v3697_v40 = vadd.f32 %v3696_v47, %v3691_v13  ;;  %v5091_v13 = vld [vmem:[%s7784_s3 + $0x190] sm:$0xff]  ;;  %v5092_v47 = vld [vmem:[%s7784_s3 + $0x198] sm:$0xff] }
0x1386   : > { %v3703_v10 = vadd.f32 %v3702_v37, %v3697_v40  ;;  %v3802_v40 = vpack.c.bf16 %v5092_v47, %v5091_v13  ;;  %v5089_v37 = vld [vmem:[%s7784_s3 + $0x180] sm:$0xff]  ;;  %v5116_v13 = vld [vmem:[%s6080_s30 + $0x10] sm:$0x7] }
0x1388   : > { %v3710_v11 = vadd.f32 %v5108_v60, %v3703_v10  ;;  %v5090_v60 = vld [vmem:[%s7784_s3 + $0x188] sm:$0xff] }
0x1389   : > { %v3801_v10 = vpack.c.bf16 %v5090_v60, %v5089_v37  ;;  %v3976_v60 = vrot.slane %v5116_v13, %v6733_v0 }
0x138a   : > { %v7411_v38 = vadd.f32 %v3710_v11, %v3613_v34  ;;  %v5111_v11 = vld [vmem:[%s7785_s4 + $0x3] ss:$0 sm:$0xff] }
0x138c   : > { %v3712_v4 = vsel %vm1301_vm6, %v7411_v38, 0.0 }
0x138d   : > { %3713 = vadd.xlane.f32.xlu1 %v3712_v4 }
0x1416   : > { %v3714_v31 = vpop.xlane.xlu1 %3713 }
0x1417   : > { %v3715_v16 = vmul.f32 0.03125, %v3714_v31 }
0x1419   : > { %v3716_v54 = vsub.f32 %v7411_v38, %v3715_v16 }
0x141b   : > { %v3717_v55 = vmul.f32 %v3716_v54, %v3716_v54 }
0x141d   : > { %v3718_v26 = vsel %vm1301_vm6, %v3717_v55, 0.0 }
0x141e   : > { %3719 = vadd.xlane.f32.xlu1 %v3718_v26  ;;  %v5113_v26 = vld [vmem:[%s7786_s8 + $0x3] ss:$0 sm:$0xff] }
0x142f   : > { %3888 = vperm.xlu1 %5646, %v3873_v18  }
0x14a7   : > { %v3720_v23 = vpop.xlane.xlu1 %3719 }
0x14a8   : > { %v3721_v21 = vmul.f32 0.03125, %v3720_v23 }
0x14aa   : > { %v3722_v56 = vadd.f32 1e-05, %v3721_v21 }
0x14ac   : > { %5805 = vrsqrt.f32 %v3722_v56 }
0x14b9   : > { %v5806_v34 = vpop.eup %5805 }
0x14ba   : > { %v3724_v53 = vmul.f32 %v5806_v34, %v3716_v54 }
0x14bc   : > { %v3731_v33 = vmul.f32 %v5109_v58, %v3724_v53 }
0x14be   : > { %v3738_v12 = vadd.f32 %v5110_v57, %v3731_v33 }
0x14c0   : > { %v3739_v63 = vpack.c.bf16 %v3738_v12, %v3738_v12 }
0x14c2   : > { %5433 = vmatmul.mubr.msk.bf16.vlgmr.msra.gmra.mxu0 %vm1301_vm6, %v3739_v63  ;;  %v7474_v63 = vpop.permute.xlu1 %3888 }
0x14c3   : > { %5452 = vmatprep.mubr.msk.bf16.mxu0 %vm6005_vm12, %v6004_v43  ;;  %5437 = vmatpush3.bf16.msra.mxu0 %v3808_v30 }
0x14c4   : > { %5438 = vmatprep.subr.bf16.mxu0 %v6004_v43 }
0x14c7   : > { %5439 = vmatpush3.bf16.msra.mxu0 %v3807_v8 }
0x14c8   : > { %5440 = vmatprep.subr.bf16.mxu0 %v6004_v43 }
0x14cb   : > { %5441 = vmatpush3.bf16.msra.mxu0 %v3806_v7 }
0x14cc   : > { %5442 = vmatprep.subr.bf16.mxu0 %v6004_v43 }
0x14cf   : > { %5443 = vmatpush3.bf16.msra.mxu0 %v3805_v27  ;;  %v5142_v27 = vld [vmem:[%s7766_s19 + $0x4] ss:$0 sm:$0xff] }
0x14d0   : > { %5444 = vmatprep.subr.bf16.mxu0 %v6004_v43 }
0x14d3   : > { %5445 = vmatpush3.bf16.msra.mxu0 %v3804_v50 }
0x14d4   : > { %5446 = vmatprep.subr.bf16.mxu0 %v6004_v43 }
0x14d7   : > { %5447 = vmatpush3.bf16.msra.mxu0 %v3803_v20 }
0x14d8   : > { %5448 = vmatprep.subr.bf16.mxu0 %v6004_v43 }
0x14db   : > { %5449 = vmatpush3.bf16.msra.mxu0 %v3802_v40 }
0x14dc   : > { %5450 = vmatprep.subr.bf16.mxu0 %v6004_v43 }
0x14df   : > { %5451 = vmatpush3.bf16.msra.mxu0 %v3801_v10  ;;  %v3981_v10 = vrot.slane %v5116_v13, %v6726_v5 }
0x14e0   : > { %5484 = vmatprep.subr.bf16.mxu0 %v6004_v43 }
0x1582   : > { %v3785_v4 = vpop.f32.mrf.mxu0 }
0x1583   : > { %v3786_v29 = vadd.f32 %v5111_v11, %v3785_v4 }
0x1584   : > { %v5434_v3 = vpop.f32.mrf.mxu0 }
0x1585   : > { %v3791_v22 = vmul.f32 %v3786_v29, %v3786_v29 }
0x1586   : > { %v3788_v28 = vpop.f32.mrf.mxu0 }
0x1587   : > { %v3792_v46 = vmul.f32 %v3791_v22, %v3786_v29 }
0x1588   : > { %v5435_v39 = vpop.f32.mrf.mxu0 }
0x1589   : > { %v3793_v52 = vmul.f32 0.044715, %v3792_v46 }
0x158b   : > { %v3794_v9 = vadd.f32 %v3793_v52, %v3786_v29 }
0x158d   : > { %v3795_v42 = vmul.f32 0.7978846, %v3794_v9  ;;  %v5144_v9 = vld [vmem:[%s7779_s13 + $0x4] ss:$0 sm:$0xff] }
0x158f   : > { %5807 = vtanh.f32 %v3795_v42 }
0x159c   : > { %v5808_v18 = vpop.eup %5807 }
0x159d   : > { %v3797_v31 = vadd.f32 1.0, %v5808_v18 }
0x159f   : > { %v3798_v16 = vmul.f32 0.5, %v3797_v31 }
0x15a1   : > { %v3799_v54 = vmul.f32 %v3798_v16, %v3786_v29  ;;  %v3987_v29 = vrot.slane %v5116_v13, %v6736_v35  ;;  %v5136_v13 = vld [vmem:[%s7784_s3 + $0x258] sm:$0xff] }
0x15a3   : > { %v3800_v55 = vpack.c.bf16 %v3799_v54, %v3799_v54  ;;  %v4149_v54 = vld [vmem:[#allocation3 + $0x1] ss:$2 sm:$0x3] }
0x15a5   : > { %5453 = vmatmul.mubr.bf16.vlgmr.msra.gmra.mxu0 %v3800_v55  ;;  %v4151_v55 = vrot.slane %v4149_v54, 6 }
0x15a6   : > { %5488 = vmatprep.mubr.msk.bf16.mxu0 %vm6005_vm12, %v6004_v43 }
0x1665   : > { %v3849_v45 = vpop.f32.mrf.mxu0 }
0x1666   : > { %v3850_v51 = vadd.f32 %v5113_v26, %v3849_v45  ;;  %v4152_v26 = vsel %vm4150_vm2, %v4151_v55, %v4149_v54 }
0x1667   : > { %v5454_v59 = vpop.f32.mrf.mxu0  ;;  %v4153_v45 = vrot.slane %v4152_v26, 6 }
0x1668   : > { %v3855_v36 = vadd.f32 %v3850_v51, %v7411_v38  ;;  %v4148_v59 = vld [vmem:[#allocation3] ss:$2 sm:$0x3] }
0x1669   : > { %v3852_v2 = vpop.f32.mrf.mxu0  ;;  %v4154_v51 = vsel %vm4150_vm2, %v4153_v45, %v4149_v54 }
0x166a   : > { %v3856_v62 = vmul.f32 %v3855_v36, %v7395_v41  ;;  %v4156_v36 = vrot.slane %v4154_v51, 1 }
0x166b   : > { %v5455_v23 = vpop.f32.mrf.mxu0 }
0x166c   : > { %3859 = vst.msk [vmem:[#allocation2] sm:$0xff] %vm1301_vm6, %v3856_v62  ;;  %3857 = vst.msk [vmem:[%s7466_s14] sm:$0xff] %vm1301_vm6, %v3856_v62  ;;  %v4158_v2 = vsel %vm1147_vm4, 0.0, %v4156_v36 }
0x166d   : > { %v4159_v62 = vmax.f32 %v4158_v2, %v4148_v59 }
0x166f   : > { %v4160_v23 = vmax.f32 %v4159_v62, %v4149_v54 }
0x1671   : > { %4430 = vst.msk [vmem:[%s1094_s6] sm:$0x3] %vm4429_vm3, %v4160_v23  ;;  %s4961_s6 = sshll.u32 %s7377_s9, 2 }
0x1672   : > { %s7544_s18 = scalar_lea.vmem [#allocation8], %s4961_s6  ;;  %s4461_s6 = sand.u32 1, %s6198_s0  }
0x1673   : > { %v3875_v21 = vld [vmem:[#allocation2 + $0x1] ss:$2 sm:$0xf]  ;;  %v3874_v38 = vld [vmem:[#allocation2] ss:$2 sm:$0xf] }
0x1674   : > { %v3876_v56 = vrot.slane %v3875_v21, 4 }
0x1676   : > { %v3877_v34 = vsel %vm3863_vm14, %v3876_v56, %v3875_v21 }
0x1677   : > { %v3878_v58 = vrot.slane %v3877_v34, 4 }
0x1679   : > { %v3879_v53 = vsel %vm3863_vm14, %v3878_v58, %v3875_v21 }
0x167a   : > { %v3881_v57 = vrot.slane %v3879_v53, 3 }
0x167c   : > { %v3883_v41 = vsel %vm1147_vm4, -1e+30, %v3881_v57  ;;  %v5122_v57 = vld [vmem:[%s7781_s1 + $0x90] sm:$0xff] }
0x167d   : > { %v3884_v33 = vmax.f32 %v3883_v41, %v3874_v38  ;;  %v5123_v38 = vld [vmem:[%s7781_s1 + $0x98] sm:$0xff]  ;;  %v5120_v41 = vld [vmem:[%s7781_s1 + $0x80] sm:$0xff] }
0x167f   : > { %v3885_v12 = vmax.f32 %v3884_v33, %v3875_v21  ;;  %v4027_v33 = vpack.c.bf16 %v5123_v38, %v5122_v57 }
0x1681   : > { %v3891_v19 = vmul.f32 %v7474_v63, %v3885_v12  ;;  %v5121_v12 = vld [vmem:[%s7781_s1 + $0x88] sm:$0xff]  ;;  %5457 = vmatpush3.bf16.msra.mxu1 %v4027_v33 }
0x1682   : > { %5458 = vmatprep.subr.bf16.mxu1 %v6004_v43 }
0x1683   : > { %v3931_v1 = vsel %vm3930_vm0, %v3891_v19, 0.0 }
0x1684   : > { %3932 = vadd.xlane.f32.xlu0 %v3931_v1 }
0x170d   : > { %v3933_v24 = vpop.xlane.xlu0 %3932 }
0x170e   : > { %v3934_v30 = vmul.f32 0.03125, %v3933_v24 }
0x1710   : > { %v3935_v61 = vsub.f32 %v3891_v19, %v3934_v30 }
0x1712   : > { %v3936_v8 = vmul.f32 %v3935_v61, %v3935_v61 }
0x1714   : > { %v3937_v14 = vsel %vm3930_vm0, %v3936_v8, 0.0  ;;  %v5145_v8 = vld [vmem:[%s7782_s5 + $0x4] ss:$0 sm:$0xff] }
0x1715   : > { %3938 = vadd.xlane.f32.xlu1 %v3937_v14 }
0x179e   : > { %v3939_v32 = vpop.xlane.xlu1 %3938 }
0x179f   : > { %v3940_v7 = vmul.f32 0.03125, %v3939_v32  ;;  %v5146_v32 = vld [vmem:[%s7783_s10 + $0x4] ss:$0 sm:$0xff] }
0x17a1   : > { %v3941_v48 = vadd.f32 1e-05, %v3940_v7 }
0x17a3   : > { %5809 = vrsqrt.f32 %v3941_v48 }
0x17b0   : > { %v5810_v15 = vpop.eup %5809 }
0x17b1   : > { %v3943_v17 = vmul.f32 %v5810_v15, %v3935_v61 }
0x17b3   : > { %v3950_v50 = vmul.f32 %v5142_v27, %v3943_v17  ;;  %v5139_v27 = vld [vmem:[%s7784_s3 + $0x270] sm:$0xff]  ;;  %v5140_v17 = vld [vmem:[%s7784_s3 + $0x278] sm:$0xff] }
0x17b5   : > { %v3957_v25 = vadd.f32 %v5143_v44, %v3950_v50  ;;  %v5137_v44 = vld [vmem:[%s7784_s3 + $0x260] sm:$0xff]  ;;  %v4094_v50 = vpack.c.bf16 %v5140_v17, %v5139_v27 }
0x17b7   : > { %v3958_v49 = vmul.f32 %v3957_v25, %v7474_v63  ;;  %v5138_v25 = vld [vmem:[%s7784_s3 + $0x268] sm:$0xff] }
0x17b9   : > { %v3959_v20 = vrot.slane %v3958_v49, 4  ;;  %v3982_v46 = vmul.f32 %v3981_v10, %v3958_v49  ;;  %v5131_v10 = vld [vmem:[%s7784_s3 + $0x230] sm:$0xff] }
0x17bb   : > { %v3960_v47 = vsel %vm3863_vm14, %v3959_v20, %v3958_v49  ;;  %v5135_v20 = vld [vmem:[%s7784_s3 + $0x250] sm:$0xff] }
0x17bc   : > { %v3961_v40 = vrot.slane %v3960_v47, 4  ;;  %v4092_v47 = vpack.c.bf16 %v5136_v13, %v5135_v20 }
0x17be   : > { %v3962_v37 = vsel %vm3863_vm14, %v3961_v40, %v3958_v49  ;;  %v4093_v49 = vpack.c.bf16 %v5138_v25, %v5137_v44  ;;  %v5133_v40 = vld [vmem:[%s7784_s3 + $0x240] sm:$0xff] }
0x17bf   : > { %v3964_v11 = vrot.slane %v3962_v37, 3  ;;  %v3970_v4 = vrot.slane %v3962_v37, 1  ;;  %v5134_v37 = vld [vmem:[%s7784_s3 + $0x248] sm:$0xff] }
0x17c1   : > { %v3966_v3 = vsel %vm1147_vm4, 0.0, %v3964_v11  ;;  %v3972_v22 = vsel %vm3967_vm1, 0.0, %v3970_v4  ;;  %v5132_v11 = vld [vmem:[%s7784_s3 + $0x238] sm:$0xff] }
0x17c2   : > { %v3977_v28 = vmul.f32 %v3976_v60, %v3966_v3  ;;  %v3988_v52 = vmul.f32 %v3987_v29, %v3972_v22  ;;  %v4091_v60 = vpack.c.bf16 %v5134_v37, %v5133_v40  ;;  %v4090_v4 = vpack.c.bf16 %v5132_v11, %v5131_v10  ;;  %v5129_v29 = vld [vmem:[%s7784_s3 + $0x220] sm:$0xff]  ;;  %v5130_v3 = vld [vmem:[%s7784_s3 + $0x228] sm:$0xff] }
0x17c3   : > { %v4089_v22 = vpack.c.bf16 %v5130_v3, %v5129_v29  ;;  %v5179_v11 = vld [vmem:[%s7765_s24 + $0x5] ss:$0 sm:$0xff] }
0x17c4   : > { %v3983_v39 = vadd.f32 %v3982_v46, %v3977_v28  ;;  %v5127_v28 = vld [vmem:[%s7784_s3 + $0x210] sm:$0xff]  ;;  %v5128_v46 = vld [vmem:[%s7784_s3 + $0x218] sm:$0xff] }
0x17c6   : > { %v3989_v42 = vadd.f32 %v3988_v52, %v3983_v39  ;;  %v4088_v39 = vpack.c.bf16 %v5128_v46, %v5127_v28  ;;  %v5125_v52 = vld [vmem:[%s7784_s3 + $0x200] sm:$0xff]  ;;  %v5152_v28 = vld [vmem:[%s6080_s30 + $0x14] sm:$0x7] }
0x17c8   : > { %v3996_v18 = vadd.f32 %v5144_v9, %v3989_v42  ;;  %v5126_v9 = vld [vmem:[%s7784_s3 + $0x208] sm:$0xff] }
0x17c9   : > { %v4087_v42 = vpack.c.bf16 %v5126_v9, %v5125_v52  ;;  %v4261_v9 = vrot.slane %v5152_v28, %v6733_v0 }
0x17ca   : > { %v7492_v31 = vadd.f32 %v3996_v18, %v3891_v19  ;;  %v4026_v19 = vpack.c.bf16 %v5121_v12, %v5120_v41  ;;  %v5147_v18 = vld [vmem:[%s7785_s4 + $0x4] ss:$0 sm:$0xff] }
0x17cc   : > { %v3998_v16 = vsel %vm3930_vm0, %v7492_v31, 0.0  ;;  %5459 = vmatpush3.bf16.msra.mxu1 %v4026_v19 }
0x17cd   : > { %3999 = vadd.xlane.f32.xlu0 %v3998_v16  ;;  %5464 = vmatprep.subr.bf16.mxu1 %v6004_v43 }
0x1856   : > { %v4000_v21 = vpop.xlane.xlu0 %3999 }
0x1857   : > { %v4001_v56 = vmul.f32 0.03125, %v4000_v21 }
0x1859   : > { %v4002_v34 = vsub.f32 %v7492_v31, %v4001_v56 }
0x185b   : > { %v4003_v58 = vmul.f32 %v4002_v34, %v4002_v34 }
0x185d   : > { %v4004_v53 = vsel %vm3930_vm0, %v4003_v58, 0.0 }
0x185e   : > { %4005 = vadd.xlane.f32.xlu0 %v4004_v53  ;;  %v5149_v53 = vld [vmem:[%s7786_s8 + $0x4] ss:$0 sm:$0xff] }
0x1874   : > { %4175 = vperm.xlu0 %5645, %v4160_v23  }
0x18e7   : > { %v4006_v1 = vpop.xlane.xlu0 %4005 }
0x18e8   : > { %v4007_v24 = vmul.f32 0.03125, %v4006_v1 }
0x18ea   : > { %v4008_v30 = vadd.f32 1e-05, %v4007_v24 }
0x18ec   : > { %5811 = vrsqrt.f32 %v4008_v30 }
0x18f9   : > { %v5812_v61 = vpop.eup %5811 }
0x18fa   : > { %v4010_v14 = vmul.f32 %v5812_v61, %v4002_v34 }
0x18fc   : > { %v4017_v7 = vmul.f32 %v5145_v8, %v4010_v14 }
0x18fe   : > { %v4024_v48 = vadd.f32 %v5146_v32, %v4017_v7 }
0x1900   : > { %v4025_v15 = vpack.c.bf16 %v4024_v48, %v4024_v48 }
0x1902   : > { %5461 = vmatmul.mubr.msk.bf16.vlgmr.msra.gmra.mxu1 %vm1301_vm6, %v4025_v15  ;;  %v7552_v15 = vpop.permute.xlu0 %4175 }
0x1903   : > { %5480 = vmatprep.mubr.msk.bf16.mxu1 %vm6005_vm12, %v6004_v43  ;;  %5465 = vmatpush3.bf16.msra.mxu1 %v4094_v50 }
0x1904   : > { %5466 = vmatprep.subr.bf16.mxu1 %v6004_v43 }
0x1907   : > { %5467 = vmatpush3.bf16.msra.mxu1 %v4093_v49 }
0x1908   : > { %5468 = vmatprep.subr.bf16.mxu1 %v6004_v43 }
0x190b   : > { %5469 = vmatpush3.bf16.msra.mxu1 %v4092_v47 }
0x190c   : > { %5470 = vmatprep.subr.bf16.mxu1 %v6004_v43 }
0x190f   : > { %5471 = vmatpush3.bf16.msra.mxu1 %v4091_v60  ;;  %v5178_v60 = vld [vmem:[%s7766_s19 + $0x5] ss:$0 sm:$0xff]  ;;  %s6006_s19 = smov [#allocation6]  }
0x1910   : > { %5472 = vmatprep.subr.bf16.mxu1 %v6004_v43  ;;  %s5825_s20 = sshll.u32 %s6006_s19, 4  ;;  %s5826_s20 = int_to_ptr.vmem [resolvable:$false] %s5825_s20 }
0x1911   : > { %s5827_s21 = scalar_lea.vmem %s5826_s20, 256 }
0x1913   : > { %5473 = vmatpush3.bf16.msra.mxu1 %v4090_v4 }
0x1914   : > { %5474 = vmatprep.subr.bf16.mxu1 %v6004_v43 }
0x1917   : > { %5475 = vmatpush3.bf16.msra.mxu1 %v4089_v22 }
0x1918   : > { %5476 = vmatprep.subr.bf16.mxu1 %v6004_v43 }
0x191b   : > { %5477 = vmatpush3.bf16.msra.mxu1 %v4088_v39 }
0x191c   : > { %5478 = vmatprep.subr.bf16.mxu1 %v6004_v43 }
0x191f   : > { %5479 = vmatpush3.bf16.msra.mxu1 %v4087_v42  ;;  %v4266_v42 = vrot.slane %v5152_v28, %v6726_v5 }
0x19c2   : > { %v4071_v16 = vpop.f32.mrf.mxu1 }
0x19c3   : > { %v4072_v54 = vadd.f32 %v5147_v18, %v4071_v16  ;;  %v4272_v16 = vrot.slane %v5152_v28, %v6736_v35  ;;  %v5162_v28 = vld [vmem:[%s7784_s3 + $0x288] sm:$0xff] }
0x19c4   : > { %v5462_v55 = vpop.f32.mrf.mxu1 }
0x19c5   : > { %v4077_v26 = vmul.f32 %v4072_v54, %v4072_v54 }
0x19c6   : > { %v4074_v45 = vpop.f32.mrf.mxu1 }
0x19c7   : > { %v4078_v51 = vmul.f32 %v4077_v26, %v4072_v54 }
0x19c8   : > { %v5463_v59 = vpop.f32.mrf.mxu1 }
0x19c9   : > { %v4079_v36 = vmul.f32 0.044715, %v4078_v51 }
0x19cb   : > { %v4080_v2 = vadd.f32 %v4079_v36, %v4072_v54  ;;  %v5180_v36 = vld [vmem:[%s7779_s13 + $0x5] ss:$0 sm:$0xff] }
0x19cd   : > { %v4081_v62 = vmul.f32 0.7978846, %v4080_v2 }
0x19cf   : > { %5813 = vtanh.f32 %v4081_v62 }
0x19dc   : > { %v5814_v23 = vpop.eup %5813 }
0x19dd   : > { %v4083_v21 = vadd.f32 1.0, %v5814_v23 }
0x19df   : > { %v4084_v56 = vmul.f32 0.5, %v4083_v21 }
0x19e1   : > { %v4085_v34 = vmul.f32 %v4084_v56, %v4072_v54 }
0x19e3   : > { %v4086_v58 = vpack.c.bf16 %v4085_v34, %v4085_v34  ;;  %v5158_v34 = vld [vmem:[%s7781_s1 + $0xb0] sm:$0xff] }
0x19e5   : > { %5481 = vmatmul.mubr.bf16.vlgmr.msra.gmra.mxu1 %v4086_v58  ;;  %v5159_v58 = vld [vmem:[%s7781_s1 + $0xb8] sm:$0xff] }
0x1aa5   : > { %v4135_v57 = vpop.f32.mrf.mxu1 }
0x1aa6   : > { %v4136_v38 = vadd.f32 %v5149_v53, %v4135_v57  ;;  %v5156_v53 = vld [vmem:[%s7781_s1 + $0xa0] sm:$0xff]  ;;  %v4312_v57 = vpack.c.bf16 %v5159_v58, %v5158_v34 }
0x1aa7   : > { %v5482_v41 = vpop.f32.mrf.mxu1 }
0x1aa8   : > { %v4141_v33 = vadd.f32 %v4136_v38, %v7492_v31  ;;  %v5157_v38 = vld [vmem:[%s7781_s1 + $0xa8] sm:$0xff]  ;;  %5485 = vmatpush3.bf16.msra.mxu0 %v4312_v57  ;;  %s5192_s1 = sshll.u32 %s6198_s0, 7 }
0x1aa9   : > { %v4138_v12 = vpop.f32.mrf.mxu1  ;;  %v4311_v41 = vpack.c.bf16 %v5157_v38, %v5156_v53  ;;  %5486 = vmatprep.subr.bf16.mxu0 %v6004_v43 }
0x1aaa   : > { %v4142_v19 = vmul.f32 %v4141_v33, %v7474_v63 }
0x1aab   : > { %v5483_v1 = vpop.f32.mrf.mxu1 }
0x1aac   : > { %4146 = vst.msk [vmem:[#allocation2] sm:$0xf] %vm3930_vm0, %v4142_v19  ;;  %4143 = vst.msk [vmem:[%s7544_s18] sm:$0xf] %vm3930_vm0, %v4142_v19  ;;  %5487 = vmatpush3.bf16.msra.mxu0 %v4311_v41 }
0x1aad   : > { %5492 = vmatprep.subr.bf16.mxu0 %v6004_v43 }
0x1ab3   : > { %v4162_v24 = vld [vmem:[#allocation2 + $0x1] ss:$2 sm:$0x3]  ;;  %v4161_v31 = vld [vmem:[#allocation2] ss:$2 sm:$0x3] }
0x1ab4   : > { %v4163_v30 = vrot.slane %v4162_v24, 6 }
0x1ab6   : > { %v4164_v61 = vsel %vm4150_vm2, %v4163_v30, %v4162_v24 }
0x1ab7   : > { %v4165_v8 = vrot.slane %v4164_v61, 6  ;;  %v5182_v61 = vld [vmem:[%s7783_s10 + $0x5] ss:$0 sm:$0xff]  ;;  %s7618_s10 = scalar_lea.sflag [#allocation7], %s4461_s6 }
0x1ab9   : > { %v4166_v14 = vsel %vm4150_vm2, %v4165_v8, %v4162_v24 }
0x1aba   : > { %v4168_v32 = vrot.slane %v4166_v14, 1 }
0x1abc   : > { %v4170_v63 = vsel %vm1147_vm4, -1e+30, %v4168_v32 }
0x1abd   : > { %v4171_v7 = vmax.f32 %v4170_v63, %v4161_v31  ;;  %v5175_v31 = vld [vmem:[%s7784_s3 + $0x2f0] sm:$0xff]  ;;  %v5176_v63 = vld [vmem:[%s7784_s3 + $0x2f8] sm:$0xff] }
0x1abf   : > { %v4172_v48 = vmax.f32 %v4171_v7, %v4162_v24  ;;  %v5181_v24 = vld [vmem:[%s7782_s5 + $0x5] ss:$0 sm:$0xff]  ;;  %s5204_s5 = sshll.u32 %s6198_s0, 8 }
0x1ac0   : > { %v5173_v7 = vld [vmem:[%s7784_s3 + $0x2e0] sm:$0xff] }
0x1ac1   : > { %v4178_v27 = vmul.f32 %v7552_v15, %v4172_v48  ;;  %v4379_v48 = vpack.c.bf16 %v5176_v63, %v5175_v31 }
0x1ac3   : > { %v4218_v17 = vsel %vm4217_vm5, %v4178_v27, 0.0 }
0x1ac4   : > { %4219 = vadd.xlane.f32.xlu1 %v4218_v17 }
0x1b4d   : > { %v4220_v44 = vpop.xlane.xlu1 %4219 }
0x1b4e   : > { %v4221_v50 = vmul.f32 0.03125, %v4220_v44  ;;  %v5171_v44 = vld [vmem:[%s7784_s3 + $0x2d0] sm:$0xff] }
0x1b50   : > { %v4222_v25 = vsub.f32 %v4178_v27, %v4221_v50  ;;  %v5172_v50 = vld [vmem:[%s7784_s3 + $0x2d8] sm:$0xff] }
0x1b52   : > { %v4223_v49 = vmul.f32 %v4222_v25, %v4222_v25 }
0x1b54   : > { %v4224_v20 = vsel %vm4217_vm5, %v4223_v49, 0.0  ;;  %v5169_v49 = vld [vmem:[%s7784_s3 + $0x2c0] sm:$0xff] }
0x1b55   : > { %4225 = vadd.xlane.f32.xlu1 %v4224_v20  ;;  %v5170_v20 = vld [vmem:[%s7784_s3 + $0x2c8] sm:$0xff] }
0x1bde   : > { %v4226_v13 = vpop.xlane.xlu1 %4225 }
0x1bdf   : > { %v4227_v47 = vmul.f32 0.03125, %v4226_v13  ;;  %v4376_v13 = vpack.c.bf16 %v5170_v20, %v5169_v49 }
0x1be1   : > { %v4228_v40 = vadd.f32 1e-05, %v4227_v47  ;;  %v5167_v47 = vld [vmem:[%s7784_s3 + $0x2b0] sm:$0xff] }
0x1be3   : > { %5815 = vrsqrt.f32 %v4228_v40  ;;  %v5168_v40 = vld [vmem:[%s7784_s3 + $0x2b8] sm:$0xff] }
0x1bf0   : > { %v5816_v37 = vpop.eup %5815 }
0x1bf1   : > { %v4230_v10 = vmul.f32 %v5816_v37, %v4222_v25  ;;  %v4377_v25 = vpack.c.bf16 %v5172_v50, %v5171_v44  ;;  %v4375_v37 = vpack.c.bf16 %v5168_v40, %v5167_v47 }
0x1bf3   : > { %v4237_v4 = vmul.f32 %v5178_v60, %v4230_v10  ;;  %v5165_v60 = vld [vmem:[%s7784_s3 + $0x2a0] sm:$0xff]  ;;  %v5166_v10 = vld [vmem:[%s7784_s3 + $0x2a8] sm:$0xff] }
0x1bf5   : > { %v4244_v29 = vadd.f32 %v5179_v11, %v4237_v4  ;;  %v4374_v11 = vpack.c.bf16 %v5166_v10, %v5165_v60  ;;  %v5163_v4 = vld [vmem:[%s7784_s3 + $0x290] sm:$0xff] }
0x1bf7   : > { %v4245_v3 = vmul.f32 %v4244_v29, %v7552_v15  ;;  %v5164_v29 = vld [vmem:[%s7784_s3 + $0x298] sm:$0xff] }
0x1bf9   : > { %v4246_v22 = vrot.slane %v4245_v3, 6  ;;  %v4267_v45 = vmul.f32 %v4266_v42, %v4245_v3 }
0x1bfb   : > { %v4247_v46 = vsel %vm4150_vm2, %v4246_v22, %v4245_v3  ;;  %v5161_v22 = vld [vmem:[%s7784_s3 + $0x280] sm:$0xff] }
0x1bfc   : > { %v4248_v39 = vrot.slane %v4247_v46, 6  ;;  %v4372_v46 = vpack.c.bf16 %v5162_v28, %v5161_v22 }
0x1bfe   : > { %v4249_v52 = vsel %vm4150_vm2, %v4248_v39, %v4245_v3  ;;  %v4373_v3 = vpack.c.bf16 %v5164_v29, %v5163_v4  ;;  %v5183_v39 = vld [vmem:[%s7785_s4 + $0x5] ss:$0 sm:$0xff]  ;;  %s4528_s4 = sshll.u32 %s7466_s14, 4  ;;  %s4529_s4 = int_to_ptr.vmem [resolvable:$true] %s4528_s4 }
0x1bff   : > { %v4251_v18 = vrot.slane %v4249_v52, 1  ;;  %s5821_s13 = scalar_lea.vmem %s4529_s4, 128  ;;  %p5828_p0 = scmp.lt.s32.totalorder %s4529_s4, %s5826_s20 }
0x1c00   : > { %p5822_p11 = scmp.ne.s32.totalorder %s4529_s4, %s5821_s13  ;;  %p5829_p1 = scmp.lt.s32.totalorder %s5827_s21, %s5821_s13 }
0x1c01   : > { %v4253_v54 = vsel %vm1147_vm4, 0.0, %v4251_v18  ;;  %v4257_v55 = vsel %vm4254_vm7, 0.0, %v4251_v18 }
0x1c02   : > { %v4262_v26 = vmul.f32 %v4261_v9, %v4253_v54  ;;  %v4273_v59 = vmul.f32 %v4272_v16, %v4257_v55  ;;  %p5823_p12 = pnand %p5822_p11, %p6217_p5  ;;  %p5830_p2 = por %p5829_p1, %p5828_p0 }
0x1c04   : > { %v4268_v51 = vadd.f32 %v4267_v45, %v4262_v26  ;;  %p5824_p13 = pneg %p5823_p12 }
0x1c06   : > { %v4274_v2 = vadd.f32 %v4273_v59, %v4268_v51  ;;  %p5831_p3 = pnand %p5830_p2, %p5824_p13 }
0x1c08   : > { %v4281_v0 = vadd.f32 %v5180_v36, %v4274_v2 }
0x1c0a   : > { %v7570_v62 = vadd.f32 %v4281_v0, %v4178_v27  ;;  %v5174_v27 = vld [vmem:[%s7784_s3 + $0x2e8] sm:$0xff]  ;;  %s7614_s3 = scalar_lea.hbm %s7794_s17, %s5192_s1 }
0x1c0b   : > { %v4378_v17 = vpack.c.bf16 %v5174_v27, %v5173_v7 }
0x1c0c   : > { %v4283_v5 = vsel %vm4217_vm5, %v7570_v62, 0.0 }
0x1c0d   : > { %4284 = vadd.xlane.f32.xlu1 %v4283_v5 }
0x1c96   : > { %v4285_v6 = vpop.xlane.xlu1 %4284 }
0x1c97   : > { %v4286_v35 = vmul.f32 0.03125, %v4285_v6 }
0x1c99   : > { %v4287_v23 = vsub.f32 %v7570_v62, %v4286_v35 }
0x1c9b   : > { %v4288_v21 = vmul.f32 %v4287_v23, %v4287_v23 }
0x1c9d   : > { %v4289_v56 = vsel %vm4217_vm5, %v4288_v21, 0.0 }
0x1c9e   : > { %4290 = vadd.xlane.f32.xlu1 %v4289_v56 }
0x1d27   : > { %v4291_v33 = vpop.xlane.xlu1 %4290 }
0x1d28   : > { %v4292_v12 = vmul.f32 0.03125, %v4291_v33 }
0x1d2a   : > { %v4293_v19 = vadd.f32 1e-05, %v4292_v12 }
0x1d2c   : > { %5817 = vrsqrt.f32 %v4293_v19 }
0x1d39   : > { %v5818_v1 = vpop.eup %5817 }
0x1d3a   : > { %v4295_v30 = vmul.f32 %v5818_v1, %v4287_v23 }
0x1d3c   : > { %v4302_v8 = vmul.f32 %v5181_v24, %v4295_v30 }
0x1d3e   : > { %v4309_v14 = vadd.f32 %v5182_v61, %v4302_v8 }
0x1d40   : > { %v4310_v32 = vpack.c.bf16 %v4309_v14, %v4309_v14 }
0x1d42   : > { %5489 = vmatmul.mubr.msk.bf16.vlgmr.msra.gmra.mxu0 %vm1301_vm6, %v4310_v32 }
0x1d43   : > { %5508 = vmatprep.mubr.msk.bf16.mxu0 %vm6005_vm12, %v6004_v43  ;;  %5493 = vmatpush3.bf16.msra.mxu0 %v4379_v48 }
0x1d44   : > { %5494 = vmatprep.subr.bf16.mxu0 %v6004_v43 }
0x1d47   : > { %5495 = vmatpush3.bf16.msra.mxu0 %v4378_v17 }
0x1d48   : > { %5496 = vmatprep.subr.bf16.mxu0 %v6004_v43 }
0x1d4b   : > { %5497 = vmatpush3.bf16.msra.mxu0 %v4377_v25 }
0x1d4c   : > { %5498 = vmatprep.subr.bf16.mxu0 %v6004_v43 }
0x1d4f   : > { %5499 = vmatpush3.bf16.msra.mxu0 %v4376_v13 }
0x1d50   : > { %5500 = vmatprep.subr.bf16.mxu0 %v6004_v43 }
0x1d53   : > { %5501 = vmatpush3.bf16.msra.mxu0 %v4375_v37 }
0x1d54   : > { %5502 = vmatprep.subr.bf16.mxu0 %v6004_v43 }
0x1d57   : > { %5503 = vmatpush3.bf16.msra.mxu0 %v4374_v11 }
0x1d58   : > { %5504 = vmatprep.subr.bf16.mxu0 %v6004_v43 }
0x1d5b   : > { %5505 = vmatpush3.bf16.msra.mxu0 %v4373_v3 }
0x1d5c   : > { %5506 = vmatprep.subr.bf16.mxu0 %v6004_v43 }
0x1d5f   : > { %5507 = vmatpush3.bf16.msra.mxu0 %v4372_v46 }
0x1e02   : > { %v4356_v52 = vpop.f32.mrf.mxu0 }
0x1e03   : > { %v4357_v9 = vadd.f32 %v5183_v39, %v4356_v52 }
0x1e04   : > { %v5490_v42 = vpop.f32.mrf.mxu0 }
0x1e05   : > { %v4362_v18 = vmul.f32 %v4357_v9, %v4357_v9 }
0x1e06   : > { %v4359_v16 = vpop.f32.mrf.mxu0 }
0x1e07   : > { %v4363_v54 = vmul.f32 %v4362_v18, %v4357_v9 }
0x1e08   : > { %v5491_v55 = vpop.f32.mrf.mxu0 }
0x1e09   : > { %v4364_v26 = vmul.f32 0.044715, %v4363_v54 }
0x1e0b   : > { %v4365_v45 = vadd.f32 %v4364_v26, %v4357_v9 }
0x1e0d   : > { %v4366_v51 = vmul.f32 0.7978846, %v4365_v45 }
0x1e0f   : > { %5819 = vtanh.f32 %v4366_v51 }
0x1e1c   : > { %v5820_v43 = vpop.eup %5819 }
0x1e1d   : > { %v4368_v59 = vadd.f32 1.0, %v5820_v43 }
0x1e1f   : > { %v4369_v36 = vmul.f32 0.5, %v4368_v59 }
0x1e21   : > { %v4370_v2 = vmul.f32 %v4369_v36, %v4357_v9 }
0x1e23   : > { %v4371_v0 = vpack.c.bf16 %v4370_v2, %v4370_v2 }
0x1e25   : > { %5509 = vmatmul.mubr.bf16.vlgmr.msra.gmra.mxu0 %v4371_v0 }
0x1e26   : > { %5834 = shalt.err (!%p5831_p3)
}
0x1e27   : > { %s5835_s1 = scalar_lea.hbm %s7614_s3, 128  ;;  %s5839_s14 = scalar_lea.hbm %s7794_s17, 256 }
0x1e28   : > { %p5836_p4 = scmp.ne.s32.totalorder %s7614_s3, %s5835_s1  ;;  %p5840_p9 = scmp.lt.s32.totalorder %s7614_s3, %s7794_s17 }
0x1e29   : > { %p5841_p10 = scmp.lt.s32.totalorder %s5839_s14, %s5835_s1 }
0x1e2a   : > { %p5837_p7 = pnand %p5836_p4, %p6217_p5 }
0x1e2b   : > { %p5842_p11 = por %p5841_p10, %p5840_p9 }
0x1e2c   : > { %p5838_p8 = pneg %p5837_p7 }
0x1e2e   : > { %p5843_p12 = pnand %p5842_p11, %p5838_p8 }
0x1e30   : > { %5846 = shalt.err (!%p5843_p12)
}
0x1e31   : > { %s7795_s21 = sld [smem:[#allocation35_spill]]  ;;  %s4509_s20 = sshll.u32 %s7383_s7, 4  ;;  %s7637_s20 = int_to_ptr.vmem [resolvable:$true] %s4509_s20 }
0x1e32   : > { %5513 = dma.vmem_to_hbm [thread:$0]  (%p6217_p5), %s4529_s4, 128, %s7614_s3, %s7618_s10  }
0x1e33   : > { %s5193_s13 = sshll.u32 %s6198_s0, 6  ;;  %s4452_s6 = scalar_lea.sflag [#allocation5], %s7377_s9 }
0x1e34   : > { %s5847_s1 = scalar_lea.vmem %s7637_s20, 256  ;;  %s6007_s14 = smov [#allocation4]  }
0x1e35   : > { %p5848_p13 = scmp.ne.s32.totalorder %s7637_s20, %s5847_s1  ;;  %s5851_s17 = sshll.u32 %s6007_s14, 4  ;;  %s5852_s17 = int_to_ptr.vmem [resolvable:$false] %s5851_s17 }
0x1e36   : > { %s5853_s24 = scalar_lea.vmem %s5852_s17, 512  ;;  %p5854_p2 = scmp.lt.s32.totalorder %s7637_s20, %s5852_s17 }
0x1e37   : > { %s7634_s19 = scalar_lea.hbm %s7795_s21, %s5204_s5  ;;  %p5849_p0 = pnand %p5848_p13, %p6217_p5 }
0x1e38   : > { %p5855_p3 = scmp.lt.s32.totalorder %s5853_s24, %s5847_s1 }
0x1e39   : > { %p5850_p1 = pneg %p5849_p0 }
0x1e3a   : > { %p5856_p4 = por %p5855_p3, %p5854_p2 }
0x1e3c   : > { %p5857_p7 = pnand %p5856_p4, %p5850_p1 }
0x1e3e   : > { %5860 = shalt.err (!%p5857_p7)
}
0x1e3f   : > { %s5861_s3 = scalar_lea.hbm %s7634_s19, 256  ;;  %s5865_s4 = scalar_lea.hbm %s7795_s21, 512 }
0x1e40   : > { %p5862_p8 = scmp.ne.s32.totalorder %s7634_s19, %s5861_s3  ;;  %p5866_p11 = scmp.lt.s32.totalorder %s7634_s19, %s7795_s21 }
0x1e41   : > { %p5867_p12 = scmp.lt.s32.totalorder %s5865_s4, %s5861_s3 }
0x1e42   : > { %p5863_p9 = pnand %p5862_p8, %p6217_p5 }
0x1e43   : > { %p5868_p13 = por %p5867_p12, %p5866_p11 }
0x1e44   : > { %p5864_p10 = pneg %p5863_p9 }
0x1e46   : > { %p5869_p0 = pnand %p5868_p13, %p5864_p10 }
0x1e48   : > { %5872 = shalt.err (!%p5869_p0)
}
0x1e49   : > { %s6008_s24 = smov 128   ;;  %s6009_s5 = smov 8  }
0x1e4a   : > { %5512 = dma.vmem_to_hbm [thread:$0]  (%p6217_p5), %s7637_s20, 256, %s7634_s19, %s4452_s6, %s6008_s24, %s6008_s24, %s6009_s5  }
0x1e4b   : > { %s4542_s7 = scalar_lea.hbm %s6160_s27, %s5193_s13  ;;  %s4544_s17 = sshll.u32 %s7544_s18, 4  ;;  %s4545_s17 = int_to_ptr.vmem [resolvable:$true] %s4544_s17 }
0x1e4c   : > { %s5873_s1 = scalar_lea.vmem %s4545_s17, 64  ;;  %s6010_s14 = smov [#allocation8]  }
0x1e4d   : > { %p5874_p1 = scmp.ne.s32.totalorder %s4545_s17, %s5873_s1  ;;  %s5877_s3 = sshll.u32 %s6010_s14, 4  ;;  %s5878_s3 = int_to_ptr.vmem [resolvable:$false] %s5877_s3 }
0x1e4e   : > { %s5879_s4 = scalar_lea.vmem %s5878_s3, 128  ;;  %p5880_p4 = scmp.lt.s32.totalorder %s4545_s17, %s5878_s3 }
0x1e4f   : > { %p5875_p2 = pnand %p5874_p1, %p6217_p5  ;;  %p5881_p7 = scmp.lt.s32.totalorder %s5879_s4, %s5873_s1 }
0x1e51   : > { %p5876_p3 = pneg %p5875_p2  ;;  %p5882_p8 = por %p5881_p7, %p5880_p4 }
0x1e53   : > { %p5883_p9 = pnand %p5882_p8, %p5876_p3 }
0x1e55   : > { %5886 = shalt.err (!%p5883_p9)
}
0x1e56   : > { %s5887_s21 = scalar_lea.hbm %s4542_s7, 64  ;;  %s5891_s18 = scalar_lea.hbm %s6160_s27, 128 }
0x1e57   : > { %p5888_p10 = scmp.ne.s32.totalorder %s4542_s7, %s5887_s21  ;;  %p5892_p13 = scmp.lt.s32.totalorder %s4542_s7, %s6160_s27 }
0x1e58   : > { %p5893_p0 = scmp.lt.s32.totalorder %s5891_s18, %s5887_s21 }
0x1e59   : > { %p5889_p11 = pnand %p5888_p10, %p6217_p5 }
0x1e5a   : > { %p5894_p1 = por %p5893_p0, %p5892_p13 }
0x1e5b   : > { %p5890_p12 = pneg %p5889_p11 }
0x1e5d   : > { %p5895_p2 = pnand %p5894_p1, %p5890_p12 }
0x1e5f   : > { %5898 = shalt.err (!%p5895_p2)
}
0x1e60   : > { %5514 = dma.vmem_to_hbm [thread:$0]  (%p6217_p5), %s4545_s17, 64, %s4542_s7, %s7618_s10   ;;  %v5185_v5 = vld [vmem:[%s7786_s8 + $0x5] ss:$0 sm:$0xff] }
0x1e61   : > { %s4962_s19 = sshll.u32 %s7377_s9, 1  ;;  %s5194_s20 = sshll.u32 %s6198_s0, 5 }
0x1e62   : > { %s1041_s21 = scalar_lea.vmem [#allocation9], %s4962_s19  ;;  %s7678_s6 = scalar_lea.hbm %s6170_s12, %s5194_s20 }
0x1e63   : > { %s4560_s13 = sshll.u32 %s1041_s21, 4  ;;  %s4480_s10 = scalar_lea.sflag [#allocation10], %s7377_s9  ;;  %s4561_s13 = int_to_ptr.vmem [resolvable:$true] %s4560_s13 }
0x1e64   : > { %s5899_s24 = scalar_lea.vmem %s4561_s13, 32  ;;  %s6011_s0 = smov [#allocation9]  }
0x1e65   : > { %p5900_p3 = scmp.ne.s32.totalorder %s4561_s13, %s5899_s24  ;;  %s5903_s5 = sshll.u32 %s6011_s0, 4  ;;  %s5904_s5 = int_to_ptr.vmem [resolvable:$false] %s5903_s5 }
0x1e66   : > { %s5905_s7 = scalar_lea.vmem %s5904_s5, 64  ;;  %p5906_p8 = scmp.lt.s32.totalorder %s4561_s13, %s5904_s5 }
0x1e67   : > { %p5901_p4 = pnand %p5900_p3, %p6217_p5  ;;  %p5907_p9 = scmp.lt.s32.totalorder %s5905_s7, %s5899_s24 }
0x1e69   : > { %p5902_p7 = pneg %p5901_p4  ;;  %p5908_p10 = por %p5907_p9, %p5906_p8 }
0x1e6b   : > { %p5909_p11 = pnand %p5908_p10, %p5902_p7 }
0x1ee5   : > { %v4420_v6 = vpop.f32.mrf.mxu0 }
0x1ee6   : > { %v4421_v35 = vadd.f32 %v5185_v5, %v4420_v6 }
0x1ee7   : > { %v5510_v23 = vpop.f32.mrf.mxu0 }
0x1ee8   : > { %v4426_v21 = vadd.f32 %v4421_v35, %v7570_v62 }
0x1ee9   : > { %v4423_v56 = vpop.f32.mrf.mxu0 }
0x1eea   : > { %v4427_v34 = vmul.f32 %v4426_v21, %v7552_v15 }
0x1eeb   : > { %v5511_v58 = vpop.f32.mrf.mxu0 }
0x1eec   : > { %4428 = vst.msk [vmem:[%s1041_s21] sm:$0x3] %vm4217_vm5, %v4427_v34 }
0x1eed   : > { %5912 = shalt.err (!%p5909_p11)
}
0x1eee   : > { %s5913_s9 = scalar_lea.hbm %s7678_s6, 32  ;;  %s5917_s17 = scalar_lea.hbm %s6170_s12, 64 }
0x1eef   : > { %p5914_p12 = scmp.ne.s32.totalorder %s7678_s6, %s5913_s9  ;;  %p5918_p1 = scmp.lt.s32.totalorder %s7678_s6, %s6170_s12 }
0x1ef0   : > { %p5919_p2 = scmp.lt.s32.totalorder %s5917_s17, %s5913_s9 }
0x1ef1   : > { %p5915_p13 = pnand %p5914_p12, %p6217_p5 }
0x1ef2   : > { %p5920_p3 = por %p5919_p2, %p5918_p1 }
0x1ef3   : > { %p5916_p0 = pneg %p5915_p13 }
0x1ef5   : > { %p5921_p4 = pnand %p5920_p3, %p5916_p0 }
0x1ef7   : > { %5924 = shalt.err (!%p5921_p4)
}
0x1ef8   : > { %5515 = dma.vmem_to_hbm [thread:$0]  (%p6217_p5), %s4561_s13, 32, %s7678_s6, %s4480_s10  }
0x1ef9 PF: > { %p5533_p7 = scmp.ge.s32.totalorder %s5967_s28, 2  ;;  %s4607_s1 = sand.u32 1, %s5955_s22  }
0x1efa   : > { %s4608_s14 = scalar_lea.sflag [#allocation5], %s4607_s1 }
0x1efb   : > { %p5521_p8 = pnand %p5533_p7, %p6221_p6 }
0x1efd   : > { %p5522_p9 = pneg %p5521_p8 }
0x1eff   : > { %5942 = dma.done.wait (%p5522_p9), %s4608_s14, 256  }
0x1f00   : > { %5944 = vsyncadd (%p5522_p9), %s4608_s14, 4294967040  ;;  %s7796_s3 = sadd.s32 4294967294, %s5967_s28  }
0x1f01   : > { %s4624_s4 = sand.u32 1, %s7796_s3  }
0x1f02   : > { %s4625_s18 = scalar_lea.sflag [#allocation7], %s4624_s4 }
0x1f03   : > { %5946 = dma.done.wait (%p5522_p9), %s4625_s18, 192  }
0x1f04   : > { %5948 = vsyncadd (%p5522_p9), %s4625_s18, 4294967104  ;;  %s4657_s15 = scalar_lea.sflag [#allocation10], %s4607_s1 }
0x1f05   : > { %5950 = dma.done.wait (%p5522_p9), %s4657_s15, 32  }
0x1f06   : > { %5952 = vsyncadd (%p5522_p9), %s4657_s15, 4294967264  ;;  %p80_p5 = scmp.ge.s32.totalorder %s6202_s2, 4   ;;  %s7797_s22 = smov %s5959_s23 }
0x1f07   : > { %s7798_s23 = smov %s5963_s26  ;;  %s7799_s26 = smov %s6215_s11 }
0x1f08   : > { %s7800_s28 = smov %s6202_s2  ;;  %82 = sbr.rel (!%p80_p5) target bundleno = 77 (0x4d), region = 378 }
0x1f0d   :  { %4669 = vsyncpa [#allocation5], 1 }
0x1f0e   :  { %4671 = vsyncpa [#allocation5 + $0x1], 1 }
0x1f0f   :  { %4672 = vsyncpa [#allocation7], 1 }
0x1f10   :  { %4674 = vsyncpa [#allocation7 + $0x1], 1 }
0x1f11   :  { %4675 = vsyncpa [#allocation10], 1 }
0x1f12   :  { %4677 = vsyncpa [#allocation10 + $0x1], 1 }

</bundles_post_ra>
